<compile_context>
chip_gen: v7x
topology: tpu7x:2x2x1
jax: 0.10.0
libtpu: 0.0.40
codegen_flags: <defaults>
</compile_context>

<pallas_src>
import jax
import jax.numpy as jnp
from jax.experimental import pallas as pl
from jax.experimental.pallas import tpu as pltpu


def _round_up(x, m):
    return (x + m - 1) // m * m


def _pick_tile(dim, candidates):
    for c in candidates:
        if dim % c == 0:
            return c
    return dim


# ----------------------------------------------------------------------------
# Tiled (rows x K) @ (K x N) + bias kernel.  Used for both the hoisted GRU
# input projection and the decoder.  Operands bf16, accumulate f32.
# ----------------------------------------------------------------------------
def matmul_bias_kernel(x_ref, w_ref, b_ref, o_ref):
    acc = jnp.dot(x_ref[...].astype(jnp.bfloat16), w_ref[...],
                  preferred_element_type=jnp.float32)
    o_ref[...] = (acc + b_ref[...]).astype(o_ref.dtype)


def matmul_bias(x2d, w_bf16, b):
    rows, K = x2d.shape
    _, N = w_bf16.shape
    TM = _pick_tile(rows, (256, 128, 64, 32, 16, 8))
    TN = _pick_tile(N, (512, 384, 256, 128))
    return pl.pallas_call(
        matmul_bias_kernel,
        out_shape=jax.ShapeDtypeStruct((rows, N), jnp.float32),
        grid_spec=pltpu.PrefetchScalarGridSpec(
            num_scalar_prefetch=0,
            grid=(rows // TM, N // TN),
            in_specs=[
                pl.BlockSpec((TM, K), lambda i, j: (i, 0)),
                pl.BlockSpec((K, TN), lambda i, j: (0, j)),
                pl.BlockSpec((1, TN), lambda i, j: (0, j)),
            ],
            out_specs=pl.BlockSpec((TM, TN), lambda i, j: (i, j)),
        ),
        compiler_params=pltpu.CompilerParams(
            dimension_semantics=("parallel", "parallel")),
    )(x2d, w_bf16, b)


# ----------------------------------------------------------------------------
# GRU recurrence kernel.  gi = x@Wi + b_i + [b_hr, b_hz, 0] is precomputed.
# PyTorch equations (gate order r, z, n):
#   r  = sigmoid(gi_r + h Wh_r)          (b_ir + b_hr already in gi_r)
#   z  = sigmoid(gi_z + h Wh_z)
#   n  = tanh   (gi_n + r * (h Wh_n + b_hn))
#   h' = (1 - z) * n + z * h  =  n + z * (h - n)
# Grid iterates over blocks of T_BLK timesteps; h lives in VMEM scratch.
# ----------------------------------------------------------------------------
def gru_recurrence_kernel(gi_ref, wh_ref, bhn_ref, out_ref, h_scratch):
    H = h_scratch.shape[-1]
    t_blk = gi_ref.shape[0]

    @pl.when(pl.program_id(0) == 0)
    def _():
        h_scratch[...] = jnp.zeros_like(h_scratch)

    bhn = bhn_ref[...]                       # (1, H) f32, hoisted out of loop

    def step(t, h):
        gi = gi_ref[t]                       # (B, 3H) f32
        gh = jnp.dot(h.astype(jnp.bfloat16), wh_ref[...],
                     preferred_element_type=jnp.float32)   # (B, 3H)
        r = jax.nn.sigmoid(gi[:, 0:H] + gh[:, 0:H])
        z = jax.nn.sigmoid(gi[:, H:2 * H] + gh[:, H:2 * H])
        n = jnp.tanh(gi[:, 2 * H:3 * H] + r * (gh[:, 2 * H:3 * H] + bhn))
        h_new = n + z * (h - n)
        out_ref[t] = h_new.astype(out_ref.dtype)
        return h_new

    h_scratch[...] = jax.lax.fori_loop(0, t_blk, step, h_scratch[...],
                                       unroll=True)


def gru_recurrence(gi, wh_bf16, bhn, H):
    seq, B, threeH = gi.shape
    T_BLK = _pick_tile(seq, (32, 16, 8, 4, 2, 1))
    return pl.pallas_call(
        gru_recurrence_kernel,
        out_shape=jax.ShapeDtypeStruct((seq, B, H), jnp.float32),
        grid_spec=pltpu.PrefetchScalarGridSpec(
            num_scalar_prefetch=0,
            grid=(seq // T_BLK,),
            in_specs=[
                pl.BlockSpec((T_BLK, B, threeH), lambda t: (t, 0, 0)),
                pl.BlockSpec((H, threeH), lambda t: (0, 0)),   # resident Wh
                pl.BlockSpec((1, H), lambda t: (0, 0)),
            ],
            out_specs=pl.BlockSpec((T_BLK, B, H), lambda t: (t, 0, 0)),
            scratch_shapes=[pltpu.VMEM((B, H), jnp.float32)],
        ),
        compiler_params=pltpu.CompilerParams(
            dimension_semantics=("arbitrary",)),   # recurrence -> sequential
    )(gi, wh_bf16, bhn)


# ----------------------------------------------------------------------------
# Parameter init (mirrors RNN.__init__ / init_weights) + TPU-layout prep
# (gate-aligned padding to (8,128), bias folding, bf16 weight cast).
# ----------------------------------------------------------------------------
def init_params_raw(key, nvoc, ninput, nhid, nlayers):
    keys = jax.random.split(key, 2 + 4 * nlayers)
    stdv = 1.0 / float(nhid) ** 0.5
    raw = {
        "embed": jax.random.uniform(keys[0], (nvoc, ninput), jnp.float32, -0.1, 0.1),
        "dec_w": jax.random.uniform(keys[1], (nhid, nvoc), jnp.float32, -0.1, 0.1),
        "dec_b": jnp.zeros((nvoc,), jnp.float32),
        "gru": [],
    }
    for l in range(nlayers):
        nin_l = ninput if l == 0 else nhid
        k0, k1, k2, k3 = keys[2 + 4 * l: 6 + 4 * l]
        raw["gru"].append({
            # (in, 3*nhid) = PyTorch weight_ih_l{l}.T ; gate order (r, z, n)
            "wi": jax.random.uniform(k0, (nin_l, 3 * nhid), jnp.float32, -stdv, stdv),
            "wh": jax.random.uniform(k1, (nhid, 3 * nhid), jnp.float32, -stdv, stdv),
            "bi": jax.random.uniform(k2, (3 * nhid,), jnp.float32, -stdv, stdv),
            "bh": jax.random.uniform(k3, (3 * nhid,), jnp.float32, -stdv, stdv),
        })
    return raw


def prepare_params(raw, ninput, nhid, nvoc):
    nin_pad = _round_up(ninput, 128)
    H_pad = _round_up(nhid, 128)
    nvoc_pad = _round_up(nvoc, 128)

    def pad_to(a, shape):
        return jnp.pad(a, [(0, s - d) for d, s in zip(a.shape, shape)])

    def pad_gates_w(w, rows_pad):          # (rows, 3*nhid) -> (rows_pad, 3*H_pad)
        gs = jnp.split(w, 3, axis=1)
        return jnp.concatenate([pad_to(g, (rows_pad, H_pad)) for g in gs], axis=1)

    def pad_gates_b(b):                    # (3*nhid,) -> (3*H_pad,)
        gs = jnp.split(b, 3)
        return jnp.concatenate([pad_to(g, (H_pad,)) for g in gs])

    params = {"nhid": nhid, "nvoc": nvoc,
              "nin_pad": nin_pad, "H_pad": H_pad, "nvoc_pad": nvoc_pad}
    params["embed"] = pad_to(raw["embed"], (raw["embed"].shape[0], nin_pad))

    layers = []
    for l, lyr in enumerate(raw["gru"]):
        in_pad = nin_pad if l == 0 else H_pad
        wi_p = pad_gates_w(lyr["wi"], in_pad)
        wh_p = pad_gates_w(lyr["wh"], H_pad)
        bi_p = pad_gates_b(lyr["bi"])
        bh_p = pad_gates_b(lyr["bh"])
        # Fold b_hr, b_hz into the hoisted projection bias; keep b_hn separate.
        b_fold = bi_p.at[:2 * H_pad].add(bh_p[:2 * H_pad])
        layers.append({
            "wi": wi_p.astype(jnp.bfloat16),
            "wh": wh_p.astype(jnp.bfloat16),
            "b_fold": b_fold.reshape(1, -1),
            "bhn": bh_p[2 * H_pad:].reshape(1, -1),
        })
    params["gru"] = layers
    params["dec_w"] = pad_to(raw["dec_w"], (H_pad, nvoc_pad)).astype(jnp.bfloat16)
    params["dec_b"] = pad_to(raw["dec_b"], (nvoc_pad,)).reshape(1, -1)
    return params


# ----------------------------------------------------------------------------
# Full forward (matches RNN.forward): embed -> [drop] -> GRU(nlayers) ->
# [drop] -> decoder.  Returns (decoded (seq,batch,nvoc), hidden (nlayers,batch,nhid)).
# ----------------------------------------------------------------------------
def rnn_forward(params, tokens):
    seq, batch = tokens.shape
    H_pad, nvoc_pad = params["H_pad"], params["nvoc_pad"]
    nhid, nvoc = params["nhid"], params["nvoc"]
    B_pad = _round_up(batch, 8)

    # Embedding lookup (glue: plain JAX gather); dropout == identity (eval).
    x = params["embed"][tokens]                               # (seq, batch, nin_pad)
    x = jnp.pad(x, ((0, 0), (0, B_pad - batch), (0, 0)))      # (seq, B_pad, nin_pad)

    hiddens = []
    for layer in params["gru"]:
        rows = seq * B_pad
        # Hoisted input projection: one big parallel matmul off the critical path.
        gi = matmul_bias(x.reshape(rows, x.shape[-1]), layer["wi"], layer["b_fold"])
        gi = gi.reshape(seq, B_pad, 3 * H_pad)
        # Sequential recurrence: only h @ Wh per step.
        x = gru_recurrence(gi, layer["wh"], layer["bhn"], H_pad)
        hiddens.append(x[-1])                                 # final hidden = last step
    hidden = jnp.stack(hiddens, axis=0)[:, :batch, :nhid]

    decoded = matmul_bias(x.reshape(seq * B_pad, H_pad),
                          params["dec_w"], params["dec_b"])
    decoded = decoded.reshape(seq, B_pad, nvoc_pad)[:, :batch, :nvoc]
    return decoded, hidden


if __name__ == "__main__":
    # Shapes implied by the module (nhid=256, ninput=128, nlayers=2), small
    # vocab / seq / batch for the demo.
    NVOC, NINPUT, NHID, NLAYERS = 26, 128, 256, 2
    SEQ, BATCH = 16, 4

    key = jax.random.PRNGKey(0)
    pkey, tkey = jax.random.split(key)
    raw = init_params_raw(pkey, NVOC, NINPUT, NHID, NLAYERS)
    params = prepare_params(raw, NINPUT, NHID, NVOC)
    tokens = jax.random.randint(tkey, (SEQ, BATCH), 0, NVOC, dtype=jnp.int32)

    fwd = jax.jit(lambda toks: rnn_forward(params, toks))
    decoded, hidden = fwd(tokens)
    jax.block_until_ready((decoded, hidden))

    assert decoded.shape == (SEQ, BATCH, NVOC)
    assert hidden.shape == (NLAYERS, BATCH, NHID)
    assert bool(jnp.all(jnp.isfinite(decoded))) and bool(jnp.all(jnp.isfinite(hidden)))
    print("KERNEL_OK")
</pallas_src>

<mosaic_0001>
module attributes {stable_mosaic.version = 11 : i64} {
  func.func @matmul_bias_kernel(%arg0: i32, %arg1: i32, %arg2: memref<128x128xf32, #tpu.memory_space<vmem>>, %arg3: memref<128x384xbf16, #tpu.memory_space<vmem>>, %arg4: memref<1x384xf32, #tpu.memory_space<vmem>>, %arg5: memref<128x384xf32, #tpu.memory_space<vmem>>) attributes {dimension_semantics = [#tpu.dimension_semantics<parallel>, #tpu.dimension_semantics<parallel>], iteration_bounds = array<i64: 1, 2>, scalar_prefetch = 0 : i64, scratch_operands = 0 : i64, tpu.core_type = #tpu.core_type<tc>, window_params = [{transform_indices = @transform_0, window_bounds = array<i64: 128, 128>}, {transform_indices = @transform_1, window_bounds = array<i64: 128, 384>}, {transform_indices = @transform_2, window_bounds = array<i64: 1, 384>}, {transform_indices = @transform_3, window_bounds = array<i64: 128, 384>}]} {
    %c0 = arith.constant 0 : index
    %c0_0 = arith.constant 0 : index
    %0 = vector.load %arg2[%c0, %c0_0] : memref<128x128xf32, #tpu.memory_space<vmem>>, vector<128x128xf32>
    %1 = arith.truncf %0 : vector<128x128xf32> to vector<128x128xbf16>
    %c0_1 = arith.constant 0 : index
    %c0_2 = arith.constant 0 : index
    %2 = vector.load %arg3[%c0_1, %c0_2] : memref<128x384xbf16, #tpu.memory_space<vmem>>, vector<128x384xbf16>
    %cst = arith.constant dense<0.000000e+00> : vector<128x384xf32>
    %3 = tpu.matmul %1, %2, %cst {dimension_numbers = #tpu.dot_dimension_numbers<[1], [0], [0], [1], [0, 0, 1, 1], [], []>} : vector<128x128xbf16>, vector<128x384xbf16>, vector<128x384xf32> -> vector<128x384xf32>
    %c0_3 = arith.constant 0 : index
    %c0_4 = arith.constant 0 : index
    %4 = vector.load %arg4[%c0_3, %c0_4] : memref<1x384xf32, #tpu.memory_space<vmem>>, vector<1x384xf32>
    %5 = vector.broadcast %4 : vector<1x384xf32> to vector<128x384xf32>
    %6 = arith.addf %3, %5 : vector<128x384xf32>
    %c0_5 = arith.constant 0 : index
    %c0_6 = arith.constant 0 : index
    %7 = vector.load %arg5[%c0_5, %c0_6] : memref<128x384xf32, #tpu.memory_space<vmem>>, vector<128x384xf32>
    tpu.vector_store %arg5[%c0_5, %c0_6], %6 {strides = array<i32>} : memref<128x384xf32, #tpu.memory_space<vmem>>, vector<128x384xf32>,
    return
  }
  func.func @transform_0(%arg0: i32, %arg1: i32) -> (i32, i32) {
    %c0_i32 = arith.constant 0 : i32
    %c0_i32_0 = arith.constant 0 : i32
    return %arg0, %c0_i32 : i32, i32
  }
  func.func @transform_1(%arg0: i32, %arg1: i32) -> (i32, i32) {
    %c0_i32 = arith.constant 0 : i32
    %c0_i32_0 = arith.constant 0 : i32
    return %c0_i32, %arg1 : i32, i32
  }
  func.func @transform_2(%arg0: i32, %arg1: i32) -> (i32, i32) {
    %c0_i32 = arith.constant 0 : i32
    %c0_i32_0 = arith.constant 0 : i32
    return %c0_i32, %arg1 : i32, i32
  }
  func.func @transform_3(%arg0: i32, %arg1: i32) -> (i32, i32) {
    %c0_i32 = arith.constant 0 : i32
    return %arg0, %arg1 : i32, i32
  }
}

module attributes {stable_mosaic.version = 11 : i64} {
  func.func @matmul_bias_kernel(%arg0: i32, %arg1: i32, %arg2: memref<128x256xf32, #tpu.memory_space<vmem>>, %arg3: memref<256x384xbf16, #tpu.memory_space<vmem>>, %arg4: memref<1x384xf32, #tpu.memory_space<vmem>>, %arg5: memref<128x384xf32, #tpu.memory_space<vmem>>) attributes {dimension_semantics = [#tpu.dimension_semantics<parallel>, #tpu.dimension_semantics<parallel>], iteration_bounds = array<i64: 1, 2>, scalar_prefetch = 0 : i64, scratch_operands = 0 : i64, tpu.core_type = #tpu.core_type<tc>, window_params = [{transform_indices = @transform_0, window_bounds = array<i64: 128, 256>}, {transform_indices = @transform_1, window_bounds = array<i64: 256, 384>}, {transform_indices = @transform_2, window_bounds = array<i64: 1, 384>}, {transform_indices = @transform_3, window_bounds = array<i64: 128, 384>}]} {
    %c0 = arith.constant 0 : index
    %c0_0 = arith.constant 0 : index
    %0 = vector.load %arg2[%c0, %c0_0] : memref<128x256xf32, #tpu.memory_space<vmem>>, vector<128x256xf32>
    %1 = arith.truncf %0 : vector<128x256xf32> to vector<128x256xbf16>
    %c0_1 = arith.constant 0 : index
    %c0_2 = arith.constant 0 : index
    %2 = vector.load %arg3[%c0_1, %c0_2] : memref<256x384xbf16, #tpu.memory_space<vmem>>, vector<256x384xbf16>
    %cst = arith.constant dense<0.000000e+00> : vector<128x384xf32>
    %3 = tpu.matmul %1, %2, %cst {dimension_numbers = #tpu.dot_dimension_numbers<[1], [0], [0], [1], [0, 0, 1, 1], [], []>} : vector<128x256xbf16>, vector<256x384xbf16>, vector<128x384xf32> -> vector<128x384xf32>
    %c0_3 = arith.constant 0 : index
    %c0_4 = arith.constant 0 : index
    %4 = vector.load %arg4[%c0_3, %c0_4] : memref<1x384xf32, #tpu.memory_space<vmem>>, vector<1x384xf32>
    %5 = vector.broadcast %4 : vector<1x384xf32> to vector<128x384xf32>
    %6 = arith.addf %3, %5 : vector<128x384xf32>
    %c0_5 = arith.constant 0 : index
    %c0_6 = arith.constant 0 : index
    %7 = vector.load %arg5[%c0_5, %c0_6] : memref<128x384xf32, #tpu.memory_space<vmem>>, vector<128x384xf32>
    tpu.vector_store %arg5[%c0_5, %c0_6], %6 {strides = array<i32>} : memref<128x384xf32, #tpu.memory_space<vmem>>, vector<128x384xf32>,
    return
  }
  func.func @transform_0(%arg0: i32, %arg1: i32) -> (i32, i32) {
    %c0_i32 = arith.constant 0 : i32
    %c0_i32_0 = arith.constant 0 : i32
    return %arg0, %c0_i32 : i32, i32
  }
  func.func @transform_1(%arg0: i32, %arg1: i32) -> (i32, i32) {
    %c0_i32 = arith.constant 0 : i32
    %c0_i32_0 = arith.constant 0 : i32
    return %c0_i32, %arg1 : i32, i32
  }
  func.func @transform_2(%arg0: i32, %arg1: i32) -> (i32, i32) {
    %c0_i32 = arith.constant 0 : i32
    %c0_i32_0 = arith.constant 0 : i32
    return %c0_i32, %arg1 : i32, i32
  }
  func.func @transform_3(%arg0: i32, %arg1: i32) -> (i32, i32) {
    %c0_i32 = arith.constant 0 : i32
    return %arg0, %arg1 : i32, i32
  }
}

module attributes {stable_mosaic.version = 11 : i64} {
  func.func @matmul_bias_kernel(%arg0: i32, %arg1: i32, %arg2: memref<128x256xf32, #tpu.memory_space<vmem>>, %arg3: memref<256x128xbf16, #tpu.memory_space<vmem>>, %arg4: memref<1x128xf32, #tpu.memory_space<vmem>>, %arg5: memref<128x128xf32, #tpu.memory_space<vmem>>) attributes {dimension_semantics = [#tpu.dimension_semantics<parallel>, #tpu.dimension_semantics<parallel>], iteration_bounds = array<i64: 1, 1>, scalar_prefetch = 0 : i64, scratch_operands = 0 : i64, tpu.core_type = #tpu.core_type<tc>, window_params = [{transform_indices = @transform_0, window_bounds = array<i64: 128, 256>}, {transform_indices = @transform_1, window_bounds = array<i64: 256, 128>}, {transform_indices = @transform_2, window_bounds = array<i64: 1, 128>}, {transform_indices = @transform_3, window_bounds = array<i64: 128, 128>}]} {
    %c0 = arith.constant 0 : index
    %c0_0 = arith.constant 0 : index
    %0 = vector.load %arg2[%c0, %c0_0] : memref<128x256xf32, #tpu.memory_space<vmem>>, vector<128x256xf32>
    %1 = arith.truncf %0 : vector<128x256xf32> to vector<128x256xbf16>
    %c0_1 = arith.constant 0 : index
    %c0_2 = arith.constant 0 : index
    %2 = vector.load %arg3[%c0_1, %c0_2] : memref<256x128xbf16, #tpu.memory_space<vmem>>, vector<256x128xbf16>
    %cst = arith.constant dense<0.000000e+00> : vector<128x128xf32>
    %3 = tpu.matmul %1, %2, %cst {dimension_numbers = #tpu.dot_dimension_numbers<[1], [0], [0], [1], [0, 0, 1, 1], [], []>} : vector<128x256xbf16>, vector<256x128xbf16>, vector<128x128xf32> -> vector<128x128xf32>
    %c0_3 = arith.constant 0 : index
    %c0_4 = arith.constant 0 : index
    %4 = vector.load %arg4[%c0_3, %c0_4] : memref<1x128xf32, #tpu.memory_space<vmem>>, vector<1x128xf32>
    %5 = vector.broadcast %4 : vector<1x128xf32> to vector<128x128xf32>
    %6 = arith.addf %3, %5 : vector<128x128xf32>
    %c0_5 = arith.constant 0 : index
    %c0_6 = arith.constant 0 : index
    %7 = vector.load %arg5[%c0_5, %c0_6] : memref<128x128xf32, #tpu.memory_space<vmem>>, vector<128x128xf32>
    tpu.vector_store %arg5[%c0_5, %c0_6], %6 {strides = array<i32>} : memref<128x128xf32, #tpu.memory_space<vmem>>, vector<128x128xf32>,
    return
  }
  func.func @transform_0(%arg0: i32, %arg1: i32) -> (i32, i32) {
    %c0_i32 = arith.constant 0 : i32
    %c0_i32_0 = arith.constant 0 : i32
    return %arg0, %c0_i32 : i32, i32
  }
  func.func @transform_1(%arg0: i32, %arg1: i32) -> (i32, i32) {
    %c0_i32 = arith.constant 0 : i32
    %c0_i32_0 = arith.constant 0 : i32
    return %c0_i32, %arg1 : i32, i32
  }
  func.func @transform_2(%arg0: i32, %arg1: i32) -> (i32, i32) {
    %c0_i32 = arith.constant 0 : i32
    %c0_i32_0 = arith.constant 0 : i32
    return %c0_i32, %arg1 : i32, i32
  }
  func.func @transform_3(%arg0: i32, %arg1: i32) -> (i32, i32) {
    %c0_i32 = arith.constant 0 : i32
    return %arg0, %arg1 : i32, i32
  }
}

module attributes {stable_mosaic.version = 11 : i64} {
  func.func @gru_recurrence_kernel(%arg0: i32, %arg1: memref<16x8x768xf32, #tpu.memory_space<vmem>>, %arg2: memref<256x768xbf16, #tpu.memory_space<vmem>>, %arg3: memref<1x256xf32, #tpu.memory_space<vmem>>, %arg4: memref<16x8x256xf32, #tpu.memory_space<vmem>>, %arg5: memref<8x256xf32, #tpu.memory_space<vmem>>) attributes {dimension_semantics = [#tpu.dimension_semantics<arbitrary>], iteration_bounds = array<i64: 1>, scalar_prefetch = 0 : i64, scratch_operands = 1 : i64, tpu.core_type = #tpu.core_type<tc>, window_params = [{transform_indices = @transform_0, window_bounds = array<i64: 16, 8, 768>}, {pipeline_mode = #tpu.pipeline_mode<synchronous>, transform_indices = @transform_1, window_bounds = array<i64: 256, 768>}, {pipeline_mode = #tpu.pipeline_mode<synchronous>, transform_indices = @transform_2, window_bounds = array<i64: 1, 256>}, {transform_indices = @transform_3, window_bounds = array<i64: 16, 8, 256>}]} {
    %c0_i32 = arith.constant 0 : i32
    %0 = arith.cmpi eq, %arg0, %c0_i32 : i32
    %1 = arith.extui %0 : i1 to i32
    %c0_i32_0 = arith.constant 0 : i32
    %2 = arith.cmpi ne, %1, %c0_i32_0 : i32
    scf.if %2 {
      %cst_150 = arith.constant 0.000000e+00 : f32
      %582 = vector.broadcast %cst_150 : f32 to vector<8x256xf32>
      %c0_151 = arith.constant 0 : index
      %c0_152 = arith.constant 0 : index
      %583 = vector.load %arg5[%c0_151, %c0_152] : memref<8x256xf32, #tpu.memory_space<vmem>>, vector<8x256xf32>
      tpu.vector_store %arg5[%c0_151, %c0_152], %582 {strides = array<i32>} : memref<8x256xf32, #tpu.memory_space<vmem>>, vector<8x256xf32>,
    } else {
    }
    %c0 = arith.constant 0 : index
    %c0_1 = arith.constant 0 : index
    %3 = vector.load %arg3[%c0, %c0_1] : memref<1x256xf32, #tpu.memory_space<vmem>>, vector<1x256xf32>
    %c0_2 = arith.constant 0 : index
    %c0_3 = arith.constant 0 : index
    %4 = vector.load %arg5[%c0_2, %c0_3] : memref<8x256xf32, #tpu.memory_space<vmem>>, vector<8x256xf32>
    %c0_i32_4 = arith.constant 0 : i32
    %5 = arith.index_cast %c0_i32_4 : i32 to index
    %c0_5 = arith.constant 0 : index
    %c0_6 = arith.constant 0 : index
    %6 = vector.load %arg1[%5, %c0_5, %c0_6] : memref<16x8x768xf32, #tpu.memory_space<vmem>>, vector<1x8x768xf32>
    %7 = vector.shape_cast %6 : vector<1x8x768xf32> to vector<8x768xf32>
    %8 = arith.truncf %4 : vector<8x256xf32> to vector<8x256xbf16>
    %c0_7 = arith.constant 0 : index
    %c0_8 = arith.constant 0 : index
    %9 = vector.load %arg2[%c0_7, %c0_8] : memref<256x768xbf16, #tpu.memory_space<vmem>>, vector<256x768xbf16>
    %cst = arith.constant dense<0.000000e+00> : vector<8x768xf32>
    %10 = tpu.matmul %8, %9, %cst {dimension_numbers = #tpu.dot_dimension_numbers<[1], [0], [0], [1], [0, 0, 1, 1], [], []>} : vector<8x256xbf16>, vector<256x768xbf16>, vector<8x768xf32> -> vector<8x768xf32>
    %11 = vector.extract_strided_slice %7 {offsets = [0, 0], sizes = [8, 256], strides = [1, 1]} : vector<8x768xf32> to vector<8x256xf32>
    %12 = vector.extract_strided_slice %10 {offsets = [0, 0], sizes = [8, 256], strides = [1, 1]} : vector<8x768xf32> to vector<8x256xf32>
    %13 = arith.addf %11, %12 : vector<8x256xf32>
    %14 = arith.negf %13 : vector<8x256xf32>
    %15 = math.exp %14 : vector<8x256xf32>
    %cst_9 = arith.constant 1.000000e+00 : f32
    %16 = vector.broadcast %cst_9 : f32 to vector<8x256xf32>
    %17 = arith.addf %16, %15 : vector<8x256xf32>
    %18 = arith.divf %16, %17 : vector<8x256xf32>
    %19 = vector.extract_strided_slice %7 {offsets = [0, 256], sizes = [8, 256], strides = [1, 1]} : vector<8x768xf32> to vector<8x256xf32>
    %20 = vector.extract_strided_slice %10 {offsets = [0, 256], sizes = [8, 256], strides = [1, 1]} : vector<8x768xf32> to vector<8x256xf32>
    %21 = arith.addf %19, %20 : vector<8x256xf32>
    %22 = arith.negf %21 : vector<8x256xf32>
    %23 = math.exp %22 : vector<8x256xf32>
    %cst_10 = arith.constant 1.000000e+00 : f32
    %24 = vector.broadcast %cst_10 : f32 to vector<8x256xf32>
    %25 = arith.addf %24, %23 : vector<8x256xf32>
    %26 = arith.divf %24, %25 : vector<8x256xf32>
    %27 = vector.extract_strided_slice %7 {offsets = [0, 512], sizes = [8, 256], strides = [1, 1]} : vector<8x768xf32> to vector<8x256xf32>
    %28 = vector.extract_strided_slice %10 {offsets = [0, 512], sizes = [8, 256], strides = [1, 1]} : vector<8x768xf32> to vector<8x256xf32>
    %29 = vector.broadcast %3 : vector<1x256xf32> to vector<8x256xf32>
    %30 = arith.addf %28, %29 : vector<8x256xf32>
    %31 = arith.mulf %18, %30 : vector<8x256xf32>
    %32 = arith.addf %27, %31 : vector<8x256xf32>
    %33 = math.tanh %32 : vector<8x256xf32>
    %34 = arith.subf %4, %33 : vector<8x256xf32>
    %35 = arith.mulf %26, %34 : vector<8x256xf32>
    %36 = arith.addf %33, %35 : vector<8x256xf32>
    %37 = arith.index_cast %c0_i32_4 : i32 to index
    %c0_11 = arith.constant 0 : index
    %c0_12 = arith.constant 0 : index
    %38 = vector.load %arg4[%37, %c0_11, %c0_12] : memref<16x8x256xf32, #tpu.memory_space<vmem>>, vector<1x8x256xf32>
    %39 = vector.shape_cast %38 : vector<1x8x256xf32> to vector<8x256xf32>
    %40 = vector.shape_cast %36 : vector<8x256xf32> to vector<1x8x256xf32>
    tpu.vector_store %arg4[%37, %c0_11, %c0_12], %40 {strides = array<i32>} : memref<16x8x256xf32, #tpu.memory_space<vmem>>, vector<1x8x256xf32>,
    %c1_i32 = arith.constant 1 : i32
    %41 = arith.index_cast %c1_i32 : i32 to index
    %c0_13 = arith.constant 0 : index
    %c0_14 = arith.constant 0 : index
    %42 = vector.load %arg1[%41, %c0_13, %c0_14] : memref<16x8x768xf32, #tpu.memory_space<vmem>>, vector<1x8x768xf32>
    %43 = vector.shape_cast %42 : vector<1x8x768xf32> to vector<8x768xf32>
    %44 = arith.truncf %36 : vector<8x256xf32> to vector<8x256xbf16>
    %c0_15 = arith.constant 0 : index
    %c0_16 = arith.constant 0 : index
    %45 = vector.load %arg2[%c0_15, %c0_16] : memref<256x768xbf16, #tpu.memory_space<vmem>>, vector<256x768xbf16>
    %cst_17 = arith.constant dense<0.000000e+00> : vector<8x768xf32>
    %46 = tpu.matmul %44, %45, %cst_17 {dimension_numbers = #tpu.dot_dimension_numbers<[1], [0], [0], [1], [0, 0, 1, 1], [], []>} : vector<8x256xbf16>, vector<256x768xbf16>, vector<8x768xf32> -> vector<8x768xf32>
    %47 = vector.extract_strided_slice %43 {offsets = [0, 0], sizes = [8, 256], strides = [1, 1]} : vector<8x768xf32> to vector<8x256xf32>
    %48 = vector.extract_strided_slice %46 {offsets = [0, 0], sizes = [8, 256], strides = [1, 1]} : vector<8x768xf32> to vector<8x256xf32>
    %49 = arith.addf %47, %48 : vector<8x256xf32>
    %50 = arith.negf %49 : vector<8x256xf32>
    %51 = math.exp %50 : vector<8x256xf32>
    %cst_18 = arith.constant 1.000000e+00 : f32
    %52 = vector.broadcast %cst_18 : f32 to vector<8x256xf32>
    %53 = arith.addf %52, %51 : vector<8x256xf32>
    %54 = arith.divf %52, %53 : vector<8x256xf32>
    %55 = vector.extract_strided_slice %43 {offsets = [0, 256], sizes = [8, 256], strides = [1, 1]} : vector<8x768xf32> to vector<8x256xf32>
    %56 = vector.extract_strided_slice %46 {offsets = [0, 256], sizes = [8, 256], strides = [1, 1]} : vector<8x768xf32> to vector<8x256xf32>
    %57 = arith.addf %55, %56 : vector<8x256xf32>
    %58 = arith.negf %57 : vector<8x256xf32>
    %59 = math.exp %58 : vector<8x256xf32>
    %cst_19 = arith.constant 1.000000e+00 : f32
    %60 = vector.broadcast %cst_19 : f32 to vector<8x256xf32>
    %61 = arith.addf %60, %59 : vector<8x256xf32>
    %62 = arith.divf %60, %61 : vector<8x256xf32>
    %63 = vector.extract_strided_slice %43 {offsets = [0, 512], sizes = [8, 256], strides = [1, 1]} : vector<8x768xf32> to vector<8x256xf32>
    %64 = vector.extract_strided_slice %46 {offsets = [0, 512], sizes = [8, 256], strides = [1, 1]} : vector<8x768xf32> to vector<8x256xf32>
    %65 = vector.broadcast %3 : vector<1x256xf32> to vector<8x256xf32>
    %66 = arith.addf %64, %65 : vector<8x256xf32>
    %67 = arith.mulf %54, %66 : vector<8x256xf32>
    %68 = arith.addf %63, %67 : vector<8x256xf32>
    %69 = math.tanh %68 : vector<8x256xf32>
    %70 = arith.subf %36, %69 : vector<8x256xf32>
    %71 = arith.mulf %62, %70 : vector<8x256xf32>
    %72 = arith.addf %69, %71 : vector<8x256xf32>
    %73 = arith.index_cast %c1_i32 : i32 to index
    %c0_20 = arith.constant 0 : index
    %c0_21 = arith.constant 0 : index
    %74 = vector.load %arg4[%73, %c0_20, %c0_21] : memref<16x8x256xf32, #tpu.memory_space<vmem>>, vector<1x8x256xf32>
    %75 = vector.shape_cast %74 : vector<1x8x256xf32> to vector<8x256xf32>
    %76 = vector.shape_cast %72 : vector<8x256xf32> to vector<1x8x256xf32>
    tpu.vector_store %arg4[%73, %c0_20, %c0_21], %76 {strides = array<i32>} : memref<16x8x256xf32, #tpu.memory_space<vmem>>, vector<1x8x256xf32>,
    %c2_i32 = arith.constant 2 : i32
    %77 = arith.index_cast %c2_i32 : i32 to index
    %c0_22 = arith.constant 0 : index
    %c0_23 = arith.constant 0 : index
    %78 = vector.load %arg1[%77, %c0_22, %c0_23] : memref<16x8x768xf32, #tpu.memory_space<vmem>>, vector<1x8x768xf32>
    %79 = vector.shape_cast %78 : vector<1x8x768xf32> to vector<8x768xf32>
    %80 = arith.truncf %72 : vector<8x256xf32> to vector<8x256xbf16>
    %c0_24 = arith.constant 0 : index
    %c0_25 = arith.constant 0 : index
    %81 = vector.load %arg2[%c0_24, %c0_25] : memref<256x768xbf16, #tpu.memory_space<vmem>>, vector<256x768xbf16>
    %cst_26 = arith.constant dense<0.000000e+00> : vector<8x768xf32>
    %82 = tpu.matmul %80, %81, %cst_26 {dimension_numbers = #tpu.dot_dimension_numbers<[1], [0], [0], [1], [0, 0, 1, 1], [], []>} : vector<8x256xbf16>, vector<256x768xbf16>, vector<8x768xf32> -> vector<8x768xf32>
    %83 = vector.extract_strided_slice %79 {offsets = [0, 0], sizes = [8, 256], strides = [1, 1]} : vector<8x768xf32> to vector<8x256xf32>
    %84 = vector.extract_strided_slice %82 {offsets = [0, 0], sizes = [8, 256], strides = [1, 1]} : vector<8x768xf32> to vector<8x256xf32>
    %85 = arith.addf %83, %84 : vector<8x256xf32>
    %86 = arith.negf %85 : vector<8x256xf32>
    %87 = math.exp %86 : vector<8x256xf32>
    %cst_27 = arith.constant 1.000000e+00 : f32
    %88 = vector.broadcast %cst_27 : f32 to vector<8x256xf32>
    %89 = arith.addf %88, %87 : vector<8x256xf32>
    %90 = arith.divf %88, %89 : vector<8x256xf32>
    %91 = vector.extract_strided_slice %79 {offsets = [0, 256], sizes = [8, 256], strides = [1, 1]} : vector<8x768xf32> to vector<8x256xf32>
    %92 = vector.extract_strided_slice %82 {offsets = [0, 256], sizes = [8, 256], strides = [1, 1]} : vector<8x768xf32> to vector<8x256xf32>
    %93 = arith.addf %91, %92 : vector<8x256xf32>
    %94 = arith.negf %93 : vector<8x256xf32>
    %95 = math.exp %94 : vector<8x256xf32>
    %cst_28 = arith.constant 1.000000e+00 : f32
    %96 = vector.broadcast %cst_28 : f32 to vector<8x256xf32>
    %97 = arith.addf %96, %95 : vector<8x256xf32>
    %98 = arith.divf %96, %97 : vector<8x256xf32>
    %99 = vector.extract_strided_slice %79 {offsets = [0, 512], sizes = [8, 256], strides = [1, 1]} : vector<8x768xf32> to vector<8x256xf32>
    %100 = vector.extract_strided_slice %82 {offsets = [0, 512], sizes = [8, 256], strides = [1, 1]} : vector<8x768xf32> to vector<8x256xf32>
    %101 = vector.broadcast %3 : vector<1x256xf32> to vector<8x256xf32>
    %102 = arith.addf %100, %101 : vector<8x256xf32>
    %103 = arith.mulf %90, %102 : vector<8x256xf32>
    %104 = arith.addf %99, %103 : vector<8x256xf32>
    %105 = math.tanh %104 : vector<8x256xf32>
    %106 = arith.subf %72, %105 : vector<8x256xf32>
    %107 = arith.mulf %98, %106 : vector<8x256xf32>
    %108 = arith.addf %105, %107 : vector<8x256xf32>
    %109 = arith.index_cast %c2_i32 : i32 to index
    %c0_29 = arith.constant 0 : index
    %c0_30 = arith.constant 0 : index
    %110 = vector.load %arg4[%109, %c0_29, %c0_30] : memref<16x8x256xf32, #tpu.memory_space<vmem>>, vector<1x8x256xf32>
    %111 = vector.shape_cast %110 : vector<1x8x256xf32> to vector<8x256xf32>
    %112 = vector.shape_cast %108 : vector<8x256xf32> to vector<1x8x256xf32>
    tpu.vector_store %arg4[%109, %c0_29, %c0_30], %112 {strides = array<i32>} : memref<16x8x256xf32, #tpu.memory_space<vmem>>, vector<1x8x256xf32>,
    %c3_i32 = arith.constant 3 : i32
    %113 = arith.index_cast %c3_i32 : i32 to index
    %c0_31 = arith.constant 0 : index
    %c0_32 = arith.constant 0 : index
    %114 = vector.load %arg1[%113, %c0_31, %c0_32] : memref<16x8x768xf32, #tpu.memory_space<vmem>>, vector<1x8x768xf32>
    %115 = vector.shape_cast %114 : vector<1x8x768xf32> to vector<8x768xf32>
    %116 = arith.truncf %108 : vector<8x256xf32> to vector<8x256xbf16>
    %c0_33 = arith.constant 0 : index
    %c0_34 = arith.constant 0 : index
    %117 = vector.load %arg2[%c0_33, %c0_34] : memref<256x768xbf16, #tpu.memory_space<vmem>>, vector<256x768xbf16>
    %cst_35 = arith.constant dense<0.000000e+00> : vector<8x768xf32>
    %118 = tpu.matmul %116, %117, %cst_35 {dimension_numbers = #tpu.dot_dimension_numbers<[1], [0], [0], [1], [0, 0, 1, 1], [], []>} : vector<8x256xbf16>, vector<256x768xbf16>, vector<8x768xf32> -> vector<8x768xf32>
    %119 = vector.extract_strided_slice %115 {offsets = [0, 0], sizes = [8, 256], strides = [1, 1]} : vector<8x768xf32> to vector<8x256xf32>
    %120 = vector.extract_strided_slice %118 {offsets = [0, 0], sizes = [8, 256], strides = [1, 1]} : vector<8x768xf32> to vector<8x256xf32>
    %121 = arith.addf %119, %120 : vector<8x256xf32>
    %122 = arith.negf %121 : vector<8x256xf32>
    %123 = math.exp %122 : vector<8x256xf32>
    %cst_36 = arith.constant 1.000000e+00 : f32
    %124 = vector.broadcast %cst_36 : f32 to vector<8x256xf32>
    %125 = arith.addf %124, %123 : vector<8x256xf32>
    %126 = arith.divf %124, %125 : vector<8x256xf32>
    %127 = vector.extract_strided_slice %115 {offsets = [0, 256], sizes = [8, 256], strides = [1, 1]} : vector<8x768xf32> to vector<8x256xf32>
    %128 = vector.extract_strided_slice %118 {offsets = [0, 256], sizes = [8, 256], strides = [1, 1]} : vector<8x768xf32> to vector<8x256xf32>
    %129 = arith.addf %127, %128 : vector<8x256xf32>
    %130 = arith.negf %129 : vector<8x256xf32>
    %131 = math.exp %130 : vector<8x256xf32>
    %cst_37 = arith.constant 1.000000e+00 : f32
    %132 = vector.broadcast %cst_37 : f32 to vector<8x256xf32>
    %133 = arith.addf %132, %131 : vector<8x256xf32>
    %134 = arith.divf %132, %133 : vector<8x256xf32>
    %135 = vector.extract_strided_slice %115 {offsets = [0, 512], sizes = [8, 256], strides = [1, 1]} : vector<8x768xf32> to vector<8x256xf32>
    %136 = vector.extract_strided_slice %118 {offsets = [0, 512], sizes = [8, 256], strides = [1, 1]} : vector<8x768xf32> to vector<8x256xf32>
    %137 = vector.broadcast %3 : vector<1x256xf32> to vector<8x256xf32>
    %138 = arith.addf %136, %137 : vector<8x256xf32>
    %139 = arith.mulf %126, %138 : vector<8x256xf32>
    %140 = arith.addf %135, %139 : vector<8x256xf32>
    %141 = math.tanh %140 : vector<8x256xf32>
    %142 = arith.subf %108, %141 : vector<8x256xf32>
    %143 = arith.mulf %134, %142 : vector<8x256xf32>
    %144 = arith.addf %141, %143 : vector<8x256xf32>
    %145 = arith.index_cast %c3_i32 : i32 to index
    %c0_38 = arith.constant 0 : index
    %c0_39 = arith.constant 0 : index
    %146 = vector.load %arg4[%145, %c0_38, %c0_39] : memref<16x8x256xf32, #tpu.memory_space<vmem>>, vector<1x8x256xf32>
    %147 = vector.shape_cast %146 : vector<1x8x256xf32> to vector<8x256xf32>
    %148 = vector.shape_cast %144 : vector<8x256xf32> to vector<1x8x256xf32>
    tpu.vector_store %arg4[%145, %c0_38, %c0_39], %148 {strides = array<i32>} : memref<16x8x256xf32, #tpu.memory_space<vmem>>, vector<1x8x256xf32>,
    %c4_i32 = arith.constant 4 : i32
    %149 = arith.index_cast %c4_i32 : i32 to index
    %c0_40 = arith.constant 0 : index
    %c0_41 = arith.constant 0 : index
    %150 = vector.load %arg1[%149, %c0_40, %c0_41] : memref<16x8x768xf32, #tpu.memory_space<vmem>>, vector<1x8x768xf32>
    %151 = vector.shape_cast %150 : vector<1x8x768xf32> to vector<8x768xf32>
    %152 = arith.truncf %144 : vector<8x256xf32> to vector<8x256xbf16>
    %c0_42 = arith.constant 0 : index
    %c0_43 = arith.constant 0 : index
    %153 = vector.load %arg2[%c0_42, %c0_43] : memref<256x768xbf16, #tpu.memory_space<vmem>>, vector<256x768xbf16>
    %cst_44 = arith.constant dense<0.000000e+00> : vector<8x768xf32>
    %154 = tpu.matmul %152, %153, %cst_44 {dimension_numbers = #tpu.dot_dimension_numbers<[1], [0], [0], [1], [0, 0, 1, 1], [], []>} : vector<8x256xbf16>, vector<256x768xbf16>, vector<8x768xf32> -> vector<8x768xf32>
    %155 = vector.extract_strided_slice %151 {offsets = [0, 0], sizes = [8, 256], strides = [1, 1]} : vector<8x768xf32> to vector<8x256xf32>
    %156 = vector.extract_strided_slice %154 {offsets = [0, 0], sizes = [8, 256], strides = [1, 1]} : vector<8x768xf32> to vector<8x256xf32>
    %157 = arith.addf %155, %156 : vector<8x256xf32>
    %158 = arith.negf %157 : vector<8x256xf32>
    %159 = math.exp %158 : vector<8x256xf32>
    %cst_45 = arith.constant 1.000000e+00 : f32
    %160 = vector.broadcast %cst_45 : f32 to vector<8x256xf32>
    %161 = arith.addf %160, %159 : vector<8x256xf32>
    %162 = arith.divf %160, %161 : vector<8x256xf32>
    %163 = vector.extract_strided_slice %151 {offsets = [0, 256], sizes = [8, 256], strides = [1, 1]} : vector<8x768xf32> to vector<8x256xf32>
    %164 = vector.extract_strided_slice %154 {offsets = [0, 256], sizes = [8, 256], strides = [1, 1]} : vector<8x768xf32> to vector<8x256xf32>
    %165 = arith.addf %163, %164 : vector<8x256xf32>
    %166 = arith.negf %165 : vector<8x256xf32>
    %167 = math.exp %166 : vector<8x256xf32>
    %cst_46 = arith.constant 1.000000e+00 : f32
    %168 = vector.broadcast %cst_46 : f32 to vector<8x256xf32>
    %169 = arith.addf %168, %167 : vector<8x256xf32>
    %170 = arith.divf %168, %169 : vector<8x256xf32>
    %171 = vector.extract_strided_slice %151 {offsets = [0, 512], sizes = [8, 256], strides = [1, 1]} : vector<8x768xf32> to vector<8x256xf32>
    %172 = vector.extract_strided_slice %154 {offsets = [0, 512], sizes = [8, 256], strides = [1, 1]} : vector<8x768xf32> to vector<8x256xf32>
    %173 = vector.broadcast %3 : vector<1x256xf32> to vector<8x256xf32>
    %174 = arith.addf %172, %173 : vector<8x256xf32>
    %175 = arith.mulf %162, %174 : vector<8x256xf32>
    %176 = arith.addf %171, %175 : vector<8x256xf32>
    %177 = math.tanh %176 : vector<8x256xf32>
    %178 = arith.subf %144, %177 : vector<8x256xf32>
    %179 = arith.mulf %170, %178 : vector<8x256xf32>
    %180 = arith.addf %177, %179 : vector<8x256xf32>
    %181 = arith.index_cast %c4_i32 : i32 to index
    %c0_47 = arith.constant 0 : index
    %c0_48 = arith.constant 0 : index
    %182 = vector.load %arg4[%181, %c0_47, %c0_48] : memref<16x8x256xf32, #tpu.memory_space<vmem>>, vector<1x8x256xf32>
    %183 = vector.shape_cast %182 : vector<1x8x256xf32> to vector<8x256xf32>
    %184 = vector.shape_cast %180 : vector<8x256xf32> to vector<1x8x256xf32>
    tpu.vector_store %arg4[%181, %c0_47, %c0_48], %184 {strides = array<i32>} : memref<16x8x256xf32, #tpu.memory_space<vmem>>, vector<1x8x256xf32>,
    %c5_i32 = arith.constant 5 : i32
    %185 = arith.index_cast %c5_i32 : i32 to index
    %c0_49 = arith.constant 0 : index
    %c0_50 = arith.constant 0 : index
    %186 = vector.load %arg1[%185, %c0_49, %c0_50] : memref<16x8x768xf32, #tpu.memory_space<vmem>>, vector<1x8x768xf32>
    %187 = vector.shape_cast %186 : vector<1x8x768xf32> to vector<8x768xf32>
    %188 = arith.truncf %180 : vector<8x256xf32> to vector<8x256xbf16>
    %c0_51 = arith.constant 0 : index
    %c0_52 = arith.constant 0 : index
    %189 = vector.load %arg2[%c0_51, %c0_52] : memref<256x768xbf16, #tpu.memory_space<vmem>>, vector<256x768xbf16>
    %cst_53 = arith.constant dense<0.000000e+00> : vector<8x768xf32>
    %190 = tpu.matmul %188, %189, %cst_53 {dimension_numbers = #tpu.dot_dimension_numbers<[1], [0], [0], [1], [0, 0, 1, 1], [], []>} : vector<8x256xbf16>, vector<256x768xbf16>, vector<8x768xf32> -> vector<8x768xf32>
    %191 = vector.extract_strided_slice %187 {offsets = [0, 0], sizes = [8, 256], strides = [1, 1]} : vector<8x768xf32> to vector<8x256xf32>
    %192 = vector.extract_strided_slice %190 {offsets = [0, 0], sizes = [8, 256], strides = [1, 1]} : vector<8x768xf32> to vector<8x256xf32>
    %193 = arith.addf %191, %192 : vector<8x256xf32>
    %194 = arith.negf %193 : vector<8x256xf32>
    %195 = math.exp %194 : vector<8x256xf32>
    %cst_54 = arith.constant 1.000000e+00 : f32
    %196 = vector.broadcast %cst_54 : f32 to vector<8x256xf32>
    %197 = arith.addf %196, %195 : vector<8x256xf32>
    %198 = arith.divf %196, %197 : vector<8x256xf32>
    %199 = vector.extract_strided_slice %187 {offsets = [0, 256], sizes = [8, 256], strides = [1, 1]} : vector<8x768xf32> to vector<8x256xf32>
    %200 = vector.extract_strided_slice %190 {offsets = [0, 256], sizes = [8, 256], strides = [1, 1]} : vector<8x768xf32> to vector<8x256xf32>
    %201 = arith.addf %199, %200 : vector<8x256xf32>
    %202 = arith.negf %201 : vector<8x256xf32>
    %203 = math.exp %202 : vector<8x256xf32>
    %cst_55 = arith.constant 1.000000e+00 : f32
    %204 = vector.broadcast %cst_55 : f32 to vector<8x256xf32>
    %205 = arith.addf %204, %203 : vector<8x256xf32>
    %206 = arith.divf %204, %205 : vector<8x256xf32>
    %207 = vector.extract_strided_slice %187 {offsets = [0, 512], sizes = [8, 256], strides = [1, 1]} : vector<8x768xf32> to vector<8x256xf32>
    %208 = vector.extract_strided_slice %190 {offsets = [0, 512], sizes = [8, 256], strides = [1, 1]} : vector<8x768xf32> to vector<8x256xf32>
    %209 = vector.broadcast %3 : vector<1x256xf32> to vector<8x256xf32>
    %210 = arith.addf %208, %209 : vector<8x256xf32>
    %211 = arith.mulf %198, %210 : vector<8x256xf32>
    %212 = arith.addf %207, %211 : vector<8x256xf32>
    %213 = math.tanh %212 : vector<8x256xf32>
    %214 = arith.subf %180, %213 : vector<8x256xf32>
    %215 = arith.mulf %206, %214 : vector<8x256xf32>
    %216 = arith.addf %213, %215 : vector<8x256xf32>
    %217 = arith.index_cast %c5_i32 : i32 to index
    %c0_56 = arith.constant 0 : index
    %c0_57 = arith.constant 0 : index
    %218 = vector.load %arg4[%217, %c0_56, %c0_57] : memref<16x8x256xf32, #tpu.memory_space<vmem>>, vector<1x8x256xf32>
    %219 = vector.shape_cast %218 : vector<1x8x256xf32> to vector<8x256xf32>
    %220 = vector.shape_cast %216 : vector<8x256xf32> to vector<1x8x256xf32>
    tpu.vector_store %arg4[%217, %c0_56, %c0_57], %220 {strides = array<i32>} : memref<16x8x256xf32, #tpu.memory_space<vmem>>, vector<1x8x256xf32>,
    %c6_i32 = arith.constant 6 : i32
    %221 = arith.index_cast %c6_i32 : i32 to index
    %c0_58 = arith.constant 0 : index
    %c0_59 = arith.constant 0 : index
    %222 = vector.load %arg1[%221, %c0_58, %c0_59] : memref<16x8x768xf32, #tpu.memory_space<vmem>>, vector<1x8x768xf32>
    %223 = vector.shape_cast %222 : vector<1x8x768xf32> to vector<8x768xf32>
    %224 = arith.truncf %216 : vector<8x256xf32> to vector<8x256xbf16>
    %c0_60 = arith.constant 0 : index
    %c0_61 = arith.constant 0 : index
    %225 = vector.load %arg2[%c0_60, %c0_61] : memref<256x768xbf16, #tpu.memory_space<vmem>>, vector<256x768xbf16>
    %cst_62 = arith.constant dense<0.000000e+00> : vector<8x768xf32>
    %226 = tpu.matmul %224, %225, %cst_62 {dimension_numbers = #tpu.dot_dimension_numbers<[1], [0], [0], [1], [0, 0, 1, 1], [], []>} : vector<8x256xbf16>, vector<256x768xbf16>, vector<8x768xf32> -> vector<8x768xf32>
    %227 = vector.extract_strided_slice %223 {offsets = [0, 0], sizes = [8, 256], strides = [1, 1]} : vector<8x768xf32> to vector<8x256xf32>
    %228 = vector.extract_strided_slice %226 {offsets = [0, 0], sizes = [8, 256], strides = [1, 1]} : vector<8x768xf32> to vector<8x256xf32>
    %229 = arith.addf %227, %228 : vector<8x256xf32>
    %230 = arith.negf %229 : vector<8x256xf32>
    %231 = math.exp %230 : vector<8x256xf32>
    %cst_63 = arith.constant 1.000000e+00 : f32
    %232 = vector.broadcast %cst_63 : f32 to vector<8x256xf32>
    %233 = arith.addf %232, %231 : vector<8x256xf32>
    %234 = arith.divf %232, %233 : vector<8x256xf32>
    %235 = vector.extract_strided_slice %223 {offsets = [0, 256], sizes = [8, 256], strides = [1, 1]} : vector<8x768xf32> to vector<8x256xf32>
    %236 = vector.extract_strided_slice %226 {offsets = [0, 256], sizes = [8, 256], strides = [1, 1]} : vector<8x768xf32> to vector<8x256xf32>
    %237 = arith.addf %235, %236 : vector<8x256xf32>
    %238 = arith.negf %237 : vector<8x256xf32>
    %239 = math.exp %238 : vector<8x256xf32>
    %cst_64 = arith.constant 1.000000e+00 : f32
    %240 = vector.broadcast %cst_64 : f32 to vector<8x256xf32>
    %241 = arith.addf %240, %239 : vector<8x256xf32>
    %242 = arith.divf %240, %241 : vector<8x256xf32>
    %243 = vector.extract_strided_slice %223 {offsets = [0, 512], sizes = [8, 256], strides = [1, 1]} : vector<8x768xf32> to vector<8x256xf32>
    %244 = vector.extract_strided_slice %226 {offsets = [0, 512], sizes = [8, 256], strides = [1, 1]} : vector<8x768xf32> to vector<8x256xf32>
    %245 = vector.broadcast %3 : vector<1x256xf32> to vector<8x256xf32>
    %246 = arith.addf %244, %245 : vector<8x256xf32>
    %247 = arith.mulf %234, %246 : vector<8x256xf32>
    %248 = arith.addf %243, %247 : vector<8x256xf32>
    %249 = math.tanh %248 : vector<8x256xf32>
    %250 = arith.subf %216, %249 : vector<8x256xf32>
    %251 = arith.mulf %242, %250 : vector<8x256xf32>
    %252 = arith.addf %249, %251 : vector<8x256xf32>
    %253 = arith.index_cast %c6_i32 : i32 to index
    %c0_65 = arith.constant 0 : index
    %c0_66 = arith.constant 0 : index
    %254 = vector.load %arg4[%253, %c0_65, %c0_66] : memref<16x8x256xf32, #tpu.memory_space<vmem>>, vector<1x8x256xf32>
    %255 = vector.shape_cast %254 : vector<1x8x256xf32> to vector<8x256xf32>
    %256 = vector.shape_cast %252 : vector<8x256xf32> to vector<1x8x256xf32>
    tpu.vector_store %arg4[%253, %c0_65, %c0_66], %256 {strides = array<i32>} : memref<16x8x256xf32, #tpu.memory_space<vmem>>, vector<1x8x256xf32>,
    %c7_i32 = arith.constant 7 : i32
    %257 = arith.index_cast %c7_i32 : i32 to index
    %c0_67 = arith.constant 0 : index
    %c0_68 = arith.constant 0 : index
    %258 = vector.load %arg1[%257, %c0_67, %c0_68] : memref<16x8x768xf32, #tpu.memory_space<vmem>>, vector<1x8x768xf32>
    %259 = vector.shape_cast %258 : vector<1x8x768xf32> to vector<8x768xf32>
    %260 = arith.truncf %252 : vector<8x256xf32> to vector<8x256xbf16>
    %c0_69 = arith.constant 0 : index
    %c0_70 = arith.constant 0 : index
    %261 = vector.load %arg2[%c0_69, %c0_70] : memref<256x768xbf16, #tpu.memory_space<vmem>>, vector<256x768xbf16>
    %cst_71 = arith.constant dense<0.000000e+00> : vector<8x768xf32>
    %262 = tpu.matmul %260, %261, %cst_71 {dimension_numbers = #tpu.dot_dimension_numbers<[1], [0], [0], [1], [0, 0, 1, 1], [], []>} : vector<8x256xbf16>, vector<256x768xbf16>, vector<8x768xf32> -> vector<8x768xf32>
    %263 = vector.extract_strided_slice %259 {offsets = [0, 0], sizes = [8, 256], strides = [1, 1]} : vector<8x768xf32> to vector<8x256xf32>
    %264 = vector.extract_strided_slice %262 {offsets = [0, 0], sizes = [8, 256], strides = [1, 1]} : vector<8x768xf32> to vector<8x256xf32>
    %265 = arith.addf %263, %264 : vector<8x256xf32>
    %266 = arith.negf %265 : vector<8x256xf32>
    %267 = math.exp %266 : vector<8x256xf32>
    %cst_72 = arith.constant 1.000000e+00 : f32
    %268 = vector.broadcast %cst_72 : f32 to vector<8x256xf32>
    %269 = arith.addf %268, %267 : vector<8x256xf32>
    %270 = arith.divf %268, %269 : vector<8x256xf32>
    %271 = vector.extract_strided_slice %259 {offsets = [0, 256], sizes = [8, 256], strides = [1, 1]} : vector<8x768xf32> to vector<8x256xf32>
    %272 = vector.extract_strided_slice %262 {offsets = [0, 256], sizes = [8, 256], strides = [1, 1]} : vector<8x768xf32> to vector<8x256xf32>
    %273 = arith.addf %271, %272 : vector<8x256xf32>
    %274 = arith.negf %273 : vector<8x256xf32>
    %275 = math.exp %274 : vector<8x256xf32>
    %cst_73 = arith.constant 1.000000e+00 : f32
    %276 = vector.broadcast %cst_73 : f32 to vector<8x256xf32>
    %277 = arith.addf %276, %275 : vector<8x256xf32>
    %278 = arith.divf %276, %277 : vector<8x256xf32>
    %279 = vector.extract_strided_slice %259 {offsets = [0, 512], sizes = [8, 256], strides = [1, 1]} : vector<8x768xf32> to vector<8x256xf32>
    %280 = vector.extract_strided_slice %262 {offsets = [0, 512], sizes = [8, 256], strides = [1, 1]} : vector<8x768xf32> to vector<8x256xf32>
    %281 = vector.broadcast %3 : vector<1x256xf32> to vector<8x256xf32>
    %282 = arith.addf %280, %281 : vector<8x256xf32>
    %283 = arith.mulf %270, %282 : vector<8x256xf32>
    %284 = arith.addf %279, %283 : vector<8x256xf32>
    %285 = math.tanh %284 : vector<8x256xf32>
    %286 = arith.subf %252, %285 : vector<8x256xf32>
    %287 = arith.mulf %278, %286 : vector<8x256xf32>
    %288 = arith.addf %285, %287 : vector<8x256xf32>
    %289 = arith.index_cast %c7_i32 : i32 to index
    %c0_74 = arith.constant 0 : index
    %c0_75 = arith.constant 0 : index
    %290 = vector.load %arg4[%289, %c0_74, %c0_75] : memref<16x8x256xf32, #tpu.memory_space<vmem>>, vector<1x8x256xf32>
    %291 = vector.shape_cast %290 : vector<1x8x256xf32> to vector<8x256xf32>
    %292 = vector.shape_cast %288 : vector<8x256xf32> to vector<1x8x256xf32>
    tpu.vector_store %arg4[%289, %c0_74, %c0_75], %292 {strides = array<i32>} : memref<16x8x256xf32, #tpu.memory_space<vmem>>, vector<1x8x256xf32>,
    %c8_i32 = arith.constant 8 : i32
    %293 = arith.index_cast %c8_i32 : i32 to index
    %c0_76 = arith.constant 0 : index
    %c0_77 = arith.constant 0 : index
    %294 = vector.load %arg1[%293, %c0_76, %c0_77] : memref<16x8x768xf32, #tpu.memory_space<vmem>>, vector<1x8x768xf32>
    %295 = vector.shape_cast %294 : vector<1x8x768xf32> to vector<8x768xf32>
    %296 = arith.truncf %288 : vector<8x256xf32> to vector<8x256xbf16>
    %c0_78 = arith.constant 0 : index
    %c0_79 = arith.constant 0 : index
    %297 = vector.load %arg2[%c0_78, %c0_79] : memref<256x768xbf16, #tpu.memory_space<vmem>>, vector<256x768xbf16>
    %cst_80 = arith.constant dense<0.000000e+00> : vector<8x768xf32>
    %298 = tpu.matmul %296, %297, %cst_80 {dimension_numbers = #tpu.dot_dimension_numbers<[1], [0], [0], [1], [0, 0, 1, 1], [], []>} : vector<8x256xbf16>, vector<256x768xbf16>, vector<8x768xf32> -> vector<8x768xf32>
    %299 = vector.extract_strided_slice %295 {offsets = [0, 0], sizes = [8, 256], strides = [1, 1]} : vector<8x768xf32> to vector<8x256xf32>
    %300 = vector.extract_strided_slice %298 {offsets = [0, 0], sizes = [8, 256], strides = [1, 1]} : vector<8x768xf32> to vector<8x256xf32>
    %301 = arith.addf %299, %300 : vector<8x256xf32>
    %302 = arith.negf %301 : vector<8x256xf32>
    %303 = math.exp %302 : vector<8x256xf32>
    %cst_81 = arith.constant 1.000000e+00 : f32
    %304 = vector.broadcast %cst_81 : f32 to vector<8x256xf32>
    %305 = arith.addf %304, %303 : vector<8x256xf32>
    %306 = arith.divf %304, %305 : vector<8x256xf32>
    %307 = vector.extract_strided_slice %295 {offsets = [0, 256], sizes = [8, 256], strides = [1, 1]} : vector<8x768xf32> to vector<8x256xf32>
    %308 = vector.extract_strided_slice %298 {offsets = [0, 256], sizes = [8, 256], strides = [1, 1]} : vector<8x768xf32> to vector<8x256xf32>
    %309 = arith.addf %307, %308 : vector<8x256xf32>
    %310 = arith.negf %309 : vector<8x256xf32>
    %311 = math.exp %310 : vector<8x256xf32>
    %cst_82 = arith.constant 1.000000e+00 : f32
    %312 = vector.broadcast %cst_82 : f32 to vector<8x256xf32>
    %313 = arith.addf %312, %311 : vector<8x256xf32>
    %314 = arith.divf %312, %313 : vector<8x256xf32>
    %315 = vector.extract_strided_slice %295 {offsets = [0, 512], sizes = [8, 256], strides = [1, 1]} : vector<8x768xf32> to vector<8x256xf32>
    %316 = vector.extract_strided_slice %298 {offsets = [0, 512], sizes = [8, 256], strides = [1, 1]} : vector<8x768xf32> to vector<8x256xf32>
    %317 = vector.broadcast %3 : vector<1x256xf32> to vector<8x256xf32>
    %318 = arith.addf %316, %317 : vector<8x256xf32>
    %319 = arith.mulf %306, %318 : vector<8x256xf32>
    %320 = arith.addf %315, %319 : vector<8x256xf32>
    %321 = math.tanh %320 : vector<8x256xf32>
    %322 = arith.subf %288, %321 : vector<8x256xf32>
    %323 = arith.mulf %314, %322 : vector<8x256xf32>
    %324 = arith.addf %321, %323 : vector<8x256xf32>
    %325 = arith.index_cast %c8_i32 : i32 to index
    %c0_83 = arith.constant 0 : index
    %c0_84 = arith.constant 0 : index
    %326 = vector.load %arg4[%325, %c0_83, %c0_84] : memref<16x8x256xf32, #tpu.memory_space<vmem>>, vector<1x8x256xf32>
    %327 = vector.shape_cast %326 : vector<1x8x256xf32> to vector<8x256xf32>
    %328 = vector.shape_cast %324 : vector<8x256xf32> to vector<1x8x256xf32>
    tpu.vector_store %arg4[%325, %c0_83, %c0_84], %328 {strides = array<i32>} : memref<16x8x256xf32, #tpu.memory_space<vmem>>, vector<1x8x256xf32>,
    %c9_i32 = arith.constant 9 : i32
    %329 = arith.index_cast %c9_i32 : i32 to index
    %c0_85 = arith.constant 0 : index
    %c0_86 = arith.constant 0 : index
    %330 = vector.load %arg1[%329, %c0_85, %c0_86] : memref<16x8x768xf32, #tpu.memory_space<vmem>>, vector<1x8x768xf32>
    %331 = vector.shape_cast %330 : vector<1x8x768xf32> to vector<8x768xf32>
    %332 = arith.truncf %324 : vector<8x256xf32> to vector<8x256xbf16>
    %c0_87 = arith.constant 0 : index
    %c0_88 = arith.constant 0 : index
    %333 = vector.load %arg2[%c0_87, %c0_88] : memref<256x768xbf16, #tpu.memory_space<vmem>>, vector<256x768xbf16>
    %cst_89 = arith.constant dense<0.000000e+00> : vector<8x768xf32>
    %334 = tpu.matmul %332, %333, %cst_89 {dimension_numbers = #tpu.dot_dimension_numbers<[1], [0], [0], [1], [0, 0, 1, 1], [], []>} : vector<8x256xbf16>, vector<256x768xbf16>, vector<8x768xf32> -> vector<8x768xf32>
    %335 = vector.extract_strided_slice %331 {offsets = [0, 0], sizes = [8, 256], strides = [1, 1]} : vector<8x768xf32> to vector<8x256xf32>
    %336 = vector.extract_strided_slice %334 {offsets = [0, 0], sizes = [8, 256], strides = [1, 1]} : vector<8x768xf32> to vector<8x256xf32>
    %337 = arith.addf %335, %336 : vector<8x256xf32>
    %338 = arith.negf %337 : vector<8x256xf32>
    %339 = math.exp %338 : vector<8x256xf32>
    %cst_90 = arith.constant 1.000000e+00 : f32
    %340 = vector.broadcast %cst_90 : f32 to vector<8x256xf32>
    %341 = arith.addf %340, %339 : vector<8x256xf32>
    %342 = arith.divf %340, %341 : vector<8x256xf32>
    %343 = vector.extract_strided_slice %331 {offsets = [0, 256], sizes = [8, 256], strides = [1, 1]} : vector<8x768xf32> to vector<8x256xf32>
    %344 = vector.extract_strided_slice %334 {offsets = [0, 256], sizes = [8, 256], strides = [1, 1]} : vector<8x768xf32> to vector<8x256xf32>
    %345 = arith.addf %343, %344 : vector<8x256xf32>
    %346 = arith.negf %345 : vector<8x256xf32>
    %347 = math.exp %346 : vector<8x256xf32>
    %cst_91 = arith.constant 1.000000e+00 : f32
    %348 = vector.broadcast %cst_91 : f32 to vector<8x256xf32>
    %349 = arith.addf %348, %347 : vector<8x256xf32>
    %350 = arith.divf %348, %349 : vector<8x256xf32>
    %351 = vector.extract_strided_slice %331 {offsets = [0, 512], sizes = [8, 256], strides = [1, 1]} : vector<8x768xf32> to vector<8x256xf32>
    %352 = vector.extract_strided_slice %334 {offsets = [0, 512], sizes = [8, 256], strides = [1, 1]} : vector<8x768xf32> to vector<8x256xf32>
    %353 = vector.broadcast %3 : vector<1x256xf32> to vector<8x256xf32>
    %354 = arith.addf %352, %353 : vector<8x256xf32>
    %355 = arith.mulf %342, %354 : vector<8x256xf32>
    %356 = arith.addf %351, %355 : vector<8x256xf32>
    %357 = math.tanh %356 : vector<8x256xf32>
    %358 = arith.subf %324, %357 : vector<8x256xf32>
    %359 = arith.mulf %350, %358 : vector<8x256xf32>
    %360 = arith.addf %357, %359 : vector<8x256xf32>
    %361 = arith.index_cast %c9_i32 : i32 to index
    %c0_92 = arith.constant 0 : index
    %c0_93 = arith.constant 0 : index
    %362 = vector.load %arg4[%361, %c0_92, %c0_93] : memref<16x8x256xf32, #tpu.memory_space<vmem>>, vector<1x8x256xf32>
    %363 = vector.shape_cast %362 : vector<1x8x256xf32> to vector<8x256xf32>
    %364 = vector.shape_cast %360 : vector<8x256xf32> to vector<1x8x256xf32>
    tpu.vector_store %arg4[%361, %c0_92, %c0_93], %364 {strides = array<i32>} : memref<16x8x256xf32, #tpu.memory_space<vmem>>, vector<1x8x256xf32>,
    %c10_i32 = arith.constant 10 : i32
    %365 = arith.index_cast %c10_i32 : i32 to index
    %c0_94 = arith.constant 0 : index
    %c0_95 = arith.constant 0 : index
    %366 = vector.load %arg1[%365, %c0_94, %c0_95] : memref<16x8x768xf32, #tpu.memory_space<vmem>>, vector<1x8x768xf32>
    %367 = vector.shape_cast %366 : vector<1x8x768xf32> to vector<8x768xf32>
    %368 = arith.truncf %360 : vector<8x256xf32> to vector<8x256xbf16>
    %c0_96 = arith.constant 0 : index
    %c0_97 = arith.constant 0 : index
    %369 = vector.load %arg2[%c0_96, %c0_97] : memref<256x768xbf16, #tpu.memory_space<vmem>>, vector<256x768xbf16>
    %cst_98 = arith.constant dense<0.000000e+00> : vector<8x768xf32>
    %370 = tpu.matmul %368, %369, %cst_98 {dimension_numbers = #tpu.dot_dimension_numbers<[1], [0], [0], [1], [0, 0, 1, 1], [], []>} : vector<8x256xbf16>, vector<256x768xbf16>, vector<8x768xf32> -> vector<8x768xf32>
    %371 = vector.extract_strided_slice %367 {offsets = [0, 0], sizes = [8, 256], strides = [1, 1]} : vector<8x768xf32> to vector<8x256xf32>
    %372 = vector.extract_strided_slice %370 {offsets = [0, 0], sizes = [8, 256], strides = [1, 1]} : vector<8x768xf32> to vector<8x256xf32>
    %373 = arith.addf %371, %372 : vector<8x256xf32>
    %374 = arith.negf %373 : vector<8x256xf32>
    %375 = math.exp %374 : vector<8x256xf32>
    %cst_99 = arith.constant 1.000000e+00 : f32
    %376 = vector.broadcast %cst_99 : f32 to vector<8x256xf32>
    %377 = arith.addf %376, %375 : vector<8x256xf32>
    %378 = arith.divf %376, %377 : vector<8x256xf32>
    %379 = vector.extract_strided_slice %367 {offsets = [0, 256], sizes = [8, 256], strides = [1, 1]} : vector<8x768xf32> to vector<8x256xf32>
    %380 = vector.extract_strided_slice %370 {offsets = [0, 256], sizes = [8, 256], strides = [1, 1]} : vector<8x768xf32> to vector<8x256xf32>
    %381 = arith.addf %379, %380 : vector<8x256xf32>
    %382 = arith.negf %381 : vector<8x256xf32>
    %383 = math.exp %382 : vector<8x256xf32>
    %cst_100 = arith.constant 1.000000e+00 : f32
    %384 = vector.broadcast %cst_100 : f32 to vector<8x256xf32>
    %385 = arith.addf %384, %383 : vector<8x256xf32>
    %386 = arith.divf %384, %385 : vector<8x256xf32>
    %387 = vector.extract_strided_slice %367 {offsets = [0, 512], sizes = [8, 256], strides = [1, 1]} : vector<8x768xf32> to vector<8x256xf32>
    %388 = vector.extract_strided_slice %370 {offsets = [0, 512], sizes = [8, 256], strides = [1, 1]} : vector<8x768xf32> to vector<8x256xf32>
    %389 = vector.broadcast %3 : vector<1x256xf32> to vector<8x256xf32>
    %390 = arith.addf %388, %389 : vector<8x256xf32>
    %391 = arith.mulf %378, %390 : vector<8x256xf32>
    %392 = arith.addf %387, %391 : vector<8x256xf32>
    %393 = math.tanh %392 : vector<8x256xf32>
    %394 = arith.subf %360, %393 : vector<8x256xf32>
    %395 = arith.mulf %386, %394 : vector<8x256xf32>
    %396 = arith.addf %393, %395 : vector<8x256xf32>
    %397 = arith.index_cast %c10_i32 : i32 to index
    %c0_101 = arith.constant 0 : index
    %c0_102 = arith.constant 0 : index
    %398 = vector.load %arg4[%397, %c0_101, %c0_102] : memref<16x8x256xf32, #tpu.memory_space<vmem>>, vector<1x8x256xf32>
    %399 = vector.shape_cast %398 : vector<1x8x256xf32> to vector<8x256xf32>
    %400 = vector.shape_cast %396 : vector<8x256xf32> to vector<1x8x256xf32>
    tpu.vector_store %arg4[%397, %c0_101, %c0_102], %400 {strides = array<i32>} : memref<16x8x256xf32, #tpu.memory_space<vmem>>, vector<1x8x256xf32>,
    %c11_i32 = arith.constant 11 : i32
    %401 = arith.index_cast %c11_i32 : i32 to index
    %c0_103 = arith.constant 0 : index
    %c0_104 = arith.constant 0 : index
    %402 = vector.load %arg1[%401, %c0_103, %c0_104] : memref<16x8x768xf32, #tpu.memory_space<vmem>>, vector<1x8x768xf32>
    %403 = vector.shape_cast %402 : vector<1x8x768xf32> to vector<8x768xf32>
    %404 = arith.truncf %396 : vector<8x256xf32> to vector<8x256xbf16>
    %c0_105 = arith.constant 0 : index
    %c0_106 = arith.constant 0 : index
    %405 = vector.load %arg2[%c0_105, %c0_106] : memref<256x768xbf16, #tpu.memory_space<vmem>>, vector<256x768xbf16>
    %cst_107 = arith.constant dense<0.000000e+00> : vector<8x768xf32>
    %406 = tpu.matmul %404, %405, %cst_107 {dimension_numbers = #tpu.dot_dimension_numbers<[1], [0], [0], [1], [0, 0, 1, 1], [], []>} : vector<8x256xbf16>, vector<256x768xbf16>, vector<8x768xf32> -> vector<8x768xf32>
    %407 = vector.extract_strided_slice %403 {offsets = [0, 0], sizes = [8, 256], strides = [1, 1]} : vector<8x768xf32> to vector<8x256xf32>
    %408 = vector.extract_strided_slice %406 {offsets = [0, 0], sizes = [8, 256], strides = [1, 1]} : vector<8x768xf32> to vector<8x256xf32>
    %409 = arith.addf %407, %408 : vector<8x256xf32>
    %410 = arith.negf %409 : vector<8x256xf32>
    %411 = math.exp %410 : vector<8x256xf32>
    %cst_108 = arith.constant 1.000000e+00 : f32
    %412 = vector.broadcast %cst_108 : f32 to vector<8x256xf32>
    %413 = arith.addf %412, %411 : vector<8x256xf32>
    %414 = arith.divf %412, %413 : vector<8x256xf32>
    %415 = vector.extract_strided_slice %403 {offsets = [0, 256], sizes = [8, 256], strides = [1, 1]} : vector<8x768xf32> to vector<8x256xf32>
    %416 = vector.extract_strided_slice %406 {offsets = [0, 256], sizes = [8, 256], strides = [1, 1]} : vector<8x768xf32> to vector<8x256xf32>
    %417 = arith.addf %415, %416 : vector<8x256xf32>
    %418 = arith.negf %417 : vector<8x256xf32>
    %419 = math.exp %418 : vector<8x256xf32>
    %cst_109 = arith.constant 1.000000e+00 : f32
    %420 = vector.broadcast %cst_109 : f32 to vector<8x256xf32>
    %421 = arith.addf %420, %419 : vector<8x256xf32>
    %422 = arith.divf %420, %421 : vector<8x256xf32>
    %423 = vector.extract_strided_slice %403 {offsets = [0, 512], sizes = [8, 256], strides = [1, 1]} : vector<8x768xf32> to vector<8x256xf32>
    %424 = vector.extract_strided_slice %406 {offsets = [0, 512], sizes = [8, 256], strides = [1, 1]} : vector<8x768xf32> to vector<8x256xf32>
    %425 = vector.broadcast %3 : vector<1x256xf32> to vector<8x256xf32>
    %426 = arith.addf %424, %425 : vector<8x256xf32>
    %427 = arith.mulf %414, %426 : vector<8x256xf32>
    %428 = arith.addf %423, %427 : vector<8x256xf32>
    %429 = math.tanh %428 : vector<8x256xf32>
    %430 = arith.subf %396, %429 : vector<8x256xf32>
    %431 = arith.mulf %422, %430 : vector<8x256xf32>
    %432 = arith.addf %429, %431 : vector<8x256xf32>
    %433 = arith.index_cast %c11_i32 : i32 to index
    %c0_110 = arith.constant 0 : index
    %c0_111 = arith.constant 0 : index
    %434 = vector.load %arg4[%433, %c0_110, %c0_111] : memref<16x8x256xf32, #tpu.memory_space<vmem>>, vector<1x8x256xf32>
    %435 = vector.shape_cast %434 : vector<1x8x256xf32> to vector<8x256xf32>
    %436 = vector.shape_cast %432 : vector<8x256xf32> to vector<1x8x256xf32>
    tpu.vector_store %arg4[%433, %c0_110, %c0_111], %436 {strides = array<i32>} : memref<16x8x256xf32, #tpu.memory_space<vmem>>, vector<1x8x256xf32>,
    %c12_i32 = arith.constant 12 : i32
    %437 = arith.index_cast %c12_i32 : i32 to index
    %c0_112 = arith.constant 0 : index
    %c0_113 = arith.constant 0 : index
    %438 = vector.load %arg1[%437, %c0_112, %c0_113] : memref<16x8x768xf32, #tpu.memory_space<vmem>>, vector<1x8x768xf32>
    %439 = vector.shape_cast %438 : vector<1x8x768xf32> to vector<8x768xf32>
    %440 = arith.truncf %432 : vector<8x256xf32> to vector<8x256xbf16>
    %c0_114 = arith.constant 0 : index
    %c0_115 = arith.constant 0 : index
    %441 = vector.load %arg2[%c0_114, %c0_115] : memref<256x768xbf16, #tpu.memory_space<vmem>>, vector<256x768xbf16>
    %cst_116 = arith.constant dense<0.000000e+00> : vector<8x768xf32>
    %442 = tpu.matmul %440, %441, %cst_116 {dimension_numbers = #tpu.dot_dimension_numbers<[1], [0], [0], [1], [0, 0, 1, 1], [], []>} : vector<8x256xbf16>, vector<256x768xbf16>, vector<8x768xf32> -> vector<8x768xf32>
    %443 = vector.extract_strided_slice %439 {offsets = [0, 0], sizes = [8, 256], strides = [1, 1]} : vector<8x768xf32> to vector<8x256xf32>
    %444 = vector.extract_strided_slice %442 {offsets = [0, 0], sizes = [8, 256], strides = [1, 1]} : vector<8x768xf32> to vector<8x256xf32>
    %445 = arith.addf %443, %444 : vector<8x256xf32>
    %446 = arith.negf %445 : vector<8x256xf32>
    %447 = math.exp %446 : vector<8x256xf32>
    %cst_117 = arith.constant 1.000000e+00 : f32
    %448 = vector.broadcast %cst_117 : f32 to vector<8x256xf32>
    %449 = arith.addf %448, %447 : vector<8x256xf32>
    %450 = arith.divf %448, %449 : vector<8x256xf32>
    %451 = vector.extract_strided_slice %439 {offsets = [0, 256], sizes = [8, 256], strides = [1, 1]} : vector<8x768xf32> to vector<8x256xf32>
    %452 = vector.extract_strided_slice %442 {offsets = [0, 256], sizes = [8, 256], strides = [1, 1]} : vector<8x768xf32> to vector<8x256xf32>
    %453 = arith.addf %451, %452 : vector<8x256xf32>
    %454 = arith.negf %453 : vector<8x256xf32>
    %455 = math.exp %454 : vector<8x256xf32>
    %cst_118 = arith.constant 1.000000e+00 : f32
    %456 = vector.broadcast %cst_118 : f32 to vector<8x256xf32>
    %457 = arith.addf %456, %455 : vector<8x256xf32>
    %458 = arith.divf %456, %457 : vector<8x256xf32>
    %459 = vector.extract_strided_slice %439 {offsets = [0, 512], sizes = [8, 256], strides = [1, 1]} : vector<8x768xf32> to vector<8x256xf32>
    %460 = vector.extract_strided_slice %442 {offsets = [0, 512], sizes = [8, 256], strides = [1, 1]} : vector<8x768xf32> to vector<8x256xf32>
    %461 = vector.broadcast %3 : vector<1x256xf32> to vector<8x256xf32>
    %462 = arith.addf %460, %461 : vector<8x256xf32>
    %463 = arith.mulf %450, %462 : vector<8x256xf32>
    %464 = arith.addf %459, %463 : vector<8x256xf32>
    %465 = math.tanh %464 : vector<8x256xf32>
    %466 = arith.subf %432, %465 : vector<8x256xf32>
    %467 = arith.mulf %458, %466 : vector<8x256xf32>
    %468 = arith.addf %465, %467 : vector<8x256xf32>
    %469 = arith.index_cast %c12_i32 : i32 to index
    %c0_119 = arith.constant 0 : index
    %c0_120 = arith.constant 0 : index
    %470 = vector.load %arg4[%469, %c0_119, %c0_120] : memref<16x8x256xf32, #tpu.memory_space<vmem>>, vector<1x8x256xf32>
    %471 = vector.shape_cast %470 : vector<1x8x256xf32> to vector<8x256xf32>
    %472 = vector.shape_cast %468 : vector<8x256xf32> to vector<1x8x256xf32>
    tpu.vector_store %arg4[%469, %c0_119, %c0_120], %472 {strides = array<i32>} : memref<16x8x256xf32, #tpu.memory_space<vmem>>, vector<1x8x256xf32>,
    %c13_i32 = arith.constant 13 : i32
    %473 = arith.index_cast %c13_i32 : i32 to index
    %c0_121 = arith.constant 0 : index
    %c0_122 = arith.constant 0 : index
    %474 = vector.load %arg1[%473, %c0_121, %c0_122] : memref<16x8x768xf32, #tpu.memory_space<vmem>>, vector<1x8x768xf32>
    %475 = vector.shape_cast %474 : vector<1x8x768xf32> to vector<8x768xf32>
    %476 = arith.truncf %468 : vector<8x256xf32> to vector<8x256xbf16>
    %c0_123 = arith.constant 0 : index
    %c0_124 = arith.constant 0 : index
    %477 = vector.load %arg2[%c0_123, %c0_124] : memref<256x768xbf16, #tpu.memory_space<vmem>>, vector<256x768xbf16>
    %cst_125 = arith.constant dense<0.000000e+00> : vector<8x768xf32>
    %478 = tpu.matmul %476, %477, %cst_125 {dimension_numbers = #tpu.dot_dimension_numbers<[1], [0], [0], [1], [0, 0, 1, 1], [], []>} : vector<8x256xbf16>, vector<256x768xbf16>, vector<8x768xf32> -> vector<8x768xf32>
    %479 = vector.extract_strided_slice %475 {offsets = [0, 0], sizes = [8, 256], strides = [1, 1]} : vector<8x768xf32> to vector<8x256xf32>
    %480 = vector.extract_strided_slice %478 {offsets = [0, 0], sizes = [8, 256], strides = [1, 1]} : vector<8x768xf32> to vector<8x256xf32>
    %481 = arith.addf %479, %480 : vector<8x256xf32>
    %482 = arith.negf %481 : vector<8x256xf32>
    %483 = math.exp %482 : vector<8x256xf32>
    %cst_126 = arith.constant 1.000000e+00 : f32
    %484 = vector.broadcast %cst_126 : f32 to vector<8x256xf32>
    %485 = arith.addf %484, %483 : vector<8x256xf32>
    %486 = arith.divf %484, %485 : vector<8x256xf32>
    %487 = vector.extract_strided_slice %475 {offsets = [0, 256], sizes = [8, 256], strides = [1, 1]} : vector<8x768xf32> to vector<8x256xf32>
    %488 = vector.extract_strided_slice %478 {offsets = [0, 256], sizes = [8, 256], strides = [1, 1]} : vector<8x768xf32> to vector<8x256xf32>
    %489 = arith.addf %487, %488 : vector<8x256xf32>
    %490 = arith.negf %489 : vector<8x256xf32>
    %491 = math.exp %490 : vector<8x256xf32>
    %cst_127 = arith.constant 1.000000e+00 : f32
    %492 = vector.broadcast %cst_127 : f32 to vector<8x256xf32>
    %493 = arith.addf %492, %491 : vector<8x256xf32>
    %494 = arith.divf %492, %493 : vector<8x256xf32>
    %495 = vector.extract_strided_slice %475 {offsets = [0, 512], sizes = [8, 256], strides = [1, 1]} : vector<8x768xf32> to vector<8x256xf32>
    %496 = vector.extract_strided_slice %478 {offsets = [0, 512], sizes = [8, 256], strides = [1, 1]} : vector<8x768xf32> to vector<8x256xf32>
    %497 = vector.broadcast %3 : vector<1x256xf32> to vector<8x256xf32>
    %498 = arith.addf %496, %497 : vector<8x256xf32>
    %499 = arith.mulf %486, %498 : vector<8x256xf32>
    %500 = arith.addf %495, %499 : vector<8x256xf32>
    %501 = math.tanh %500 : vector<8x256xf32>
    %502 = arith.subf %468, %501 : vector<8x256xf32>
    %503 = arith.mulf %494, %502 : vector<8x256xf32>
    %504 = arith.addf %501, %503 : vector<8x256xf32>
    %505 = arith.index_cast %c13_i32 : i32 to index
    %c0_128 = arith.constant 0 : index
    %c0_129 = arith.constant 0 : index
    %506 = vector.load %arg4[%505, %c0_128, %c0_129] : memref<16x8x256xf32, #tpu.memory_space<vmem>>, vector<1x8x256xf32>
    %507 = vector.shape_cast %506 : vector<1x8x256xf32> to vector<8x256xf32>
    %508 = vector.shape_cast %504 : vector<8x256xf32> to vector<1x8x256xf32>
    tpu.vector_store %arg4[%505, %c0_128, %c0_129], %508 {strides = array<i32>} : memref<16x8x256xf32, #tpu.memory_space<vmem>>, vector<1x8x256xf32>,
    %c14_i32 = arith.constant 14 : i32
    %509 = arith.index_cast %c14_i32 : i32 to index
    %c0_130 = arith.constant 0 : index
    %c0_131 = arith.constant 0 : index
    %510 = vector.load %arg1[%509, %c0_130, %c0_131] : memref<16x8x768xf32, #tpu.memory_space<vmem>>, vector<1x8x768xf32>
    %511 = vector.shape_cast %510 : vector<1x8x768xf32> to vector<8x768xf32>
    %512 = arith.truncf %504 : vector<8x256xf32> to vector<8x256xbf16>
    %c0_132 = arith.constant 0 : index
    %c0_133 = arith.constant 0 : index
    %513 = vector.load %arg2[%c0_132, %c0_133] : memref<256x768xbf16, #tpu.memory_space<vmem>>, vector<256x768xbf16>
    %cst_134 = arith.constant dense<0.000000e+00> : vector<8x768xf32>
    %514 = tpu.matmul %512, %513, %cst_134 {dimension_numbers = #tpu.dot_dimension_numbers<[1], [0], [0], [1], [0, 0, 1, 1], [], []>} : vector<8x256xbf16>, vector<256x768xbf16>, vector<8x768xf32> -> vector<8x768xf32>
    %515 = vector.extract_strided_slice %511 {offsets = [0, 0], sizes = [8, 256], strides = [1, 1]} : vector<8x768xf32> to vector<8x256xf32>
    %516 = vector.extract_strided_slice %514 {offsets = [0, 0], sizes = [8, 256], strides = [1, 1]} : vector<8x768xf32> to vector<8x256xf32>
    %517 = arith.addf %515, %516 : vector<8x256xf32>
    %518 = arith.negf %517 : vector<8x256xf32>
    %519 = math.exp %518 : vector<8x256xf32>
    %cst_135 = arith.constant 1.000000e+00 : f32
    %520 = vector.broadcast %cst_135 : f32 to vector<8x256xf32>
    %521 = arith.addf %520, %519 : vector<8x256xf32>
    %522 = arith.divf %520, %521 : vector<8x256xf32>
    %523 = vector.extract_strided_slice %511 {offsets = [0, 256], sizes = [8, 256], strides = [1, 1]} : vector<8x768xf32> to vector<8x256xf32>
    %524 = vector.extract_strided_slice %514 {offsets = [0, 256], sizes = [8, 256], strides = [1, 1]} : vector<8x768xf32> to vector<8x256xf32>
    %525 = arith.addf %523, %524 : vector<8x256xf32>
    %526 = arith.negf %525 : vector<8x256xf32>
    %527 = math.exp %526 : vector<8x256xf32>
    %cst_136 = arith.constant 1.000000e+00 : f32
    %528 = vector.broadcast %cst_136 : f32 to vector<8x256xf32>
    %529 = arith.addf %528, %527 : vector<8x256xf32>
    %530 = arith.divf %528, %529 : vector<8x256xf32>
    %531 = vector.extract_strided_slice %511 {offsets = [0, 512], sizes = [8, 256], strides = [1, 1]} : vector<8x768xf32> to vector<8x256xf32>
    %532 = vector.extract_strided_slice %514 {offsets = [0, 512], sizes = [8, 256], strides = [1, 1]} : vector<8x768xf32> to vector<8x256xf32>
    %533 = vector.broadcast %3 : vector<1x256xf32> to vector<8x256xf32>
    %534 = arith.addf %532, %533 : vector<8x256xf32>
    %535 = arith.mulf %522, %534 : vector<8x256xf32>
    %536 = arith.addf %531, %535 : vector<8x256xf32>
    %537 = math.tanh %536 : vector<8x256xf32>
    %538 = arith.subf %504, %537 : vector<8x256xf32>
    %539 = arith.mulf %530, %538 : vector<8x256xf32>
    %540 = arith.addf %537, %539 : vector<8x256xf32>
    %541 = arith.index_cast %c14_i32 : i32 to index
    %c0_137 = arith.constant 0 : index
    %c0_138 = arith.constant 0 : index
    %542 = vector.load %arg4[%541, %c0_137, %c0_138] : memref<16x8x256xf32, #tpu.memory_space<vmem>>, vector<1x8x256xf32>
    %543 = vector.shape_cast %542 : vector<1x8x256xf32> to vector<8x256xf32>
    %544 = vector.shape_cast %540 : vector<8x256xf32> to vector<1x8x256xf32>
    tpu.vector_store %arg4[%541, %c0_137, %c0_138], %544 {strides = array<i32>} : memref<16x8x256xf32, #tpu.memory_space<vmem>>, vector<1x8x256xf32>,
    %c15_i32 = arith.constant 15 : i32
    %545 = arith.index_cast %c15_i32 : i32 to index
    %c0_139 = arith.constant 0 : index
    %c0_140 = arith.constant 0 : index
    %546 = vector.load %arg1[%545, %c0_139, %c0_140] : memref<16x8x768xf32, #tpu.memory_space<vmem>>, vector<1x8x768xf32>
    %547 = vector.shape_cast %546 : vector<1x8x768xf32> to vector<8x768xf32>
    %548 = arith.truncf %540 : vector<8x256xf32> to vector<8x256xbf16>
    %c0_141 = arith.constant 0 : index
    %c0_142 = arith.constant 0 : index
    %549 = vector.load %arg2[%c0_141, %c0_142] : memref<256x768xbf16, #tpu.memory_space<vmem>>, vector<256x768xbf16>
    %cst_143 = arith.constant dense<0.000000e+00> : vector<8x768xf32>
    %550 = tpu.matmul %548, %549, %cst_143 {dimension_numbers = #tpu.dot_dimension_numbers<[1], [0], [0], [1], [0, 0, 1, 1], [], []>} : vector<8x256xbf16>, vector<256x768xbf16>, vector<8x768xf32> -> vector<8x768xf32>
    %551 = vector.extract_strided_slice %547 {offsets = [0, 0], sizes = [8, 256], strides = [1, 1]} : vector<8x768xf32> to vector<8x256xf32>
    %552 = vector.extract_strided_slice %550 {offsets = [0, 0], sizes = [8, 256], strides = [1, 1]} : vector<8x768xf32> to vector<8x256xf32>
    %553 = arith.addf %551, %552 : vector<8x256xf32>
    %554 = arith.negf %553 : vector<8x256xf32>
    %555 = math.exp %554 : vector<8x256xf32>
    %cst_144 = arith.constant 1.000000e+00 : f32
    %556 = vector.broadcast %cst_144 : f32 to vector<8x256xf32>
    %557 = arith.addf %556, %555 : vector<8x256xf32>
    %558 = arith.divf %556, %557 : vector<8x256xf32>
    %559 = vector.extract_strided_slice %547 {offsets = [0, 256], sizes = [8, 256], strides = [1, 1]} : vector<8x768xf32> to vector<8x256xf32>
    %560 = vector.extract_strided_slice %550 {offsets = [0, 256], sizes = [8, 256], strides = [1, 1]} : vector<8x768xf32> to vector<8x256xf32>
    %561 = arith.addf %559, %560 : vector<8x256xf32>
    %562 = arith.negf %561 : vector<8x256xf32>
    %563 = math.exp %562 : vector<8x256xf32>
    %cst_145 = arith.constant 1.000000e+00 : f32
    %564 = vector.broadcast %cst_145 : f32 to vector<8x256xf32>
    %565 = arith.addf %564, %563 : vector<8x256xf32>
    %566 = arith.divf %564, %565 : vector<8x256xf32>
    %567 = vector.extract_strided_slice %547 {offsets = [0, 512], sizes = [8, 256], strides = [1, 1]} : vector<8x768xf32> to vector<8x256xf32>
    %568 = vector.extract_strided_slice %550 {offsets = [0, 512], sizes = [8, 256], strides = [1, 1]} : vector<8x768xf32> to vector<8x256xf32>
    %569 = vector.broadcast %3 : vector<1x256xf32> to vector<8x256xf32>
    %570 = arith.addf %568, %569 : vector<8x256xf32>
    %571 = arith.mulf %558, %570 : vector<8x256xf32>
    %572 = arith.addf %567, %571 : vector<8x256xf32>
    %573 = math.tanh %572 : vector<8x256xf32>
    %574 = arith.subf %540, %573 : vector<8x256xf32>
    %575 = arith.mulf %566, %574 : vector<8x256xf32>
    %576 = arith.addf %573, %575 : vector<8x256xf32>
    %577 = arith.index_cast %c15_i32 : i32 to index
    %c0_146 = arith.constant 0 : index
    %c0_147 = arith.constant 0 : index
    %578 = vector.load %arg4[%577, %c0_146, %c0_147] : memref<16x8x256xf32, #tpu.memory_space<vmem>>, vector<1x8x256xf32>
    %579 = vector.shape_cast %578 : vector<1x8x256xf32> to vector<8x256xf32>
    %580 = vector.shape_cast %576 : vector<8x256xf32> to vector<1x8x256xf32>
    tpu.vector_store %arg4[%577, %c0_146, %c0_147], %580 {strides = array<i32>} : memref<16x8x256xf32, #tpu.memory_space<vmem>>, vector<1x8x256xf32>,
    %c16_i32 = arith.constant 16 : i32
    %c0_148 = arith.constant 0 : index
    %c0_149 = arith.constant 0 : index
    %581 = vector.load %arg5[%c0_148, %c0_149] : memref<8x256xf32, #tpu.memory_space<vmem>>, vector<8x256xf32>
    tpu.vector_store %arg5[%c0_148, %c0_149], %576 {strides = array<i32>} : memref<8x256xf32, #tpu.memory_space<vmem>>, vector<8x256xf32>,
    return
  }
  func.func @transform_0(%arg0: i32) -> (i32, i32, i32) {
    %c0_i32 = arith.constant 0 : i32
    %c0_i32_0 = arith.constant 0 : i32
    %c0_i32_1 = arith.constant 0 : i32
    return %arg0, %c0_i32, %c0_i32_0 : i32, i32, i32
  }
  func.func @transform_1(%arg0: i32) -> (i32, i32) {
    %c0_i32 = arith.constant 0 : i32
    %c0_i32_0 = arith.constant 0 : i32
    %c0_i32_1 = arith.constant 0 : i32
    return %c0_i32, %c0_i32_0 : i32, i32
  }
  func.func @transform_2(%arg0: i32) -> (i32, i32) {
    %c0_i32 = arith.constant 0 : i32
    %c0_i32_0 = arith.constant 0 : i32
    %c0_i32_1 = arith.constant 0 : i32
    return %c0_i32, %c0_i32_0 : i32, i32
  }
  func.func @transform_3(%arg0: i32) -> (i32, i32, i32) {
    %c0_i32 = arith.constant 0 : i32
    %c0_i32_0 = arith.constant 0 : i32
    %c0_i32_1 = arith.constant 0 : i32
    return %arg0, %c0_i32, %c0_i32_0 : i32, i32, i32
  }
}

</mosaic_0001>

<bundles_post_ra>
// kernel: _lambda_.5
= control target key start
LH: loop header
LB: loop body
LE: loop exit
PB: predicated region body
PF: predicated region fallthrough
CT: control target
= control target key end

     0   :  { %s1247_s12 = smov 0   ;;  %s1249_s13 = smov 0   ;;  %s1679_s0 = inlined_call_operand.vmem [shape: f32[128,128], index: 0, kind: input, shape index: {}]   ;;  %s1680_s1 = inlined_call_operand.vmem [shape: bf16[128,768], index: 1, kind: input, shape index: {}]   ;;  %s1681_s2 = inlined_call_operand.vmem [shape: f32[1,768], index: 2, kind: input, shape index: {}]   ;;  %s1682_s3 = inlined_call_operand.vmem [shape: f32[128,768], index: 3, kind: output, shape index: {}]  }
   0x1   :  { %s1251_s14 = smov 0   ;;  %s1253_s15 = smov 0  }
   0x2   :  { %s1255_s16 = smov 0  }
   0x3 LB: > { %s22_s17 = sadd.s32 1, %s1220_s15  ;;  %s994_s18 = sadd.s32 4294967295, %s1224_s16   ;;  %s1224_s16 = sphi %s1255_s16, %s13_s16   ;;  %s1220_s15 = sphi %s1253_s15, %s1687_s15   ;;  %s1216_s14 = sphi %s1251_s14, %s1686_s14   ;;  %s1212_s13 = sphi %s1249_s13, %s1685_s13   ;;  %s1208_s12 = sphi %s1247_s12, %s1684_s12  }
   0x4   : > { %p23_p0 = scmp.ge.s32.totalorder %s22_s17, 2  ;;  %p65_p1 = scmp.ne.s32.totalorder %s1212_s13, %s1208_s12 }
   0x5   : > { %p66_p2 = scmp.eq.s32.totalorder %s1224_s16, 0  ;;  %p123_p4 = scmp.eq.s32.totalorder %s994_s18, 1 }
   0x6   : > { %s1689_s17 = smov (%p23_p0, %s22_s17), 0  ;;  %s58_s20 = sadd.s32 1, %s1212_s13 }
   0x7   : > { %p67_p3 = por %p66_p2, %p65_p1  ;;  %s55_s19 = ssub.s32 %s1220_s15, %s1689_s17 }
   0x8   : > { %p56_p5 = scmp.eq.s32.totalorder %s55_s19, 0  ;;  %p1282_p6 = por %p123_p4, %p65_p1 }
   0x9   : > { %p998_p7 = scmp.ge.s32.totalorder %s1224_s16, 2 }
   0xa   : > { %s1287_s22 = scalar_select %p56_p5, %s1212_s13, %s58_s20  }
   0xb   : > { %154 = sbr.rel (%p998_p7) target bundleno = 41 (0x29), region = 20 }
  0x12   : > { %157 = sbr.rel (!%p67_p3) target bundleno = 41 (0x29), region = 24  ;;  %s159_s23 = sand.u32 (%p67_p3), 1, %s1212_s13  }
  0x13   : > { %s1060_s24 = smul.u32 (%p67_p3), 12, %s1220_s15 }
  0x14   : > { %s1110_s25 = smul.u32 (%p67_p3), 192, %s159_s23 }
  0x15   : > { %s1295_s28 = scalar_lea.vmem (%p67_p3), %s1680_s1, %s1060_s24 }
  0x16   : > { %v179_v0 = vld [vmem:[%s1295_s28] sm:$0xff] (%p67_p3)  ;;  %v181_v1 = vld [vmem:[%s1295_s28 + $0x18] sm:$0xff] (%p67_p3)  ;;  %v183_v2 = vld [vmem:[%s1295_s28 + $0x30] sm:$0xff] (%p67_p3)  ;;  %s1300_s29 = scalar_lea.vmem (%p67_p3), [#allocation2], %s1110_s25 }
  0x17   : > { %180 = vst [vmem:[%s1300_s29] sm:$0xff] (%p67_p3), %v179_v0  ;;  %182 = vst [vmem:[%s1300_s29 + $0xc] sm:$0xff] (%p67_p3), %v181_v1  ;;  %v185_v3 = vld [vmem:[%s1295_s28 + $0x48] sm:$0xff] (%p67_p3)  ;;  %v187_v4 = vld [vmem:[%s1295_s28 + $0x60] sm:$0xff] (%p67_p3) }
  0x18   : > { %184 = vst [vmem:[%s1300_s29 + $0x18] sm:$0xff] (%p67_p3), %v183_v2  ;;  %v189_v5 = vld [vmem:[%s1295_s28 + $0x78] sm:$0xff] (%p67_p3)  ;;  %186 = vst [vmem:[%s1300_s29 + $0x24] sm:$0xff] (%p67_p3), %v185_v3  ;;  %v191_v6 = vld [vmem:[%s1295_s28 + $0x90] sm:$0xff] (%p67_p3) }
  0x19   : > { %188 = vst [vmem:[%s1300_s29 + $0x30] sm:$0xff] %v187_v4  ;;  %190 = vst [vmem:[%s1300_s29 + $0x3c] sm:$0xff] %v189_v5  ;;  %v193_v7 = vld [vmem:[%s1295_s28 + $0xa8] sm:$0xff]  ;;  %v195_v8 = vld [vmem:[%s1295_s28 + $0xc0] sm:$0xff] }
  0x1a   : > { %192 = vst [vmem:[%s1300_s29 + $0x48] sm:$0xff] %v191_v6  ;;  %194 = vst [vmem:[%s1300_s29 + $0x54] sm:$0xff] %v193_v7  ;;  %v197_v9 = vld [vmem:[%s1295_s28 + $0xd8] sm:$0xff]  ;;  %v199_v10 = vld [vmem:[%s1295_s28 + $0xf0] sm:$0xff] }
  0x1b   : > { %196 = vst [vmem:[%s1300_s29 + $0x60] sm:$0xff] %v195_v8  ;;  %v201_v11 = vld [vmem:[%s1295_s28 + $0x108] sm:$0xff]  ;;  %198 = vst [vmem:[%s1300_s29 + $0x6c] sm:$0xff] %v197_v9  ;;  %v203_v12 = vld [vmem:[%s1295_s28 + $0x120] sm:$0xff] }
  0x1c   : > { %200 = vst [vmem:[%s1300_s29 + $0x78] sm:$0xff] %v199_v10  ;;  %202 = vst [vmem:[%s1300_s29 + $0x84] sm:$0xff] %v201_v11  ;;  %v205_v13 = vld [vmem:[%s1295_s28 + $0x138] sm:$0xff]  ;;  %v207_v14 = vld [vmem:[%s1295_s28 + $0x150] sm:$0xff] }
  0x1d   : > { %204 = vst [vmem:[%s1300_s29 + $0x90] sm:$0xff] %v203_v12  ;;  %206 = vst [vmem:[%s1300_s29 + $0x9c] sm:$0xff] %v205_v13  ;;  %v209_v15 = vld [vmem:[%s1295_s28 + $0x168] sm:$0xff]  ;;  %v1002_v17 = vld [vmem:[%s1295_s28 + $0x20] sm:$0xf] }
  0x1e   : > { %208 = vst [vmem:[%s1300_s29 + $0xa8] sm:$0xff] %v207_v14  ;;  %v1000_v16 = vld [vmem:[%s1295_s28 + $0x8] sm:$0xf]  ;;  %210 = vst [vmem:[%s1300_s29 + $0xb4] sm:$0xff] %v209_v15  ;;  %v1004_v18 = vld [vmem:[%s1295_s28 + $0x38] sm:$0xf] }
  0x1f   : > { %1001 = vst [vmem:[%s1300_s29 + $0x8] sm:$0xf] %v1000_v16  ;;  %1003 = vst [vmem:[%s1300_s29 + $0x14] sm:$0xf] %v1002_v17  ;;  %v1006_v19 = vld [vmem:[%s1295_s28 + $0x50] sm:$0xf] }
  0x20   : > { %v1008_v20 = vld [vmem:[%s1295_s28 + $0x68] sm:$0xf]  ;;  %1005 = vst [vmem:[%s1300_s29 + $0x20] sm:$0xf] %v1004_v18  ;;  %1007 = vst [vmem:[%s1300_s29 + $0x2c] sm:$0xf] %v1006_v19 }
  0x21   : > { %1009 = vst [vmem:[%s1300_s29 + $0x38] sm:$0xf] %v1008_v20  ;;  %v1010_v21 = vld [vmem:[%s1295_s28 + $0x80] sm:$0xf]  ;;  %v1012_v22 = vld [vmem:[%s1295_s28 + $0x98] sm:$0xf] }
  0x22   : > { %v1014_v23 = vld [vmem:[%s1295_s28 + $0xb0] sm:$0xf]  ;;  %1011 = vst [vmem:[%s1300_s29 + $0x44] sm:$0xf] %v1010_v21  ;;  %1013 = vst [vmem:[%s1300_s29 + $0x50] sm:$0xf] %v1012_v22 }
  0x23   : > { %1015 = vst [vmem:[%s1300_s29 + $0x5c] sm:$0xf] %v1014_v23  ;;  %v1016_v24 = vld [vmem:[%s1295_s28 + $0xc8] sm:$0xf]  ;;  %v1018_v25 = vld [vmem:[%s1295_s28 + $0xe0] sm:$0xf] }
  0x24   : > { %v1020_v26 = vld [vmem:[%s1295_s28 + $0xf8] sm:$0xf]  ;;  %1017 = vst [vmem:[%s1300_s29 + $0x68] sm:$0xf] %v1016_v24  ;;  %1019 = vst [vmem:[%s1300_s29 + $0x74] sm:$0xf] %v1018_v25 }
  0x25   : > { %1021 = vst [vmem:[%s1300_s29 + $0x80] sm:$0xf] %v1020_v26  ;;  %v1022_v27 = vld [vmem:[%s1295_s28 + $0x110] sm:$0xf]  ;;  %v1024_v28 = vld [vmem:[%s1295_s28 + $0x128] sm:$0xf] }
  0x26   : > { %v1026_v29 = vld [vmem:[%s1295_s28 + $0x140] sm:$0xf]  ;;  %1023 = vst [vmem:[%s1300_s29 + $0x8c] sm:$0xf] %v1022_v27  ;;  %1025 = vst [vmem:[%s1300_s29 + $0x98] sm:$0xf] %v1024_v28 }
  0x27   : > { %1027 = vst [vmem:[%s1300_s29 + $0xa4] sm:$0xf] %v1026_v29  ;;  %v1028_v30 = vld [vmem:[%s1295_s28 + $0x158] sm:$0xf]  ;;  %v1030_v31 = vld [vmem:[%s1295_s28 + $0x170] sm:$0xf] }
  0x28   : > { %1029 = vst [vmem:[%s1300_s29 + $0xb0] sm:$0xf] %v1028_v30  ;;  %1031 = vst [vmem:[%s1300_s29 + $0xbc] sm:$0xf] %v1030_v31 }
  0x29 PF: > { %p1032_p8 = scmp.ge.s32.totalorder %s1224_s16, 1  ;;  %p262_p9 = scmp.lt.s32.totalorder %s1224_s16, 3 }
  0x2b   : > { %p263_p10 = pnand %p1032_p8, %p262_p9 }
  0x2c   : > { %s269_s30 = sand.u32 (!%p263_p10), 1, %s1208_s12   ;;  %v315_v32 = vld [vmem:[%s1679_s0] sm:$0xff] (!%p263_p10)  ;;  %v316_v33 = vld [vmem:[%s1679_s0 + $0x8] sm:$0xff] (!%p263_p10)  ;;  %v1226_v34 = vmov (!%p263_p10), 0   ;;  %v317_v59 = vld [vmem:[%s1679_s0 + $0x10] sm:$0xff] (!%p263_p10)  ;;  %s307_s28 = smul.u32 (!%p263_p10), 3, %s1216_s14  ;;  %v373_v17 = vlaneseq (!%p263_p10) }
  0x2d   : > { %266 = sbr.rel (%p263_p10) target bundleno = 364 (0x16c), region = 54  ;;  %548 = vmatprep.mubr.bf16.mxu0 (!%p263_p10), %v1226_v34  ;;  %v331_v35 = vpack.c.bf16 (!%p263_p10), %v316_v33, %v315_v32  ;;  %v318_v60 = vld [vmem:[%s1679_s0 + $0x18] sm:$0xff] (!%p263_p10)  ;;  %v319_v63 = vld [vmem:[%s1679_s0 + $0x20] sm:$0xff] (!%p263_p10)  ;;  %v320_v0 = vld [vmem:[%s1679_s0 + $0x28] sm:$0xff] (!%p263_p10) }
  0x2e   : > { %s1111_s8 = smul.u32 (!%p263_p10), 192, %s269_s30  ;;  %v332_v62 = vpack.c.bf16 (!%p263_p10), %v318_v60, %v317_v59  ;;  %v333_v1 = vpack.c.bf16 (!%p263_p10), %v320_v0, %v319_v63  ;;  %v321_v2 = vld [vmem:[%s1679_s0 + $0x30] sm:$0xff] (!%p263_p10)  ;;  %v322_v3 = vld [vmem:[%s1679_s0 + $0x38] sm:$0xff] (!%p263_p10)  ;;  %v323_v4 = vld [vmem:[%s1679_s0 + $0x40] sm:$0xff] (!%p263_p10)  ;;  %p308_p11 = scmp.lt.s32.totalorder (!%p263_p10), %s307_s28, 5  ;;  %v374_v18 = vshrl.u32 (!%p263_p10), %v373_v17, 7 }
  0x2f   : > { %1094 = vmatprep.mubr.bf16.mxu1 (!%p263_p10), %v331_v35  ;;  %v324_v5 = vld [vmem:[%s1679_s0 + $0x48] sm:$0xff] (!%p263_p10)  ;;  %v334_v6 = vpack.c.bf16 (!%p263_p10), %v322_v3, %v321_v2  ;;  %v325_v8 = vld [vmem:[%s1679_s0 + $0x50] sm:$0xff] (!%p263_p10)  ;;  %v326_v9 = vld [vmem:[%s1679_s0 + $0x58] sm:$0xff] (!%p263_p10)  ;;  %s1112_s6 = smul.u32 (!%p263_p10), 384, %s269_s30 }
  0x30   : > { %s1375_s9 = scalar_lea.vmem (!%p263_p10), [#allocation2], %s1111_s8  ;;  %v335_v7 = vpack.c.bf16 (!%p263_p10), %v324_v5, %v323_v4  ;;  %v327_v10 = vld [vmem:[%s1679_s0 + $0x60] sm:$0xff] (!%p263_p10)  ;;  %v328_v11 = vld [vmem:[%s1679_s0 + $0x68] sm:$0xff] (!%p263_p10)  ;;  %v336_v12 = vpack.c.bf16 (!%p263_p10), %v326_v9, %v325_v8  ;;  %v329_v14 = vld [vmem:[%s1679_s0 + $0x70] sm:$0xff] (!%p263_p10)  ;;  %v375_v19 = vsub.s32 (!%p263_p10), 0, %v374_v18  ;;  %v379_v21 = vsub.s32 (!%p263_p10), 1, %v374_v18 }
  0x31   : > { %v1154_v36 = vld [vmem:[%s1375_s9 + $0x4] ss:$12 sps:$4 sm:$0xff] (!%p263_p10)   ;;  %v1156_v37 = vld [vmem:[%s1375_s9] ss:$12 sps:$4 sm:$0xff] (!%p263_p10)   ;;  %v1157_v38 = vld [vmem:[%s1375_s9 + $0x1c] ss:$12 sps:$4 sm:$0xff] (!%p263_p10)   ;;  %v337_v13 = vpack.c.bf16 (!%p263_p10), %v328_v11, %v327_v10 }
  0x32   : > { %516 = vmatprep.subr.bf16.mxu0 (!%p263_p10), %v1154_v36  ;;  %v1159_v39 = vld [vmem:[%s1375_s9 + $0x18] ss:$12 sps:$4 sm:$0xff] (!%p263_p10)   ;;  %v1160_v40 = vld [vmem:[%s1375_s9 + $0x34] ss:$12 sps:$4 sm:$0xff] (!%p263_p10)   ;;  %v1162_v41 = vld [vmem:[%s1375_s9 + $0x30] ss:$12 sps:$4 sm:$0xff] (!%p263_p10)  }
  0x33   : > { %517 = vmatpush1.bf16.msra.mxu0 (!%p263_p10), %v1156_v37  ;;  %v1163_v42 = vld [vmem:[%s1375_s9 + $0x4c] ss:$12 sps:$4 sm:$0xff] (!%p263_p10)   ;;  %v1165_v43 = vld [vmem:[%s1375_s9 + $0x48] ss:$12 sps:$4 sm:$0xff] (!%p263_p10)   ;;  %v1166_v44 = vld [vmem:[%s1375_s9 + $0x64] ss:$12 sps:$4 sm:$0xff] (!%p263_p10)  }
  0x34   : > { %518 = vmatprep.subr.bf16.mxu0 %v1157_v38  ;;  %v1178_v45 = vld [vmem:[%s1375_s9 + $0x8] ss:$12 sps:$4 sm:$0xff]   ;;  %v1179_v46 = vld [vmem:[%s1375_s9 + $0x20] ss:$12 sps:$4 sm:$0xff]   ;;  %v1180_v48 = vld [vmem:[%s1375_s9 + $0x38] ss:$12 sps:$4 sm:$0xff]  }
  0x35   : > { %1078 = vmatprep.subr.bf16.mxu1 %v1178_v45  ;;  %v1168_v47 = vld [vmem:[%s1375_s9 + $0x60] ss:$12 sps:$4 sm:$0xff]   ;;  %v1169_v49 = vld [vmem:[%s1375_s9 + $0x7c] ss:$12 sps:$4 sm:$0xff]   ;;  %v1171_v50 = vld [vmem:[%s1375_s9 + $0x78] ss:$12 sps:$4 sm:$0xff]  }
  0x36   : > { %1079 = vmatpush3.bf16.msra.mxu1 %v1178_v45  ;;  %v1181_v51 = vld [vmem:[%s1375_s9 + $0x50] ss:$12 sps:$4 sm:$0xff]   ;;  %v1172_v52 = vld [vmem:[%s1375_s9 + $0x94] ss:$12 sps:$4 sm:$0xff]   ;;  %v1175_v55 = vld [vmem:[%s1375_s9 + $0xac] ss:$12 sps:$4 sm:$0xff]  }
  0x37   : > { %519 = vmatpush1.bf16.msra.mxu0 %v1159_v39  ;;  %1080 = vmatprep.subr.bf16.mxu1 %v1179_v46  ;;  %v1174_v53 = vld [vmem:[%s1375_s9 + $0x90] ss:$12 sps:$4 sm:$0xff]   ;;  %v1182_v54 = vld [vmem:[%s1375_s9 + $0x68] ss:$12 sps:$4 sm:$0xff]   ;;  %v1183_v57 = vld [vmem:[%s1375_s9 + $0x80] ss:$12 sps:$4 sm:$0xff]  }
  0x38   : > { %520 = vmatprep.subr.bf16.mxu0 %v1160_v40  ;;  %v1177_v56 = vld [vmem:[%s1375_s9 + $0xa8] ss:$12 sps:$4 sm:$0xff]   ;;  %v1184_v58 = vld [vmem:[%s1375_s9 + $0x98] ss:$12 sps:$4 sm:$0xff]   ;;  %v1185_v61 = vld [vmem:[%s1375_s9 + $0xb0] ss:$12 sps:$4 sm:$0xff]  }
  0x39   : > { %v330_v15 = vld [vmem:[%s1679_s0 + $0x78] sm:$0xff]  ;;  %s1691_s28 = smov (!%p308_p11, %s307_s28), 5  ;;  %s1462_s7 = scalar_lea.vmem [#allocation3], %s1112_s6  ;;  %v383_v32 = vsub.s32 2, %v374_v18 }
  0x3a   : > { %1081 = vmatpush3.bf16.msra.mxu1 %v1179_v46  ;;  %v338_v16 = vpack.c.bf16 %v330_v15, %v329_v14  ;;  %s310_s5 = scalar_lea.vmem %s1681_s2, %s1691_s28  ;;  %s1061_s12 = smul.u32 (%p1282_p6), 24, %s1216_s14 }
  0x3b   : > { %521 = vmatpush1.bf16.msra.mxu0 %v1162_v41  ;;  %1082 = vmatprep.subr.bf16.mxu1 %v1180_v48  ;;  %v371_v20 = vld [vmem:[%s310_s5] sm:$0x7] }
  0x3c   : > { %522 = vmatprep.subr.bf16.mxu0 %v1163_v42  ;;  %v1456_v22 = vrot.slane %v371_v20, %v375_v19  ;;  %v1458_v23 = vrot.slane %v371_v20, %v379_v21  ;;  %s1572_s8 = scalar_lea.vmem (%p1282_p6), %s1682_s3, %s1061_s12 }
  0x3e   : > { %1083 = vmatpush3.bf16.msra.mxu1 %v1180_v48 }
  0x3f   : > { %523 = vmatpush1.bf16.msra.mxu0 %v1165_v43  ;;  %1084 = vmatprep.subr.bf16.mxu1 %v1181_v51 }
  0x40   : > { %524 = vmatprep.subr.bf16.mxu0 %v1166_v44 }
  0x42   : > { %1085 = vmatpush3.bf16.msra.mxu1 %v1181_v51 }
  0x43   : > { %525 = vmatpush1.bf16.msra.mxu0 %v1168_v47  ;;  %1086 = vmatprep.subr.bf16.mxu1 %v1182_v54 }
  0x44   : > { %526 = vmatprep.subr.bf16.mxu0 %v1169_v49 }
  0x46   : > { %1087 = vmatpush3.bf16.msra.mxu1 %v1182_v54 }
  0x47   : > { %527 = vmatpush1.bf16.msra.mxu0 %v1171_v50  ;;  %1088 = vmatprep.subr.bf16.mxu1 %v1183_v57 }
  0x48   : > { %528 = vmatprep.subr.bf16.mxu0 %v1172_v52 }
  0x4a   : > { %1089 = vmatpush3.bf16.msra.mxu1 %v1183_v57 }
  0x4b   : > { %529 = vmatpush1.bf16.msra.mxu0 %v1174_v53  ;;  %1090 = vmatprep.subr.bf16.mxu1 %v1184_v58 }
  0x4c   : > { %530 = vmatprep.subr.bf16.mxu0 %v1175_v55 }
  0x4e   : > { %1091 = vmatpush3.bf16.msra.mxu1 %v1184_v58 }
  0x4f   : > { %531 = vmatpush1.bf16.msra.mxu0 %v1177_v56  ;;  %1092 = vmatprep.subr.bf16.mxu1 %v1185_v61 }
  0x52   : > { %549 = vmatmul.mubr.bf16.vlgmr.msra.gmra.mrb[0].mxu0 %v331_v35  ;;  %1093 = vmatpush3.bf16.msra.mxu1 %v1185_v61 }
  0x53   : > { %558 = vmatprep.mubr.bf16.mxu0 %v1226_v34 }
  0x55   : > { %1095 = vmatmul.mubr.bf16.vlgmr.msra.gmra.mrb[0].mxu1 %v332_v62 }
  0x56   : > { %1098 = vmatprep.mubr.bf16.mxu1 %v333_v1 }
  0x5a   : > { %559 = vmatmul.mubr.bf16.gmra.mrb[4].mxu0 %v332_v62 }
  0x5b   : > { %568 = vmatprep.mubr.bf16.mxu0 %v1226_v34 }
  0x5d   : > { %1099 = vmatmul.mubr.bf16.gmra.mrb[4].mxu1 %v334_v6 }
  0x5e   : > { %1102 = vmatprep.mubr.bf16.mxu1 %v335_v7 }
  0x62   : > { %569 = vmatmul.mubr.bf16.gmra.mrb[8].mxu0 %v333_v1 }
  0x63   : > { %578 = vmatprep.mubr.bf16.mxu0 %v1226_v34 }
  0x65   : > { %1103 = vmatmul.mubr.bf16.gmra.mrb[8].mxu1 %v336_v12 }
  0x66   : > { %1106 = vmatprep.mubr.bf16.mxu1 %v337_v13 }
  0x6a   : > { %579 = vmatmul.mubr.bf16.gmra.mrb[12].mxu0 %v334_v6 }
  0x6b   : > { %588 = vmatprep.mubr.bf16.mxu0 %v1226_v34 }
  0x6d   : > { %1107 = vmatmul.mubr.bf16.gmra.mrb[12].mxu1 %v338_v16 }
  0x72   : > { %589 = vmatmul.mubr.bf16.gmra.mrb[16].mxu0 %v335_v7 }
  0x73   : > { %598 = vmatprep.mubr.bf16.mxu0 %v1226_v34 }
  0x7a   : > { %599 = vmatmul.mubr.bf16.gmra.mrb[20].mxu0 %v336_v12 }
  0x7b   : > { %608 = vmatprep.mubr.bf16.mxu0 %v1226_v34 }
  0x82   : > { %609 = vmatmul.mubr.bf16.gmra.mrb[24].mxu0 %v337_v13 }
  0x83   : > { %618 = vmatprep.mubr.bf16.mxu0 %v1226_v34  ;;  %v1470_v34 = vrot.slane %v371_v20, %v383_v32 }
  0x8a   : > { %619 = vmatmul.mubr.bf16.gmra.mrb[28].mxu0 %v338_v16 }
 0x125   : > { %v550_v24 = vpop.f32.mrb[0].mxu0 }
 0x126   : > { %v551_v25 = vadd.f32 %v550_v24, %v1456_v22  ;;  %v552_v26 = vpop.f32.mrb[1].mxu0 }
 0x127   : > { %v553_v27 = vadd.f32 %v552_v26, %v1458_v23  ;;  %v554_v28 = vpop.f32.mrb[2].mxu0 }
 0x128   : > { %726 = vst [vmem:[%s1462_s7] sm:$0xff] %v551_v25  ;;  %v555_v29 = vadd.f32 %v554_v28, %v1456_v22  ;;  %v556_v30 = vpop.f32.mrb[3].mxu0  ;;  %v1096_v41 = vpop.f32.mrb[0].mxu1 }
 0x129   : > { %727 = vst [vmem:[%s1462_s7 + $0x8] sm:$0xff] %v553_v27  ;;  %v557_v31 = vadd.f32 %v556_v30, %v1458_v23  ;;  %v672_v43 = vadd.f32 %v1096_v41, %v1470_v34  ;;  %v663_v44 = vpop.f32.mrb[1].mxu1 }
 0x12a   : > { %729 = vst [vmem:[%s1462_s7 + $0x18] sm:$0xff] %v555_v29  ;;  %v664_v45 = vadd.f32 %v663_v44, %v1470_v34  ;;  %v1097_v46 = vpop.f32.mrb[2].mxu1 }
 0x12b   : > { %730 = vst [vmem:[%s1462_s7 + $0x20] sm:$0xff] %v557_v31  ;;  %734 = vst [vmem:[%s1462_s7 + $0x40] sm:$0xff] %v672_v43  ;;  %v675_v47 = vadd.f32 %v1097_v46, %v1470_v34  ;;  %v666_v48 = vpop.f32.mrb[3].mxu1 }
 0x12c   : > { %728 = vst [vmem:[%s1462_s7 + $0x10] sm:$0xff] %v664_v45  ;;  %v667_v49 = vadd.f32 %v666_v48, %v1470_v34 }
 0x12d   : > { %v560_v33 = vpop.f32.mrb[4].mxu0  ;;  %737 = vst [vmem:[%s1462_s7 + $0x58] sm:$0xff] %v675_v47 }
 0x12e   : > { %v561_v35 = vadd.f32 %v560_v33, %v1456_v22  ;;  %v562_v36 = vpop.f32.mrb[5].mxu0  ;;  %731 = vst [vmem:[%s1462_s7 + $0x28] sm:$0xff] %v667_v49 }
 0x12f   : > { %v563_v37 = vadd.f32 %v562_v36, %v1458_v23  ;;  %v564_v38 = vpop.f32.mrb[6].mxu0 }
 0x130   : > { %732 = vst [vmem:[%s1462_s7 + $0x30] sm:$0xff] %v561_v35  ;;  %v565_v39 = vadd.f32 %v564_v38, %v1456_v22  ;;  %v566_v40 = vpop.f32.mrb[7].mxu0  ;;  %v1100_v57 = vpop.f32.mrb[4].mxu1 }
 0x131   : > { %733 = vst [vmem:[%s1462_s7 + $0x38] sm:$0xff] %v563_v37  ;;  %v567_v42 = vadd.f32 %v566_v40, %v1458_v23  ;;  %v688_v59 = vadd.f32 %v1100_v57, %v1470_v34  ;;  %v679_v60 = vpop.f32.mrb[5].mxu1 }
 0x132   : > { %735 = vst [vmem:[%s1462_s7 + $0x48] sm:$0xff] %v565_v39  ;;  %v680_v61 = vadd.f32 %v679_v60, %v1470_v34  ;;  %v1101_v62 = vpop.f32.mrb[6].mxu1  ;;  %v801_v60 = vld [vmem:[%s1462_s7 + $0x8] sm:$0xff] (%p1282_p6) }
 0x133   : > { %736 = vst [vmem:[%s1462_s7 + $0x50] sm:$0xff] %v567_v42  ;;  %746 = vst [vmem:[%s1462_s7 + $0xa0] sm:$0xff] %v688_v59  ;;  %v691_v63 = vadd.f32 %v1101_v62, %v1470_v34  ;;  %v682_v0 = vpop.f32.mrb[7].mxu1  ;;  %v807_v62 = vld [vmem:[%s1462_s7 + $0x20] sm:$0xff] (%p1282_p6) }
 0x134   : > { %740 = vst [vmem:[%s1462_s7 + $0x70] sm:$0xff] %v680_v61  ;;  %v683_v1 = vadd.f32 %v682_v0, %v1470_v34  ;;  %v803_v61 = vld [vmem:[%s1462_s7 + $0x10] sm:$0xff] (%p1282_p6)  ;;  %802 = vst [vmem:[%s1572_s8 + $0x8] sm:$0xff] (%p1282_p6), %v801_v60 }
 0x135   : > { %v570_v50 = vpop.f32.mrb[8].mxu0  ;;  %749 = vst [vmem:[%s1462_s7 + $0xb8] sm:$0xff] %v691_v63  ;;  %v809_v63 = vld [vmem:[%s1462_s7 + $0x28] sm:$0xff] (%p1282_p6)  ;;  %804 = vst [vmem:[%s1572_s8 + $0x10] sm:$0xff] (%p1282_p6), %v803_v61 }
 0x136   : > { %v571_v51 = vadd.f32 %v570_v50, %v1456_v22  ;;  %v572_v52 = vpop.f32.mrb[9].mxu0  ;;  %743 = vst [vmem:[%s1462_s7 + $0x88] sm:$0xff] %v683_v1  ;;  %808 = vst [vmem:[%s1572_s8 + $0x38] sm:$0xff] (%p1282_p6), %v807_v62 }
 0x137   : > { %v573_v53 = vadd.f32 %v572_v52, %v1458_v23  ;;  %v574_v54 = vpop.f32.mrb[10].mxu0  ;;  %v811_v0 = vld [vmem:[%s1462_s7 + $0x30] sm:$0xff] (%p1282_p6)  ;;  %810 = vst [vmem:[%s1572_s8 + $0x40] sm:$0xff] (%p1282_p6), %v809_v63 }
 0x138   : > { %738 = vst [vmem:[%s1462_s7 + $0x60] sm:$0xff] %v571_v51  ;;  %v575_v55 = vadd.f32 %v574_v54, %v1456_v22  ;;  %v576_v56 = vpop.f32.mrb[11].mxu0  ;;  %v1104_v9 = vpop.f32.mrb[8].mxu1  ;;  %v813_v1 = vld [vmem:[%s1462_s7 + $0x38] sm:$0xff] (%p1282_p6)  ;;  %812 = vst [vmem:[%s1572_s8 + $0x60] sm:$0xff] (%p1282_p6), %v811_v0 }
 0x139   : > { %739 = vst [vmem:[%s1462_s7 + $0x68] sm:$0xff] %v573_v53  ;;  %v577_v58 = vadd.f32 %v576_v56, %v1458_v23  ;;  %v704_v11 = vadd.f32 %v1104_v9, %v1470_v34  ;;  %v695_v12 = vpop.f32.mrb[9].mxu1  ;;  %814 = vst [vmem:[%s1572_s8 + $0x68] sm:$0xff] (%p1282_p6), %v813_v1 }
 0x13a   : > { %741 = vst [vmem:[%s1462_s7 + $0x78] sm:$0xff] %v575_v55  ;;  %v696_v13 = vadd.f32 %v695_v12, %v1470_v34  ;;  %v1105_v14 = vpop.f32.mrb[10].mxu1 }
 0x13b   : > { %742 = vst [vmem:[%s1462_s7 + $0x80] sm:$0xff] %v577_v58  ;;  %758 = vst [vmem:[%s1462_s7 + $0x100] sm:$0xff] %v704_v11  ;;  %v707_v15 = vadd.f32 %v1105_v14, %v1470_v34  ;;  %v698_v16 = vpop.f32.mrb[11].mxu1  ;;  %v839_v14 = vld [vmem:[%s1462_s7 + $0xa0] sm:$0xff] (%p1282_p6) }
 0x13c   : > { %752 = vst [vmem:[%s1462_s7 + $0xd0] sm:$0xff] %v696_v13  ;;  %v699_v17 = vadd.f32 %v698_v16, %v1470_v34  ;;  %840 = vst [vmem:[%s1572_s8 + $0x130] sm:$0xff] (%p1282_p6), %v839_v14 }
 0x13d   : > { %v580_v2 = vpop.f32.mrb[12].mxu0  ;;  %761 = vst [vmem:[%s1462_s7 + $0x118] sm:$0xff] %v707_v15  ;;  %v833_v11 = vld [vmem:[%s1462_s7 + $0x88] sm:$0xff] (%p1282_p6) }
 0x13e   : > { %v581_v3 = vadd.f32 %v580_v2, %v1456_v22  ;;  %v582_v4 = vpop.f32.mrb[13].mxu0  ;;  %755 = vst [vmem:[%s1462_s7 + $0xe8] sm:$0xff] %v699_v17  ;;  %v815_v2 = vld [vmem:[%s1462_s7 + $0x40] sm:$0xff] (%p1282_p6)  ;;  %834 = vst [vmem:[%s1572_s8 + $0x100] sm:$0xff] (%p1282_p6), %v833_v11  ;;  %v845_v17 = vld [vmem:[%s1462_s7 + $0xb8] sm:$0xff] (%p1282_p6) }
 0x13f   : > { %v583_v5 = vadd.f32 %v582_v4, %v1458_v23  ;;  %v584_v6 = vpop.f32.mrb[14].mxu0  ;;  %816 = vst [vmem:[%s1572_s8 + $0x70] sm:$0xff] (%p1282_p6), %v815_v2  ;;  %v819_v4 = vld [vmem:[%s1462_s7 + $0x50] sm:$0xff] (%p1282_p6)  ;;  %846 = vst [vmem:[%s1572_s8 + $0x160] sm:$0xff] (%p1282_p6), %v845_v17 }
 0x140   : > { %744 = vst [vmem:[%s1462_s7 + $0x90] sm:$0xff] %v581_v3  ;;  %v585_v7 = vadd.f32 %v584_v6, %v1456_v22  ;;  %v586_v8 = vpop.f32.mrb[15].mxu0  ;;  %v1108_v27 = vpop.f32.mrb[12].mxu1  ;;  %v817_v3 = vld [vmem:[%s1462_s7 + $0x48] sm:$0xff] (%p1282_p6)  ;;  %820 = vst [vmem:[%s1572_s8 + $0x98] sm:$0xff] (%p1282_p6), %v819_v4  ;;  %v823_v6 = vld [vmem:[%s1462_s7 + $0x60] sm:$0xff] (%p1282_p6) }
 0x141   : > { %745 = vst [vmem:[%s1462_s7 + $0x98] sm:$0xff] %v583_v5  ;;  %v587_v10 = vadd.f32 %v586_v8, %v1458_v23  ;;  %v720_v29 = vadd.f32 %v1108_v27, %v1470_v34  ;;  %v711_v30 = vpop.f32.mrb[13].mxu1  ;;  %v821_v5 = vld [vmem:[%s1462_s7 + $0x58] sm:$0xff] (%p1282_p6)  ;;  %818 = vst [vmem:[%s1572_s8 + $0x90] sm:$0xff] (%p1282_p6), %v817_v3  ;;  %v827_v8 = vld [vmem:[%s1462_s7 + $0x70] sm:$0xff] (%p1282_p6) }
 0x142   : > { %747 = vst [vmem:[%s1462_s7 + $0xa8] sm:$0xff] %v585_v7  ;;  %v712_v31 = vadd.f32 %v711_v30, %v1470_v34  ;;  %v1109_v32 = vpop.f32.mrb[14].mxu1  ;;  %822 = vst [vmem:[%s1572_s8 + $0xa0] sm:$0xff] (%p1282_p6), %v821_v5  ;;  %v825_v7 = vld [vmem:[%s1462_s7 + $0x68] sm:$0xff] (%p1282_p6)  ;;  %v829_v9 = vld [vmem:[%s1462_s7 + $0x78] sm:$0xff] (%p1282_p6) }
 0x143   : > { %748 = vst [vmem:[%s1462_s7 + $0xb0] sm:$0xff] %v587_v10  ;;  %770 = vst [vmem:[%s1462_s7 + $0x160] sm:$0xff] %v720_v29  ;;  %v723_v33 = vadd.f32 %v1109_v32, %v1470_v34  ;;  %v714_v35 = vpop.f32.mrb[15].mxu1  ;;  %v831_v10 = vld [vmem:[%s1462_s7 + $0x80] sm:$0xff] (%p1282_p6) }
 0x144   : > { %764 = vst [vmem:[%s1462_s7 + $0x130] sm:$0xff] %v712_v31  ;;  %v715_v36 = vadd.f32 %v714_v35, %v1470_v34  ;;  %824 = vst [vmem:[%s1572_s8 + $0xc0] sm:$0xff] (%p1282_p6), %v823_v6  ;;  %v869_v31 = vld [vmem:[%s1462_s7 + $0x118] sm:$0xff] (%p1282_p6) }
 0x145   : > { %v590_v18 = vpop.f32.mrb[16].mxu0  ;;  %773 = vst [vmem:[%s1462_s7 + $0x178] sm:$0xff] %v723_v33  ;;  %826 = vst [vmem:[%s1572_s8 + $0xc8] sm:$0xff] (%p1282_p6), %v825_v7 }
 0x146   : > { %v591_v19 = vadd.f32 %v590_v18, %v1456_v22  ;;  %v592_v20 = vpop.f32.mrb[17].mxu0  ;;  %767 = vst [vmem:[%s1462_s7 + $0x148] sm:$0xff] %v715_v36  ;;  %828 = vst [vmem:[%s1572_s8 + $0xd0] sm:$0xff] (%p1282_p6), %v827_v8 }
 0x147   : > { %v593_v21 = vadd.f32 %v592_v20, %v1458_v23  ;;  %v594_v24 = vpop.f32.mrb[18].mxu0  ;;  %830 = vst [vmem:[%s1572_s8 + $0xf0] sm:$0xff] (%p1282_p6), %v829_v9  ;;  %832 = vst [vmem:[%s1572_s8 + $0xf8] sm:$0xff] (%p1282_p6), %v831_v10  ;;  %v835_v12 = vld [vmem:[%s1462_s7 + $0x90] sm:$0xff] (%p1282_p6) }
 0x148   : > { %750 = vst [vmem:[%s1462_s7 + $0xc0] sm:$0xff] %v591_v19  ;;  %v595_v25 = vadd.f32 %v594_v24, %v1456_v22  ;;  %v596_v26 = vpop.f32.mrb[19].mxu0  ;;  %v837_v13 = vld [vmem:[%s1462_s7 + $0x98] sm:$0xff] (%p1282_p6)  ;;  %836 = vst [vmem:[%s1572_s8 + $0x120] sm:$0xff] (%p1282_p6), %v835_v12  ;;  %v851_v20 = vld [vmem:[%s1462_s7 + $0xd0] sm:$0xff] (%p1282_p6) }
 0x149   : > { %751 = vst [vmem:[%s1462_s7 + $0xc8] sm:$0xff] %v593_v21  ;;  %v597_v28 = vadd.f32 %v596_v26, %v1458_v23  ;;  %838 = vst [vmem:[%s1572_s8 + $0x128] sm:$0xff] (%p1282_p6), %v837_v13  ;;  %v841_v15 = vld [vmem:[%s1462_s7 + $0xa8] sm:$0xff] (%p1282_p6) }
 0x14a   : > { %753 = vst [vmem:[%s1462_s7 + $0xd8] sm:$0xff] %v595_v25  ;;  %v843_v16 = vld [vmem:[%s1462_s7 + $0xb0] sm:$0xff] (%p1282_p6)  ;;  %842 = vst [vmem:[%s1572_s8 + $0x150] sm:$0xff] (%p1282_p6), %v841_v15  ;;  %v857_v25 = vld [vmem:[%s1462_s7 + $0xe8] sm:$0xff] (%p1282_p6) }
 0x14b   : > { %754 = vst [vmem:[%s1462_s7 + $0xe0] sm:$0xff] %v597_v28  ;;  %844 = vst [vmem:[%s1572_s8 + $0x158] sm:$0xff] (%p1282_p6), %v843_v16  ;;  %v863_v28 = vld [vmem:[%s1462_s7 + $0x100] sm:$0xff] (%p1282_p6)  ;;  %v875_v35 = vld [vmem:[%s1462_s7 + $0x130] sm:$0xff] (%p1282_p6) }
 0x14c   : > { %852 = vst [vmem:[%s1572_s8 + $0x190] sm:$0xff] (%p1282_p6), %v851_v20  ;;  %858 = vst [vmem:[%s1572_s8 + $0x1c0] sm:$0xff] (%p1282_p6), %v857_v25 }
 0x14d   : > { %v600_v37 = vpop.f32.mrb[20].mxu0  ;;  %864 = vst [vmem:[%s1572_s8 + $0x1f0] sm:$0xff] (%p1282_p6), %v863_v28  ;;  %870 = vst [vmem:[%s1572_s8 + $0x220] sm:$0xff] (%p1282_p6), %v869_v31 }
 0x14e   : > { %v601_v38 = vadd.f32 %v600_v37, %v1456_v22  ;;  %v602_v39 = vpop.f32.mrb[21].mxu0  ;;  %876 = vst [vmem:[%s1572_s8 + $0x250] sm:$0xff] (%p1282_p6), %v875_v35 }
 0x14f   : > { %v603_v40 = vadd.f32 %v602_v39, %v1458_v23  ;;  %v604_v41 = vpop.f32.mrb[22].mxu0  ;;  %v847_v18 = vld [vmem:[%s1462_s7 + $0xc0] sm:$0xff] (%p1282_p6) }
 0x150   : > { %756 = vst [vmem:[%s1462_s7 + $0xf0] sm:$0xff] %v601_v38  ;;  %v605_v42 = vadd.f32 %v604_v41, %v1456_v22  ;;  %v606_v43 = vpop.f32.mrb[23].mxu0  ;;  %v849_v19 = vld [vmem:[%s1462_s7 + $0xc8] sm:$0xff] (%p1282_p6)  ;;  %848 = vst [vmem:[%s1572_s8 + $0x180] sm:$0xff] (%p1282_p6), %v847_v18  ;;  %v887_v41 = vld [vmem:[%s1462_s7 + $0x160] sm:$0xff] (%p1282_p6) }
 0x151   : > { %757 = vst [vmem:[%s1462_s7 + $0xf8] sm:$0xff] %v603_v40  ;;  %v607_v34 = vadd.f32 %v606_v43, %v1458_v23  ;;  %850 = vst [vmem:[%s1572_s8 + $0x188] sm:$0xff] (%p1282_p6), %v849_v19  ;;  %v853_v21 = vld [vmem:[%s1462_s7 + $0xd8] sm:$0xff] (%p1282_p6)  ;;  %v881_v38 = vld [vmem:[%s1462_s7 + $0x148] sm:$0xff] (%p1282_p6) }
 0x152   : > { %759 = vst [vmem:[%s1462_s7 + $0x108] sm:$0xff] %v605_v42  ;;  %v855_v24 = vld [vmem:[%s1462_s7 + $0xe0] sm:$0xff] (%p1282_p6)  ;;  %854 = vst [vmem:[%s1572_s8 + $0x1b0] sm:$0xff] (%p1282_p6), %v853_v21 }
 0x153   : > { %760 = vst [vmem:[%s1462_s7 + $0x110] sm:$0xff] %v607_v34  ;;  %856 = vst [vmem:[%s1572_s8 + $0x1b8] sm:$0xff] (%p1282_p6), %v855_v24  ;;  %v893_v34 = vld [vmem:[%s1462_s7 + $0x178] sm:$0xff] (%p1282_p6) }
 0x154   : > { %882 = vst [vmem:[%s1572_s8 + $0x280] sm:$0xff] (%p1282_p6), %v881_v38  ;;  %888 = vst [vmem:[%s1572_s8 + $0x2b0] sm:$0xff] (%p1282_p6), %v887_v41 }
 0x155   : > { %v610_v44 = vpop.f32.mrb[24].mxu0  ;;  %894 = vst [vmem:[%s1572_s8 + $0x2e0] sm:$0xff] (%p1282_p6), %v893_v34 }
 0x156   : > { %v611_v45 = vadd.f32 %v610_v44, %v1456_v22  ;;  %v612_v46 = vpop.f32.mrb[25].mxu0 }
 0x157   : > { %v613_v47 = vadd.f32 %v612_v46, %v1458_v23  ;;  %v614_v48 = vpop.f32.mrb[26].mxu0  ;;  %v859_v26 = vld [vmem:[%s1462_s7 + $0xf0] sm:$0xff] (%p1282_p6) }
 0x158   : > { %762 = vst [vmem:[%s1462_s7 + $0x120] sm:$0xff] %v611_v45  ;;  %v615_v49 = vadd.f32 %v614_v48, %v1456_v22  ;;  %v616_v50 = vpop.f32.mrb[27].mxu0  ;;  %v861_v27 = vld [vmem:[%s1462_s7 + $0xf8] sm:$0xff] (%p1282_p6)  ;;  %860 = vst [vmem:[%s1572_s8 + $0x1e0] sm:$0xff] (%p1282_p6), %v859_v26 }
 0x159   : > { %763 = vst [vmem:[%s1462_s7 + $0x128] sm:$0xff] %v613_v47  ;;  %v617_v51 = vadd.f32 %v616_v50, %v1458_v23  ;;  %862 = vst [vmem:[%s1572_s8 + $0x1e8] sm:$0xff] (%p1282_p6), %v861_v27  ;;  %v865_v29 = vld [vmem:[%s1462_s7 + $0x108] sm:$0xff] (%p1282_p6) }
 0x15a   : > { %765 = vst [vmem:[%s1462_s7 + $0x138] sm:$0xff] %v615_v49  ;;  %v867_v30 = vld [vmem:[%s1462_s7 + $0x110] sm:$0xff] (%p1282_p6)  ;;  %866 = vst [vmem:[%s1572_s8 + $0x210] sm:$0xff] (%p1282_p6), %v865_v29 }
 0x15b   : > { %766 = vst [vmem:[%s1462_s7 + $0x140] sm:$0xff] %v617_v51  ;;  %868 = vst [vmem:[%s1572_s8 + $0x218] sm:$0xff] (%p1282_p6), %v867_v30 }
 0x15d   : > { %v620_v52 = vpop.f32.mrb[28].mxu0  ;;  %780 = sbr.rel (!%p1282_p6) target bundleno = 364 (0x16c), region = 62 }
 0x15e   : > { %v621_v53 = vadd.f32 %v620_v52, %v1456_v22  ;;  %v622_v54 = vpop.f32.mrb[29].mxu0 }
 0x15f   : > { %v623_v55 = vadd.f32 %v622_v54, %v1458_v23  ;;  %v624_v56 = vpop.f32.mrb[30].mxu0  ;;  %v871_v32 = vld [vmem:[%s1462_s7 + $0x120] sm:$0xff] (%p1282_p6) }
 0x160   : > { %768 = vst [vmem:[%s1462_s7 + $0x150] sm:$0xff] %v621_v53  ;;  %v625_v57 = vadd.f32 %v624_v56, %v1456_v22  ;;  %v626_v58 = vpop.f32.mrb[31].mxu0  ;;  %v799_v22 = vld [vmem:[%s1462_s7] sm:$0xff] (%p1282_p6)  ;;  %v873_v33 = vld [vmem:[%s1462_s7 + $0x128] sm:$0xff] (%p1282_p6)  ;;  %872 = vst [vmem:[%s1572_s8 + $0x240] sm:$0xff] (%p1282_p6), %v871_v32 }
 0x161   : > { %769 = vst [vmem:[%s1462_s7 + $0x158] sm:$0xff] %v623_v55  ;;  %v627_v59 = vadd.f32 %v626_v58, %v1458_v23  ;;  %v805_v23 = vld [vmem:[%s1462_s7 + $0x18] sm:$0xff] (%p1282_p6)  ;;  %800 = vst [vmem:[%s1572_s8] sm:$0xff] (%p1282_p6), %v799_v22 }
 0x162   : > { %771 = vst [vmem:[%s1462_s7 + $0x168] sm:$0xff] %v625_v57  ;;  %806 = vst [vmem:[%s1572_s8 + $0x30] sm:$0xff] (%p1282_p6), %v805_v23  ;;  %v877_v36 = vld [vmem:[%s1462_s7 + $0x138] sm:$0xff] (%p1282_p6)  ;;  %v879_v37 = vld [vmem:[%s1462_s7 + $0x140] sm:$0xff] (%p1282_p6) }
 0x163   : > { %772 = vst [vmem:[%s1462_s7 + $0x170] sm:$0xff] %v627_v59  ;;  %874 = vst [vmem:[%s1572_s8 + $0x248] sm:$0xff] (%p1282_p6), %v873_v33 }
 0x164   : > { %878 = vst [vmem:[%s1572_s8 + $0x270] sm:$0xff] %v877_v36  ;;  %880 = vst [vmem:[%s1572_s8 + $0x278] sm:$0xff] %v879_v37 }
 0x167   : > { %v883_v39 = vld [vmem:[%s1462_s7 + $0x150] sm:$0xff] }
 0x168   : > { %v885_v40 = vld [vmem:[%s1462_s7 + $0x158] sm:$0xff]  ;;  %884 = vst [vmem:[%s1572_s8 + $0x2a0] sm:$0xff] %v883_v39 }
 0x169   : > { %886 = vst [vmem:[%s1572_s8 + $0x2a8] sm:$0xff] %v885_v40  ;;  %v889_v42 = vld [vmem:[%s1462_s7 + $0x168] sm:$0xff] }
 0x16a   : > { %v891_v43 = vld [vmem:[%s1462_s7 + $0x170] sm:$0xff]  ;;  %890 = vst [vmem:[%s1572_s8 + $0x2d0] sm:$0xff] %v889_v42 }
 0x16b   : > { %892 = vst [vmem:[%s1572_s8 + $0x2d8] sm:$0xff] %v891_v43 }
 0x16c PF: > { %s13_s16 = sadd.s32 1, %s1224_s16   ;;  %s1684_s12 = smov %s1212_s13 }
 0x16d   : > { %p10_p12 = scmp.ge.s32.totalorder %s13_s16, 4   ;;  %s1685_s13 = smov %s1287_s22 }
 0x16e   : > { %s1686_s14 = smov %s1220_s15  ;;  %s1687_s15 = smov %s1689_s17 }
 0x16f   :  { %12 = sbr.rel (!%p10_p12) target bundleno = 3 (0x3), region = 128 }

// kernel: _lambda_.9
= control target key start
LH: loop header
LB: loop body
LE: loop exit
PB: predicated region body
PF: predicated region fallthrough
CT: control target
= control target key end

     0   :  { %s661_s1 = inlined_call_operand.vmem [shape: bf16[256,128], index: 1, kind: input, shape index: {}]   ;;  %s662_s0 = inlined_call_operand.vmem [shape: f32[128,256], index: 0, kind: input, shape index: {}]   ;;  %s663_s2 = inlined_call_operand.vmem [shape: f32[1,128], index: 2, kind: input, shape index: {}]   ;;  %s664_s3 = inlined_call_operand.vmem [shape: f32[128,128], index: 3, kind: output, shape index: {}]  }
   0x1   :  { %v412_v0 = vld [vmem:[%s661_s1 + $0x40] sm:$0xff]   ;;  %v414_v2 = vld [vmem:[%s661_s1 + $0x48] sm:$0xff]   ;;  %v416_v4 = vld [vmem:[%s661_s1 + $0x50] sm:$0xff]  }
   0x2   :  { %v413_v1 = vld [vmem:[%s661_s1] sm:$0xff]   ;;  %332 = vmatprep.subr.bf16.mxu0 %v412_v0  ;;  %396 = vmatprep.subr.bf16.mxu1 %v412_v0  ;;  %v415_v3 = vld [vmem:[%s661_s1 + $0x8] sm:$0xff]   ;;  %v417_v5 = vld [vmem:[%s661_s1 + $0x10] sm:$0xff]  }
   0x3   :  { %333 = vmatpush3.bf16.msra.mxu0 %v413_v1  ;;  %404 = vmatpush3.bf16.msra.mxu1 %v413_v1  ;;  %v418_v6 = vld [vmem:[%s661_s1 + $0x58] sm:$0xff]   ;;  %v420_v8 = vld [vmem:[%s661_s1 + $0x60] sm:$0xff]   ;;  %v422_v10 = vld [vmem:[%s661_s1 + $0x68] sm:$0xff]  }
   0x4   :  { %334 = vmatprep.subr.bf16.mxu0 %v414_v2  ;;  %397 = vmatprep.subr.bf16.mxu1 %v414_v2  ;;  %v419_v7 = vld [vmem:[%s661_s1 + $0x18] sm:$0xff]   ;;  %v421_v9 = vld [vmem:[%s661_s1 + $0x20] sm:$0xff]   ;;  %v16_v11 = vld [vmem:[%s662_s0 + $0x8] sm:$0xff] }
   0x5   :  { %v18_v12 = vld [vmem:[%s662_s0 + $0x18] sm:$0xff]  ;;  %v32_v13 = vld [vmem:[%s662_s0 + $0x88] sm:$0xff]  ;;  %v424_v18 = vld [vmem:[%s661_s1 + $0x70] sm:$0xff]  }
   0x6   :  { %v48_v14 = vpack.c.bf16 %v18_v12, %v16_v11  ;;  %v34_v15 = vld [vmem:[%s662_s0 + $0x98] sm:$0xff]  ;;  %v423_v17 = vld [vmem:[%s661_s1 + $0x28] sm:$0xff]   ;;  %v425_v19 = vld [vmem:[%s661_s1 + $0x30] sm:$0xff]  }
   0x7   :  { %335 = vmatpush3.bf16.msra.mxu0 %v415_v3  ;;  %405 = vmatpush3.bf16.msra.mxu1 %v415_v3  ;;  %v56_v16 = vpack.c.bf16 %v34_v15, %v32_v13  ;;  %v426_v20 = vld [vmem:[%s661_s1 + $0x78] sm:$0xff]   ;;  %v15_v22 = vld [vmem:[%s662_s0] sm:$0xff]  ;;  %v17_v23 = vld [vmem:[%s662_s0 + $0x10] sm:$0xff] }
   0x8   :  { %336 = vmatprep.subr.bf16.mxu0 %v416_v4  ;;  %398 = vmatprep.subr.bf16.mxu1 %v416_v4  ;;  %v427_v21 = vld [vmem:[%s661_s1 + $0x38] sm:$0xff]   ;;  %v31_v24 = vld [vmem:[%s662_s0 + $0x80] sm:$0xff]  ;;  %v33_v25 = vld [vmem:[%s662_s0 + $0x90] sm:$0xff]  ;;  %v47_v30 = vpack.c.bf16 %v17_v23, %v15_v22 }
   0x9   :  { %230 = vmatprep.mubr.bf16.mxu0 %v48_v14  ;;  %262 = vmatprep.mubr.bf16.mxu1 %v56_v16  ;;  %v20_v26 = vld [vmem:[%s662_s0 + $0x28] sm:$0xff]  ;;  %v22_v27 = vld [vmem:[%s662_s0 + $0x38] sm:$0xff]  ;;  %v55_v31 = vpack.c.bf16 %v33_v25, %v31_v24  ;;  %v19_v34 = vld [vmem:[%s662_s0 + $0x20] sm:$0xff] }
   0xa   :  { %v36_v28 = vld [vmem:[%s662_s0 + $0xa8] sm:$0xff]  ;;  %v38_v29 = vld [vmem:[%s662_s0 + $0xb8] sm:$0xff]  ;;  %v50_v32 = vpack.c.bf16 %v22_v27, %v20_v26  ;;  %v21_v35 = vld [vmem:[%s662_s0 + $0x30] sm:$0xff] }
   0xb   :  { %337 = vmatpush3.bf16.msra.mxu0 %v417_v5  ;;  %406 = vmatpush3.bf16.msra.mxu1 %v417_v5  ;;  %v58_v33 = vpack.c.bf16 %v38_v29, %v36_v28  ;;  %v35_v36 = vld [vmem:[%s662_s0 + $0xa0] sm:$0xff]  ;;  %v37_v37 = vld [vmem:[%s662_s0 + $0xb0] sm:$0xff]  ;;  %v24_v38 = vld [vmem:[%s662_s0 + $0x48] sm:$0xff]  ;;  %v49_v42 = vpack.c.bf16 %v21_v35, %v19_v34 }
   0xc   :  { %338 = vmatprep.subr.bf16.mxu0 %v418_v6  ;;  %399 = vmatprep.subr.bf16.mxu1 %v418_v6  ;;  %v26_v39 = vld [vmem:[%s662_s0 + $0x58] sm:$0xff]  ;;  %v40_v40 = vld [vmem:[%s662_s0 + $0xc8] sm:$0xff]  ;;  %v57_v43 = vpack.c.bf16 %v37_v37, %v35_v36  ;;  %v23_v46 = vld [vmem:[%s662_s0 + $0x40] sm:$0xff] }
   0xd   :  { %v42_v41 = vld [vmem:[%s662_s0 + $0xd8] sm:$0xff]  ;;  %v52_v44 = vpack.c.bf16 %v26_v39, %v24_v38  ;;  %v25_v47 = vld [vmem:[%s662_s0 + $0x50] sm:$0xff]  ;;  %v39_v48 = vld [vmem:[%s662_s0 + $0xc0] sm:$0xff] }
   0xe   :  { %v60_v45 = vpack.c.bf16 %v42_v41, %v40_v40  ;;  %v41_v49 = vld [vmem:[%s662_s0 + $0xd0] sm:$0xff]  ;;  %v28_v50 = vld [vmem:[%s662_s0 + $0x68] sm:$0xff]  ;;  %v30_v51 = vld [vmem:[%s662_s0 + $0x78] sm:$0xff]  ;;  %v51_v54 = vpack.c.bf16 %v25_v47, %v23_v46 }
   0xf   :  { %339 = vmatpush3.bf16.msra.mxu0 %v419_v7  ;;  %407 = vmatpush3.bf16.msra.mxu1 %v419_v7  ;;  %v44_v52 = vld [vmem:[%s662_s0 + $0xe8] sm:$0xff]  ;;  %v46_v53 = vld [vmem:[%s662_s0 + $0xf8] sm:$0xff]  ;;  %v59_v55 = vpack.c.bf16 %v41_v49, %v39_v48  ;;  %v54_v56 = vpack.c.bf16 %v30_v51, %v28_v50  ;;  %v27_v58 = vld [vmem:[%s662_s0 + $0x60] sm:$0xff] }
  0x10   :  { %340 = vmatprep.subr.bf16.mxu0 %v420_v8  ;;  %400 = vmatprep.subr.bf16.mxu1 %v420_v8  ;;  %v62_v57 = vpack.c.bf16 %v46_v53, %v44_v52  ;;  %v29_v59 = vld [vmem:[%s662_s0 + $0x70] sm:$0xff]  ;;  %v43_v60 = vld [vmem:[%s662_s0 + $0xe0] sm:$0xff] }
  0x11   :  { %v45_v61 = vld [vmem:[%s662_s0 + $0xf0] sm:$0xff]  ;;  %v53_v62 = vpack.c.bf16 %v29_v59, %v27_v58  ;;  %v595_v2 = vld [vmem:[%s663_s2] ss:$0 sm:$0xff] }
  0x12   :  { %v61_v63 = vpack.c.bf16 %v45_v61, %v43_v60 }
  0x13   :  { %341 = vmatpush3.bf16.msra.mxu0 %v421_v9  ;;  %408 = vmatpush3.bf16.msra.mxu1 %v421_v9 }
  0x14   :  { %342 = vmatprep.subr.bf16.mxu0 %v422_v10  ;;  %401 = vmatprep.subr.bf16.mxu1 %v422_v10 }
  0x17   :  { %343 = vmatpush3.bf16.msra.mxu0 %v423_v17  ;;  %409 = vmatpush3.bf16.msra.mxu1 %v423_v17 }
  0x18   :  { %344 = vmatprep.subr.bf16.mxu0 %v424_v18  ;;  %402 = vmatprep.subr.bf16.mxu1 %v424_v18 }
  0x1b   :  { %345 = vmatpush3.bf16.msra.mxu0 %v425_v19  ;;  %410 = vmatpush3.bf16.msra.mxu1 %v425_v19 }
  0x1c   :  { %346 = vmatprep.subr.bf16.mxu0 %v426_v20  ;;  %403 = vmatprep.subr.bf16.mxu1 %v426_v20 }
  0x1f   :  { %347 = vmatpush3.bf16.msra.mxu0 %v427_v21  ;;  %411 = vmatpush3.bf16.msra.mxu1 %v427_v21 }
  0x22   :  { %231 = vmatmul.mubr.bf16.vlgmr.msra.gmra.mrb[0].mxu0 %v47_v30  ;;  %263 = vmatmul.mubr.bf16.vlgmr.msra.gmra.mrb[0].mxu1 %v55_v31 }
  0x23   :  { %238 = vmatprep.mubr.bf16.mxu0 %v50_v32  ;;  %270 = vmatprep.mubr.bf16.mxu1 %v58_v33 }
  0x2a   :  { %239 = vmatmul.mubr.bf16.gmra.mrb[4].mxu0 %v49_v42  ;;  %271 = vmatmul.mubr.bf16.gmra.mrb[4].mxu1 %v57_v43 }
  0x2b   :  { %246 = vmatprep.mubr.bf16.mxu0 %v52_v44  ;;  %278 = vmatprep.mubr.bf16.mxu1 %v60_v45 }
  0x32   :  { %247 = vmatmul.mubr.bf16.gmra.mrb[8].mxu0 %v51_v54  ;;  %279 = vmatmul.mubr.bf16.gmra.mrb[8].mxu1 %v59_v55 }
  0x33   :  { %254 = vmatprep.mubr.bf16.mxu0 %v54_v56  ;;  %286 = vmatprep.mubr.bf16.mxu1 %v62_v57 }
  0x3a   :  { %255 = vmatmul.mubr.bf16.gmra.mrb[12].mxu0 %v53_v62  ;;  %287 = vmatmul.mubr.bf16.gmra.mrb[12].mxu1 %v61_v63 }
  0xf5   :  { %v348_v0 = vpop.f32.mrb[0].mxu0  ;;  %v372_v1 = vpop.f32.mrb[0].mxu1 }
  0xf6   :  { %v349_v3 = vpop.f32.mrb[1].mxu0  ;;  %v373_v4 = vpop.f32.mrb[1].mxu1 }
  0xf7   :  { %v350_v5 = vadd.f32 %v349_v3, %v348_v0  ;;  %v374_v6 = vadd.f32 %v373_v4, %v372_v1  ;;  %v351_v7 = vpop.f32.mrb[2].mxu0  ;;  %v375_v8 = vpop.f32.mrb[2].mxu1 }
  0xf8   :  { %v352_v9 = vpop.f32.mrb[3].mxu0  ;;  %v376_v10 = vpop.f32.mrb[3].mxu1 }
  0xf9   :  { %v233_v11 = vadd.f32 %v350_v5, %v595_v2  ;;  %v265_v12 = vadd.f32 %v374_v6, %v595_v2  ;;  %v353_v13 = vadd.f32 %v352_v9, %v351_v7  ;;  %v377_v14 = vadd.f32 %v376_v10, %v375_v8 }
  0xfb   :  { %295 = vst [vmem:[%s664_s3] sm:$0xff] %v233_v11  ;;  %303 = vst [vmem:[%s664_s3 + $0x40] sm:$0xff] %v265_v12  ;;  %v236_v15 = vadd.f32 %v353_v13, %v595_v2  ;;  %v268_v16 = vadd.f32 %v377_v14, %v595_v2 }
  0xfd   :  { %296 = vst [vmem:[%s664_s3 + $0x8] sm:$0xff] %v236_v15  ;;  %304 = vst [vmem:[%s664_s3 + $0x48] sm:$0xff] %v268_v16  ;;  %v354_v17 = vpop.f32.mrb[4].mxu0  ;;  %v378_v18 = vpop.f32.mrb[4].mxu1 }
  0xfe   :  { %v355_v19 = vpop.f32.mrb[5].mxu0  ;;  %v379_v20 = vpop.f32.mrb[5].mxu1 }
  0xff   :  { %v356_v21 = vadd.f32 %v355_v19, %v354_v17  ;;  %v380_v22 = vadd.f32 %v379_v20, %v378_v18  ;;  %v357_v23 = vpop.f32.mrb[6].mxu0  ;;  %v381_v24 = vpop.f32.mrb[6].mxu1 }
 0x100   :  { %v358_v25 = vpop.f32.mrb[7].mxu0  ;;  %v382_v26 = vpop.f32.mrb[7].mxu1 }
 0x101   :  { %v241_v27 = vadd.f32 %v356_v21, %v595_v2  ;;  %v273_v28 = vadd.f32 %v380_v22, %v595_v2  ;;  %v359_v29 = vadd.f32 %v358_v25, %v357_v23  ;;  %v383_v30 = vadd.f32 %v382_v26, %v381_v24 }
 0x103   :  { %297 = vst [vmem:[%s664_s3 + $0x10] sm:$0xff] %v241_v27  ;;  %305 = vst [vmem:[%s664_s3 + $0x50] sm:$0xff] %v273_v28  ;;  %v244_v31 = vadd.f32 %v359_v29, %v595_v2  ;;  %v276_v32 = vadd.f32 %v383_v30, %v595_v2 }
 0x105   :  { %298 = vst [vmem:[%s664_s3 + $0x18] sm:$0xff] %v244_v31  ;;  %306 = vst [vmem:[%s664_s3 + $0x58] sm:$0xff] %v276_v32  ;;  %v360_v33 = vpop.f32.mrb[8].mxu0  ;;  %v384_v34 = vpop.f32.mrb[8].mxu1 }
 0x106   :  { %v361_v35 = vpop.f32.mrb[9].mxu0  ;;  %v385_v36 = vpop.f32.mrb[9].mxu1 }
 0x107   :  { %v362_v37 = vadd.f32 %v361_v35, %v360_v33  ;;  %v386_v38 = vadd.f32 %v385_v36, %v384_v34  ;;  %v363_v39 = vpop.f32.mrb[10].mxu0  ;;  %v387_v40 = vpop.f32.mrb[10].mxu1 }
 0x108   :  { %v364_v41 = vpop.f32.mrb[11].mxu0  ;;  %v388_v42 = vpop.f32.mrb[11].mxu1 }
 0x109   :  { %v249_v43 = vadd.f32 %v362_v37, %v595_v2  ;;  %v281_v44 = vadd.f32 %v386_v38, %v595_v2  ;;  %v365_v45 = vadd.f32 %v364_v41, %v363_v39  ;;  %v389_v46 = vadd.f32 %v388_v42, %v387_v40 }
 0x10b   :  { %299 = vst [vmem:[%s664_s3 + $0x20] sm:$0xff] %v249_v43  ;;  %307 = vst [vmem:[%s664_s3 + $0x60] sm:$0xff] %v281_v44  ;;  %v252_v47 = vadd.f32 %v365_v45, %v595_v2  ;;  %v284_v48 = vadd.f32 %v389_v46, %v595_v2 }
 0x10d   :  { %300 = vst [vmem:[%s664_s3 + $0x28] sm:$0xff] %v252_v47  ;;  %308 = vst [vmem:[%s664_s3 + $0x68] sm:$0xff] %v284_v48  ;;  %v366_v49 = vpop.f32.mrb[12].mxu0  ;;  %v390_v50 = vpop.f32.mrb[12].mxu1 }
 0x10e   :  { %v367_v51 = vpop.f32.mrb[13].mxu0  ;;  %v391_v52 = vpop.f32.mrb[13].mxu1 }
 0x10f   :  { %v368_v53 = vadd.f32 %v367_v51, %v366_v49  ;;  %v392_v54 = vadd.f32 %v391_v52, %v390_v50  ;;  %v369_v55 = vpop.f32.mrb[14].mxu0  ;;  %v393_v56 = vpop.f32.mrb[14].mxu1 }
 0x110   :  { %v370_v57 = vpop.f32.mrb[15].mxu0  ;;  %v394_v58 = vpop.f32.mrb[15].mxu1 }
 0x111   :  { %v257_v59 = vadd.f32 %v368_v53, %v595_v2  ;;  %v289_v60 = vadd.f32 %v392_v54, %v595_v2  ;;  %v371_v61 = vadd.f32 %v370_v57, %v369_v55  ;;  %v395_v62 = vadd.f32 %v394_v58, %v393_v56 }
 0x113   :  { %301 = vst [vmem:[%s664_s3 + $0x30] sm:$0xff] %v257_v59  ;;  %309 = vst [vmem:[%s664_s3 + $0x70] sm:$0xff] %v289_v60  ;;  %v260_v63 = vadd.f32 %v371_v61, %v595_v2  ;;  %v292_v0 = vadd.f32 %v395_v62, %v595_v2 }
 0x115   :  { %302 = vst [vmem:[%s664_s3 + $0x38] sm:$0xff] %v260_v63  ;;  %310 = vst [vmem:[%s664_s3 + $0x78] sm:$0xff] %v292_v0 }

// kernel: _lambda_.7
= control target key start
LH: loop header
LB: loop body
LE: loop exit
PB: predicated region body
PF: predicated region fallthrough
CT: control target
= control target key end

     0   :  { %s1599_s12 = smov 0   ;;  %s1601_s13 = smov 0   ;;  %s2159_s0 = inlined_call_operand.vmem [shape: f32[128,256], index: 0, kind: input, shape index: {}]   ;;  %s2160_s1 = inlined_call_operand.vmem [shape: bf16[256,768], index: 1, kind: input, shape index: {}]   ;;  %s2161_s2 = inlined_call_operand.vmem [shape: f32[1,768], index: 2, kind: input, shape index: {}]   ;;  %s2162_s3 = inlined_call_operand.vmem [shape: f32[128,768], index: 3, kind: output, shape index: {}]  }
   0x1   :  { %s1603_s14 = smov 0   ;;  %s1605_s15 = smov 0  }
   0x2   :  { %s1607_s16 = smov 0  }
   0x3 LB: > { %s22_s17 = sadd.s32 1, %s1573_s15  ;;  %s1245_s18 = sadd.s32 4294967295, %s1577_s16   ;;  %s1577_s16 = sphi %s1607_s16, %s13_s16   ;;  %s1573_s15 = sphi %s1605_s15, %s2167_s15   ;;  %s1569_s14 = sphi %s1603_s14, %s2166_s14   ;;  %s1565_s13 = sphi %s1601_s13, %s2165_s13   ;;  %s1561_s12 = sphi %s1599_s12, %s2164_s12  }
   0x4   : > { %p23_p0 = scmp.ge.s32.totalorder %s22_s17, 2  ;;  %p65_p1 = scmp.ne.s32.totalorder %s1565_s13, %s1561_s12 }
   0x5   : > { %p66_p2 = scmp.eq.s32.totalorder %s1577_s16, 0  ;;  %p123_p4 = scmp.eq.s32.totalorder %s1245_s18, 1 }
   0x6   : > { %s2169_s17 = smov (%p23_p0, %s22_s17), 0  ;;  %s58_s20 = sadd.s32 1, %s1565_s13 }
   0x7   : > { %p67_p3 = por %p66_p2, %p65_p1  ;;  %s55_s19 = ssub.s32 %s1573_s15, %s2169_s17 }
   0x8   : > { %p56_p5 = scmp.eq.s32.totalorder %s55_s19, 0  ;;  %p1634_p6 = por %p123_p4, %p65_p1 }
   0x9   : > { %p1249_p7 = scmp.ge.s32.totalorder %s1577_s16, 2 }
   0xa   : > { %s1639_s22 = scalar_select %p56_p5, %s1565_s13, %s58_s20  }
   0xb   : > { %155 = sbr.rel (%p1249_p7) target bundleno = 60 (0x3c), region = 20 }
  0x12   : > { %158 = sbr.rel (!%p67_p3) target bundleno = 60 (0x3c), region = 24  ;;  %s160_s23 = sand.u32 (%p67_p3), 1, %s1565_s13  }
  0x13   : > { %s1367_s24 = smul.u32 (%p67_p3), 12, %s1573_s15 }
  0x14   : > { %s1433_s25 = smul.u32 (%p67_p3), 384, %s160_s23 }
  0x15   : > { %s1647_s28 = scalar_lea.vmem (%p67_p3), %s2160_s1, %s1367_s24 }
  0x16   : > { %v180_v0 = vld [vmem:[%s1647_s28] sm:$0xff] (%p67_p3)  ;;  %v182_v1 = vld [vmem:[%s1647_s28 + $0x18] sm:$0xff] (%p67_p3)  ;;  %v184_v2 = vld [vmem:[%s1647_s28 + $0x30] sm:$0xff] (%p67_p3)  ;;  %s1652_s29 = scalar_lea.vmem (%p67_p3), [#allocation2], %s1433_s25 }
  0x17   : > { %181 = vst [vmem:[%s1652_s29] sm:$0xff] (%p67_p3), %v180_v0  ;;  %183 = vst [vmem:[%s1652_s29 + $0xc] sm:$0xff] (%p67_p3), %v182_v1  ;;  %v186_v3 = vld [vmem:[%s1647_s28 + $0x48] sm:$0xff] (%p67_p3)  ;;  %v188_v4 = vld [vmem:[%s1647_s28 + $0x60] sm:$0xff] (%p67_p3) }
  0x18   : > { %185 = vst [vmem:[%s1652_s29 + $0x18] sm:$0xff] (%p67_p3), %v184_v2  ;;  %v190_v5 = vld [vmem:[%s1647_s28 + $0x78] sm:$0xff] (%p67_p3)  ;;  %187 = vst [vmem:[%s1652_s29 + $0x24] sm:$0xff] (%p67_p3), %v186_v3  ;;  %v192_v6 = vld [vmem:[%s1647_s28 + $0x90] sm:$0xff] (%p67_p3) }
  0x19   : > { %189 = vst [vmem:[%s1652_s29 + $0x30] sm:$0xff] %v188_v4  ;;  %191 = vst [vmem:[%s1652_s29 + $0x3c] sm:$0xff] %v190_v5  ;;  %v194_v7 = vld [vmem:[%s1647_s28 + $0xa8] sm:$0xff]  ;;  %v196_v8 = vld [vmem:[%s1647_s28 + $0xc0] sm:$0xff] }
  0x1a   : > { %193 = vst [vmem:[%s1652_s29 + $0x48] sm:$0xff] %v192_v6  ;;  %195 = vst [vmem:[%s1652_s29 + $0x54] sm:$0xff] %v194_v7  ;;  %v198_v9 = vld [vmem:[%s1647_s28 + $0xd8] sm:$0xff]  ;;  %v200_v10 = vld [vmem:[%s1647_s28 + $0xf0] sm:$0xff] }
  0x1b   : > { %197 = vst [vmem:[%s1652_s29 + $0x60] sm:$0xff] %v196_v8  ;;  %v202_v11 = vld [vmem:[%s1647_s28 + $0x108] sm:$0xff]  ;;  %199 = vst [vmem:[%s1652_s29 + $0x6c] sm:$0xff] %v198_v9  ;;  %v204_v12 = vld [vmem:[%s1647_s28 + $0x120] sm:$0xff] }
  0x1c   : > { %201 = vst [vmem:[%s1652_s29 + $0x78] sm:$0xff] %v200_v10  ;;  %203 = vst [vmem:[%s1652_s29 + $0x84] sm:$0xff] %v202_v11  ;;  %v206_v13 = vld [vmem:[%s1647_s28 + $0x138] sm:$0xff]  ;;  %v208_v14 = vld [vmem:[%s1647_s28 + $0x150] sm:$0xff] }
  0x1d   : > { %205 = vst [vmem:[%s1652_s29 + $0x90] sm:$0xff] %v204_v12  ;;  %207 = vst [vmem:[%s1652_s29 + $0x9c] sm:$0xff] %v206_v13  ;;  %v210_v15 = vld [vmem:[%s1647_s28 + $0x168] sm:$0xff]  ;;  %v212_v16 = vld [vmem:[%s1647_s28 + $0x180] sm:$0xff] }
  0x1e   : > { %209 = vst [vmem:[%s1652_s29 + $0xa8] sm:$0xff] %v208_v14  ;;  %v214_v17 = vld [vmem:[%s1647_s28 + $0x198] sm:$0xff]  ;;  %211 = vst [vmem:[%s1652_s29 + $0xb4] sm:$0xff] %v210_v15  ;;  %v216_v18 = vld [vmem:[%s1647_s28 + $0x1b0] sm:$0xff] }
  0x1f   : > { %213 = vst [vmem:[%s1652_s29 + $0xc0] sm:$0xff] %v212_v16  ;;  %215 = vst [vmem:[%s1652_s29 + $0xcc] sm:$0xff] %v214_v17  ;;  %v218_v19 = vld [vmem:[%s1647_s28 + $0x1c8] sm:$0xff]  ;;  %v220_v20 = vld [vmem:[%s1647_s28 + $0x1e0] sm:$0xff] }
  0x20   : > { %217 = vst [vmem:[%s1652_s29 + $0xd8] sm:$0xff] %v216_v18  ;;  %219 = vst [vmem:[%s1652_s29 + $0xe4] sm:$0xff] %v218_v19  ;;  %v222_v21 = vld [vmem:[%s1647_s28 + $0x1f8] sm:$0xff]  ;;  %v224_v22 = vld [vmem:[%s1647_s28 + $0x210] sm:$0xff] }
  0x21   : > { %221 = vst [vmem:[%s1652_s29 + $0xf0] sm:$0xff] %v220_v20  ;;  %v226_v23 = vld [vmem:[%s1647_s28 + $0x228] sm:$0xff]  ;;  %223 = vst [vmem:[%s1652_s29 + $0xfc] sm:$0xff] %v222_v21  ;;  %v228_v24 = vld [vmem:[%s1647_s28 + $0x240] sm:$0xff] }
  0x22   : > { %225 = vst [vmem:[%s1652_s29 + $0x108] sm:$0xff] %v224_v22  ;;  %227 = vst [vmem:[%s1652_s29 + $0x114] sm:$0xff] %v226_v23  ;;  %v230_v25 = vld [vmem:[%s1647_s28 + $0x258] sm:$0xff]  ;;  %v232_v26 = vld [vmem:[%s1647_s28 + $0x270] sm:$0xff] }
  0x23   : > { %229 = vst [vmem:[%s1652_s29 + $0x120] sm:$0xff] %v228_v24  ;;  %231 = vst [vmem:[%s1652_s29 + $0x12c] sm:$0xff] %v230_v25  ;;  %v234_v27 = vld [vmem:[%s1647_s28 + $0x288] sm:$0xff]  ;;  %v236_v28 = vld [vmem:[%s1647_s28 + $0x2a0] sm:$0xff] }
  0x24   : > { %233 = vst [vmem:[%s1652_s29 + $0x138] sm:$0xff] %v232_v26  ;;  %v238_v29 = vld [vmem:[%s1647_s28 + $0x2b8] sm:$0xff]  ;;  %235 = vst [vmem:[%s1652_s29 + $0x144] sm:$0xff] %v234_v27  ;;  %v240_v30 = vld [vmem:[%s1647_s28 + $0x2d0] sm:$0xff] }
  0x25   : > { %237 = vst [vmem:[%s1652_s29 + $0x150] sm:$0xff] %v236_v28  ;;  %239 = vst [vmem:[%s1652_s29 + $0x15c] sm:$0xff] %v238_v29  ;;  %v242_v31 = vld [vmem:[%s1647_s28 + $0x2e8] sm:$0xff]  ;;  %v1253_v33 = vld [vmem:[%s1647_s28 + $0x20] sm:$0xf] }
  0x26   : > { %v1251_v32 = vld [vmem:[%s1647_s28 + $0x8] sm:$0xf]  ;;  %241 = vst [vmem:[%s1652_s29 + $0x168] sm:$0xff] %v240_v30  ;;  %243 = vst [vmem:[%s1652_s29 + $0x174] sm:$0xff] %v242_v31  ;;  %v1255_v34 = vld [vmem:[%s1647_s28 + $0x38] sm:$0xf] }
  0x27   : > { %1252 = vst [vmem:[%s1652_s29 + $0x8] sm:$0xf] %v1251_v32  ;;  %v1257_v35 = vld [vmem:[%s1647_s28 + $0x50] sm:$0xf]  ;;  %1254 = vst [vmem:[%s1652_s29 + $0x14] sm:$0xf] %v1253_v33 }
  0x28   : > { %1256 = vst [vmem:[%s1652_s29 + $0x20] sm:$0xf] %v1255_v34  ;;  %1258 = vst [vmem:[%s1652_s29 + $0x2c] sm:$0xf] %v1257_v35  ;;  %v1259_v36 = vld [vmem:[%s1647_s28 + $0x68] sm:$0xf] }
  0x29   : > { %v1261_v37 = vld [vmem:[%s1647_s28 + $0x80] sm:$0xf]  ;;  %v1263_v38 = vld [vmem:[%s1647_s28 + $0x98] sm:$0xf]  ;;  %1260 = vst [vmem:[%s1652_s29 + $0x38] sm:$0xf] %v1259_v36 }
  0x2a   : > { %1262 = vst [vmem:[%s1652_s29 + $0x44] sm:$0xf] %v1261_v37  ;;  %1264 = vst [vmem:[%s1652_s29 + $0x50] sm:$0xf] %v1263_v38  ;;  %v1265_v39 = vld [vmem:[%s1647_s28 + $0xb0] sm:$0xf] }
  0x2b   : > { %v1267_v40 = vld [vmem:[%s1647_s28 + $0xc8] sm:$0xf]  ;;  %v1269_v41 = vld [vmem:[%s1647_s28 + $0xe0] sm:$0xf]  ;;  %1266 = vst [vmem:[%s1652_s29 + $0x5c] sm:$0xf] %v1265_v39 }
  0x2c   : > { %1268 = vst [vmem:[%s1652_s29 + $0x68] sm:$0xf] %v1267_v40  ;;  %1270 = vst [vmem:[%s1652_s29 + $0x74] sm:$0xf] %v1269_v41  ;;  %v1271_v42 = vld [vmem:[%s1647_s28 + $0xf8] sm:$0xf] }
  0x2d   : > { %v1273_v43 = vld [vmem:[%s1647_s28 + $0x110] sm:$0xf]  ;;  %v1275_v44 = vld [vmem:[%s1647_s28 + $0x128] sm:$0xf]  ;;  %1272 = vst [vmem:[%s1652_s29 + $0x80] sm:$0xf] %v1271_v42 }
  0x2e   : > { %1274 = vst [vmem:[%s1652_s29 + $0x8c] sm:$0xf] %v1273_v43  ;;  %1276 = vst [vmem:[%s1652_s29 + $0x98] sm:$0xf] %v1275_v44  ;;  %v1277_v45 = vld [vmem:[%s1647_s28 + $0x140] sm:$0xf] }
  0x2f   : > { %v1279_v46 = vld [vmem:[%s1647_s28 + $0x158] sm:$0xf]  ;;  %v1281_v47 = vld [vmem:[%s1647_s28 + $0x170] sm:$0xf]  ;;  %1278 = vst [vmem:[%s1652_s29 + $0xa4] sm:$0xf] %v1277_v45 }
  0x30   : > { %1280 = vst [vmem:[%s1652_s29 + $0xb0] sm:$0xf] %v1279_v46  ;;  %1282 = vst [vmem:[%s1652_s29 + $0xbc] sm:$0xf] %v1281_v47  ;;  %v1283_v48 = vld [vmem:[%s1647_s28 + $0x188] sm:$0xf] }
  0x31   : > { %v1285_v49 = vld [vmem:[%s1647_s28 + $0x1a0] sm:$0xf]  ;;  %v1287_v50 = vld [vmem:[%s1647_s28 + $0x1b8] sm:$0xf]  ;;  %1284 = vst [vmem:[%s1652_s29 + $0xc8] sm:$0xf] %v1283_v48 }
  0x32   : > { %1286 = vst [vmem:[%s1652_s29 + $0xd4] sm:$0xf] %v1285_v49  ;;  %1288 = vst [vmem:[%s1652_s29 + $0xe0] sm:$0xf] %v1287_v50  ;;  %v1289_v51 = vld [vmem:[%s1647_s28 + $0x1d0] sm:$0xf] }
  0x33   : > { %v1291_v52 = vld [vmem:[%s1647_s28 + $0x1e8] sm:$0xf]  ;;  %v1293_v53 = vld [vmem:[%s1647_s28 + $0x200] sm:$0xf]  ;;  %1290 = vst [vmem:[%s1652_s29 + $0xec] sm:$0xf] %v1289_v51 }
  0x34   : > { %1292 = vst [vmem:[%s1652_s29 + $0xf8] sm:$0xf] %v1291_v52  ;;  %1294 = vst [vmem:[%s1652_s29 + $0x104] sm:$0xf] %v1293_v53  ;;  %v1295_v54 = vld [vmem:[%s1647_s28 + $0x218] sm:$0xf] }
  0x35   : > { %v1297_v55 = vld [vmem:[%s1647_s28 + $0x230] sm:$0xf]  ;;  %v1299_v56 = vld [vmem:[%s1647_s28 + $0x248] sm:$0xf]  ;;  %1296 = vst [vmem:[%s1652_s29 + $0x110] sm:$0xf] %v1295_v54 }
  0x36   : > { %1298 = vst [vmem:[%s1652_s29 + $0x11c] sm:$0xf] %v1297_v55  ;;  %1300 = vst [vmem:[%s1652_s29 + $0x128] sm:$0xf] %v1299_v56  ;;  %v1301_v57 = vld [vmem:[%s1647_s28 + $0x260] sm:$0xf] }
  0x37   : > { %v1303_v58 = vld [vmem:[%s1647_s28 + $0x278] sm:$0xf]  ;;  %v1305_v59 = vld [vmem:[%s1647_s28 + $0x290] sm:$0xf]  ;;  %1302 = vst [vmem:[%s1652_s29 + $0x134] sm:$0xf] %v1301_v57 }
  0x38   : > { %1304 = vst [vmem:[%s1652_s29 + $0x140] sm:$0xf] %v1303_v58  ;;  %1306 = vst [vmem:[%s1652_s29 + $0x14c] sm:$0xf] %v1305_v59  ;;  %v1307_v60 = vld [vmem:[%s1647_s28 + $0x2a8] sm:$0xf] }
  0x39   : > { %v1309_v61 = vld [vmem:[%s1647_s28 + $0x2c0] sm:$0xf]  ;;  %v1311_v62 = vld [vmem:[%s1647_s28 + $0x2d8] sm:$0xf]  ;;  %1308 = vst [vmem:[%s1652_s29 + $0x158] sm:$0xf] %v1307_v60 }
  0x3a   : > { %1310 = vst [vmem:[%s1652_s29 + $0x164] sm:$0xf] %v1309_v61  ;;  %1312 = vst [vmem:[%s1652_s29 + $0x170] sm:$0xf] %v1311_v62  ;;  %v1313_v63 = vld [vmem:[%s1647_s28 + $0x2f0] sm:$0xf] }
  0x3b   : > { %1314 = vst [vmem:[%s1652_s29 + $0x17c] sm:$0xf] %v1313_v63 }
  0x3c PF: > { %p1315_p8 = scmp.ge.s32.totalorder %s1577_s16, 1  ;;  %p327_p9 = scmp.lt.s32.totalorder %s1577_s16, 3 }
  0x3e   : > { %p328_p10 = pnand %p1315_p8, %p327_p9 }
  0x3f   : > { %s334_s30 = sand.u32 (!%p328_p10), 1, %s1561_s12   ;;  %v383_v0 = vld [vmem:[%s2159_s0 + $0x8] sm:$0xff] (!%p328_p10)  ;;  %v385_v1 = vld [vmem:[%s2159_s0 + $0x18] sm:$0xff] (!%p328_p10)  ;;  %v382_v40 = vld [vmem:[%s2159_s0] sm:$0xff] (!%p328_p10)  ;;  %s374_s19 = smul.u32 (!%p328_p10), 3, %s1569_s14 }
  0x40   : > { %331 = sbr.rel (%p328_p10) target bundleno = 415 (0x19f), region = 54  ;;  %v415_v2 = vpack.c.bf16 (!%p328_p10), %v385_v1, %v383_v0  ;;  %v384_v41 = vld [vmem:[%s2159_s0 + $0x10] sm:$0xff] (!%p328_p10)  ;;  %v387_v43 = vld [vmem:[%s2159_s0 + $0x28] sm:$0xff] (!%p328_p10)  ;;  %v389_v44 = vld [vmem:[%s2159_s0 + $0x38] sm:$0xff] (!%p328_p10) }
  0x41   : > { %s1788_s8 = smul.u32 (!%p328_p10), 384, %s334_s30  ;;  %v414_v46 = vpack.c.bf16 (!%p328_p10), %v384_v41, %v382_v40  ;;  %v417_v47 = vpack.c.bf16 (!%p328_p10), %v389_v44, %v387_v43  ;;  %v386_v50 = vld [vmem:[%s2159_s0 + $0x20] sm:$0xff] (!%p328_p10)  ;;  %v388_v51 = vld [vmem:[%s2159_s0 + $0x30] sm:$0xff] (!%p328_p10)  ;;  %v391_v53 = vld [vmem:[%s2159_s0 + $0x48] sm:$0xff] (!%p328_p10)  ;;  %p375_p11 = scmp.lt.s32.totalorder (!%p328_p10), %s374_s19, 5 }
  0x42   : > { %912 = vmatprep.mubr.bf16.mxu1 (!%p328_p10), %v415_v2  ;;  %799 = vmatprep.mubr.bf16.mxu0 (!%p328_p10), %v415_v2  ;;  %v393_v54 = vld [vmem:[%s2159_s0 + $0x58] sm:$0xff] (!%p328_p10)  ;;  %v416_v56 = vpack.c.bf16 (!%p328_p10), %v388_v51, %v386_v50  ;;  %v390_v60 = vld [vmem:[%s2159_s0 + $0x40] sm:$0xff] (!%p328_p10)  ;;  %v392_v61 = vld [vmem:[%s2159_s0 + $0x50] sm:$0xff] (!%p328_p10) }
  0x43   : > { %s1791_s9 = scalar_lea.vmem (!%p328_p10), [#allocation2], %s1788_s8  ;;  %v419_v57 = vpack.c.bf16 (!%p328_p10), %v393_v54, %v391_v53  ;;  %v395_v63 = vld [vmem:[%s2159_s0 + $0x68] sm:$0xff] (!%p328_p10)  ;;  %v397_v0 = vld [vmem:[%s2159_s0 + $0x78] sm:$0xff] (!%p328_p10)  ;;  %v418_v2 = vpack.c.bf16 (!%p328_p10), %v392_v61, %v390_v60  ;;  %s1939_s25 = scalar_lea.vmem (!%p328_p10), [#allocation3], %s1788_s8 }
  0x44   : > { %v1475_v3 = vld [vmem:[%s1791_s9 + $0x4] ss:$12 sps:$4 sm:$0xff] (!%p328_p10)   ;;  %v1477_v4 = vld [vmem:[%s1791_s9] ss:$12 sps:$4 sm:$0xff] (!%p328_p10)   ;;  %v1478_v5 = vld [vmem:[%s1791_s9 + $0x1c] ss:$12 sps:$4 sm:$0xff] (!%p328_p10)  }
  0x45   : > { %767 = vmatprep.subr.bf16.mxu0 (!%p328_p10), %v1475_v3  ;;  %v1480_v6 = vld [vmem:[%s1791_s9 + $0x18] ss:$12 sps:$4 sm:$0xff] (!%p328_p10)   ;;  %v1481_v7 = vld [vmem:[%s1791_s9 + $0x34] ss:$12 sps:$4 sm:$0xff] (!%p328_p10)   ;;  %v1483_v8 = vld [vmem:[%s1791_s9 + $0x30] ss:$12 sps:$4 sm:$0xff] (!%p328_p10)   ;;  %v421_v3 = vpack.c.bf16 (!%p328_p10), %v397_v0, %v395_v63 }
  0x46   : > { %768 = vmatpush1.bf16.msra.mxu0 (!%p328_p10), %v1477_v4  ;;  %v1484_v9 = vld [vmem:[%s1791_s9 + $0x4c] ss:$12 sps:$4 sm:$0xff] (!%p328_p10)   ;;  %v1496_v10 = vld [vmem:[%s1791_s9 + $0xc8] ss:$12 sps:$4 sm:$0xff] (!%p328_p10)   ;;  %v1487_v12 = vld [vmem:[%s1791_s9 + $0x64] ss:$12 sps:$4 sm:$0xff] (!%p328_p10)  }
  0x47   : > { %769 = vmatprep.subr.bf16.mxu0 %v1478_v5  ;;  %v1486_v11 = vld [vmem:[%s1791_s9 + $0x48] ss:$12 sps:$4 sm:$0xff]   ;;  %1369 = vmatprep.subr.bf16.mxu1 %v1496_v10  ;;  %v1501_v14 = vld [vmem:[%s1791_s9 + $0xe0] ss:$12 sps:$4 sm:$0xff]   ;;  %v1506_v18 = vld [vmem:[%s1791_s9 + $0xf8] ss:$12 sps:$4 sm:$0xff]  }
  0x48   : > { %v1499_v13 = vld [vmem:[%s1791_s9 + $0x8] ss:$12 sps:$4 sm:$0xff]   ;;  %v1489_v15 = vld [vmem:[%s1791_s9 + $0x60] ss:$12 sps:$4 sm:$0xff]   ;;  %v1492_v19 = vld [vmem:[%s1791_s9 + $0x78] ss:$12 sps:$4 sm:$0xff]  }
  0x49   : > { %1370 = vmatpush3.bf16.msra.mxu1 %v1499_v13  ;;  %v1490_v16 = vld [vmem:[%s1791_s9 + $0x7c] ss:$12 sps:$4 sm:$0xff]   ;;  %v1504_v17 = vld [vmem:[%s1791_s9 + $0x20] ss:$12 sps:$4 sm:$0xff]   ;;  %v1509_v20 = vld [vmem:[%s1791_s9 + $0x38] ss:$12 sps:$4 sm:$0xff]  }
  0x4a   : > { %770 = vmatpush1.bf16.msra.mxu0 %v1480_v6  ;;  %1371 = vmatprep.subr.bf16.mxu1 %v1501_v14  ;;  %v1493_v21 = vld [vmem:[%s1791_s9 + $0x94] ss:$12 sps:$4 sm:$0xff]   ;;  %v1511_v22 = vld [vmem:[%s1791_s9 + $0x110] ss:$12 sps:$4 sm:$0xff]   ;;  %v1497_v26 = vld [vmem:[%s1791_s9 + $0xac] ss:$12 sps:$4 sm:$0xff]  }
  0x4b   : > { %771 = vmatprep.subr.bf16.mxu0 %v1481_v7  ;;  %v1495_v23 = vld [vmem:[%s1791_s9 + $0x90] ss:$12 sps:$4 sm:$0xff]   ;;  %v1516_v25 = vld [vmem:[%s1791_s9 + $0x128] ss:$12 sps:$4 sm:$0xff]   ;;  %v1521_v29 = vld [vmem:[%s1791_s9 + $0x140] ss:$12 sps:$4 sm:$0xff]  }
  0x4c   : > { %v1514_v24 = vld [vmem:[%s1791_s9 + $0x50] ss:$12 sps:$4 sm:$0xff]   ;;  %v1500_v27 = vld [vmem:[%s1791_s9 + $0xa8] ss:$12 sps:$4 sm:$0xff]   ;;  %v1505_v31 = vld [vmem:[%s1791_s9 + $0xc0] ss:$12 sps:$4 sm:$0xff]  }
  0x4d   : > { %1372 = vmatpush3.bf16.msra.mxu1 %v1504_v17  ;;  %v1519_v28 = vld [vmem:[%s1791_s9 + $0x68] ss:$12 sps:$4 sm:$0xff]   ;;  %v1502_v30 = vld [vmem:[%s1791_s9 + $0xc4] ss:$12 sps:$4 sm:$0xff]   ;;  %v1524_v32 = vld [vmem:[%s1791_s9 + $0x80] ss:$12 sps:$4 sm:$0xff]  }
  0x4e   : > { %772 = vmatpush1.bf16.msra.mxu0 %v1483_v8  ;;  %1373 = vmatprep.subr.bf16.mxu1 %v1506_v18  ;;  %v1526_v33 = vld [vmem:[%s1791_s9 + $0x158] ss:$12 sps:$4 sm:$0xff]   ;;  %v1507_v34 = vld [vmem:[%s1791_s9 + $0xdc] ss:$12 sps:$4 sm:$0xff]   ;;  %v1512_v38 = vld [vmem:[%s1791_s9 + $0xf4] ss:$12 sps:$4 sm:$0xff]  }
  0x4f   : > { %773 = vmatprep.subr.bf16.mxu0 %v1484_v9  ;;  %v1529_v35 = vld [vmem:[%s1791_s9 + $0x98] ss:$12 sps:$4 sm:$0xff]   ;;  %v1531_v37 = vld [vmem:[%s1791_s9 + $0x170] ss:$12 sps:$4 sm:$0xff]   ;;  %v1520_v48 = vld [vmem:[%s1791_s9 + $0x108] ss:$12 sps:$4 sm:$0xff]  }
  0x50   : > { %v1510_v36 = vld [vmem:[%s1791_s9 + $0xd8] ss:$12 sps:$4 sm:$0xff]   ;;  %v1534_v39 = vld [vmem:[%s1791_s9 + $0xb0] ss:$12 sps:$4 sm:$0xff]   ;;  %v1525_v52 = vld [vmem:[%s1791_s9 + $0x120] ss:$12 sps:$4 sm:$0xff]  }
  0x51   : > { %1374 = vmatpush3.bf16.msra.mxu1 %v1509_v20  ;;  %v1515_v42 = vld [vmem:[%s1791_s9 + $0xf0] ss:$12 sps:$4 sm:$0xff]   ;;  %v1517_v45 = vld [vmem:[%s1791_s9 + $0x10c] ss:$12 sps:$4 sm:$0xff]   ;;  %v1532_v59 = vld [vmem:[%s1791_s9 + $0x154] ss:$12 sps:$4 sm:$0xff]  }
  0x52   : > { %774 = vmatpush1.bf16.msra.mxu0 %v1486_v11  ;;  %1375 = vmatprep.subr.bf16.mxu1 %v1511_v22  ;;  %v1522_v49 = vld [vmem:[%s1791_s9 + $0x124] ss:$12 sps:$4 sm:$0xff]   ;;  %v1527_v55 = vld [vmem:[%s1791_s9 + $0x13c] ss:$12 sps:$4 sm:$0xff]   ;;  %v1536_v1 = vld [vmem:[%s1791_s9 + $0x16c] ss:$12 sps:$4 sm:$0xff]  }
  0x53   : > { %775 = vmatprep.subr.bf16.mxu0 %v1487_v12  ;;  %v1530_v58 = vld [vmem:[%s1791_s9 + $0x138] ss:$12 sps:$4 sm:$0xff]   ;;  %v1535_v62 = vld [vmem:[%s1791_s9 + $0x150] ss:$12 sps:$4 sm:$0xff]   ;;  %v1538_v4 = vld [vmem:[%s1791_s9 + $0x168] ss:$12 sps:$4 sm:$0xff]  }
  0x54   : > { %v394_v5 = vld [vmem:[%s2159_s0 + $0x60] sm:$0xff]  ;;  %v396_v6 = vld [vmem:[%s2159_s0 + $0x70] sm:$0xff]  ;;  %v399_v7 = vld [vmem:[%s2159_s0 + $0x88] sm:$0xff]  ;;  %s2171_s19 = smov (!%p375_p11, %s374_s19), 5  ;;  %s1368_s8 = smul.u32 (%p1634_p6), 24, %s1569_s14 }
  0x55   : > { %1376 = vmatpush3.bf16.msra.mxu1 %v1514_v24  ;;  %v401_v8 = vld [vmem:[%s2159_s0 + $0x98] sm:$0xff]  ;;  %v420_v9 = vpack.c.bf16 %v396_v6, %v394_v5  ;;  %v398_v11 = vld [vmem:[%s2159_s0 + $0x80] sm:$0xff]  ;;  %v400_v12 = vld [vmem:[%s2159_s0 + $0x90] sm:$0xff]  ;;  %s377_s24 = scalar_lea.vmem %s2161_s2, %s2171_s19 }
  0x56   : > { %776 = vmatpush1.bf16.msra.mxu0 %v1489_v15  ;;  %1377 = vmatprep.subr.bf16.mxu1 %v1516_v25  ;;  %v423_v10 = vpack.c.bf16 %v401_v8, %v399_v7  ;;  %v403_v13 = vld [vmem:[%s2159_s0 + $0xa8] sm:$0xff]  ;;  %v405_v14 = vld [vmem:[%s2159_s0 + $0xb8] sm:$0xff]  ;;  %v422_v15 = vpack.c.bf16 %v400_v12, %v398_v11  ;;  %v402_v17 = vld [vmem:[%s2159_s0 + $0xa0] sm:$0xff]  ;;  %s2052_s27 = scalar_lea.vmem (%p1634_p6), %s2162_s3, %s1368_s8 }
  0x57   : > { %777 = vmatprep.subr.bf16.mxu0 %v1490_v16  ;;  %v425_v16 = vpack.c.bf16 %v405_v14, %v403_v13  ;;  %v404_v18 = vld [vmem:[%s2159_s0 + $0xb0] sm:$0xff]  ;;  %v409_v20 = vld [vmem:[%s2159_s0 + $0xd8] sm:$0xff]  ;;  %v411_v25 = vld [vmem:[%s2159_s0 + $0xe8] sm:$0xff] }
  0x58   : > { %v408_v24 = vld [vmem:[%s2159_s0 + $0xd0] sm:$0xff] }
  0x59   : > { %1378 = vmatpush3.bf16.msra.mxu1 %v1519_v28 }
  0x5a   : > { %778 = vmatpush1.bf16.msra.mxu0 %v1492_v19  ;;  %1379 = vmatprep.subr.bf16.mxu1 %v1521_v29  ;;  %v407_v19 = vld [vmem:[%s2159_s0 + $0xc8] sm:$0xff]  ;;  %v410_v29 = vld [vmem:[%s2159_s0 + $0xe0] sm:$0xff] }
  0x5b   : > { %779 = vmatprep.subr.bf16.mxu0 %v1493_v21  ;;  %v424_v21 = vpack.c.bf16 %v404_v18, %v402_v17  ;;  %v427_v22 = vpack.c.bf16 %v409_v20, %v407_v19 }
  0x5d   : > { %1380 = vmatpush3.bf16.msra.mxu1 %v1524_v32  ;;  %v496_v32 = vlaneseq }
  0x5e   : > { %780 = vmatpush1.bf16.msra.mxu0 %v1495_v23  ;;  %1381 = vmatprep.subr.bf16.mxu1 %v1526_v33  ;;  %v406_v23 = vld [vmem:[%s2159_s0 + $0xc0] sm:$0xff] }
  0x5f   : > { %781 = vmatprep.subr.bf16.mxu0 %v1497_v26  ;;  %v413_v26 = vld [vmem:[%s2159_s0 + $0xf8] sm:$0xff]  ;;  %v497_v33 = vshrl.u32 %v496_v32, 7 }
  0x60   : > { %v429_v28 = vpack.c.bf16 %v413_v26, %v411_v25 }
  0x61   : > { %1382 = vmatpush3.bf16.msra.mxu1 %v1529_v35  ;;  %v494_v35 = vld [vmem:[%s377_s24] sm:$0x7]  ;;  %v502_v54 = vsub.s32 1, %v497_v33 }
  0x62   : > { %782 = vmatpush1.bf16.msra.mxu0 %v1500_v27  ;;  %1383 = vmatprep.subr.bf16.mxu1 %v1531_v37  ;;  %v426_v27 = vpack.c.bf16 %v408_v24, %v406_v23 }
  0x63   : > { %783 = vmatprep.subr.bf16.mxu0 %v1502_v30  ;;  %v412_v30 = vld [vmem:[%s2159_s0 + $0xf0] sm:$0xff]  ;;  %v1950_v60 = vrot.slane %v494_v35, %v502_v54 }
  0x65   : > { %1384 = vmatpush3.bf16.msra.mxu1 %v1534_v39 }
  0x66   : > { %784 = vmatpush1.bf16.msra.mxu0 %v1505_v31  ;;  %v428_v31 = vpack.c.bf16 %v412_v30, %v410_v29 }
  0x67   : > { %785 = vmatprep.subr.bf16.mxu0 %v1507_v34  ;;  %v506_v34 = vsub.s32 2, %v497_v33 }
  0x68   : > { %913 = vmatmul.mubr.bf16.vlgmr.msra.gmra.mrb[0].mxu1 %v414_v46 }
  0x69   : > { %920 = vmatprep.mubr.bf16.mxu1 %v417_v47  ;;  %v1935_v37 = vrot.slane %v494_v35, %v506_v34 }
  0x6a   : > { %786 = vmatpush1.bf16.msra.mxu0 %v1510_v36 }
  0x6b   : > { %787 = vmatprep.subr.bf16.mxu0 %v1512_v38 }
  0x6e   : > { %788 = vmatpush1.bf16.msra.mxu0 %v1515_v42 }
  0x6f   : > { %789 = vmatprep.subr.bf16.mxu0 %v1517_v45 }
  0x70   : > { %921 = vmatmul.mubr.bf16.gmra.mrb[4].mxu1 %v416_v56 }
  0x71   : > { %928 = vmatprep.mubr.bf16.mxu1 %v419_v57 }
  0x72   : > { %790 = vmatpush1.bf16.msra.mxu0 %v1520_v48 }
  0x73   : > { %791 = vmatprep.subr.bf16.mxu0 %v1522_v49 }
  0x76   : > { %792 = vmatpush1.bf16.msra.mxu0 %v1525_v52  ;;  %v498_v52 = vsub.s32 0, %v497_v33 }
  0x77   : > { %793 = vmatprep.subr.bf16.mxu0 %v1527_v55 }
  0x78   : > { %929 = vmatmul.mubr.bf16.gmra.mrb[8].mxu1 %v418_v2 }
  0x79   : > { %936 = vmatprep.mubr.bf16.mxu1 %v421_v3 }
  0x7a   : > { %794 = vmatpush1.bf16.msra.mxu0 %v1530_v58 }
  0x7b   : > { %795 = vmatprep.subr.bf16.mxu0 %v1532_v59 }
  0x7e   : > { %796 = vmatpush1.bf16.msra.mxu0 %v1535_v62 }
  0x7f   : > { %797 = vmatprep.subr.bf16.mxu0 %v1536_v1 }
  0x80   : > { %937 = vmatmul.mubr.bf16.gmra.mrb[12].mxu1 %v420_v9 }
  0x81   : > { %944 = vmatprep.mubr.bf16.mxu1 %v423_v10 }
  0x82   : > { %798 = vmatpush1.bf16.msra.mxu0 %v1538_v4 }
  0x85   : > { %800 = vmatmul.mubr.bf16.vlgmr.msra.gmra.mrb[0].mxu0 %v414_v46 }
  0x86   : > { %809 = vmatprep.mubr.bf16.mxu0 %v417_v47 }
  0x88   : > { %945 = vmatmul.mubr.bf16.gmra.mrb[16].mxu1 %v422_v15 }
  0x89   : > { %952 = vmatprep.mubr.bf16.mxu1 %v425_v16 }
  0x8d   : > { %810 = vmatmul.mubr.bf16.gmra.mrb[4].mxu0 %v416_v56 }
  0x8e   : > { %819 = vmatprep.mubr.bf16.mxu0 %v419_v57  ;;  %v1948_v57 = vrot.slane %v494_v35, %v498_v52 }
  0x90   : > { %953 = vmatmul.mubr.bf16.gmra.mrb[20].mxu1 %v424_v21 }
  0x91   : > { %960 = vmatprep.mubr.bf16.mxu1 %v427_v22 }
  0x95   : > { %820 = vmatmul.mubr.bf16.gmra.mrb[8].mxu0 %v418_v2 }
  0x96   : > { %829 = vmatprep.mubr.bf16.mxu0 %v421_v3 }
  0x98   : > { %961 = vmatmul.mubr.bf16.gmra.mrb[24].mxu1 %v426_v27 }
  0x99   : > { %968 = vmatprep.mubr.bf16.mxu1 %v429_v28 }
  0x9d   : > { %830 = vmatmul.mubr.bf16.gmra.mrb[12].mxu0 %v420_v9 }
  0x9e   : > { %839 = vmatprep.mubr.bf16.mxu0 %v423_v10 }
  0xa0   : > { %969 = vmatmul.mubr.bf16.gmra.mrb[28].mxu1 %v428_v31 }
  0xa5   : > { %840 = vmatmul.mubr.bf16.gmra.mrb[16].mxu0 %v422_v15 }
  0xa6   : > { %849 = vmatprep.mubr.bf16.mxu0 %v425_v16 }
  0xad   : > { %850 = vmatmul.mubr.bf16.gmra.mrb[20].mxu0 %v424_v21 }
  0xae   : > { %859 = vmatprep.mubr.bf16.mxu0 %v427_v22 }
  0xb5   : > { %860 = vmatmul.mubr.bf16.gmra.mrb[24].mxu0 %v426_v27 }
  0xb6   : > { %869 = vmatprep.mubr.bf16.mxu0 %v429_v28 }
  0xbd   : > { %870 = vmatmul.mubr.bf16.gmra.mrb[28].mxu0 %v428_v31 }
 0x13b   : > { %v1385_v36 = vpop.f32.mrb[0].mxu1 }
 0x13c   : > { %v1386_v38 = vpop.f32.mrb[1].mxu1 }
 0x13d   : > { %v1387_v39 = vadd.f32 %v1386_v38, %v1385_v36  ;;  %v1388_v40 = vpop.f32.mrb[2].mxu1 }
 0x13e   : > { %v1389_v41 = vpop.f32.mrb[3].mxu1 }
 0x13f   : > { %v915_v42 = vadd.f32 %v1387_v39, %v1935_v37  ;;  %v1390_v43 = vadd.f32 %v1389_v41, %v1388_v40 }
 0x141   : > { %979 = vst [vmem:[%s1939_s25 + $0x10] sm:$0xff] %v915_v42  ;;  %v918_v44 = vadd.f32 %v1390_v43, %v1935_v37 }
 0x143   : > { %982 = vst [vmem:[%s1939_s25 + $0x28] sm:$0xff] %v918_v44  ;;  %v1391_v45 = vpop.f32.mrb[4].mxu1 }
 0x144   : > { %v1392_v46 = vpop.f32.mrb[5].mxu1 }
 0x145   : > { %v1393_v47 = vadd.f32 %v1392_v46, %v1391_v45  ;;  %v1394_v48 = vpop.f32.mrb[6].mxu1 }
 0x146   : > { %v1395_v49 = vpop.f32.mrb[7].mxu1 }
 0x147   : > { %v923_v50 = vadd.f32 %v1393_v47, %v1935_v37  ;;  %v1396_v51 = vadd.f32 %v1395_v49, %v1394_v48 }
 0x149   : > { %985 = vst [vmem:[%s1939_s25 + $0x40] sm:$0xff] %v923_v50  ;;  %v926_v53 = vadd.f32 %v1396_v51, %v1935_v37 }
 0x14b   : > { %988 = vst [vmem:[%s1939_s25 + $0x58] sm:$0xff] %v926_v53  ;;  %v1397_v55 = vpop.f32.mrb[8].mxu1 }
 0x14c   : > { %v1398_v56 = vpop.f32.mrb[9].mxu1 }
 0x14d   : > { %v1399_v58 = vadd.f32 %v1398_v56, %v1397_v55  ;;  %v1400_v59 = vpop.f32.mrb[10].mxu1 }
 0x14e   : > { %v1401_v61 = vpop.f32.mrb[11].mxu1 }
 0x14f   : > { %v931_v62 = vadd.f32 %v1399_v58, %v1935_v37  ;;  %v1402_v63 = vadd.f32 %v1401_v61, %v1400_v59 }
 0x151   : > { %991 = vst [vmem:[%s1939_s25 + $0x70] sm:$0xff] %v931_v62  ;;  %v934_v3 = vadd.f32 %v1402_v63, %v1935_v37 }
 0x153   : > { %994 = vst [vmem:[%s1939_s25 + $0x88] sm:$0xff] %v934_v3  ;;  %v1403_v8 = vpop.f32.mrb[12].mxu1 }
 0x154   : > { %v1404_v10 = vpop.f32.mrb[13].mxu1 }
 0x155   : > { %v1405_v11 = vadd.f32 %v1404_v10, %v1403_v8  ;;  %v1406_v12 = vpop.f32.mrb[14].mxu1 }
 0x156   : > { %v1407_v13 = vpop.f32.mrb[15].mxu1 }
 0x157   : > { %v939_v14 = vadd.f32 %v1405_v11, %v1935_v37  ;;  %v1408_v15 = vadd.f32 %v1407_v13, %v1406_v12 }
 0x158   : > { %v801_v0 = vpop.f32.mrb[0].mxu0 }
 0x159   : > { %v802_v1 = vadd.f32 %v801_v0, %v1948_v57  ;;  %v803_v2 = vpop.f32.mrb[1].mxu0  ;;  %997 = vst [vmem:[%s1939_s25 + $0xa0] sm:$0xff] %v939_v14  ;;  %v942_v19 = vadd.f32 %v1408_v15, %v1935_v37 }
 0x15a   : > { %v804_v4 = vadd.f32 %v803_v2, %v1950_v60  ;;  %v805_v5 = vpop.f32.mrb[2].mxu0 }
 0x15b   : > { %977 = vst [vmem:[%s1939_s25] sm:$0xff] %v802_v1  ;;  %v806_v6 = vadd.f32 %v805_v5, %v1948_v57  ;;  %v807_v7 = vpop.f32.mrb[3].mxu0  ;;  %1000 = vst [vmem:[%s1939_s25 + $0xb8] sm:$0xff] %v942_v19  ;;  %v1409_v24 = vpop.f32.mrb[16].mxu1 }
 0x15c   : > { %978 = vst [vmem:[%s1939_s25 + $0x8] sm:$0xff] %v804_v4  ;;  %v808_v9 = vadd.f32 %v807_v7, %v1950_v60  ;;  %v1410_v26 = vpop.f32.mrb[17].mxu1 }
 0x15d   : > { %980 = vst [vmem:[%s1939_s25 + $0x18] sm:$0xff] %v806_v6  ;;  %v1411_v27 = vadd.f32 %v1410_v26, %v1409_v24  ;;  %v1412_v28 = vpop.f32.mrb[18].mxu1 }
 0x15e   : > { %981 = vst [vmem:[%s1939_s25 + $0x20] sm:$0xff] %v808_v9  ;;  %v1413_v29 = vpop.f32.mrb[19].mxu1 }
 0x15f   : > { %v947_v30 = vadd.f32 %v1411_v27, %v1935_v37  ;;  %v1414_v31 = vadd.f32 %v1413_v29, %v1412_v28 }
 0x160   : > { %v811_v16 = vpop.f32.mrb[4].mxu0 }
 0x161   : > { %v812_v17 = vadd.f32 %v811_v16, %v1948_v57  ;;  %v813_v18 = vpop.f32.mrb[5].mxu0  ;;  %1003 = vst [vmem:[%s1939_s25 + $0xd0] sm:$0xff] %v947_v30  ;;  %v950_v35 = vadd.f32 %v1414_v31, %v1935_v37 }
 0x162   : > { %v814_v20 = vadd.f32 %v813_v18, %v1950_v60  ;;  %v815_v21 = vpop.f32.mrb[6].mxu0 }
 0x163   : > { %983 = vst [vmem:[%s1939_s25 + $0x30] sm:$0xff] %v812_v17  ;;  %v816_v22 = vadd.f32 %v815_v21, %v1948_v57  ;;  %v817_v23 = vpop.f32.mrb[7].mxu0  ;;  %1006 = vst [vmem:[%s1939_s25 + $0xe8] sm:$0xff] %v950_v35  ;;  %v1415_v41 = vpop.f32.mrb[20].mxu1 }
 0x164   : > { %984 = vst [vmem:[%s1939_s25 + $0x38] sm:$0xff] %v814_v20  ;;  %v818_v25 = vadd.f32 %v817_v23, %v1950_v60  ;;  %v1416_v43 = vpop.f32.mrb[21].mxu1 }
 0x165   : > { %986 = vst [vmem:[%s1939_s25 + $0x48] sm:$0xff] %v816_v22  ;;  %v1417_v44 = vadd.f32 %v1416_v43, %v1415_v41  ;;  %v1418_v45 = vpop.f32.mrb[22].mxu1 }
 0x166   : > { %987 = vst [vmem:[%s1939_s25 + $0x50] sm:$0xff] %v818_v25  ;;  %v1419_v46 = vpop.f32.mrb[23].mxu1 }
 0x167   : > { %v955_v47 = vadd.f32 %v1417_v44, %v1935_v37  ;;  %v1420_v48 = vadd.f32 %v1419_v46, %v1418_v45  ;;  %v1052_v44 = vld [vmem:[%s1939_s25 + $0x8] sm:$0xff] (%p1634_p6)  ;;  %v1054_v45 = vld [vmem:[%s1939_s25 + $0x10] sm:$0xff] (%p1634_p6)  ;;  %v1058_v46 = vld [vmem:[%s1939_s25 + $0x20] sm:$0xff] (%p1634_p6) }
 0x168   : > { %v821_v32 = vpop.f32.mrb[8].mxu0  ;;  %1053 = vst [vmem:[%s2052_s27 + $0x8] sm:$0xff] (%p1634_p6), %v1052_v44  ;;  %1055 = vst [vmem:[%s2052_s27 + $0x10] sm:$0xff] (%p1634_p6), %v1054_v45 }
 0x169   : > { %v822_v33 = vadd.f32 %v821_v32, %v1948_v57  ;;  %v823_v34 = vpop.f32.mrb[9].mxu0  ;;  %1009 = vst [vmem:[%s1939_s25 + $0x100] sm:$0xff] %v955_v47  ;;  %v958_v52 = vadd.f32 %v1420_v48, %v1935_v37  ;;  %v1060_v47 = vld [vmem:[%s1939_s25 + $0x28] sm:$0xff] (%p1634_p6)  ;;  %1059 = vst [vmem:[%s2052_s27 + $0x38] sm:$0xff] (%p1634_p6), %v1058_v46 }
 0x16a   : > { %v824_v36 = vadd.f32 %v823_v34, %v1950_v60  ;;  %v825_v38 = vpop.f32.mrb[10].mxu0  ;;  %v1062_v48 = vld [vmem:[%s1939_s25 + $0x30] sm:$0xff] (%p1634_p6)  ;;  %1061 = vst [vmem:[%s2052_s27 + $0x40] sm:$0xff] (%p1634_p6), %v1060_v47 }
 0x16b   : > { %989 = vst [vmem:[%s1939_s25 + $0x60] sm:$0xff] %v822_v33  ;;  %v826_v39 = vadd.f32 %v825_v38, %v1948_v57  ;;  %v827_v40 = vpop.f32.mrb[11].mxu0  ;;  %1012 = vst [vmem:[%s1939_s25 + $0x118] sm:$0xff] %v958_v52  ;;  %v1421_v58 = vpop.f32.mrb[24].mxu1 }
 0x16c   : > { %990 = vst [vmem:[%s1939_s25 + $0x68] sm:$0xff] %v824_v36  ;;  %v828_v42 = vadd.f32 %v827_v40, %v1950_v60  ;;  %v1422_v61 = vpop.f32.mrb[25].mxu1  ;;  %1063 = vst [vmem:[%s2052_s27 + $0x60] sm:$0xff] (%p1634_p6), %v1062_v48 }
 0x16d   : > { %992 = vst [vmem:[%s1939_s25 + $0x78] sm:$0xff] %v826_v39  ;;  %v1423_v62 = vadd.f32 %v1422_v61, %v1421_v58  ;;  %v1424_v63 = vpop.f32.mrb[26].mxu1  ;;  %v1070_v52 = vld [vmem:[%s1939_s25 + $0x50] sm:$0xff] (%p1634_p6)  ;;  %v1084_v61 = vld [vmem:[%s1939_s25 + $0x88] sm:$0xff] (%p1634_p6) }
 0x16e   : > { %993 = vst [vmem:[%s1939_s25 + $0x80] sm:$0xff] %v828_v42  ;;  %v1425_v0 = vpop.f32.mrb[27].mxu1  ;;  %1071 = vst [vmem:[%s2052_s27 + $0x98] sm:$0xff] (%p1634_p6), %v1070_v52 }
 0x16f   : > { %v963_v1 = vadd.f32 %v1423_v62, %v1935_v37  ;;  %v1426_v2 = vadd.f32 %v1425_v0, %v1424_v63  ;;  %1085 = vst [vmem:[%s2052_s27 + $0x100] sm:$0xff] (%p1634_p6), %v1084_v61  ;;  %v1090_v0 = vld [vmem:[%s1939_s25 + $0xa0] sm:$0xff] (%p1634_p6) }
 0x170   : > { %v831_v49 = vpop.f32.mrb[12].mxu0  ;;  %1091 = vst [vmem:[%s2052_s27 + $0x130] sm:$0xff] (%p1634_p6), %v1090_v0 }
 0x171   : > { %v832_v50 = vadd.f32 %v831_v49, %v1948_v57  ;;  %v833_v51 = vpop.f32.mrb[13].mxu0  ;;  %1015 = vst [vmem:[%s1939_s25 + $0x130] sm:$0xff] %v963_v1  ;;  %v966_v6 = vadd.f32 %v1426_v2, %v1935_v37  ;;  %v1064_v49 = vld [vmem:[%s1939_s25 + $0x38] sm:$0xff] (%p1634_p6) }
 0x172   : > { %v834_v53 = vadd.f32 %v833_v51, %v1950_v60  ;;  %v835_v54 = vpop.f32.mrb[14].mxu0  ;;  %1065 = vst [vmem:[%s2052_s27 + $0x68] sm:$0xff] (%p1634_p6), %v1064_v49  ;;  %v1068_v51 = vld [vmem:[%s1939_s25 + $0x48] sm:$0xff] (%p1634_p6) }
 0x173   : > { %995 = vst [vmem:[%s1939_s25 + $0x90] sm:$0xff] %v832_v50  ;;  %v836_v55 = vadd.f32 %v835_v54, %v1948_v57  ;;  %v837_v56 = vpop.f32.mrb[15].mxu0  ;;  %1018 = vst [vmem:[%s1939_s25 + $0x148] sm:$0xff] %v966_v6  ;;  %v1427_v11 = vpop.f32.mrb[28].mxu1  ;;  %v1066_v50 = vld [vmem:[%s1939_s25 + $0x40] sm:$0xff] (%p1634_p6)  ;;  %v1102_v6 = vld [vmem:[%s1939_s25 + $0xd0] sm:$0xff] (%p1634_p6) }
 0x174   : > { %996 = vst [vmem:[%s1939_s25 + $0x98] sm:$0xff] %v834_v53  ;;  %v838_v59 = vadd.f32 %v837_v56, %v1950_v60  ;;  %v1428_v13 = vpop.f32.mrb[29].mxu1  ;;  %1067 = vst [vmem:[%s2052_s27 + $0x70] sm:$0xff] (%p1634_p6), %v1066_v50  ;;  %v1072_v53 = vld [vmem:[%s1939_s25 + $0x58] sm:$0xff] (%p1634_p6)  ;;  %v1074_v54 = vld [vmem:[%s1939_s25 + $0x60] sm:$0xff] (%p1634_p6) }
 0x175   : > { %998 = vst [vmem:[%s1939_s25 + $0xa8] sm:$0xff] %v836_v55  ;;  %v1429_v14 = vadd.f32 %v1428_v13, %v1427_v11  ;;  %v1430_v15 = vpop.f32.mrb[30].mxu1  ;;  %1069 = vst [vmem:[%s2052_s27 + $0x90] sm:$0xff] (%p1634_p6), %v1068_v51  ;;  %v1076_v55 = vld [vmem:[%s1939_s25 + $0x68] sm:$0xff] (%p1634_p6)  ;;  %v1078_v56 = vld [vmem:[%s1939_s25 + $0x70] sm:$0xff] (%p1634_p6) }
 0x176   : > { %999 = vst [vmem:[%s1939_s25 + $0xb0] sm:$0xff] %v838_v59  ;;  %v1431_v16 = vpop.f32.mrb[31].mxu1  ;;  %1073 = vst [vmem:[%s2052_s27 + $0xa0] sm:$0xff] (%p1634_p6), %v1072_v53  ;;  %v1080_v58 = vld [vmem:[%s1939_s25 + $0x78] sm:$0xff] (%p1634_p6)  ;;  %v1082_v59 = vld [vmem:[%s1939_s25 + $0x80] sm:$0xff] (%p1634_p6) }
 0x177   : > { %v971_v17 = vadd.f32 %v1429_v14, %v1935_v37  ;;  %v1432_v18 = vadd.f32 %v1431_v16, %v1430_v15  ;;  %1075 = vst [vmem:[%s2052_s27 + $0xc0] sm:$0xff] (%p1634_p6), %v1074_v54  ;;  %1077 = vst [vmem:[%s2052_s27 + $0xc8] sm:$0xff] (%p1634_p6), %v1076_v55  ;;  %v1120_v15 = vld [vmem:[%s1939_s25 + $0x118] sm:$0xff] (%p1634_p6) }
 0x178   : > { %v841_v3 = vpop.f32.mrb[16].mxu0  ;;  %1079 = vst [vmem:[%s2052_s27 + $0xd0] sm:$0xff] (%p1634_p6), %v1078_v56  ;;  %1081 = vst [vmem:[%s2052_s27 + $0xf0] sm:$0xff] (%p1634_p6), %v1080_v58 }
 0x179   : > { %v842_v4 = vadd.f32 %v841_v3, %v1948_v57  ;;  %v843_v5 = vpop.f32.mrb[17].mxu0  ;;  %1021 = vst [vmem:[%s1939_s25 + $0x160] sm:$0xff] %v971_v17  ;;  %v974_v22 = vadd.f32 %v1432_v18, %v1935_v37  ;;  %1083 = vst [vmem:[%s2052_s27 + $0xf8] sm:$0xff] (%p1634_p6), %v1082_v59  ;;  %v1096_v3 = vld [vmem:[%s1939_s25 + $0xb8] sm:$0xff] (%p1634_p6)  ;;  %v1126_v18 = vld [vmem:[%s1939_s25 + $0x130] sm:$0xff] (%p1634_p6) }
 0x17a   : > { %v844_v7 = vadd.f32 %v843_v5, %v1950_v60  ;;  %v845_v8 = vpop.f32.mrb[18].mxu0  ;;  %v1086_v62 = vld [vmem:[%s1939_s25 + $0x90] sm:$0xff] (%p1634_p6)  ;;  %1097 = vst [vmem:[%s2052_s27 + $0x160] sm:$0xff] (%p1634_p6), %v1096_v3  ;;  %1103 = vst [vmem:[%s2052_s27 + $0x190] sm:$0xff] (%p1634_p6), %v1102_v6 }
 0x17b   : > { %1001 = vst [vmem:[%s1939_s25 + $0xc0] sm:$0xff] %v842_v4  ;;  %v846_v9 = vadd.f32 %v845_v8, %v1948_v57  ;;  %v847_v10 = vpop.f32.mrb[19].mxu0  ;;  %1024 = vst [vmem:[%s1939_s25 + $0x178] sm:$0xff] %v974_v22  ;;  %v1088_v63 = vld [vmem:[%s1939_s25 + $0x98] sm:$0xff] (%p1634_p6) }
 0x17c   : > { %1002 = vst [vmem:[%s1939_s25 + $0xc8] sm:$0xff] %v844_v7  ;;  %v848_v12 = vadd.f32 %v847_v10, %v1950_v60  ;;  %1087 = vst [vmem:[%s2052_s27 + $0x120] sm:$0xff] (%p1634_p6), %v1086_v62  ;;  %v1092_v1 = vld [vmem:[%s1939_s25 + $0xa8] sm:$0xff] (%p1634_p6) }
 0x17d   : > { %1004 = vst [vmem:[%s1939_s25 + $0xd8] sm:$0xff] %v846_v9  ;;  %1089 = vst [vmem:[%s2052_s27 + $0x128] sm:$0xff] (%p1634_p6), %v1088_v63  ;;  %v1094_v2 = vld [vmem:[%s1939_s25 + $0xb0] sm:$0xff] (%p1634_p6)  ;;  %v1108_v9 = vld [vmem:[%s1939_s25 + $0xe8] sm:$0xff] (%p1634_p6) }
 0x17e   : > { %1005 = vst [vmem:[%s1939_s25 + $0xe0] sm:$0xff] %v848_v12  ;;  %1093 = vst [vmem:[%s2052_s27 + $0x150] sm:$0xff] (%p1634_p6), %v1092_v1  ;;  %v1114_v12 = vld [vmem:[%s1939_s25 + $0x100] sm:$0xff] (%p1634_p6) }
 0x17f   : > { %1095 = vst [vmem:[%s2052_s27 + $0x158] sm:$0xff] (%p1634_p6), %v1094_v2  ;;  %1109 = vst [vmem:[%s2052_s27 + $0x1c0] sm:$0xff] (%p1634_p6), %v1108_v9 }
 0x180   : > { %v851_v19 = vpop.f32.mrb[20].mxu0  ;;  %1115 = vst [vmem:[%s2052_s27 + $0x1f0] sm:$0xff] (%p1634_p6), %v1114_v12  ;;  %1121 = vst [vmem:[%s2052_s27 + $0x220] sm:$0xff] (%p1634_p6), %v1120_v15 }
 0x181   : > { %v852_v20 = vadd.f32 %v851_v19, %v1948_v57  ;;  %v853_v21 = vpop.f32.mrb[21].mxu0  ;;  %1127 = vst [vmem:[%s2052_s27 + $0x250] sm:$0xff] (%p1634_p6), %v1126_v18 }
 0x182   : > { %v854_v23 = vadd.f32 %v853_v21, %v1950_v60  ;;  %v855_v24 = vpop.f32.mrb[22].mxu0  ;;  %v1098_v4 = vld [vmem:[%s1939_s25 + $0xc0] sm:$0xff] (%p1634_p6)  ;;  %v1132_v21 = vld [vmem:[%s1939_s25 + $0x148] sm:$0xff] (%p1634_p6) }
 0x183   : > { %1007 = vst [vmem:[%s1939_s25 + $0xf0] sm:$0xff] %v852_v20  ;;  %v856_v25 = vadd.f32 %v855_v24, %v1948_v57  ;;  %v857_v26 = vpop.f32.mrb[23].mxu0  ;;  %v1100_v5 = vld [vmem:[%s1939_s25 + $0xc8] sm:$0xff] (%p1634_p6)  ;;  %1099 = vst [vmem:[%s2052_s27 + $0x180] sm:$0xff] (%p1634_p6), %v1098_v4  ;;  %v1138_v24 = vld [vmem:[%s1939_s25 + $0x160] sm:$0xff] (%p1634_p6) }
 0x184   : > { %1008 = vst [vmem:[%s1939_s25 + $0xf8] sm:$0xff] %v854_v23  ;;  %v858_v27 = vadd.f32 %v857_v26, %v1950_v60  ;;  %1101 = vst [vmem:[%s2052_s27 + $0x188] sm:$0xff] (%p1634_p6), %v1100_v5  ;;  %v1104_v7 = vld [vmem:[%s1939_s25 + $0xd8] sm:$0xff] (%p1634_p6) }
 0x185   : > { %1010 = vst [vmem:[%s1939_s25 + $0x108] sm:$0xff] %v856_v25  ;;  %v1106_v8 = vld [vmem:[%s1939_s25 + $0xe0] sm:$0xff] (%p1634_p6)  ;;  %1105 = vst [vmem:[%s2052_s27 + $0x1b0] sm:$0xff] (%p1634_p6), %v1104_v7 }
 0x186   : > { %1011 = vst [vmem:[%s1939_s25 + $0x110] sm:$0xff] %v858_v27  ;;  %1107 = vst [vmem:[%s2052_s27 + $0x1b8] sm:$0xff] (%p1634_p6), %v1106_v8  ;;  %v1144_v27 = vld [vmem:[%s1939_s25 + $0x178] sm:$0xff] (%p1634_p6) }
 0x187   : > { %1133 = vst [vmem:[%s2052_s27 + $0x280] sm:$0xff] (%p1634_p6), %v1132_v21  ;;  %1139 = vst [vmem:[%s2052_s27 + $0x2b0] sm:$0xff] (%p1634_p6), %v1138_v24 }
 0x188   : > { %v861_v28 = vpop.f32.mrb[24].mxu0  ;;  %1145 = vst [vmem:[%s2052_s27 + $0x2e0] sm:$0xff] (%p1634_p6), %v1144_v27 }
 0x189   : > { %v862_v37 = vadd.f32 %v861_v28, %v1948_v57  ;;  %v863_v29 = vpop.f32.mrb[25].mxu0 }
 0x18a   : > { %v864_v30 = vadd.f32 %v863_v29, %v1950_v60  ;;  %v865_v31 = vpop.f32.mrb[26].mxu0  ;;  %v1110_v10 = vld [vmem:[%s1939_s25 + $0xf0] sm:$0xff] (%p1634_p6) }
 0x18b   : > { %1013 = vst [vmem:[%s1939_s25 + $0x120] sm:$0xff] %v862_v37  ;;  %v866_v32 = vadd.f32 %v865_v31, %v1948_v57  ;;  %v867_v33 = vpop.f32.mrb[27].mxu0  ;;  %v1112_v11 = vld [vmem:[%s1939_s25 + $0xf8] sm:$0xff] (%p1634_p6)  ;;  %1111 = vst [vmem:[%s2052_s27 + $0x1e0] sm:$0xff] (%p1634_p6), %v1110_v10 }
 0x18c   : > { %1014 = vst [vmem:[%s1939_s25 + $0x128] sm:$0xff] %v864_v30  ;;  %v868_v34 = vadd.f32 %v867_v33, %v1950_v60  ;;  %1113 = vst [vmem:[%s2052_s27 + $0x1e8] sm:$0xff] (%p1634_p6), %v1112_v11  ;;  %v1116_v13 = vld [vmem:[%s1939_s25 + $0x108] sm:$0xff] (%p1634_p6) }
 0x18d   : > { %1016 = vst [vmem:[%s1939_s25 + $0x138] sm:$0xff] %v866_v32  ;;  %v1118_v14 = vld [vmem:[%s1939_s25 + $0x110] sm:$0xff] (%p1634_p6)  ;;  %1117 = vst [vmem:[%s2052_s27 + $0x210] sm:$0xff] (%p1634_p6), %v1116_v13 }
 0x18e   : > { %1017 = vst [vmem:[%s1939_s25 + $0x140] sm:$0xff] %v868_v34  ;;  %1119 = vst [vmem:[%s2052_s27 + $0x218] sm:$0xff] (%p1634_p6), %v1118_v14 }
 0x190   : > { %v871_v35 = vpop.f32.mrb[28].mxu0  ;;  %1031 = sbr.rel (!%p1634_p6) target bundleno = 415 (0x19f), region = 62 }
 0x191   : > { %v872_v36 = vadd.f32 %v871_v35, %v1948_v57  ;;  %v873_v38 = vpop.f32.mrb[29].mxu0 }
 0x192   : > { %v874_v39 = vadd.f32 %v873_v38, %v1950_v60  ;;  %v875_v40 = vpop.f32.mrb[30].mxu0  ;;  %v1122_v16 = vld [vmem:[%s1939_s25 + $0x120] sm:$0xff] (%p1634_p6) }
 0x193   : > { %1019 = vst [vmem:[%s1939_s25 + $0x150] sm:$0xff] %v872_v36  ;;  %v876_v41 = vadd.f32 %v875_v40, %v1948_v57  ;;  %v877_v42 = vpop.f32.mrb[31].mxu0  ;;  %v1050_v57 = vld [vmem:[%s1939_s25] sm:$0xff] (%p1634_p6)  ;;  %v1124_v17 = vld [vmem:[%s1939_s25 + $0x128] sm:$0xff] (%p1634_p6)  ;;  %1123 = vst [vmem:[%s2052_s27 + $0x240] sm:$0xff] (%p1634_p6), %v1122_v16 }
 0x194   : > { %1020 = vst [vmem:[%s1939_s25 + $0x158] sm:$0xff] %v874_v39  ;;  %v878_v43 = vadd.f32 %v877_v42, %v1950_v60  ;;  %v1056_v60 = vld [vmem:[%s1939_s25 + $0x18] sm:$0xff] (%p1634_p6)  ;;  %1051 = vst [vmem:[%s2052_s27] sm:$0xff] (%p1634_p6), %v1050_v57 }
 0x195   : > { %1022 = vst [vmem:[%s1939_s25 + $0x168] sm:$0xff] %v876_v41  ;;  %1057 = vst [vmem:[%s2052_s27 + $0x30] sm:$0xff] (%p1634_p6), %v1056_v60  ;;  %v1128_v19 = vld [vmem:[%s1939_s25 + $0x138] sm:$0xff] (%p1634_p6)  ;;  %v1130_v20 = vld [vmem:[%s1939_s25 + $0x140] sm:$0xff] (%p1634_p6) }
 0x196   : > { %1023 = vst [vmem:[%s1939_s25 + $0x170] sm:$0xff] %v878_v43  ;;  %1125 = vst [vmem:[%s2052_s27 + $0x248] sm:$0xff] (%p1634_p6), %v1124_v17 }
 0x197   : > { %1129 = vst [vmem:[%s2052_s27 + $0x270] sm:$0xff] %v1128_v19  ;;  %1131 = vst [vmem:[%s2052_s27 + $0x278] sm:$0xff] %v1130_v20 }
 0x19a   : > { %v1134_v22 = vld [vmem:[%s1939_s25 + $0x150] sm:$0xff] }
 0x19b   : > { %v1136_v23 = vld [vmem:[%s1939_s25 + $0x158] sm:$0xff]  ;;  %1135 = vst [vmem:[%s2052_s27 + $0x2a0] sm:$0xff] %v1134_v22 }
 0x19c   : > { %1137 = vst [vmem:[%s2052_s27 + $0x2a8] sm:$0xff] %v1136_v23  ;;  %v1140_v25 = vld [vmem:[%s1939_s25 + $0x168] sm:$0xff] }
 0x19d   : > { %v1142_v26 = vld [vmem:[%s1939_s25 + $0x170] sm:$0xff]  ;;  %1141 = vst [vmem:[%s2052_s27 + $0x2d0] sm:$0xff] %v1140_v25 }
 0x19e   : > { %1143 = vst [vmem:[%s2052_s27 + $0x2d8] sm:$0xff] %v1142_v26 }
 0x19f PF: > { %s13_s16 = sadd.s32 1, %s1577_s16   ;;  %s2164_s12 = smov %s1565_s13 }
 0x1a0   : > { %p10_p12 = scmp.ge.s32.totalorder %s13_s16, 4   ;;  %s2165_s13 = smov %s1639_s22 }
 0x1a1   : > { %s2166_s14 = smov %s1573_s15  ;;  %s2167_s15 = smov %s2169_s17 }
 0x1a2   :  { %12 = sbr.rel (!%p10_p12) target bundleno = 3 (0x3), region = 128 }

// kernel: _lambda_.6
= control target key start
LH: loop header
LB: loop body
LE: loop exit
PB: predicated region body
PF: predicated region fallthrough
CT: control target
= control target key end

     0   :  { %v21333_v1 = vmov 0.0|0.0   ;;  %s21325_s1 = inlined_call_operand.vmem [shape: bf16[256,768], index: 1, kind: input, shape index: {}]   ;;  %s21326_s0 = inlined_call_operand.vmem [shape: f32[16,8,768], index: 0, kind: input, shape index: {}]   ;;  %s21327_s2 = inlined_call_operand.vmem [shape: f32[1,256], index: 2, kind: input, shape index: {}]   ;;  %s21328_s3 = inlined_call_operand.vmem [shape: f32[16,8,256], index: 3, kind: output, shape index: {}]  }
   0x1   :  { %v15334_v0 = vld [vmem:[%s21325_s1 + $0x4] ss:$24 sps:$4 sm:$0xff]   ;;  %639 = vmatprep.mubr.bf16.mxu0 %v21333_v1  ;;  %680 = vmatprep.mubr.bf16.mxu1 %v21333_v1  ;;  %v15341_v2 = vld [vmem:[%s21325_s1] ss:$24 sps:$4 sm:$0xff]   ;;  %v15347_v3 = vld [vmem:[%s21325_s1 + $0x34] ss:$24 sps:$4 sm:$0xff]  }
   0x2   :  { %607 = vmatprep.subr.bf16.mxu0 %v15334_v0  ;;  %v15353_v4 = vld [vmem:[%s21325_s1 + $0x30] ss:$24 sps:$4 sm:$0xff]   ;;  %v15359_v5 = vld [vmem:[%s21325_s1 + $0x64] ss:$24 sps:$4 sm:$0xff]   ;;  %v15365_v6 = vld [vmem:[%s21325_s1 + $0x60] ss:$24 sps:$4 sm:$0xff]  }
   0x3   :  { %608 = vmatpush1.bf16.msra.mxu0 %v15341_v2  ;;  %v15371_v7 = vld [vmem:[%s21325_s1 + $0x94] ss:$24 sps:$4 sm:$0xff]   ;;  %v15377_v8 = vld [vmem:[%s21325_s1 + $0x90] ss:$24 sps:$4 sm:$0xff]   ;;  %v15383_v9 = vld [vmem:[%s21325_s1 + $0xc4] ss:$24 sps:$4 sm:$0xff]  }
   0x4   :  { %609 = vmatprep.subr.bf16.mxu0 %v15347_v3  ;;  %v15389_v10 = vld [vmem:[%s21325_s1 + $0xc0] ss:$24 sps:$4 sm:$0xff]   ;;  %v15395_v11 = vld [vmem:[%s21325_s1 + $0xf4] ss:$24 sps:$4 sm:$0xff]   ;;  %v15401_v12 = vld [vmem:[%s21325_s1 + $0xf0] ss:$24 sps:$4 sm:$0xff]  }
   0x5   :  { %v15406_v13 = vld [vmem:[%s21325_s1 + $0xc] ss:$24 sps:$4 sm:$0xff]   ;;  %v15411_v14 = vld [vmem:[%s21325_s1 + $0x8] ss:$24 sps:$4 sm:$0xff]   ;;  %v15423_v16 = vld [vmem:[%s21325_s1 + $0x3c] ss:$24 sps:$4 sm:$0xff]  }
   0x6   :  { %v15417_v15 = vld [vmem:[%s21325_s1 + $0x124] ss:$24 sps:$4 sm:$0xff]   ;;  %648 = vmatprep.subr.bf16.mxu1 %v15406_v13  ;;  %v15429_v17 = vld [vmem:[%s21325_s1 + $0x38] ss:$24 sps:$4 sm:$0xff]   ;;  %v15442_v19 = vld [vmem:[%s21325_s1 + $0x154] ss:$24 sps:$4 sm:$0xff]  }
   0x7   :  { %610 = vmatpush1.bf16.msra.mxu0 %v15353_v4  ;;  %649 = vmatpush1.bf16.msra.mxu1 %v15411_v14  ;;  %v15435_v18 = vld [vmem:[%s21325_s1 + $0x120] ss:$24 sps:$4 sm:$0xff]   ;;  %v15447_v20 = vld [vmem:[%s21325_s1 + $0x6c] ss:$24 sps:$4 sm:$0xff]   ;;  %v15459_v22 = vld [vmem:[%s21325_s1 + $0x150] ss:$24 sps:$4 sm:$0xff]  }
   0x8   :  { %611 = vmatprep.subr.bf16.mxu0 %v15359_v5  ;;  %650 = vmatprep.subr.bf16.mxu1 %v15423_v16  ;;  %v15453_v21 = vld [vmem:[%s21325_s1 + $0x68] ss:$24 sps:$4 sm:$0xff]   ;;  %v15465_v23 = vld [vmem:[%s21325_s1 + $0x9c] ss:$24 sps:$4 sm:$0xff]   ;;  %v15482_v26 = vld [vmem:[%s21325_s1 + $0x98] ss:$24 sps:$4 sm:$0xff]  }
   0x9   :  { %v15471_v24 = vld [vmem:[%s21325_s1 + $0x184] ss:$24 sps:$4 sm:$0xff]   ;;  %v15476_v25 = vld [vmem:[%s21325_s1 + $0x180] ss:$24 sps:$4 sm:$0xff]   ;;  %v15495_v28 = vld [vmem:[%s21325_s1 + $0x1b4] ss:$24 sps:$4 sm:$0xff]  }
   0xa   :  { %v15489_v27 = vld [vmem:[%s21325_s1 + $0xcc] ss:$24 sps:$4 sm:$0xff]   ;;  %v15501_v29 = vld [vmem:[%s21325_s1 + $0xc8] ss:$24 sps:$4 sm:$0xff]   ;;  %v15513_v31 = vld [vmem:[%s21325_s1 + $0xfc] ss:$24 sps:$4 sm:$0xff]  }
   0xb   :  { %612 = vmatpush1.bf16.msra.mxu0 %v15365_v6  ;;  %651 = vmatpush1.bf16.msra.mxu1 %v15429_v17  ;;  %v15507_v30 = vld [vmem:[%s21325_s1 + $0x1b0] ss:$24 sps:$4 sm:$0xff]   ;;  %v15519_v32 = vld [vmem:[%s21325_s1 + $0x1e4] ss:$24 sps:$4 sm:$0xff]   ;;  %v15524_v33 = vld [vmem:[%s21325_s1 + $0x1e0] ss:$24 sps:$4 sm:$0xff]  }
   0xc   :  { %613 = vmatprep.subr.bf16.mxu0 %v15371_v7  ;;  %652 = vmatprep.subr.bf16.mxu1 %v15447_v20  ;;  %v15530_v34 = vld [vmem:[%s21325_s1 + $0xf8] ss:$24 sps:$4 sm:$0xff]   ;;  %v15537_v35 = vld [vmem:[%s21325_s1 + $0x12c] ss:$24 sps:$4 sm:$0xff]   ;;  %v15549_v37 = vld [vmem:[%s21325_s1 + $0x128] ss:$24 sps:$4 sm:$0xff]  }
   0xd   :  { %v15543_v36 = vld [vmem:[%s21325_s1 + $0x214] ss:$24 sps:$4 sm:$0xff]   ;;  %v15555_v38 = vld [vmem:[%s21325_s1 + $0x210] ss:$24 sps:$4 sm:$0xff]   ;;  %v15567_v40 = vld [vmem:[%s21325_s1 + $0x244] ss:$24 sps:$4 sm:$0xff]  }
   0xe   :  { %v15561_v39 = vld [vmem:[%s21325_s1 + $0x15c] ss:$24 sps:$4 sm:$0xff]   ;;  %v15572_v41 = vld [vmem:[%s21325_s1 + $0x240] ss:$24 sps:$4 sm:$0xff]   ;;  %v15585_v43 = vld [vmem:[%s21325_s1 + $0x18c] ss:$24 sps:$4 sm:$0xff]  }
   0xf   :  { %614 = vmatpush1.bf16.msra.mxu0 %v15377_v8  ;;  %653 = vmatpush1.bf16.msra.mxu1 %v15453_v21  ;;  %v15578_v42 = vld [vmem:[%s21325_s1 + $0x158] ss:$24 sps:$4 sm:$0xff]   ;;  %v15591_v44 = vld [vmem:[%s21325_s1 + $0x274] ss:$24 sps:$4 sm:$0xff]   ;;  %v15597_v45 = vld [vmem:[%s21325_s1 + $0x188] ss:$24 sps:$4 sm:$0xff]  }
  0x10   :  { %615 = vmatprep.subr.bf16.mxu0 %v15383_v9  ;;  %654 = vmatprep.subr.bf16.mxu1 %v15465_v23  ;;  %v15603_v46 = vld [vmem:[%s21325_s1 + $0x270] ss:$24 sps:$4 sm:$0xff]   ;;  %v15609_v47 = vld [vmem:[%s21325_s1 + $0x1bc] ss:$24 sps:$4 sm:$0xff]   ;;  %v15620_v49 = vld [vmem:[%s21325_s1 + $0x2a0] ss:$24 sps:$4 sm:$0xff]  }
  0x11   :  { %v15615_v48 = vld [vmem:[%s21325_s1 + $0x2a4] ss:$24 sps:$4 sm:$0xff]   ;;  %v15626_v50 = vld [vmem:[%s21325_s1 + $0x1b8] ss:$24 sps:$4 sm:$0xff]   ;;  %v15639_v52 = vld [vmem:[%s21325_s1 + $0x2d4] ss:$24 sps:$4 sm:$0xff]  }
  0x12   :  { %21516 = vst [vmem:[#allocation3_spill] sm:$0xff] %v15626_v50  ;;  %v15633_v51 = vld [vmem:[%s21325_s1 + $0x1ec] ss:$24 sps:$4 sm:$0xff]   ;;  %v15645_v53 = vld [vmem:[%s21325_s1 + $0x1e8] ss:$24 sps:$4 sm:$0xff]  }
  0x13   :  { %616 = vmatpush1.bf16.msra.mxu0 %v15389_v10  ;;  %655 = vmatpush1.bf16.msra.mxu1 %v15482_v26  ;;  %21517 = vst [vmem:[#allocation4_spill] sm:$0xff] %v15633_v51  ;;  %21518 = vst [vmem:[#allocation5_spill] sm:$0xff] %v15645_v53  ;;  %v15651_v54 = vld [vmem:[%s21325_s1 + $0x2d0] ss:$24 sps:$4 sm:$0xff]   ;;  %v15657_v55 = vld [vmem:[%s21325_s1 + $0x21c] ss:$24 sps:$4 sm:$0xff]  }
  0x14   :  { %617 = vmatprep.subr.bf16.mxu0 %v15395_v11  ;;  %656 = vmatprep.subr.bf16.mxu1 %v15489_v27  ;;  %21519 = vst [vmem:[#allocation6_spill] sm:$0xff] %v15657_v55  ;;  %v15663_v56 = vld [vmem:[%s21325_s1 + $0x14] ss:$24 sps:$4 sm:$0xff]   ;;  %v13866_v57 = vld [vmem:[%s21325_s1 + $0x10] ss:$24 sps:$4 sm:$0xff]  }
  0x15   :  { %v15672_v58 = vld [vmem:[%s21325_s1 + $0x218] ss:$24 sps:$4 sm:$0xff]   ;;  %v13874_v59 = vld [vmem:[%s21325_s1 + $0x44] ss:$24 sps:$4 sm:$0xff]   ;;  %v15688_v61 = vld [vmem:[%s21325_s1 + $0x248] ss:$24 sps:$4 sm:$0xff]  }
  0x16   :  { %v15682_v60 = vld [vmem:[%s21325_s1 + $0x24c] ss:$24 sps:$4 sm:$0xff]   ;;  %21521 = vst [vmem:[#allocation8_spill] sm:$0xff] %v15688_v61  ;;  %v13872_v62 = vld [vmem:[%s21325_s1 + $0x40] ss:$24 sps:$4 sm:$0xff]  }
  0x17   :  { %618 = vmatpush1.bf16.msra.mxu0 %v15401_v12  ;;  %657 = vmatpush1.bf16.msra.mxu1 %v15501_v29  ;;  %21520 = vst [vmem:[#allocation7_spill] sm:$0xff] %v15682_v60  ;;  %v15696_v63 = vld [vmem:[%s21325_s1 + $0x27c] ss:$24 sps:$4 sm:$0xff]  }
  0x18   :  { %619 = vmatprep.subr.bf16.mxu0 %v15417_v15  ;;  %658 = vmatprep.subr.bf16.mxu1 %v15513_v31  ;;  %21522 = vst [vmem:[#allocation9_spill] sm:$0xff] %v15696_v63 }
  0x1b   :  { %620 = vmatpush1.bf16.msra.mxu0 %v15435_v18  ;;  %659 = vmatpush1.bf16.msra.mxu1 %v15530_v34 }
  0x1c   :  { %621 = vmatprep.subr.bf16.mxu0 %v15442_v19  ;;  %660 = vmatprep.subr.bf16.mxu1 %v15537_v35 }
  0x1f   :  { %622 = vmatpush1.bf16.msra.mxu0 %v15459_v22  ;;  %661 = vmatpush1.bf16.msra.mxu1 %v15549_v37 }
  0x20   :  { %623 = vmatprep.subr.bf16.mxu0 %v15471_v24  ;;  %662 = vmatprep.subr.bf16.mxu1 %v15561_v39 }
  0x23   :  { %624 = vmatpush1.bf16.msra.mxu0 %v15476_v25  ;;  %663 = vmatpush1.bf16.msra.mxu1 %v15578_v42 }
  0x24   :  { %625 = vmatprep.subr.bf16.mxu0 %v15495_v28  ;;  %664 = vmatprep.subr.bf16.mxu1 %v15585_v43 }
  0x27   :  { %626 = vmatpush1.bf16.msra.mxu0 %v15507_v30  ;;  %665 = vmatpush1.bf16.msra.mxu1 %v15597_v45 }
  0x28   :  { %627 = vmatprep.subr.bf16.mxu0 %v15519_v32  ;;  %666 = vmatprep.subr.bf16.mxu1 %v15609_v47 }
  0x2b   :  { %628 = vmatpush1.bf16.msra.mxu0 %v15524_v33  ;;  %667 = vmatpush1.bf16.msra.mxu1 %v15626_v50  ;;  %v15716_v50 = vld [vmem:[%s21325_s1 + $0x2ac] ss:$24 sps:$4 sm:$0xff]  }
  0x2c   :  { %629 = vmatprep.subr.bf16.mxu0 %v15543_v36  ;;  %668 = vmatprep.subr.bf16.mxu1 %v15633_v51  ;;  %v13878_v51 = vld [vmem:[%s21325_s1 + $0x70] ss:$24 sps:$4 sm:$0xff]  }
  0x2f   :  { %630 = vmatpush1.bf16.msra.mxu0 %v15555_v38  ;;  %669 = vmatpush1.bf16.msra.mxu1 %v15645_v53  ;;  %v15707_v53 = vld [vmem:[%s21325_s1 + $0x278] ss:$24 sps:$4 sm:$0xff]  }
  0x30   :  { %631 = vmatprep.subr.bf16.mxu0 %v15567_v40  ;;  %670 = vmatprep.subr.bf16.mxu1 %v15657_v55  ;;  %v13880_v55 = vld [vmem:[%s21325_s1 + $0x74] ss:$24 sps:$4 sm:$0xff]  }
  0x33   :  { %632 = vmatpush1.bf16.msra.mxu0 %v15572_v41  ;;  %671 = vmatpush1.bf16.msra.mxu1 %v15672_v58 }
  0x34   :  { %633 = vmatprep.subr.bf16.mxu0 %v15591_v44  ;;  %672 = vmatprep.subr.bf16.mxu1 %v15682_v60  ;;  %v15734_v60 = vld [vmem:[%s21325_s1 + $0x2dc] ss:$24 sps:$4 sm:$0xff]  }
  0x35   :  { %21523 = vst [vmem:[#allocation10_spill] sm:$0xff] %v15734_v60 }
  0x37   :  { %634 = vmatpush1.bf16.msra.mxu0 %v15603_v46  ;;  %673 = vmatpush1.bf16.msra.mxu1 %v15688_v61  ;;  %v13898_v61 = vld [vmem:[%s21325_s1 + $0x104] ss:$24 sps:$4 sm:$0xff]  }
  0x38   :  { %635 = vmatprep.subr.bf16.mxu0 %v15615_v48  ;;  %674 = vmatprep.subr.bf16.mxu1 %v15696_v63  ;;  %v13890_v63 = vld [vmem:[%s21325_s1 + $0xd0] ss:$24 sps:$4 sm:$0xff]  }
  0x3b   :  { %636 = vmatpush1.bf16.msra.mxu0 %v15620_v49  ;;  %675 = vmatpush1.bf16.msra.mxu1 %v15707_v53 }
  0x3c   :  { %637 = vmatprep.subr.bf16.mxu0 %v15639_v52  ;;  %676 = vmatprep.subr.bf16.mxu1 %v15716_v50 }
  0x3f   :  { %638 = vmatpush1.bf16.msra.mxu0 %v15651_v54 }
  0x40   :  { %689 = vmatprep.subr.bf16.mxu0 %v15663_v56 }
  0x42   :  { %640 = vmatmul.mubr.bf16.vlgmr.msra.gmra.mrb[0].mxu0 %v21333_v1 }
  0x43   :  { %690 = vmatpush1.bf16.msra.mxu0 %v13866_v57  ;;  %721 = vmatprep.mubr.bf16.mxu0 %v21333_v1  ;;  %v13886_v57 = vld [vmem:[%s21325_s1 + $0xa4] ss:$24 sps:$4 sm:$0xff]   ;;  %v13884_v1 = vld [vmem:[%s21325_s1 + $0xa0] ss:$24 sps:$4 sm:$0xff]  }
  0x44   :  { %691 = vmatprep.subr.bf16.mxu0 %v13874_v59  ;;  %v15726_v59 = vld [vmem:[%s21325_s1 + $0x2a8] ss:$24 sps:$4 sm:$0xff]  }
  0x45   :  { %677 = vmatpush1.bf16.msra.mxu1 %v15726_v59 }
  0x46   :  { %678 = vmatprep.subr.bf16.mxu1 %v15734_v60  ;;  %v21524_v60 = vmov 0.0|0.0  }
  0x47   :  { %692 = vmatpush1.bf16.msra.mxu0 %v13872_v62  ;;  %v13892_v62 = vld [vmem:[%s21325_s1 + $0xd4] ss:$24 sps:$4 sm:$0xff]  }
  0x48   :  { %693 = vmatprep.subr.bf16.mxu0 %v13880_v55  ;;  %v15744_v55 = vld [vmem:[%s21325_s1 + $0x2d8] ss:$24 sps:$4 sm:$0xff]  }
  0x49   :  { %679 = vmatpush1.bf16.msra.mxu1 %v15744_v55 }
  0x4a   :  { %1370 = vmatprep.subr.bf16.mxu1 %v15334_v0  ;;  %v13908_v0 = vld [vmem:[%s21325_s1 + $0x160] ss:$24 sps:$4 sm:$0xff]  }
  0x4b   :  { %694 = vmatpush1.bf16.msra.mxu0 %v13878_v51  ;;  %v13896_v51 = vld [vmem:[%s21325_s1 + $0x100] ss:$24 sps:$4 sm:$0xff]  }
  0x4c   :  { %695 = vmatprep.subr.bf16.mxu0 %v13886_v57  ;;  %v13904_v57 = vld [vmem:[%s21325_s1 + $0x134] ss:$24 sps:$4 sm:$0xff]   ;;  %681 = vmatmul.mubr.bf16.vlgmr.msra.gmra.mrb[0].mxu1 %v21524_v60 }
  0x4d   :  { %1371 = vmatpush1.bf16.msra.mxu1 %v15341_v2  ;;  %v13914_v2 = vld [vmem:[%s21325_s1 + $0x190] ss:$24 sps:$4 sm:$0xff]  }
  0x4e   :  { %1372 = vmatprep.subr.bf16.mxu1 %v15347_v3  ;;  %v13922_v3 = vld [vmem:[%s21325_s1 + $0x1c4] ss:$24 sps:$4 sm:$0xff]  }
  0x4f   :  { %696 = vmatpush1.bf16.msra.mxu0 %v13884_v1  ;;  %v13902_v1 = vld [vmem:[%s21325_s1 + $0x130] ss:$24 sps:$4 sm:$0xff]  }
  0x50   :  { %697 = vmatprep.subr.bf16.mxu0 %v13892_v62  ;;  %v13910_v62 = vld [vmem:[%s21325_s1 + $0x164] ss:$24 sps:$4 sm:$0xff]  }
  0x51   :  { %1373 = vmatpush1.bf16.msra.mxu1 %v15353_v4  ;;  %v13920_v4 = vld [vmem:[%s21325_s1 + $0x1c0] ss:$24 sps:$4 sm:$0xff]  }
  0x52   :  { %1374 = vmatprep.subr.bf16.mxu1 %v15359_v5  ;;  %v13928_v5 = vld [vmem:[%s21325_s1 + $0x1f4] ss:$24 sps:$4 sm:$0xff]  }
  0x53   :  { %698 = vmatpush1.bf16.msra.mxu0 %v13890_v63 }
  0x54   :  { %699 = vmatprep.subr.bf16.mxu0 %v13898_v61  ;;  %v13916_v61 = vld [vmem:[%s21325_s1 + $0x194] ss:$24 sps:$4 sm:$0xff]  }
  0x55   :  { %1375 = vmatpush1.bf16.msra.mxu1 %v15365_v6  ;;  %v13926_v6 = vld [vmem:[%s21325_s1 + $0x1f0] ss:$24 sps:$4 sm:$0xff]  }
  0x56   :  { %1376 = vmatprep.subr.bf16.mxu1 %v15371_v7  ;;  %v13934_v7 = vld [vmem:[%s21325_s1 + $0x224] ss:$24 sps:$4 sm:$0xff]  }
  0x57   :  { %700 = vmatpush1.bf16.msra.mxu0 %v13896_v51 }
  0x58   :  { %701 = vmatprep.subr.bf16.mxu0 %v13904_v57 }
  0x59   :  { %1377 = vmatpush1.bf16.msra.mxu1 %v15377_v8  ;;  %v13932_v8 = vld [vmem:[%s21325_s1 + $0x220] ss:$24 sps:$4 sm:$0xff]  }
  0x5a   :  { %1378 = vmatprep.subr.bf16.mxu1 %v15383_v9  ;;  %v13940_v9 = vld [vmem:[%s21325_s1 + $0x254] ss:$24 sps:$4 sm:$0xff]  }
  0x5b   :  { %702 = vmatpush1.bf16.msra.mxu0 %v13902_v1 }
  0x5c   :  { %703 = vmatprep.subr.bf16.mxu0 %v13910_v62 }
  0x5d   :  { %1379 = vmatpush1.bf16.msra.mxu1 %v15389_v10  ;;  %v13938_v10 = vld [vmem:[%s21325_s1 + $0x250] ss:$24 sps:$4 sm:$0xff]  }
  0x5e   :  { %1380 = vmatprep.subr.bf16.mxu1 %v15395_v11  ;;  %v13944_v11 = vld [vmem:[%s21325_s1 + $0x284] ss:$24 sps:$4 sm:$0xff]  }
  0x5f   :  { %704 = vmatpush1.bf16.msra.mxu0 %v13908_v0  ;;  %v27_v0 = vld [vmem:[%s21326_s0 + $0x20] sm:$0xff] }
  0x60   :  { %705 = vmatprep.subr.bf16.mxu0 %v13916_v61 }
  0x61   :  { %1381 = vmatpush1.bf16.msra.mxu1 %v15401_v12  ;;  %v13942_v12 = vld [vmem:[%s21325_s1 + $0x280] ss:$24 sps:$4 sm:$0xff]  }
  0x62   :  { %1382 = vmatprep.subr.bf16.mxu1 %v15417_v15  ;;  %v13947_v15 = vld [vmem:[%s21325_s1 + $0x2b4] ss:$24 sps:$4 sm:$0xff]  }
  0x63   :  { %706 = vmatpush1.bf16.msra.mxu0 %v13914_v2 }
  0x64   :  { %707 = vmatprep.subr.bf16.mxu0 %v13922_v3 }
  0x65   :  { %1383 = vmatpush1.bf16.msra.mxu1 %v15435_v18  ;;  %v13945_v18 = vld [vmem:[%s21325_s1 + $0x2b0] ss:$24 sps:$4 sm:$0xff]  }
  0x66   :  { %1384 = vmatprep.subr.bf16.mxu1 %v15442_v19  ;;  %v13950_v19 = vld [vmem:[%s21325_s1 + $0x2e4] ss:$24 sps:$4 sm:$0xff]  }
  0x67   :  { %708 = vmatpush1.bf16.msra.mxu0 %v13920_v4 }
  0x68   :  { %709 = vmatprep.subr.bf16.mxu0 %v13928_v5  ;;  %v28_v5 = vld [vmem:[%s21326_s0 + $0x28] sm:$0xff] }
  0x69   :  { %1385 = vmatpush1.bf16.msra.mxu1 %v15459_v22  ;;  %v13948_v22 = vld [vmem:[%s21325_s1 + $0x2e0] ss:$24 sps:$4 sm:$0xff]  }
  0x6a   :  { %1386 = vmatprep.subr.bf16.mxu1 %v15471_v24  ;;  %v21532_v24 = vld [vmem:[#allocation10_spill] sm:$0xff] }
  0x6b   :  { %710 = vmatpush1.bf16.msra.mxu0 %v13926_v6 }
  0x6c   :  { %711 = vmatprep.subr.bf16.mxu0 %v13934_v7 }
  0x6d   :  { %1387 = vmatpush1.bf16.msra.mxu1 %v15476_v25 }
  0x6e   :  { %1388 = vmatprep.subr.bf16.mxu1 %v15495_v28 }
  0x6f   :  { %712 = vmatpush1.bf16.msra.mxu0 %v13932_v8 }
  0x70   :  { %713 = vmatprep.subr.bf16.mxu0 %v13940_v9 }
  0x71   :  { %1389 = vmatpush1.bf16.msra.mxu1 %v15507_v30 }
  0x72   :  { %1390 = vmatprep.subr.bf16.mxu1 %v15519_v32 }
  0x73   :  { %714 = vmatpush1.bf16.msra.mxu0 %v13938_v10 }
  0x74   :  { %715 = vmatprep.subr.bf16.mxu0 %v13944_v11 }
  0x75   :  { %1391 = vmatpush1.bf16.msra.mxu1 %v15524_v33  ;;  %v23_v33 = vld [vmem:[%s21326_s0] sm:$0xff] }
  0x76   :  { %1392 = vmatprep.subr.bf16.mxu1 %v15543_v36 }
  0x77   :  { %716 = vmatpush1.bf16.msra.mxu0 %v13942_v12 }
  0x78   :  { %717 = vmatprep.subr.bf16.mxu0 %v13947_v15 }
  0x79   :  { %1393 = vmatpush1.bf16.msra.mxu1 %v15555_v38 }
  0x7a   :  { %1394 = vmatprep.subr.bf16.mxu1 %v15567_v40  ;;  %v26_v40 = vld [vmem:[%s21326_s0 + $0x18] sm:$0xff] }
  0x7b   :  { %718 = vmatpush1.bf16.msra.mxu0 %v13945_v18 }
  0x7c   :  { %719 = vmatprep.subr.bf16.mxu0 %v13950_v19 }
  0x7d   :  { %1395 = vmatpush1.bf16.msra.mxu1 %v15572_v41 }
  0x7e   :  { %1396 = vmatprep.subr.bf16.mxu1 %v15591_v44 }
  0x7f   :  { %720 = vmatpush1.bf16.msra.mxu0 %v13948_v22 }
  0x80   :  { %1411 = vmatprep.subr.bf16.mxu0 %v15406_v13  ;;  %v21525_v13 = vld [vmem:[#allocation3_spill] sm:$0xff] }
  0x81   :  { %1397 = vmatpush1.bf16.msra.mxu1 %v15603_v46  ;;  %v759_v46 = vlaneseq }
  0x82   :  { %722 = vmatmul.mubr.bf16.vlgmr.msra.gmra.mrb[4].mxu0 %v21524_v60  ;;  %1398 = vmatprep.subr.bf16.mxu1 %v15615_v48 }
  0x83   :  { %1412 = vmatpush1.bf16.msra.mxu0 %v15411_v14  ;;  %v21526_v14 = vld [vmem:[#allocation4_spill] sm:$0xff] }
  0x84   :  { %1413 = vmatprep.subr.bf16.mxu0 %v15423_v16  ;;  %v21527_v16 = vld [vmem:[#allocation5_spill] sm:$0xff] }
  0x85   :  { %1399 = vmatpush1.bf16.msra.mxu1 %v15620_v49 }
  0x86   :  { %1400 = vmatprep.subr.bf16.mxu1 %v15639_v52 }
  0x87   :  { %1414 = vmatpush1.bf16.msra.mxu0 %v15429_v17  ;;  %v21528_v17 = vld [vmem:[#allocation6_spill] sm:$0xff] }
  0x88   :  { %1415 = vmatprep.subr.bf16.mxu0 %v15447_v20  ;;  %v21529_v20 = vld [vmem:[#allocation7_spill] sm:$0xff] }
  0x89   :  { %1401 = vmatpush1.bf16.msra.mxu1 %v15651_v54 }
  0x8a   :  { %1452 = vmatprep.subr.bf16.mxu1 %v15663_v56 }
  0x8b   :  { %1416 = vmatpush1.bf16.msra.mxu0 %v15453_v21  ;;  %v21530_v21 = vld [vmem:[#allocation8_spill] sm:$0xff] }
  0x8c   :  { %1417 = vmatprep.subr.bf16.mxu0 %v15465_v23  ;;  %v21531_v23 = vld [vmem:[#allocation9_spill] sm:$0xff] }
  0x8f   :  { %1418 = vmatpush1.bf16.msra.mxu0 %v15482_v26 }
  0x90   :  { %1419 = vmatprep.subr.bf16.mxu0 %v15489_v27 }
  0x93   :  { %1420 = vmatpush1.bf16.msra.mxu0 %v15501_v29 }
  0x94   :  { %1421 = vmatprep.subr.bf16.mxu0 %v15513_v31 }
  0x97   :  { %1422 = vmatpush1.bf16.msra.mxu0 %v15530_v34  ;;  %v24_v34 = vld [vmem:[%s21326_s0 + $0x8] sm:$0xff] }
  0x98   :  { %1423 = vmatprep.subr.bf16.mxu0 %v15537_v35 }
  0x9b   :  { %1424 = vmatpush1.bf16.msra.mxu0 %v15549_v37 }
  0x9c   :  { %1425 = vmatprep.subr.bf16.mxu0 %v15561_v39  ;;  %v25_v39 = vld [vmem:[%s21326_s0 + $0x10] sm:$0xff] }
  0x9f   :  { %1426 = vmatpush1.bf16.msra.mxu0 %v15578_v42 }
  0xa0   :  { %1427 = vmatprep.subr.bf16.mxu0 %v15585_v43 }
  0xa3   :  { %1428 = vmatpush1.bf16.msra.mxu0 %v15597_v45 }
  0xa4   :  { %1429 = vmatprep.subr.bf16.mxu0 %v15609_v47 }
  0xa7   :  { %1430 = vmatpush1.bf16.msra.mxu0 %v21525_v13 }
  0xa8   :  { %1431 = vmatprep.subr.bf16.mxu0 %v21526_v14 }
  0xab   :  { %1432 = vmatpush1.bf16.msra.mxu0 %v21527_v16 }
  0xac   :  { %1433 = vmatprep.subr.bf16.mxu0 %v21528_v17 }
  0xaf   :  { %1434 = vmatpush1.bf16.msra.mxu0 %v15672_v58 }
  0xb0   :  { %1435 = vmatprep.subr.bf16.mxu0 %v21529_v20 }
  0xb3   :  { %1436 = vmatpush1.bf16.msra.mxu0 %v21530_v21  ;;  %v15279_v21 = vld [vmem:[%s21325_s1 + $0x10] ss:$24 sps:$4 sm:$0xff]  }
  0xb4   :  { %1437 = vmatprep.subr.bf16.mxu0 %v21531_v23  ;;  %v15280_v23 = vld [vmem:[%s21325_s1 + $0x44] ss:$24 sps:$4 sm:$0xff]  }
  0xb7   :  { %1438 = vmatpush1.bf16.msra.mxu0 %v15707_v53  ;;  %v20_v53 = vld [vmem:[%s21327_s2] sm:$0x3] }
  0xb8   :  { %1439 = vmatprep.subr.bf16.mxu0 %v15716_v50  ;;  %v760_v50 = vshrl.u32 %v759_v46, 7  ;;  %v15303_v46 = vld [vmem:[%s21325_s1 + $0x250] ss:$24 sps:$4 sm:$0xff]  }
  0xba   :  { %v761_v52 = vsub.s32 0, %v760_v50  ;;  %v765_v54 = vsub.s32 1, %v760_v50  ;;  %v15307_v50 = vld [vmem:[%s21325_s1 + $0x2b0] ss:$24 sps:$4 sm:$0xff]  }
  0xbb   :  { %1440 = vmatpush1.bf16.msra.mxu0 %v15726_v59 }
  0xbc   :  { %1441 = vmatprep.subr.bf16.mxu0 %v21532_v24  ;;  %v15900_v56 = vrot.slane %v20_v53, %v761_v52  ;;  %v15902_v60 = vrot.slane %v20_v53, %v765_v54  ;;  %v15281_v24 = vld [vmem:[%s21325_s1 + $0x40] ss:$24 sps:$4 sm:$0xff]   ;;  %v15308_v52 = vld [vmem:[%s21325_s1 + $0x2e4] ss:$24 sps:$4 sm:$0xff]  }
  0xbd   :  { %v15309_v53 = vld [vmem:[%s21325_s1 + $0x2e0] ss:$24 sps:$4 sm:$0xff]  }
  0xbe   :  { %21533 = vst [vmem:[#allocation3_spill] sm:$0xff] %v15900_v56  ;;  %21534 = vst [vmem:[#allocation4_spill] sm:$0xff] %v15902_v60  ;;  %v16029_v54 = vld [vmem:[%s21325_s1] ss:$24 sps:$4 sm:$0xff]  }
  0xbf   :  { %1442 = vmatpush1.bf16.msra.mxu0 %v15744_v55 }
 0x115   :  { %v641_v25 = vpop.f32.mrb[0].mxu0 }
 0x116   :  { %v643_v26 = vpop.f32.mrb[1].mxu0  ;;  %v730_v35 = vadd.f32 %v641_v25, %v23_v33  ;;  %v15282_v25 = vld [vmem:[%s21325_s1 + $0x74] ss:$24 sps:$4 sm:$0xff]  }
 0x117   :  { %v645_v27 = vpop.f32.mrb[2].mxu0  ;;  %v731_v36 = vadd.f32 %v643_v26, %v24_v34  ;;  %v15283_v26 = vld [vmem:[%s21325_s1 + $0x70] ss:$24 sps:$4 sm:$0xff]   ;;  %v15290_v33 = vld [vmem:[%s21325_s1 + $0x134] ss:$24 sps:$4 sm:$0xff]  }
 0x118   :  { %v646_v28 = vpop.f32.mrb[3].mxu0  ;;  %v12182_v37 = vmul.f32 -1.442695, %v730_v35  ;;  %v15284_v27 = vld [vmem:[%s21325_s1 + $0xa4] ss:$24 sps:$4 sm:$0xff]  }
 0x119   :  { %v12183_v38 = vmul.f32 -1.442695, %v731_v36  ;;  %v15285_v28 = vld [vmem:[%s21325_s1 + $0xa0] ss:$24 sps:$4 sm:$0xff]   ;;  %v15291_v34 = vld [vmem:[%s21325_s1 + $0x130] ss:$24 sps:$4 sm:$0xff]  }
 0x11a   :  { %14959 = vpow2.f32 %v12182_v37  ;;  %v15292_v35 = vld [vmem:[%s21325_s1 + $0x164] ss:$24 sps:$4 sm:$0xff]   ;;  %v15293_v36 = vld [vmem:[%s21325_s1 + $0x160] ss:$24 sps:$4 sm:$0xff]   ;;  %v15294_v37 = vld [vmem:[%s21325_s1 + $0x194] ss:$24 sps:$4 sm:$0xff]  }
 0x11b   :  { %14961 = vpow2.f32 %v12183_v38  ;;  %v15295_v38 = vld [vmem:[%s21325_s1 + $0x190] ss:$24 sps:$4 sm:$0xff]  }
 0x11f   :  { %v682_v29 = vpop.f32.mrb[0].mxu1 }
 0x120   :  { %v684_v30 = vpop.f32.mrb[1].mxu1  ;;  %v744_v41 = vadd.f32 %v682_v29, %v25_v39  ;;  %v15286_v29 = vld [vmem:[%s21325_s1 + $0xd4] ss:$24 sps:$4 sm:$0xff]   ;;  %v15296_v39 = vld [vmem:[%s21325_s1 + $0x1c4] ss:$24 sps:$4 sm:$0xff]  }
 0x121   :  { %v686_v31 = vpop.f32.mrb[2].mxu1  ;;  %v745_v42 = vadd.f32 %v684_v30, %v26_v40  ;;  %v15287_v30 = vld [vmem:[%s21325_s1 + $0xd0] ss:$24 sps:$4 sm:$0xff]   ;;  %v15297_v40 = vld [vmem:[%s21325_s1 + $0x1c0] ss:$24 sps:$4 sm:$0xff]  }
 0x122   :  { %v687_v32 = vpop.f32.mrb[3].mxu1  ;;  %v12184_v43 = vmul.f32 -1.442695, %v744_v41  ;;  %v15288_v31 = vld [vmem:[%s21325_s1 + $0x104] ss:$24 sps:$4 sm:$0xff]  }
 0x123   :  { %v12185_v45 = vmul.f32 -1.442695, %v745_v42  ;;  %v15289_v32 = vld [vmem:[%s21325_s1 + $0x100] ss:$24 sps:$4 sm:$0xff]   ;;  %v15298_v41 = vld [vmem:[%s21325_s1 + $0x1f4] ss:$24 sps:$4 sm:$0xff]  }
 0x124   :  { %v14960_v44 = vpop.eup %14959  ;;  %14963 = vpow2.f32 %v12184_v43  ;;  %v15299_v42 = vld [vmem:[%s21325_s1 + $0x1f0] ss:$24 sps:$4 sm:$0xff]   ;;  %v15300_v43 = vld [vmem:[%s21325_s1 + $0x224] ss:$24 sps:$4 sm:$0xff]  }
 0x125   :  { %v14962_v47 = vpop.eup %14961  ;;  %v738_v48 = vadd.f32 1.0, %v14960_v44  ;;  %14965 = vpow2.f32 %v12185_v45  ;;  %v15301_v44 = vld [vmem:[%s21325_s1 + $0x220] ss:$24 sps:$4 sm:$0xff]   ;;  %v15302_v45 = vld [vmem:[%s21325_s1 + $0x254] ss:$24 sps:$4 sm:$0xff]  }
 0x126   :  { %v739_v49 = vadd.f32 1.0, %v14962_v47  ;;  %v15304_v47 = vld [vmem:[%s21325_s1 + $0x284] ss:$24 sps:$4 sm:$0xff]  }
 0x127   :  { %14967 = vrcp.f32 %v738_v48  ;;  %v15305_v48 = vld [vmem:[%s21325_s1 + $0x280] ss:$24 sps:$4 sm:$0xff]  }
 0x128   :  { %14969 = vrcp.f32 %v739_v49  ;;  %v15306_v49 = vld [vmem:[%s21325_s1 + $0x2b4] ss:$24 sps:$4 sm:$0xff]  }
 0x12e   :  { %v14964_v58 = vpop.eup %14963 }
 0x12f   :  { %v14966_v63 = vpop.eup %14965  ;;  %v752_v55 = vadd.f32 1.0, %v14964_v58  ;;  %v16034_v58 = vld [vmem:[%s21325_s1 + $0x4] ss:$24 sps:$4 sm:$0xff]  }
 0x130   :  { %v753_v62 = vadd.f32 1.0, %v14966_v63  ;;  %v16039_v63 = vld [vmem:[%s21325_s1 + $0x8] ss:$24 sps:$4 sm:$0xff]   ;;  %2123 = vmatprep.subr.bf16.mxu0 %v16034_v58 }
 0x131   :  { %v14968_v1 = vpop.eup %14967  ;;  %14971 = vrcp.f32 %v752_v55  ;;  %v16049_v55 = vld [vmem:[%s21325_s1 + $0x34] ss:$24 sps:$4 sm:$0xff]  }
 0x132   :  { %v14970_v3 = vpop.eup %14969  ;;  %14973 = vrcp.f32 %v753_v62  ;;  %v16074_v62 = vld [vmem:[%s21325_s1 + $0x64] ss:$24 sps:$4 sm:$0xff]  }
 0x13b   :  { %v14972_v10 = vpop.eup %14971 }
 0x13c   :  { %v14974_v11 = vpop.eup %14973 }
 0x155   :  { %v723_v59 = vpop.f32.mrb[4].mxu0 }
 0x156   :  { %v769_v51 = vadd.f32 %v15900_v56, %v723_v59  ;;  %v725_v57 = vpop.f32.mrb[5].mxu0  ;;  %v16044_v59 = vld [vmem:[%s21325_s1 + $0xc] ss:$24 sps:$4 sm:$0xff]  }
 0x157   :  { %v770_v61 = vadd.f32 %v15902_v60, %v725_v57  ;;  %v727_v2 = vpop.f32.mrb[6].mxu0  ;;  %v16062_v57 = vld [vmem:[%s21325_s1 + $0x30] ss:$24 sps:$4 sm:$0xff]  }
 0x158   :  { %v771_v4 = vmul.f32 %v14968_v1, %v769_v51  ;;  %v728_v6 = vpop.f32.mrb[7].mxu0  ;;  %v16055_v51 = vld [vmem:[%s21325_s1 + $0x3c] ss:$24 sps:$4 sm:$0xff]   ;;  %v16069_v1 = vld [vmem:[%s21325_s1 + $0x38] ss:$24 sps:$4 sm:$0xff]  }
 0x159   :  { %v772_v7 = vmul.f32 %v14970_v3, %v770_v61  ;;  %v16086_v61 = vld [vmem:[%s21325_s1 + $0x60] ss:$24 sps:$4 sm:$0xff]   ;;  %v16098_v3 = vld [vmem:[%s21325_s1 + $0x94] ss:$24 sps:$4 sm:$0xff]  }
 0x15a   :  { %v773_v8 = vadd.f32 %v771_v4, %v27_v0  ;;  %v16080_v0 = vld [vmem:[%s21325_s1 + $0x6c] ss:$24 sps:$4 sm:$0xff]   ;;  %v16093_v2 = vld [vmem:[%s21325_s1 + $0x68] ss:$24 sps:$4 sm:$0xff]   ;;  %v16104_v4 = vld [vmem:[%s21325_s1 + $0x9c] ss:$24 sps:$4 sm:$0xff]  }
 0x15b   :  { %v774_v9 = vadd.f32 %v772_v7, %v28_v5  ;;  %v16110_v5 = vld [vmem:[%s21325_s1 + $0x90] ss:$24 sps:$4 sm:$0xff]   ;;  %v16122_v7 = vld [vmem:[%s21325_s1 + $0xc4] ss:$24 sps:$4 sm:$0xff]  }
 0x15c   :  { %14975 = vtanh.f32 %v773_v8  ;;  %v16117_v6 = vld [vmem:[%s21325_s1 + $0x98] ss:$24 sps:$4 sm:$0xff]   ;;  %v16128_v8 = vld [vmem:[%s21325_s1 + $0xcc] ss:$24 sps:$4 sm:$0xff]  }
 0x15d   :  { %14977 = vtanh.f32 %v774_v9  ;;  %v16134_v9 = vld [vmem:[%s21325_s1 + $0xc0] ss:$24 sps:$4 sm:$0xff]  }
 0x166   :  { %v14976_v12 = vpop.eup %14975 }
 0x167   :  { %v14978_v15 = vpop.eup %14977  ;;  %v777_v18 = vsub.f32 0.0, %v14976_v12 }
 0x168   :  { %v778_v19 = vsub.f32 0.0, %v14978_v15 }
 0x169   :  { %v779_v22 = vmul.f32 %v14972_v10, %v777_v18  ;;  %v16141_v10 = vld [vmem:[%s21325_s1 + $0xc8] ss:$24 sps:$4 sm:$0xff]   ;;  %v16165_v18 = vld [vmem:[%s21325_s1 + $0xf8] ss:$24 sps:$4 sm:$0xff]  }
 0x16a   :  { %v780_v13 = vmul.f32 %v14974_v11, %v778_v19  ;;  %21535 = vst [vmem:[#allocation5_spill] sm:$0xff] %v16141_v10  ;;  %v16146_v11 = vld [vmem:[%s21325_s1 + $0xf4] ss:$24 sps:$4 sm:$0xff]   ;;  %21537 = vst [vmem:[#allocation7_spill] sm:$0xff] %v16165_v18  ;;  %v16170_v19 = vld [vmem:[%s21325_s1 + $0x124] ss:$24 sps:$4 sm:$0xff]  }
 0x16b   :  { %v15912_v14 = vadd.f32 %v14976_v12, %v779_v22  ;;  %v16152_v12 = vld [vmem:[%s21325_s1 + $0xfc] ss:$24 sps:$4 sm:$0xff]   ;;  %v16176_v22 = vld [vmem:[%s21325_s1 + $0x12c] ss:$24 sps:$4 sm:$0xff]  }
 0x16c   :  { %v15914_v16 = vadd.f32 %v14978_v15, %v780_v13  ;;  %21536 = vst [vmem:[#allocation6_spill] sm:$0xff] %v16152_v12  ;;  %v16158_v15 = vld [vmem:[%s21325_s1 + $0xf0] ss:$24 sps:$4 sm:$0xff]   ;;  %21538 = vst [vmem:[#allocation8_spill] sm:$0xff] %v16176_v22  ;;  %v16182_v13 = vld [vmem:[%s21325_s1 + $0x120] ss:$24 sps:$4 sm:$0xff]  }
 0x16d   :  { %783 = vst [vmem:[%s21328_s3] sm:$0xff] %v15912_v14  ;;  %v15928_v20 = vpack.c.bf16 %v15912_v14, %v15912_v14 }
 0x16e   :  { %784 = vst [vmem:[%s21328_s3 + $0x8] sm:$0xff] %v15914_v16  ;;  %v793_v17 = vpack.c.bf16 %v15914_v16, %v15914_v16 }
 0x170   :  { %1402 = vmatprep.mubr.bf16.mxu1 %v793_v17  ;;  %1443 = vmatprep.mubr.bf16.mxu0 %v793_v17 }
 0x171   :  { %1403 = vmatmul.mubr.bf16.vlgmr.msra.gmra.mrb[4].mxu1 %v15928_v20  ;;  %1444 = vmatmul.mubr.bf16.vlgmr.msra.gmra.mrb[8].mxu0 %v15928_v20 }
 0x172   :  { %1453 = vmatpush1.bf16.msra.mxu1 %v15279_v21  ;;  %1484 = vmatprep.mubr.bf16.mxu1 %v793_v17  ;;  %v16189_v17 = vld [vmem:[%s21325_s1 + $0x128] ss:$24 sps:$4 sm:$0xff]   ;;  %v16200_v21 = vld [vmem:[%s21325_s1 + $0x15c] ss:$24 sps:$4 sm:$0xff]  }
 0x173   :  { %1454 = vmatprep.subr.bf16.mxu1 %v15280_v23  ;;  %2124 = vmatpush1.bf16.msra.mxu0 %v16029_v54  ;;  %21539 = vst [vmem:[#allocation9_spill] sm:$0xff] %v16189_v17  ;;  %21540 = vst [vmem:[#allocation10_spill] sm:$0xff] %v16200_v21  ;;  %v16206_v23 = vld [vmem:[%s21325_s1 + $0x150] ss:$24 sps:$4 sm:$0xff]  }
 0x174   :  { %2125 = vmatprep.subr.bf16.mxu0 %v16049_v55 }
 0x176   :  { %1455 = vmatpush1.bf16.msra.mxu1 %v15281_v24  ;;  %v16213_v24 = vld [vmem:[%s21325_s1 + $0x158] ss:$24 sps:$4 sm:$0xff]  }
 0x177   :  { %1456 = vmatprep.subr.bf16.mxu1 %v15282_v25  ;;  %2126 = vmatpush1.bf16.msra.mxu0 %v16062_v57  ;;  %21541 = vst [vmem:[#allocation11_spill] sm:$0xff] %v16213_v24  ;;  %v16218_v25 = vld [vmem:[%s21325_s1 + $0x184] ss:$24 sps:$4 sm:$0xff]  }
 0x178   :  { %2127 = vmatprep.subr.bf16.mxu0 %v16074_v62 }
 0x17a   :  { %1457 = vmatpush1.bf16.msra.mxu1 %v15283_v26  ;;  %v16224_v26 = vld [vmem:[%s21325_s1 + $0x18c] ss:$24 sps:$4 sm:$0xff]  }
 0x17b   :  { %1458 = vmatprep.subr.bf16.mxu1 %v15284_v27  ;;  %2128 = vmatpush1.bf16.msra.mxu0 %v16086_v61  ;;  %21542 = vst [vmem:[#allocation12_spill] sm:$0xff] %v16224_v26  ;;  %v16230_v27 = vld [vmem:[%s21325_s1 + $0x180] ss:$24 sps:$4 sm:$0xff]  }
 0x17c   :  { %2129 = vmatprep.subr.bf16.mxu0 %v16098_v3 }
 0x17e   :  { %1459 = vmatpush1.bf16.msra.mxu1 %v15285_v28  ;;  %v16237_v28 = vld [vmem:[%s21325_s1 + $0x188] ss:$24 sps:$4 sm:$0xff]  }
 0x17f   :  { %1460 = vmatprep.subr.bf16.mxu1 %v15286_v29  ;;  %2130 = vmatpush1.bf16.msra.mxu0 %v16110_v5  ;;  %21543 = vst [vmem:[#allocation13_spill] sm:$0xff] %v16237_v28  ;;  %v16242_v29 = vld [vmem:[%s21325_s1 + $0x1b4] ss:$24 sps:$4 sm:$0xff]  }
 0x180   :  { %2131 = vmatprep.subr.bf16.mxu0 %v16122_v7 }
 0x182   :  { %1461 = vmatpush1.bf16.msra.mxu1 %v15287_v30  ;;  %v16249_v30 = vld [vmem:[%s21325_s1 + $0x1b0] ss:$24 sps:$4 sm:$0xff]  }
 0x183   :  { %1462 = vmatprep.subr.bf16.mxu1 %v15288_v31  ;;  %2132 = vmatpush1.bf16.msra.mxu0 %v16134_v9  ;;  %v16257_v31 = vld [vmem:[%s21325_s1 + $0x1bc] ss:$24 sps:$4 sm:$0xff]  }
 0x184   :  { %2133 = vmatprep.subr.bf16.mxu0 %v16146_v11  ;;  %21544 = vst [vmem:[#allocation14_spill] sm:$0xff] %v16257_v31 }
 0x186   :  { %1463 = vmatpush1.bf16.msra.mxu1 %v15289_v32  ;;  %v16262_v32 = vld [vmem:[%s21325_s1 + $0x1b8] ss:$24 sps:$4 sm:$0xff]  }
 0x187   :  { %1464 = vmatprep.subr.bf16.mxu1 %v15290_v33  ;;  %2134 = vmatpush1.bf16.msra.mxu0 %v16158_v15  ;;  %21545 = vst [vmem:[#allocation15_spill] sm:$0xff] %v16262_v32  ;;  %v16269_v33 = vld [vmem:[%s21325_s1 + $0x1e4] ss:$24 sps:$4 sm:$0xff]  }
 0x188   :  { %2135 = vmatprep.subr.bf16.mxu0 %v16170_v19 }
 0x18a   :  { %1465 = vmatpush1.bf16.msra.mxu1 %v15291_v34  ;;  %v16274_v34 = vld [vmem:[%s21325_s1 + $0x1e0] ss:$24 sps:$4 sm:$0xff]  }
 0x18b   :  { %1466 = vmatprep.subr.bf16.mxu1 %v15292_v35  ;;  %2136 = vmatpush1.bf16.msra.mxu0 %v16182_v13  ;;  %v16279_v35 = vld [vmem:[%s21325_s1 + $0x1ec] ss:$24 sps:$4 sm:$0xff]  }
 0x18c   :  { %21546 = vst [vmem:[#allocation16_spill] sm:$0xff] %v16279_v35 }
 0x18e   :  { %1467 = vmatpush1.bf16.msra.mxu1 %v15293_v36  ;;  %v16285_v36 = vld [vmem:[%s21325_s1 + $0x1e8] ss:$24 sps:$4 sm:$0xff]  }
 0x18f   :  { %1468 = vmatprep.subr.bf16.mxu1 %v15294_v37  ;;  %21547 = vst [vmem:[#allocation17_spill] sm:$0xff] %v16285_v36  ;;  %v16293_v37 = vld [vmem:[%s21325_s1 + $0x214] ss:$24 sps:$4 sm:$0xff]  }
 0x192   :  { %1469 = vmatpush1.bf16.msra.mxu1 %v15295_v38  ;;  %v16298_v38 = vld [vmem:[%s21325_s1 + $0x210] ss:$24 sps:$4 sm:$0xff]  }
 0x193   :  { %1470 = vmatprep.subr.bf16.mxu1 %v15296_v39  ;;  %v16303_v39 = vld [vmem:[%s21325_s1 + $0x21c] ss:$24 sps:$4 sm:$0xff]  }
 0x194   :  { %21548 = vst [vmem:[#allocation18_spill] sm:$0xff] %v16303_v39 }
 0x196   :  { %1471 = vmatpush1.bf16.msra.mxu1 %v15297_v40  ;;  %v16309_v40 = vld [vmem:[%s21325_s1 + $0x218] ss:$24 sps:$4 sm:$0xff]  }
 0x197   :  { %1472 = vmatprep.subr.bf16.mxu1 %v15298_v41  ;;  %21549 = vst [vmem:[#allocation19_spill] sm:$0xff] %v16309_v40  ;;  %v16314_v41 = vld [vmem:[%s21325_s1 + $0x244] ss:$24 sps:$4 sm:$0xff]  }
 0x19a   :  { %1473 = vmatpush1.bf16.msra.mxu1 %v15299_v42  ;;  %v16321_v42 = vld [vmem:[%s21325_s1 + $0x240] ss:$24 sps:$4 sm:$0xff]  }
 0x19b   :  { %1474 = vmatprep.subr.bf16.mxu1 %v15300_v43  ;;  %v16326_v43 = vld [vmem:[%s21325_s1 + $0x24c] ss:$24 sps:$4 sm:$0xff]  }
 0x19c   :  { %21550 = vst [vmem:[#allocation20_spill] sm:$0xff] %v16326_v43 }
 0x19e   :  { %1475 = vmatpush1.bf16.msra.mxu1 %v15301_v44  ;;  %v16333_v44 = vld [vmem:[%s21325_s1 + $0x248] ss:$24 sps:$4 sm:$0xff]  }
 0x19f   :  { %1476 = vmatprep.subr.bf16.mxu1 %v15302_v45  ;;  %21551 = vst [vmem:[#allocation21_spill] sm:$0xff] %v16333_v44  ;;  %v16338_v45 = vld [vmem:[%s21325_s1 + $0x274] ss:$24 sps:$4 sm:$0xff]  }
 0x1a2   :  { %1477 = vmatpush1.bf16.msra.mxu1 %v15303_v46  ;;  %v16344_v46 = vld [vmem:[%s21325_s1 + $0x27c] ss:$24 sps:$4 sm:$0xff]  }
 0x1a3   :  { %1478 = vmatprep.subr.bf16.mxu1 %v15304_v47  ;;  %21552 = vst [vmem:[#allocation22_spill] sm:$0xff] %v16344_v46  ;;  %v16350_v47 = vld [vmem:[%s21325_s1 + $0x270] ss:$24 sps:$4 sm:$0xff]  }
 0x1a6   :  { %1479 = vmatpush1.bf16.msra.mxu1 %v15305_v48  ;;  %v16357_v48 = vld [vmem:[%s21325_s1 + $0x278] ss:$24 sps:$4 sm:$0xff]  }
 0x1a7   :  { %1480 = vmatprep.subr.bf16.mxu1 %v15306_v49  ;;  %21553 = vst [vmem:[#allocation23_spill] sm:$0xff] %v16357_v48  ;;  %v16362_v49 = vld [vmem:[%s21325_s1 + $0x2a4] ss:$24 sps:$4 sm:$0xff]  }
 0x1aa   :  { %1481 = vmatpush1.bf16.msra.mxu1 %v15307_v50  ;;  %v16368_v50 = vld [vmem:[%s21325_s1 + $0x2ac] ss:$24 sps:$4 sm:$0xff]  }
 0x1ab   :  { %1482 = vmatprep.subr.bf16.mxu1 %v15308_v52  ;;  %21554 = vst [vmem:[#allocation24_spill] sm:$0xff] %v16368_v50  ;;  %v16374_v52 = vld [vmem:[%s21325_s1 + $0x2a0] ss:$24 sps:$4 sm:$0xff]  }
 0x1ae   :  { %1483 = vmatpush1.bf16.msra.mxu1 %v15309_v53  ;;  %v16381_v53 = vld [vmem:[%s21325_s1 + $0x2a8] ss:$24 sps:$4 sm:$0xff]  }
 0x1af   :  { %2164 = vmatprep.subr.bf16.mxu1 %v16044_v59  ;;  %21555 = vst [vmem:[#allocation25_spill] sm:$0xff] %v16381_v53 }
 0x1b1   :  { %1485 = vmatmul.mubr.bf16.vlgmr.msra.gmra.mrb[8].mxu1 %v15928_v20  ;;  %v16194_v20 = vld [vmem:[%s21325_s1 + $0x154] ss:$24 sps:$4 sm:$0xff]  }
 0x1b2   :  { %2165 = vmatpush1.bf16.msra.mxu1 %v16039_v63  ;;  %2137 = vmatprep.subr.bf16.mxu0 %v16194_v20 }
 0x1b3   :  { %2166 = vmatprep.subr.bf16.mxu1 %v16055_v51  ;;  %2138 = vmatpush1.bf16.msra.mxu0 %v16206_v23 }
 0x1b4   :  { %2139 = vmatprep.subr.bf16.mxu0 %v16218_v25 }
 0x1b6   :  { %2167 = vmatpush1.bf16.msra.mxu1 %v16069_v1 }
 0x1b7   :  { %2168 = vmatprep.subr.bf16.mxu1 %v16080_v0  ;;  %2140 = vmatpush1.bf16.msra.mxu0 %v16230_v27 }
 0x1b8   :  { %2141 = vmatprep.subr.bf16.mxu0 %v16242_v29 }
 0x1ba   :  { %2169 = vmatpush1.bf16.msra.mxu1 %v16093_v2 }
 0x1bb   :  { %2170 = vmatprep.subr.bf16.mxu1 %v16104_v4  ;;  %2142 = vmatpush1.bf16.msra.mxu0 %v16249_v30 }
 0x1bc   :  { %2143 = vmatprep.subr.bf16.mxu0 %v16269_v33 }
 0x1be   :  { %2171 = vmatpush1.bf16.msra.mxu1 %v16117_v6 }
 0x1bf   :  { %2172 = vmatprep.subr.bf16.mxu1 %v16128_v8  ;;  %2144 = vmatpush1.bf16.msra.mxu0 %v16274_v34 }
 0x1c0   :  { %2145 = vmatprep.subr.bf16.mxu0 %v16293_v37 }
 0x1c2   :  { %2173 = vmatpush1.bf16.msra.mxu1 %v16141_v10 }
 0x1c3   :  { %2174 = vmatprep.subr.bf16.mxu1 %v16152_v12  ;;  %2146 = vmatpush1.bf16.msra.mxu0 %v16298_v38 }
 0x1c4   :  { %2147 = vmatprep.subr.bf16.mxu0 %v16314_v41 }
 0x1c6   :  { %2175 = vmatpush1.bf16.msra.mxu1 %v16165_v18 }
 0x1c7   :  { %2176 = vmatprep.subr.bf16.mxu1 %v16176_v22  ;;  %2148 = vmatpush1.bf16.msra.mxu0 %v16321_v42 }
 0x1c8   :  { %2149 = vmatprep.subr.bf16.mxu0 %v16338_v45 }
 0x1ca   :  { %2177 = vmatpush1.bf16.msra.mxu1 %v16189_v17 }
 0x1cb   :  { %2178 = vmatprep.subr.bf16.mxu1 %v16200_v21  ;;  %2150 = vmatpush1.bf16.msra.mxu0 %v16350_v47 }
 0x1cc   :  { %2151 = vmatprep.subr.bf16.mxu0 %v16362_v49 }
 0x1ce   :  { %2179 = vmatpush1.bf16.msra.mxu1 %v16213_v24 }
 0x1cf   :  { %2180 = vmatprep.subr.bf16.mxu1 %v16224_v26  ;;  %2152 = vmatpush1.bf16.msra.mxu0 %v16374_v52 }
 0x1d2   :  { %2181 = vmatpush1.bf16.msra.mxu1 %v16237_v28  ;;  %v12187_v28 = vld [vmem:[%s21326_s0 + $0x38] sm:$0xff] }
 0x1d3   :  { %2182 = vmatprep.subr.bf16.mxu1 %v16257_v31 }
 0x1d6   :  { %2183 = vmatpush1.bf16.msra.mxu1 %v16262_v32 }
 0x1d7   :  { %2184 = vmatprep.subr.bf16.mxu1 %v16279_v35 }
 0x1da   :  { %2185 = vmatpush1.bf16.msra.mxu1 %v16285_v36 }
 0x1db   :  { %2186 = vmatprep.subr.bf16.mxu1 %v16303_v39 }
 0x1de   :  { %2187 = vmatpush1.bf16.msra.mxu1 %v16309_v40 }
 0x1df   :  { %2188 = vmatprep.subr.bf16.mxu1 %v16326_v43  ;;  %v16413_v43 = vld [vmem:[%s21325_s1 + $0x14] ss:$24 sps:$4 sm:$0xff]  }
 0x1e2   :  { %2189 = vmatpush1.bf16.msra.mxu1 %v16333_v44  ;;  %v16392_v44 = vld [vmem:[%s21325_s1 + $0x2dc] ss:$24 sps:$4 sm:$0xff]  }
 0x1e3   :  { %2190 = vmatprep.subr.bf16.mxu1 %v16344_v46  ;;  %v16386_v46 = vld [vmem:[%s21325_s1 + $0x2d4] ss:$24 sps:$4 sm:$0xff]   ;;  %21556 = vst [vmem:[#allocation26_spill] sm:$0xff] %v16392_v44 }
 0x1e4   :  { %2153 = vmatprep.subr.bf16.mxu0 %v16386_v46 }
 0x1e6   :  { %2191 = vmatpush1.bf16.msra.mxu1 %v16357_v48  ;;  %v16398_v48 = vld [vmem:[%s21325_s1 + $0x2d0] ss:$24 sps:$4 sm:$0xff]  }
 0x1e7   :  { %2192 = vmatprep.subr.bf16.mxu1 %v16368_v50  ;;  %v16405_v50 = vld [vmem:[%s21325_s1 + $0x2d8] ss:$24 sps:$4 sm:$0xff]   ;;  %2154 = vmatpush1.bf16.msra.mxu0 %v16398_v48 }
 0x1e8   :  { %21557 = vst [vmem:[#allocation27_spill] sm:$0xff] %v16405_v50  ;;  %2205 = vmatprep.subr.bf16.mxu0 %v16413_v43 }
 0x1ea   :  { %2193 = vmatpush1.bf16.msra.mxu1 %v16381_v53 }
 0x1eb   :  { %2194 = vmatprep.subr.bf16.mxu1 %v16392_v44 }
 0x1ee   :  { %2195 = vmatpush1.bf16.msra.mxu1 %v16405_v50  ;;  %v12186_v50 = vld [vmem:[%s21326_s0 + $0x30] sm:$0xff] }
 0x1ef   :  { %2876 = vmatprep.subr.bf16.mxu1 %v16034_v58 }
 0x244   :  { %v1404_v53 = vpop.f32.mrb[4].mxu1  ;;  %v1445_v40 = vpop.f32.mrb[8].mxu0 }
 0x245   :  { %v1406_v39 = vpop.f32.mrb[5].mxu1  ;;  %v1447_v36 = vpop.f32.mrb[9].mxu0  ;;  %v1493_v26 = vadd.f32 %v12186_v50, %v1404_v53 }
 0x246   :  { %v1408_v35 = vpop.f32.mrb[6].mxu1  ;;  %v1449_v32 = vpop.f32.mrb[10].mxu0  ;;  %v1494_v58 = vadd.f32 %v12187_v28, %v1406_v39 }
 0x247   :  { %v1409_v44 = vpop.f32.mrb[7].mxu1  ;;  %v1450_v31 = vpop.f32.mrb[11].mxu0  ;;  %v12288_v24 = vmul.f32 -1.442695, %v1493_v26  ;;  %v12188_v32 = vld [vmem:[%s21326_s0 + $0x40] sm:$0xff] }
 0x248   :  { %v12289_v21 = vmul.f32 -1.442695, %v1494_v58  ;;  %v12189_v31 = vld [vmem:[%s21326_s0 + $0x48] sm:$0xff]  ;;  %v1507_v35 = vadd.f32 %v12188_v32, %v1445_v40 }
 0x249   :  { %14979 = vpow2.f32 %v12288_v24  ;;  %v1508_v44 = vadd.f32 %v12189_v31, %v1447_v36  ;;  %v12190_v36 = vld [vmem:[%s21326_s0 + $0x50] sm:$0xff] }
 0x24a   :  { %14981 = vpow2.f32 %v12289_v21  ;;  %v12290_v18 = vmul.f32 -1.442695, %v1507_v35 }
 0x24b   :  { %v12291_v12 = vmul.f32 -1.442695, %v1508_v44 }
 0x24c   :  { %14983 = vpow2.f32 %v12290_v18 }
 0x24d   :  { %14985 = vpow2.f32 %v12291_v12  ;;  %v12191_v12 = vld [vmem:[%s21326_s0 + $0x58] sm:$0xff] }
 0x253   :  { %v14980_v17 = vpop.eup %14979 }
 0x254   :  { %v14982_v22 = vpop.eup %14981  ;;  %v1501_v50 = vadd.f32 1.0, %v14980_v17 }
 0x255   :  { %v1502_v28 = vadd.f32 1.0, %v14982_v22 }
 0x256   :  { %14987 = vrcp.f32 %v1501_v50  ;;  %v14984_v21 = vpop.eup %14983 }
 0x257   :  { %14989 = vrcp.f32 %v1502_v28  ;;  %v14986_v26 = vpop.eup %14985  ;;  %v1515_v35 = vadd.f32 1.0, %v14984_v21 }
 0x258   :  { %v1516_v50 = vadd.f32 1.0, %v14986_v26  ;;  %v16479_v26 = vld [vmem:[%s21325_s1 + $0x74] ss:$24 sps:$4 sm:$0xff]  }
 0x260   :  { %v14988_v58 = vpop.eup %14987 }
 0x261   :  { %v14990_v17 = vpop.eup %14989 }
 0x284   :  { %v1486_v24 = vpop.f32.mrb[8].mxu1 }
 0x285   :  { %v1521_v39 = vadd.f32 %v1486_v24, %v15900_v56  ;;  %v1488_v53 = vpop.f32.mrb[9].mxu1 }
 0x286   :  { %v1522_v40 = vadd.f32 %v1488_v53, %v15902_v60  ;;  %v1490_v32 = vpop.f32.mrb[10].mxu1 }
 0x287   :  { %v1523_v22 = vmul.f32 %v14988_v58, %v1521_v39  ;;  %v1491_v18 = vpop.f32.mrb[11].mxu1 }
 0x288   :  { %v1524_v31 = vmul.f32 %v14990_v17, %v1522_v40  ;;  %v16493_v40 = vld [vmem:[%s21325_s1 + $0xa4] ss:$24 sps:$4 sm:$0xff]   ;;  %v21574_v17 = vld [vmem:[#allocation21_spill] sm:$0xff] }
 0x289   :  { %v1525_v44 = vadd.f32 %v12190_v36, %v1523_v22  ;;  %v16487_v36 = vld [vmem:[%s21325_s1 + $0x70] ss:$24 sps:$4 sm:$0xff]   ;;  %v21575_v22 = vld [vmem:[#allocation22_spill] sm:$0xff] }
 0x28a   :  { %v1526_v28 = vadd.f32 %v12191_v12, %v1524_v31  ;;  %v21576_v12 = vld [vmem:[#allocation23_spill] sm:$0xff]  ;;  %v21577_v31 = vld [vmem:[#allocation24_spill] sm:$0xff] }
 0x28b   :  { %14991 = vtanh.f32 %v1525_v44  ;;  %v21579_v44 = vld [vmem:[#allocation26_spill] sm:$0xff] }
 0x28c   :  { %14993 = vtanh.f32 %v1526_v28 }
 0x28d   :  { %14995 = vrcp.f32 %v1515_v35  ;;  %v21578_v35 = vld [vmem:[#allocation25_spill] sm:$0xff] }
 0x28e   :  { %14997 = vrcp.f32 %v1516_v50  ;;  %v21580_v50 = vld [vmem:[#allocation27_spill] sm:$0xff] }
 0x295   :  { %v14992_v24 = vpop.eup %14991 }
 0x296   :  { %v14994_v56 = vpop.eup %14993  ;;  %v1529_v53 = vsub.f32 %v15912_v14, %v14992_v24 }
 0x297   :  { %v14996_v32 = vpop.eup %14995  ;;  %v1530_v39 = vsub.f32 %v15914_v16, %v14994_v56  ;;  %v16465_v16 = vld [vmem:[%s21325_s1 + $0x44] ss:$24 sps:$4 sm:$0xff]  }
 0x298   :  { %v14998_v58 = vpop.eup %14997  ;;  %v1531_v60 = vmul.f32 %v14996_v32, %v1529_v53 }
 0x299   :  { %v1532_v10 = vmul.f32 %v14998_v58, %v1530_v39 }
 0x29a   :  { %v16439_v18 = vadd.f32 %v14992_v24, %v1531_v60  ;;  %v16456_v60 = vld [vmem:[%s21325_s1 + $0x10] ss:$24 sps:$4 sm:$0xff]  }
 0x29b   :  { %v16441_v21 = vadd.f32 %v14994_v56, %v1532_v10  ;;  %v16473_v10 = vld [vmem:[%s21325_s1 + $0x40] ss:$24 sps:$4 sm:$0xff]  }
 0x29c   :  { %12292 = vst [vmem:[%s21328_s3 + $0x10] sm:$0xff] %v16439_v18  ;;  %v16460_v56 = vpack.c.bf16 %v16439_v18, %v16439_v18 }
 0x29d   :  { %12293 = vst [vmem:[%s21328_s3 + $0x18] sm:$0xff] %v16441_v21  ;;  %v1546_v14 = vpack.c.bf16 %v16441_v21, %v16441_v21 }
 0x29f   :  { %2155 = vmatprep.mubr.bf16.mxu0 %v1546_v14  ;;  %2196 = vmatprep.mubr.bf16.mxu1 %v1546_v14 }
 0x2a0   :  { %2156 = vmatmul.mubr.bf16.vlgmr.msra.gmra.mrb[12].mxu0 %v16460_v56  ;;  %2197 = vmatmul.mubr.bf16.vlgmr.msra.gmra.mrb[12].mxu1 %v16460_v56 }
 0x2a1   :  { %2206 = vmatpush1.bf16.msra.mxu0 %v16456_v60  ;;  %2237 = vmatprep.mubr.bf16.mxu0 %v1546_v14 }
 0x2a2   :  { %2207 = vmatprep.subr.bf16.mxu0 %v16465_v16  ;;  %2877 = vmatpush1.bf16.msra.mxu1 %v16029_v54  ;;  %v16501_v54 = vld [vmem:[%s21325_s1 + $0xa0] ss:$24 sps:$4 sm:$0xff]  }
 0x2a3   :  { %2878 = vmatprep.subr.bf16.mxu1 %v16049_v55  ;;  %v16507_v55 = vld [vmem:[%s21325_s1 + $0xd4] ss:$24 sps:$4 sm:$0xff]  }
 0x2a5   :  { %2208 = vmatpush1.bf16.msra.mxu0 %v16473_v10 }
 0x2a6   :  { %2209 = vmatprep.subr.bf16.mxu0 %v16479_v26  ;;  %2879 = vmatpush1.bf16.msra.mxu1 %v16062_v57  ;;  %v16515_v57 = vld [vmem:[%s21325_s1 + $0xd0] ss:$24 sps:$4 sm:$0xff]  }
 0x2a7   :  { %2880 = vmatprep.subr.bf16.mxu1 %v16074_v62  ;;  %v16521_v62 = vld [vmem:[%s21325_s1 + $0x104] ss:$24 sps:$4 sm:$0xff]  }
 0x2a9   :  { %2210 = vmatpush1.bf16.msra.mxu0 %v16487_v36 }
 0x2aa   :  { %2211 = vmatprep.subr.bf16.mxu0 %v16493_v40  ;;  %2881 = vmatpush1.bf16.msra.mxu1 %v16086_v61  ;;  %v16529_v61 = vld [vmem:[%s21325_s1 + $0x100] ss:$24 sps:$4 sm:$0xff]  }
 0x2ab   :  { %2882 = vmatprep.subr.bf16.mxu1 %v16098_v3  ;;  %v16535_v3 = vld [vmem:[%s21325_s1 + $0x134] ss:$24 sps:$4 sm:$0xff]  }
 0x2ad   :  { %2212 = vmatpush1.bf16.msra.mxu0 %v16501_v54 }
 0x2ae   :  { %2213 = vmatprep.subr.bf16.mxu0 %v16507_v55  ;;  %2883 = vmatpush1.bf16.msra.mxu1 %v16110_v5  ;;  %v16543_v5 = vld [vmem:[%s21325_s1 + $0x130] ss:$24 sps:$4 sm:$0xff]  }
 0x2af   :  { %2884 = vmatprep.subr.bf16.mxu1 %v16122_v7  ;;  %v16549_v7 = vld [vmem:[%s21325_s1 + $0x164] ss:$24 sps:$4 sm:$0xff]  }
 0x2b1   :  { %2214 = vmatpush1.bf16.msra.mxu0 %v16515_v57 }
 0x2b2   :  { %2215 = vmatprep.subr.bf16.mxu0 %v16521_v62  ;;  %2885 = vmatpush1.bf16.msra.mxu1 %v16134_v9  ;;  %v16557_v9 = vld [vmem:[%s21325_s1 + $0x160] ss:$24 sps:$4 sm:$0xff]  }
 0x2b3   :  { %2886 = vmatprep.subr.bf16.mxu1 %v16146_v11  ;;  %v16563_v11 = vld [vmem:[%s21325_s1 + $0x194] ss:$24 sps:$4 sm:$0xff]  }
 0x2b5   :  { %2216 = vmatpush1.bf16.msra.mxu0 %v16529_v61 }
 0x2b6   :  { %2217 = vmatprep.subr.bf16.mxu0 %v16535_v3  ;;  %2887 = vmatpush1.bf16.msra.mxu1 %v16158_v15  ;;  %v16571_v15 = vld [vmem:[%s21325_s1 + $0x190] ss:$24 sps:$4 sm:$0xff]  }
 0x2b7   :  { %2888 = vmatprep.subr.bf16.mxu1 %v16170_v19  ;;  %v16577_v19 = vld [vmem:[%s21325_s1 + $0x1c4] ss:$24 sps:$4 sm:$0xff]  }
 0x2b9   :  { %2218 = vmatpush1.bf16.msra.mxu0 %v16543_v5 }
 0x2ba   :  { %2219 = vmatprep.subr.bf16.mxu0 %v16549_v7  ;;  %2889 = vmatpush1.bf16.msra.mxu1 %v16182_v13  ;;  %v16585_v13 = vld [vmem:[%s21325_s1 + $0x1c0] ss:$24 sps:$4 sm:$0xff]  }
 0x2bb   :  { %2890 = vmatprep.subr.bf16.mxu1 %v16194_v20  ;;  %v16591_v20 = vld [vmem:[%s21325_s1 + $0x1f4] ss:$24 sps:$4 sm:$0xff]  }
 0x2bd   :  { %2220 = vmatpush1.bf16.msra.mxu0 %v16557_v9 }
 0x2be   :  { %2221 = vmatprep.subr.bf16.mxu0 %v16563_v11  ;;  %2891 = vmatpush1.bf16.msra.mxu1 %v16206_v23  ;;  %v16599_v23 = vld [vmem:[%s21325_s1 + $0x1f0] ss:$24 sps:$4 sm:$0xff]  }
 0x2bf   :  { %2892 = vmatprep.subr.bf16.mxu1 %v16218_v25  ;;  %v16605_v25 = vld [vmem:[%s21325_s1 + $0x224] ss:$24 sps:$4 sm:$0xff]  }
 0x2c1   :  { %2222 = vmatpush1.bf16.msra.mxu0 %v16571_v15 }
 0x2c2   :  { %2223 = vmatprep.subr.bf16.mxu0 %v16577_v19  ;;  %2893 = vmatpush1.bf16.msra.mxu1 %v16230_v27  ;;  %v16613_v27 = vld [vmem:[%s21325_s1 + $0x220] ss:$24 sps:$4 sm:$0xff]  }
 0x2c3   :  { %2894 = vmatprep.subr.bf16.mxu1 %v16242_v29  ;;  %v16619_v29 = vld [vmem:[%s21325_s1 + $0x254] ss:$24 sps:$4 sm:$0xff]  }
 0x2c5   :  { %2224 = vmatpush1.bf16.msra.mxu0 %v16585_v13 }
 0x2c6   :  { %2225 = vmatprep.subr.bf16.mxu0 %v16591_v20  ;;  %2895 = vmatpush1.bf16.msra.mxu1 %v16249_v30  ;;  %v16627_v30 = vld [vmem:[%s21325_s1 + $0x250] ss:$24 sps:$4 sm:$0xff]  }
 0x2c7   :  { %2896 = vmatprep.subr.bf16.mxu1 %v16269_v33  ;;  %v16633_v33 = vld [vmem:[%s21325_s1 + $0x284] ss:$24 sps:$4 sm:$0xff]  }
 0x2c9   :  { %2226 = vmatpush1.bf16.msra.mxu0 %v16599_v23 }
 0x2ca   :  { %2227 = vmatprep.subr.bf16.mxu0 %v16605_v25  ;;  %2897 = vmatpush1.bf16.msra.mxu1 %v16274_v34  ;;  %v16641_v34 = vld [vmem:[%s21325_s1 + $0x280] ss:$24 sps:$4 sm:$0xff]  }
 0x2cb   :  { %2898 = vmatprep.subr.bf16.mxu1 %v16293_v37  ;;  %v16647_v37 = vld [vmem:[%s21325_s1 + $0x2b4] ss:$24 sps:$4 sm:$0xff]  }
 0x2cd   :  { %2228 = vmatpush1.bf16.msra.mxu0 %v16613_v27 }
 0x2ce   :  { %2229 = vmatprep.subr.bf16.mxu0 %v16619_v29  ;;  %2899 = vmatpush1.bf16.msra.mxu1 %v16298_v38  ;;  %v16655_v38 = vld [vmem:[%s21325_s1 + $0x2b0] ss:$24 sps:$4 sm:$0xff]  }
 0x2cf   :  { %2900 = vmatprep.subr.bf16.mxu1 %v16314_v41  ;;  %v16661_v41 = vld [vmem:[%s21325_s1 + $0x2e4] ss:$24 sps:$4 sm:$0xff]  }
 0x2d1   :  { %2230 = vmatpush1.bf16.msra.mxu0 %v16627_v30 }
 0x2d2   :  { %2231 = vmatprep.subr.bf16.mxu0 %v16633_v33  ;;  %2901 = vmatpush1.bf16.msra.mxu1 %v16321_v42  ;;  %v16669_v42 = vld [vmem:[%s21325_s1 + $0x2e0] ss:$24 sps:$4 sm:$0xff]  }
 0x2d3   :  { %2902 = vmatprep.subr.bf16.mxu1 %v16338_v45  ;;  %v21560_v45 = vld [vmem:[#allocation7_spill] sm:$0xff] }
 0x2d5   :  { %2232 = vmatpush1.bf16.msra.mxu0 %v16641_v34 }
 0x2d6   :  { %2233 = vmatprep.subr.bf16.mxu0 %v16647_v37  ;;  %2903 = vmatpush1.bf16.msra.mxu1 %v16350_v47  ;;  %v21570_v47 = vld [vmem:[#allocation17_spill] sm:$0xff] }
 0x2d7   :  { %2904 = vmatprep.subr.bf16.mxu1 %v16362_v49  ;;  %v21572_v49 = vld [vmem:[#allocation19_spill] sm:$0xff] }
 0x2d9   :  { %2234 = vmatpush1.bf16.msra.mxu0 %v16655_v38 }
 0x2da   :  { %2235 = vmatprep.subr.bf16.mxu0 %v16661_v41  ;;  %2905 = vmatpush1.bf16.msra.mxu1 %v16374_v52  ;;  %v21573_v52 = vld [vmem:[#allocation20_spill] sm:$0xff] }
 0x2db   :  { %2906 = vmatprep.subr.bf16.mxu1 %v16386_v46  ;;  %v21569_v46 = vld [vmem:[#allocation16_spill] sm:$0xff] }
 0x2dd   :  { %2236 = vmatpush1.bf16.msra.mxu0 %v16669_v42 }
 0x2de   :  { %2917 = vmatprep.subr.bf16.mxu0 %v16044_v59  ;;  %2907 = vmatpush1.bf16.msra.mxu1 %v16398_v48  ;;  %v21558_v59 = vld [vmem:[#allocation5_spill] sm:$0xff]  ;;  %v21571_v48 = vld [vmem:[#allocation18_spill] sm:$0xff] }
 0x2df   :  { %2958 = vmatprep.subr.bf16.mxu1 %v16413_v43  ;;  %v21559_v43 = vld [vmem:[#allocation6_spill] sm:$0xff] }
 0x2e0   :  { %2238 = vmatmul.mubr.bf16.vlgmr.msra.gmra.mrb[16].mxu0 %v16460_v56 }
 0x2e1   :  { %2918 = vmatpush1.bf16.msra.mxu0 %v16039_v63  ;;  %v21561_v63 = vld [vmem:[#allocation8_spill] sm:$0xff] }
 0x2e2   :  { %2919 = vmatprep.subr.bf16.mxu0 %v16055_v51  ;;  %v21562_v51 = vld [vmem:[#allocation9_spill] sm:$0xff] }
 0x2e5   :  { %2920 = vmatpush1.bf16.msra.mxu0 %v16069_v1  ;;  %v21563_v1 = vld [vmem:[#allocation10_spill] sm:$0xff] }
 0x2e6   :  { %2921 = vmatprep.subr.bf16.mxu0 %v16080_v0  ;;  %v21564_v0 = vld [vmem:[#allocation11_spill] sm:$0xff] }
 0x2e9   :  { %2922 = vmatpush1.bf16.msra.mxu0 %v16093_v2  ;;  %v21565_v2 = vld [vmem:[#allocation12_spill] sm:$0xff] }
 0x2ea   :  { %2923 = vmatprep.subr.bf16.mxu0 %v16104_v4  ;;  %v21566_v4 = vld [vmem:[#allocation13_spill] sm:$0xff] }
 0x2ed   :  { %2924 = vmatpush1.bf16.msra.mxu0 %v16117_v6  ;;  %v21567_v6 = vld [vmem:[#allocation14_spill] sm:$0xff] }
 0x2ee   :  { %2925 = vmatprep.subr.bf16.mxu0 %v16128_v8  ;;  %v21568_v8 = vld [vmem:[#allocation15_spill] sm:$0xff] }
 0x2f1   :  { %2926 = vmatpush1.bf16.msra.mxu0 %v21558_v59  ;;  %v12294_v59 = vld [vmem:[%s21326_s0 + $0x60] sm:$0xff] }
 0x2f2   :  { %2927 = vmatprep.subr.bf16.mxu0 %v21559_v43  ;;  %v12295_v43 = vld [vmem:[%s21326_s0 + $0x68] sm:$0xff] }
 0x2f5   :  { %2928 = vmatpush1.bf16.msra.mxu0 %v21560_v45 }
 0x2f6   :  { %2929 = vmatprep.subr.bf16.mxu0 %v21561_v63 }
 0x2f9   :  { %2930 = vmatpush1.bf16.msra.mxu0 %v21562_v51 }
 0x2fa   :  { %2931 = vmatprep.subr.bf16.mxu0 %v21563_v1 }
 0x2fd   :  { %2932 = vmatpush1.bf16.msra.mxu0 %v21564_v0  ;;  %v12296_v0 = vld [vmem:[%s21326_s0 + $0x70] sm:$0xff] }
 0x2fe   :  { %2933 = vmatprep.subr.bf16.mxu0 %v21565_v2  ;;  %v12297_v2 = vld [vmem:[%s21326_s0 + $0x78] sm:$0xff] }
 0x301   :  { %2934 = vmatpush1.bf16.msra.mxu0 %v21566_v4 }
 0x302   :  { %2935 = vmatprep.subr.bf16.mxu0 %v21567_v6 }
 0x305   :  { %2936 = vmatpush1.bf16.msra.mxu0 %v21568_v8 }
 0x306   :  { %2937 = vmatprep.subr.bf16.mxu0 %v21569_v46 }
 0x309   :  { %2938 = vmatpush1.bf16.msra.mxu0 %v21570_v47 }
 0x30a   :  { %2939 = vmatprep.subr.bf16.mxu0 %v21571_v48 }
 0x30d   :  { %2940 = vmatpush1.bf16.msra.mxu0 %v21572_v49 }
 0x30e   :  { %2941 = vmatprep.subr.bf16.mxu0 %v21573_v52 }
 0x311   :  { %2942 = vmatpush1.bf16.msra.mxu0 %v21574_v17 }
 0x312   :  { %2943 = vmatprep.subr.bf16.mxu0 %v21575_v22 }
 0x315   :  { %2944 = vmatpush1.bf16.msra.mxu0 %v21576_v12 }
 0x316   :  { %2945 = vmatprep.subr.bf16.mxu0 %v21577_v31  ;;  %v21581_v31 = vld [vmem:[#allocation3_spill] sm:$0xff] }
 0x319   :  { %2946 = vmatpush1.bf16.msra.mxu0 %v21578_v35 }
 0x31a   :  { %2947 = vmatprep.subr.bf16.mxu0 %v21579_v44 }
 0x31d   :  { %2948 = vmatpush1.bf16.msra.mxu0 %v21580_v50 }
 0x373   :  { %v2157_v28 = vpop.f32.mrb[12].mxu0  ;;  %v2198_v24 = vpop.f32.mrb[12].mxu1 }
 0x374   :  { %v2159_v53 = vpop.f32.mrb[13].mxu0  ;;  %v2200_v32 = vpop.f32.mrb[13].mxu1  ;;  %v2246_v45 = vadd.f32 %v12294_v59, %v2157_v28  ;;  %v2260_v4 = vadd.f32 %v12296_v0, %v2198_v24  ;;  %v12298_v28 = vld [vmem:[%s21326_s0 + $0x80] sm:$0xff]  ;;  %v21582_v24 = vld [vmem:[#allocation4_spill] sm:$0xff] }
 0x375   :  { %v2161_v39 = vpop.f32.mrb[14].mxu0  ;;  %v2202_v58 = vpop.f32.mrb[14].mxu1  ;;  %v2247_v63 = vadd.f32 %v12295_v43, %v2159_v53  ;;  %v2261_v6 = vadd.f32 %v12297_v2, %v2200_v32 }
 0x376   :  { %v2162_v14 = vpop.f32.mrb[15].mxu0  ;;  %v2203_v56 = vpop.f32.mrb[15].mxu1  ;;  %v12396_v51 = vmul.f32 -1.442695, %v2246_v45  ;;  %v12398_v47 = vmul.f32 -1.442695, %v2260_v4 }
 0x377   :  { %v12397_v1 = vmul.f32 -1.442695, %v2247_v63  ;;  %v12399_v48 = vmul.f32 -1.442695, %v2261_v6  ;;  %v12299_v14 = vld [vmem:[%s21326_s0 + $0x88] sm:$0xff] }
 0x378   :  { %14999 = vpow2.f32 %v12396_v51 }
 0x379   :  { %15001 = vpow2.f32 %v12397_v1 }
 0x37a   :  { %15003 = vpow2.f32 %v12398_v47 }
 0x37b   :  { %15005 = vpow2.f32 %v12399_v48 }
 0x382   :  { %v15000_v8 = vpop.eup %14999 }
 0x383   :  { %v15002_v46 = vpop.eup %15001  ;;  %v2254_v49 = vadd.f32 1.0, %v15000_v8 }
 0x384   :  { %v2255_v52 = vadd.f32 1.0, %v15002_v46  ;;  %v15004_v17 = vpop.eup %15003 }
 0x385   :  { %15007 = vrcp.f32 %v2254_v49  ;;  %v15006_v12 = vpop.eup %15005  ;;  %v2268_v43 = vadd.f32 1.0, %v15004_v17  ;;  %v16971_v17 = vld [vmem:[%s21325_s1 + $0x184] ss:$24 sps:$4 sm:$0xff]  }
 0x386   :  { %15009 = vrcp.f32 %v2255_v52  ;;  %v2269_v63 = vadd.f32 1.0, %v15006_v12  ;;  %v16966_v52 = vld [vmem:[%s21325_s1 + $0x158] ss:$24 sps:$4 sm:$0xff]  }
 0x387   :  { %21589 = vst [vmem:[#allocation11_spill] sm:$0xff] %v16966_v52  ;;  %v16983_v12 = vld [vmem:[%s21325_s1 + $0x180] ss:$24 sps:$4 sm:$0xff]  }
 0x38f   :  { %v15008_v50 = vpop.eup %15007 }
 0x390   :  { %v15010_v39 = vpop.eup %15009 }
 0x3b3   :  { %v2239_v22 = vpop.f32.mrb[16].mxu0 }
 0x3b4   :  { %v2274_v35 = vadd.f32 %v2239_v22, %v21581_v31  ;;  %v2241_v44 = vpop.f32.mrb[17].mxu0  ;;  %v16977_v22 = vld [vmem:[%s21325_s1 + $0x18c] ss:$24 sps:$4 sm:$0xff]  }
 0x3b5   :  { %v2275_v53 = vadd.f32 %v2241_v44, %v21582_v24  ;;  %v2243_v32 = vpop.f32.mrb[18].mxu0  ;;  %21590 = vst [vmem:[#allocation12_spill] sm:$0xff] %v16977_v22  ;;  %v16995_v44 = vld [vmem:[%s21325_s1 + $0x1b4] ss:$24 sps:$4 sm:$0xff]  }
 0x3b6   :  { %v2276_v58 = vmul.f32 %v15008_v50, %v2274_v35  ;;  %v2244_v56 = vpop.f32.mrb[19].mxu0  ;;  %v16990_v35 = vld [vmem:[%s21325_s1 + $0x188] ss:$24 sps:$4 sm:$0xff]   ;;  %v17022_v32 = vld [vmem:[%s21325_s1 + $0x1e4] ss:$24 sps:$4 sm:$0xff]  }
 0x3b7   :  { %v2277_v59 = vmul.f32 %v15010_v39, %v2275_v53  ;;  %21591 = vst [vmem:[#allocation13_spill] sm:$0xff] %v16990_v35  ;;  %v17002_v50 = vld [vmem:[%s21325_s1 + $0x1b0] ss:$24 sps:$4 sm:$0xff]   ;;  %v17027_v39 = vld [vmem:[%s21325_s1 + $0x1e0] ss:$24 sps:$4 sm:$0xff]  }
 0x3b8   :  { %v2278_v45 = vadd.f32 %v12298_v28, %v2276_v58  ;;  %v17010_v28 = vld [vmem:[%s21325_s1 + $0x1bc] ss:$24 sps:$4 sm:$0xff]   ;;  %v17015_v53 = vld [vmem:[%s21325_s1 + $0x1b8] ss:$24 sps:$4 sm:$0xff]   ;;  %v17032_v58 = vld [vmem:[%s21325_s1 + $0x1ec] ss:$24 sps:$4 sm:$0xff]  }
 0x3b9   :  { %v2279_v51 = vadd.f32 %v12299_v14, %v2277_v59  ;;  %21592 = vst [vmem:[#allocation14_spill] sm:$0xff] %v17010_v28  ;;  %21593 = vst [vmem:[#allocation15_spill] sm:$0xff] %v17015_v53  ;;  %v17038_v14 = vld [vmem:[%s21325_s1 + $0x1e8] ss:$24 sps:$4 sm:$0xff]   ;;  %v17046_v56 = vld [vmem:[%s21325_s1 + $0x214] ss:$24 sps:$4 sm:$0xff]  }
 0x3ba   :  { %15011 = vtanh.f32 %v2278_v45  ;;  %21594 = vst [vmem:[#allocation16_spill] sm:$0xff] %v17032_v58  ;;  %21595 = vst [vmem:[#allocation17_spill] sm:$0xff] %v17038_v14  ;;  %v17051_v59 = vld [vmem:[%s21325_s1 + $0x210] ss:$24 sps:$4 sm:$0xff]  }
 0x3bb   :  { %15013 = vtanh.f32 %v2279_v51  ;;  %v17062_v45 = vld [vmem:[%s21325_s1 + $0x218] ss:$24 sps:$4 sm:$0xff]  }
 0x3bc   :  { %15015 = vrcp.f32 %v2268_v43  ;;  %v17056_v43 = vld [vmem:[%s21325_s1 + $0x21c] ss:$24 sps:$4 sm:$0xff]   ;;  %21597 = vst [vmem:[#allocation19_spill] sm:$0xff] %v17062_v45  ;;  %v17074_v51 = vld [vmem:[%s21325_s1 + $0x240] ss:$24 sps:$4 sm:$0xff]  }
 0x3bd   :  { %15017 = vrcp.f32 %v2269_v63  ;;  %21596 = vst [vmem:[#allocation18_spill] sm:$0xff] %v17056_v43  ;;  %v17067_v63 = vld [vmem:[%s21325_s1 + $0x244] ss:$24 sps:$4 sm:$0xff]  }
 0x3c4   :  { %v15012_v1 = vpop.eup %15011 }
 0x3c5   :  { %v15014_v0 = vpop.eup %15013  ;;  %v2282_v2 = vsub.f32 %v16439_v18, %v15012_v1 }
 0x3c6   :  { %v15016_v4 = vpop.eup %15015  ;;  %v2283_v6 = vsub.f32 %v16441_v21, %v15014_v0 }
 0x3c7   :  { %v15018_v8 = vpop.eup %15017  ;;  %v2284_v46 = vmul.f32 %v15016_v4, %v2282_v2  ;;  %v17091_v2 = vld [vmem:[%s21325_s1 + $0x274] ss:$24 sps:$4 sm:$0xff]  }
 0x3c8   :  { %v2285_v47 = vmul.f32 %v15018_v8, %v2283_v6  ;;  %v17097_v4 = vld [vmem:[%s21325_s1 + $0x27c] ss:$24 sps:$4 sm:$0xff]   ;;  %v17103_v6 = vld [vmem:[%s21325_s1 + $0x270] ss:$24 sps:$4 sm:$0xff]  }
 0x3c9   :  { %v16732_v48 = vadd.f32 %v15012_v1, %v2284_v46  ;;  %v17079_v1 = vld [vmem:[%s21325_s1 + $0x24c] ss:$24 sps:$4 sm:$0xff]   ;;  %21600 = vst [vmem:[#allocation22_spill] sm:$0xff] %v17097_v4  ;;  %v17110_v8 = vld [vmem:[%s21325_s1 + $0x278] ss:$24 sps:$4 sm:$0xff]  }
 0x3ca   :  { %v16734_v49 = vadd.f32 %v15014_v0, %v2285_v47  ;;  %21598 = vst [vmem:[#allocation20_spill] sm:$0xff] %v17079_v1  ;;  %v17086_v0 = vld [vmem:[%s21325_s1 + $0x248] ss:$24 sps:$4 sm:$0xff]   ;;  %21601 = vst [vmem:[#allocation23_spill] sm:$0xff] %v17110_v8  ;;  %v17115_v46 = vld [vmem:[%s21325_s1 + $0x2a4] ss:$24 sps:$4 sm:$0xff]  }
 0x3cb   :  { %12400 = vst [vmem:[%s21328_s3 + $0x20] sm:$0xff] %v16732_v48  ;;  %v2298_v21 = vpack.c.bf16 %v16732_v48, %v16732_v48  ;;  %21599 = vst [vmem:[#allocation21_spill] sm:$0xff] %v17086_v0  ;;  %v17121_v47 = vld [vmem:[%s21325_s1 + $0x2ac] ss:$24 sps:$4 sm:$0xff]  }
 0x3cc   :  { %12401 = vst [vmem:[%s21328_s3 + $0x28] sm:$0xff] %v16734_v49  ;;  %v2299_v18 = vpack.c.bf16 %v16734_v49, %v16734_v49  ;;  %21602 = vst [vmem:[#allocation24_spill] sm:$0xff] %v17121_v47 }
 0x3ce   :  { %2908 = vmatprep.mubr.bf16.mxu1 %v2299_v18  ;;  %2949 = vmatprep.mubr.bf16.mxu0 %v2299_v18 }
 0x3cf   :  { %2909 = vmatmul.mubr.bf16.vlgmr.msra.gmra.mrb[16].mxu1 %v2298_v21  ;;  %2950 = vmatmul.mubr.bf16.vlgmr.msra.gmra.mrb[20].mxu0 %v2298_v21 }
 0x3d0   :  { %2959 = vmatpush1.bf16.msra.mxu1 %v16456_v60  ;;  %2990 = vmatprep.mubr.bf16.mxu1 %v2299_v18  ;;  %v16782_v60 = vld [vmem:[%s21325_s1] ss:$24 sps:$4 sm:$0xff]  }
 0x3d1   :  { %2960 = vmatprep.subr.bf16.mxu1 %v16465_v16  ;;  %v16787_v16 = vld [vmem:[%s21325_s1 + $0x4] ss:$24 sps:$4 sm:$0xff]   ;;  %v17127_v18 = vld [vmem:[%s21325_s1 + $0x2a0] ss:$24 sps:$4 sm:$0xff]  }
 0x3d2   :  { %3629 = vmatprep.subr.bf16.mxu0 %v16787_v16 }
 0x3d3   :  { %3630 = vmatpush1.bf16.msra.mxu0 %v16782_v60 }
 0x3d4   :  { %2961 = vmatpush1.bf16.msra.mxu1 %v16473_v10  ;;  %v16792_v10 = vld [vmem:[%s21325_s1 + $0x8] ss:$24 sps:$4 sm:$0xff]  }
 0x3d5   :  { %2962 = vmatprep.subr.bf16.mxu1 %v16479_v26  ;;  %v16797_v26 = vld [vmem:[%s21325_s1 + $0xc] ss:$24 sps:$4 sm:$0xff]  }
 0x3d8   :  { %2963 = vmatpush1.bf16.msra.mxu1 %v16487_v36  ;;  %v16802_v36 = vld [vmem:[%s21325_s1 + $0x34] ss:$24 sps:$4 sm:$0xff]  }
 0x3d9   :  { %2964 = vmatprep.subr.bf16.mxu1 %v16493_v40  ;;  %v16808_v40 = vld [vmem:[%s21325_s1 + $0x3c] ss:$24 sps:$4 sm:$0xff]   ;;  %3631 = vmatprep.subr.bf16.mxu0 %v16802_v36 }
 0x3dc   :  { %2965 = vmatpush1.bf16.msra.mxu1 %v16501_v54  ;;  %v16815_v54 = vld [vmem:[%s21325_s1 + $0x30] ss:$24 sps:$4 sm:$0xff]  }
 0x3dd   :  { %2966 = vmatprep.subr.bf16.mxu1 %v16507_v55  ;;  %v16822_v55 = vld [vmem:[%s21325_s1 + $0x38] ss:$24 sps:$4 sm:$0xff]   ;;  %3632 = vmatpush1.bf16.msra.mxu0 %v16815_v54 }
 0x3e0   :  { %2967 = vmatpush1.bf16.msra.mxu1 %v16515_v57  ;;  %v16827_v57 = vld [vmem:[%s21325_s1 + $0x64] ss:$24 sps:$4 sm:$0xff]  }
 0x3e1   :  { %2968 = vmatprep.subr.bf16.mxu1 %v16521_v62  ;;  %v16833_v62 = vld [vmem:[%s21325_s1 + $0x6c] ss:$24 sps:$4 sm:$0xff]   ;;  %3633 = vmatprep.subr.bf16.mxu0 %v16827_v57 }
 0x3e4   :  { %2969 = vmatpush1.bf16.msra.mxu1 %v16529_v61  ;;  %v16839_v61 = vld [vmem:[%s21325_s1 + $0x60] ss:$24 sps:$4 sm:$0xff]  }
 0x3e5   :  { %2970 = vmatprep.subr.bf16.mxu1 %v16535_v3  ;;  %v16846_v3 = vld [vmem:[%s21325_s1 + $0x68] ss:$24 sps:$4 sm:$0xff]   ;;  %3634 = vmatpush1.bf16.msra.mxu0 %v16839_v61 }
 0x3e8   :  { %2971 = vmatpush1.bf16.msra.mxu1 %v16543_v5  ;;  %v16851_v5 = vld [vmem:[%s21325_s1 + $0x94] ss:$24 sps:$4 sm:$0xff]  }
 0x3e9   :  { %2972 = vmatprep.subr.bf16.mxu1 %v16549_v7  ;;  %v16857_v7 = vld [vmem:[%s21325_s1 + $0x9c] ss:$24 sps:$4 sm:$0xff]   ;;  %3635 = vmatprep.subr.bf16.mxu0 %v16851_v5 }
 0x3ec   :  { %2973 = vmatpush1.bf16.msra.mxu1 %v16557_v9  ;;  %v16863_v9 = vld [vmem:[%s21325_s1 + $0x90] ss:$24 sps:$4 sm:$0xff]  }
 0x3ed   :  { %2974 = vmatprep.subr.bf16.mxu1 %v16563_v11  ;;  %v16870_v11 = vld [vmem:[%s21325_s1 + $0x98] ss:$24 sps:$4 sm:$0xff]   ;;  %3636 = vmatpush1.bf16.msra.mxu0 %v16863_v9 }
 0x3f0   :  { %2975 = vmatpush1.bf16.msra.mxu1 %v16571_v15  ;;  %v16875_v15 = vld [vmem:[%s21325_s1 + $0xc4] ss:$24 sps:$4 sm:$0xff]  }
 0x3f1   :  { %2976 = vmatprep.subr.bf16.mxu1 %v16577_v19  ;;  %v16881_v19 = vld [vmem:[%s21325_s1 + $0xcc] ss:$24 sps:$4 sm:$0xff]   ;;  %3637 = vmatprep.subr.bf16.mxu0 %v16875_v15 }
 0x3f4   :  { %2977 = vmatpush1.bf16.msra.mxu1 %v16585_v13  ;;  %v16887_v13 = vld [vmem:[%s21325_s1 + $0xc0] ss:$24 sps:$4 sm:$0xff]  }
 0x3f5   :  { %2978 = vmatprep.subr.bf16.mxu1 %v16591_v20  ;;  %v16894_v20 = vld [vmem:[%s21325_s1 + $0xc8] ss:$24 sps:$4 sm:$0xff]   ;;  %3638 = vmatpush1.bf16.msra.mxu0 %v16887_v13 }
 0x3f6   :  { %21583 = vst [vmem:[#allocation5_spill] sm:$0xff] %v16894_v20 }
 0x3f8   :  { %2979 = vmatpush1.bf16.msra.mxu1 %v16599_v23  ;;  %v16899_v23 = vld [vmem:[%s21325_s1 + $0xf4] ss:$24 sps:$4 sm:$0xff]  }
 0x3f9   :  { %2980 = vmatprep.subr.bf16.mxu1 %v16605_v25  ;;  %v16905_v25 = vld [vmem:[%s21325_s1 + $0xfc] ss:$24 sps:$4 sm:$0xff]   ;;  %3639 = vmatprep.subr.bf16.mxu0 %v16899_v23 }
 0x3fa   :  { %21584 = vst [vmem:[#allocation6_spill] sm:$0xff] %v16905_v25 }
 0x3fc   :  { %2981 = vmatpush1.bf16.msra.mxu1 %v16613_v27  ;;  %v16911_v27 = vld [vmem:[%s21325_s1 + $0xf0] ss:$24 sps:$4 sm:$0xff]  }
 0x3fd   :  { %2982 = vmatprep.subr.bf16.mxu1 %v16619_v29  ;;  %v16918_v29 = vld [vmem:[%s21325_s1 + $0xf8] ss:$24 sps:$4 sm:$0xff]   ;;  %3640 = vmatpush1.bf16.msra.mxu0 %v16911_v27 }
 0x3fe   :  { %21585 = vst [vmem:[#allocation7_spill] sm:$0xff] %v16918_v29 }
 0x400   :  { %2983 = vmatpush1.bf16.msra.mxu1 %v16627_v30  ;;  %v16923_v30 = vld [vmem:[%s21325_s1 + $0x124] ss:$24 sps:$4 sm:$0xff]  }
 0x401   :  { %2984 = vmatprep.subr.bf16.mxu1 %v16633_v33  ;;  %v16929_v33 = vld [vmem:[%s21325_s1 + $0x12c] ss:$24 sps:$4 sm:$0xff]   ;;  %3641 = vmatprep.subr.bf16.mxu0 %v16923_v30 }
 0x402   :  { %21586 = vst [vmem:[#allocation8_spill] sm:$0xff] %v16929_v33 }
 0x404   :  { %2985 = vmatpush1.bf16.msra.mxu1 %v16641_v34  ;;  %v16935_v34 = vld [vmem:[%s21325_s1 + $0x120] ss:$24 sps:$4 sm:$0xff]  }
 0x405   :  { %2986 = vmatprep.subr.bf16.mxu1 %v16647_v37  ;;  %v16942_v37 = vld [vmem:[%s21325_s1 + $0x128] ss:$24 sps:$4 sm:$0xff]   ;;  %3642 = vmatpush1.bf16.msra.mxu0 %v16935_v34 }
 0x406   :  { %21587 = vst [vmem:[#allocation9_spill] sm:$0xff] %v16942_v37 }
 0x408   :  { %2987 = vmatpush1.bf16.msra.mxu1 %v16655_v38  ;;  %v16947_v38 = vld [vmem:[%s21325_s1 + $0x154] ss:$24 sps:$4 sm:$0xff]  }
 0x409   :  { %2988 = vmatprep.subr.bf16.mxu1 %v16661_v41  ;;  %v16953_v41 = vld [vmem:[%s21325_s1 + $0x15c] ss:$24 sps:$4 sm:$0xff]   ;;  %3643 = vmatprep.subr.bf16.mxu0 %v16947_v38 }
 0x40a   :  { %21588 = vst [vmem:[#allocation10_spill] sm:$0xff] %v16953_v41 }
 0x40c   :  { %2989 = vmatpush1.bf16.msra.mxu1 %v16669_v42  ;;  %v16959_v42 = vld [vmem:[%s21325_s1 + $0x150] ss:$24 sps:$4 sm:$0xff]  }
 0x40d   :  { %3670 = vmatprep.subr.bf16.mxu1 %v16797_v26  ;;  %3644 = vmatpush1.bf16.msra.mxu0 %v16959_v42 }
 0x40e   :  { %3645 = vmatprep.subr.bf16.mxu0 %v16971_v17 }
 0x40f   :  { %2991 = vmatmul.mubr.bf16.vlgmr.msra.gmra.mrb[20].mxu1 %v2298_v21  ;;  %v17134_v21 = vld [vmem:[%s21325_s1 + $0x2a8] ss:$24 sps:$4 sm:$0xff]  }
 0x410   :  { %3671 = vmatpush1.bf16.msra.mxu1 %v16792_v10  ;;  %21603 = vst [vmem:[#allocation25_spill] sm:$0xff] %v17134_v21 }
 0x411   :  { %3672 = vmatprep.subr.bf16.mxu1 %v16808_v40  ;;  %3646 = vmatpush1.bf16.msra.mxu0 %v16983_v12 }
 0x412   :  { %3647 = vmatprep.subr.bf16.mxu0 %v16995_v44 }
 0x414   :  { %3673 = vmatpush1.bf16.msra.mxu1 %v16822_v55 }
 0x415   :  { %3674 = vmatprep.subr.bf16.mxu1 %v16833_v62  ;;  %3648 = vmatpush1.bf16.msra.mxu0 %v17002_v50 }
 0x416   :  { %3649 = vmatprep.subr.bf16.mxu0 %v17022_v32 }
 0x418   :  { %3675 = vmatpush1.bf16.msra.mxu1 %v16846_v3 }
 0x419   :  { %3676 = vmatprep.subr.bf16.mxu1 %v16857_v7  ;;  %3650 = vmatpush1.bf16.msra.mxu0 %v17027_v39 }
 0x41a   :  { %3651 = vmatprep.subr.bf16.mxu0 %v17046_v56 }
 0x41c   :  { %3677 = vmatpush1.bf16.msra.mxu1 %v16870_v11 }
 0x41d   :  { %3678 = vmatprep.subr.bf16.mxu1 %v16881_v19  ;;  %3652 = vmatpush1.bf16.msra.mxu0 %v17051_v59 }
 0x41e   :  { %3653 = vmatprep.subr.bf16.mxu0 %v17067_v63 }
 0x420   :  { %3679 = vmatpush1.bf16.msra.mxu1 %v16894_v20 }
 0x421   :  { %3680 = vmatprep.subr.bf16.mxu1 %v16905_v25  ;;  %3654 = vmatpush1.bf16.msra.mxu0 %v17074_v51 }
 0x422   :  { %3655 = vmatprep.subr.bf16.mxu0 %v17091_v2 }
 0x424   :  { %3681 = vmatpush1.bf16.msra.mxu1 %v16918_v29 }
 0x425   :  { %3682 = vmatprep.subr.bf16.mxu1 %v16929_v33  ;;  %3656 = vmatpush1.bf16.msra.mxu0 %v17103_v6 }
 0x426   :  { %3657 = vmatprep.subr.bf16.mxu0 %v17115_v46 }
 0x428   :  { %3683 = vmatpush1.bf16.msra.mxu1 %v16942_v37 }
 0x429   :  { %3684 = vmatprep.subr.bf16.mxu1 %v16953_v41  ;;  %3658 = vmatpush1.bf16.msra.mxu0 %v17127_v18 }
 0x42c   :  { %3685 = vmatpush1.bf16.msra.mxu1 %v16966_v52 }
 0x42d   :  { %3686 = vmatprep.subr.bf16.mxu1 %v16977_v22 }
 0x430   :  { %3687 = vmatpush1.bf16.msra.mxu1 %v16990_v35  ;;  %v12403_v35 = vld [vmem:[%s21326_s0 + $0x98] sm:$0xff] }
 0x431   :  { %3688 = vmatprep.subr.bf16.mxu1 %v17010_v28 }
 0x434   :  { %3689 = vmatpush1.bf16.msra.mxu1 %v17015_v53 }
 0x435   :  { %3690 = vmatprep.subr.bf16.mxu1 %v17032_v58 }
 0x438   :  { %3691 = vmatpush1.bf16.msra.mxu1 %v17038_v14 }
 0x439   :  { %3692 = vmatprep.subr.bf16.mxu1 %v17056_v43 }
 0x43c   :  { %3693 = vmatpush1.bf16.msra.mxu1 %v17062_v45 }
 0x43d   :  { %3694 = vmatprep.subr.bf16.mxu1 %v17079_v1  ;;  %v17166_v1 = vld [vmem:[%s21325_s1 + $0x14] ss:$24 sps:$4 sm:$0xff]  }
 0x440   :  { %3695 = vmatpush1.bf16.msra.mxu1 %v17086_v0  ;;  %v17145_v0 = vld [vmem:[%s21325_s1 + $0x2dc] ss:$24 sps:$4 sm:$0xff]  }
 0x441   :  { %3696 = vmatprep.subr.bf16.mxu1 %v17097_v4  ;;  %v17139_v4 = vld [vmem:[%s21325_s1 + $0x2d4] ss:$24 sps:$4 sm:$0xff]   ;;  %21604 = vst [vmem:[#allocation26_spill] sm:$0xff] %v17145_v0 }
 0x442   :  { %3659 = vmatprep.subr.bf16.mxu0 %v17139_v4 }
 0x444   :  { %3697 = vmatpush1.bf16.msra.mxu1 %v17110_v8  ;;  %v17151_v8 = vld [vmem:[%s21325_s1 + $0x2d0] ss:$24 sps:$4 sm:$0xff]  }
 0x445   :  { %3698 = vmatprep.subr.bf16.mxu1 %v17121_v47  ;;  %v17158_v47 = vld [vmem:[%s21325_s1 + $0x2d8] ss:$24 sps:$4 sm:$0xff]   ;;  %3660 = vmatpush1.bf16.msra.mxu0 %v17151_v8 }
 0x446   :  { %21605 = vst [vmem:[#allocation27_spill] sm:$0xff] %v17158_v47  ;;  %3711 = vmatprep.subr.bf16.mxu0 %v17166_v1 }
 0x448   :  { %3699 = vmatpush1.bf16.msra.mxu1 %v17134_v21 }
 0x449   :  { %3700 = vmatprep.subr.bf16.mxu1 %v17145_v0 }
 0x44c   :  { %3701 = vmatpush1.bf16.msra.mxu1 %v17158_v47  ;;  %v12402_v47 = vld [vmem:[%s21326_s0 + $0x90] sm:$0xff] }
 0x44d   :  { %4382 = vmatprep.subr.bf16.mxu1 %v16787_v16 }
 0x4a2   :  { %v2910_v21 = vpop.f32.mrb[16].mxu1  ;;  %v2951_v45 = vpop.f32.mrb[20].mxu0 }
 0x4a3   :  { %v2912_v43 = vpop.f32.mrb[17].mxu1  ;;  %v2953_v14 = vpop.f32.mrb[21].mxu0  ;;  %v2999_v22 = vadd.f32 %v12402_v47, %v2910_v21 }
 0x4a4   :  { %v2914_v58 = vpop.f32.mrb[18].mxu1  ;;  %v2955_v53 = vpop.f32.mrb[22].mxu0  ;;  %v3000_v16 = vadd.f32 %v12403_v35, %v2912_v43 }
 0x4a5   :  { %v2915_v0 = vpop.f32.mrb[19].mxu1  ;;  %v2956_v28 = vpop.f32.mrb[23].mxu0  ;;  %v12504_v52 = vmul.f32 -1.442695, %v2999_v22  ;;  %v12404_v53 = vld [vmem:[%s21326_s0 + $0xa0] sm:$0xff] }
 0x4a6   :  { %v12505_v41 = vmul.f32 -1.442695, %v3000_v16  ;;  %v12405_v28 = vld [vmem:[%s21326_s0 + $0xa8] sm:$0xff]  ;;  %v3013_v58 = vadd.f32 %v12404_v53, %v2951_v45 }
 0x4a7   :  { %15019 = vpow2.f32 %v12504_v52  ;;  %v3014_v0 = vadd.f32 %v12405_v28, %v2953_v14  ;;  %v12406_v14 = vld [vmem:[%s21326_s0 + $0xb0] sm:$0xff] }
 0x4a8   :  { %15021 = vpow2.f32 %v12505_v41  ;;  %v12506_v29 = vmul.f32 -1.442695, %v3013_v58 }
 0x4a9   :  { %v12507_v25 = vmul.f32 -1.442695, %v3014_v0 }
 0x4aa   :  { %15023 = vpow2.f32 %v12506_v29 }
 0x4ab   :  { %15025 = vpow2.f32 %v12507_v25  ;;  %v12407_v25 = vld [vmem:[%s21326_s0 + $0xb8] sm:$0xff] }
 0x4b1   :  { %v15020_v37 = vpop.eup %15019 }
 0x4b2   :  { %v15022_v33 = vpop.eup %15021  ;;  %v3007_v47 = vadd.f32 1.0, %v15020_v37 }
 0x4b3   :  { %v3008_v35 = vadd.f32 1.0, %v15022_v33 }
 0x4b4   :  { %15027 = vrcp.f32 %v3007_v47  ;;  %v15024_v41 = vpop.eup %15023 }
 0x4b5   :  { %15029 = vrcp.f32 %v3008_v35  ;;  %v15026_v22 = vpop.eup %15025  ;;  %v3021_v58 = vadd.f32 1.0, %v15024_v41 }
 0x4b6   :  { %v3022_v47 = vadd.f32 1.0, %v15026_v22  ;;  %v17232_v22 = vld [vmem:[%s21325_s1 + $0x74] ss:$24 sps:$4 sm:$0xff]  }
 0x4be   :  { %v15028_v16 = vpop.eup %15027 }
 0x4bf   :  { %v15030_v37 = vpop.eup %15029 }
 0x4e2   :  { %v2992_v52 = vpop.f32.mrb[20].mxu1 }
 0x4e3   :  { %v3027_v43 = vadd.f32 %v2992_v52, %v21581_v31  ;;  %v2994_v21 = vpop.f32.mrb[21].mxu1 }
 0x4e4   :  { %v3028_v45 = vadd.f32 %v2994_v21, %v21582_v24  ;;  %v2996_v53 = vpop.f32.mrb[22].mxu1 }
 0x4e5   :  { %v3029_v33 = vmul.f32 %v15028_v16, %v3027_v43  ;;  %v2997_v29 = vpop.f32.mrb[23].mxu1 }
 0x4e6   :  { %v3030_v28 = vmul.f32 %v15030_v37, %v3028_v45  ;;  %v17246_v45 = vld [vmem:[%s21325_s1 + $0xa4] ss:$24 sps:$4 sm:$0xff]   ;;  %v21622_v37 = vld [vmem:[#allocation21_spill] sm:$0xff] }
 0x4e7   :  { %v3031_v0 = vadd.f32 %v12406_v14, %v3029_v33  ;;  %v17240_v14 = vld [vmem:[%s21325_s1 + $0x70] ss:$24 sps:$4 sm:$0xff]   ;;  %v21623_v33 = vld [vmem:[#allocation22_spill] sm:$0xff] }
 0x4e8   :  { %v3032_v35 = vadd.f32 %v12407_v25, %v3030_v28  ;;  %v21624_v25 = vld [vmem:[#allocation23_spill] sm:$0xff]  ;;  %v21625_v28 = vld [vmem:[#allocation24_spill] sm:$0xff] }
 0x4e9   :  { %15031 = vtanh.f32 %v3031_v0  ;;  %v21627_v0 = vld [vmem:[#allocation26_spill] sm:$0xff] }
 0x4ea   :  { %15033 = vtanh.f32 %v3032_v35 }
 0x4eb   :  { %15035 = vrcp.f32 %v3021_v58  ;;  %v21626_v58 = vld [vmem:[#allocation25_spill] sm:$0xff] }
 0x4ec   :  { %15037 = vrcp.f32 %v3022_v47  ;;  %v21628_v47 = vld [vmem:[#allocation27_spill] sm:$0xff] }
 0x4f3   :  { %v15032_v52 = vpop.eup %15031 }
 0x4f4   :  { %v15034_v31 = vpop.eup %15033  ;;  %v3035_v21 = vsub.f32 %v16732_v48, %v15032_v52 }
 0x4f5   :  { %v15036_v53 = vpop.eup %15035  ;;  %v3036_v43 = vsub.f32 %v16734_v49, %v15034_v31  ;;  %v17218_v49 = vld [vmem:[%s21325_s1 + $0x44] ss:$24 sps:$4 sm:$0xff]  }
 0x4f6   :  { %v15038_v16 = vpop.eup %15037  ;;  %v3037_v24 = vmul.f32 %v15036_v53, %v3035_v21 }
 0x4f7   :  { %v3038_v20 = vmul.f32 %v15038_v16, %v3036_v43 }
 0x4f8   :  { %v17192_v29 = vadd.f32 %v15032_v52, %v3037_v24  ;;  %v17209_v24 = vld [vmem:[%s21325_s1 + $0x10] ss:$24 sps:$4 sm:$0xff]  }
 0x4f9   :  { %v17194_v41 = vadd.f32 %v15034_v31, %v3038_v20  ;;  %v17226_v20 = vld [vmem:[%s21325_s1 + $0x40] ss:$24 sps:$4 sm:$0xff]  }
 0x4fa   :  { %12508 = vst [vmem:[%s21328_s3 + $0x30] sm:$0xff] %v17192_v29  ;;  %v17213_v31 = vpack.c.bf16 %v17192_v29, %v17192_v29 }
 0x4fb   :  { %12509 = vst [vmem:[%s21328_s3 + $0x38] sm:$0xff] %v17194_v41  ;;  %v3052_v48 = vpack.c.bf16 %v17194_v41, %v17194_v41 }
 0x4fd   :  { %3661 = vmatprep.mubr.bf16.mxu0 %v3052_v48  ;;  %3702 = vmatprep.mubr.bf16.mxu1 %v3052_v48 }
 0x4fe   :  { %3662 = vmatmul.mubr.bf16.vlgmr.msra.gmra.mrb[24].mxu0 %v17213_v31  ;;  %3703 = vmatmul.mubr.bf16.vlgmr.msra.gmra.mrb[24].mxu1 %v17213_v31 }
 0x4ff   :  { %3712 = vmatpush1.bf16.msra.mxu0 %v17209_v24  ;;  %3743 = vmatprep.mubr.bf16.mxu0 %v3052_v48 }
 0x500   :  { %3713 = vmatprep.subr.bf16.mxu0 %v17218_v49  ;;  %4383 = vmatpush1.bf16.msra.mxu1 %v16782_v60  ;;  %v17254_v60 = vld [vmem:[%s21325_s1 + $0xa0] ss:$24 sps:$4 sm:$0xff]  }
 0x501   :  { %4384 = vmatprep.subr.bf16.mxu1 %v16802_v36  ;;  %v17260_v36 = vld [vmem:[%s21325_s1 + $0xd4] ss:$24 sps:$4 sm:$0xff]  }
 0x503   :  { %3714 = vmatpush1.bf16.msra.mxu0 %v17226_v20 }
 0x504   :  { %3715 = vmatprep.subr.bf16.mxu0 %v17232_v22  ;;  %4385 = vmatpush1.bf16.msra.mxu1 %v16815_v54  ;;  %v17268_v54 = vld [vmem:[%s21325_s1 + $0xd0] ss:$24 sps:$4 sm:$0xff]  }
 0x505   :  { %4386 = vmatprep.subr.bf16.mxu1 %v16827_v57  ;;  %v17274_v57 = vld [vmem:[%s21325_s1 + $0x104] ss:$24 sps:$4 sm:$0xff]  }
 0x507   :  { %3716 = vmatpush1.bf16.msra.mxu0 %v17240_v14 }
 0x508   :  { %3717 = vmatprep.subr.bf16.mxu0 %v17246_v45  ;;  %4387 = vmatpush1.bf16.msra.mxu1 %v16839_v61  ;;  %v17282_v61 = vld [vmem:[%s21325_s1 + $0x100] ss:$24 sps:$4 sm:$0xff]  }
 0x509   :  { %4388 = vmatprep.subr.bf16.mxu1 %v16851_v5  ;;  %v17288_v5 = vld [vmem:[%s21325_s1 + $0x134] ss:$24 sps:$4 sm:$0xff]  }
 0x50b   :  { %3718 = vmatpush1.bf16.msra.mxu0 %v17254_v60 }
 0x50c   :  { %3719 = vmatprep.subr.bf16.mxu0 %v17260_v36  ;;  %4389 = vmatpush1.bf16.msra.mxu1 %v16863_v9  ;;  %v17296_v9 = vld [vmem:[%s21325_s1 + $0x130] ss:$24 sps:$4 sm:$0xff]  }
 0x50d   :  { %4390 = vmatprep.subr.bf16.mxu1 %v16875_v15  ;;  %v17302_v15 = vld [vmem:[%s21325_s1 + $0x164] ss:$24 sps:$4 sm:$0xff]  }
 0x50f   :  { %3720 = vmatpush1.bf16.msra.mxu0 %v17268_v54 }
 0x510   :  { %3721 = vmatprep.subr.bf16.mxu0 %v17274_v57  ;;  %4391 = vmatpush1.bf16.msra.mxu1 %v16887_v13  ;;  %v17310_v13 = vld [vmem:[%s21325_s1 + $0x160] ss:$24 sps:$4 sm:$0xff]  }
 0x511   :  { %4392 = vmatprep.subr.bf16.mxu1 %v16899_v23  ;;  %v17316_v23 = vld [vmem:[%s21325_s1 + $0x194] ss:$24 sps:$4 sm:$0xff]  }
 0x513   :  { %3722 = vmatpush1.bf16.msra.mxu0 %v17282_v61 }
 0x514   :  { %3723 = vmatprep.subr.bf16.mxu0 %v17288_v5  ;;  %4393 = vmatpush1.bf16.msra.mxu1 %v16911_v27  ;;  %v17324_v27 = vld [vmem:[%s21325_s1 + $0x190] ss:$24 sps:$4 sm:$0xff]  }
 0x515   :  { %4394 = vmatprep.subr.bf16.mxu1 %v16923_v30  ;;  %v17330_v30 = vld [vmem:[%s21325_s1 + $0x1c4] ss:$24 sps:$4 sm:$0xff]  }
 0x517   :  { %3724 = vmatpush1.bf16.msra.mxu0 %v17296_v9 }
 0x518   :  { %3725 = vmatprep.subr.bf16.mxu0 %v17302_v15  ;;  %4395 = vmatpush1.bf16.msra.mxu1 %v16935_v34  ;;  %v17338_v34 = vld [vmem:[%s21325_s1 + $0x1c0] ss:$24 sps:$4 sm:$0xff]  }
 0x519   :  { %4396 = vmatprep.subr.bf16.mxu1 %v16947_v38  ;;  %v17344_v38 = vld [vmem:[%s21325_s1 + $0x1f4] ss:$24 sps:$4 sm:$0xff]  }
 0x51b   :  { %3726 = vmatpush1.bf16.msra.mxu0 %v17310_v13 }
 0x51c   :  { %3727 = vmatprep.subr.bf16.mxu0 %v17316_v23  ;;  %4397 = vmatpush1.bf16.msra.mxu1 %v16959_v42  ;;  %v17352_v42 = vld [vmem:[%s21325_s1 + $0x1f0] ss:$24 sps:$4 sm:$0xff]  }
 0x51d   :  { %4398 = vmatprep.subr.bf16.mxu1 %v16971_v17  ;;  %v17358_v17 = vld [vmem:[%s21325_s1 + $0x224] ss:$24 sps:$4 sm:$0xff]  }
 0x51f   :  { %3728 = vmatpush1.bf16.msra.mxu0 %v17324_v27 }
 0x520   :  { %3729 = vmatprep.subr.bf16.mxu0 %v17330_v30  ;;  %4399 = vmatpush1.bf16.msra.mxu1 %v16983_v12  ;;  %v17366_v12 = vld [vmem:[%s21325_s1 + $0x220] ss:$24 sps:$4 sm:$0xff]  }
 0x521   :  { %4400 = vmatprep.subr.bf16.mxu1 %v16995_v44  ;;  %v17372_v44 = vld [vmem:[%s21325_s1 + $0x254] ss:$24 sps:$4 sm:$0xff]  }
 0x523   :  { %3730 = vmatpush1.bf16.msra.mxu0 %v17338_v34 }
 0x524   :  { %3731 = vmatprep.subr.bf16.mxu0 %v17344_v38  ;;  %4401 = vmatpush1.bf16.msra.mxu1 %v17002_v50  ;;  %v17380_v50 = vld [vmem:[%s21325_s1 + $0x250] ss:$24 sps:$4 sm:$0xff]  }
 0x525   :  { %4402 = vmatprep.subr.bf16.mxu1 %v17022_v32  ;;  %v17386_v32 = vld [vmem:[%s21325_s1 + $0x284] ss:$24 sps:$4 sm:$0xff]  }
 0x527   :  { %3732 = vmatpush1.bf16.msra.mxu0 %v17352_v42 }
 0x528   :  { %3733 = vmatprep.subr.bf16.mxu0 %v17358_v17  ;;  %4403 = vmatpush1.bf16.msra.mxu1 %v17027_v39  ;;  %v17394_v39 = vld [vmem:[%s21325_s1 + $0x280] ss:$24 sps:$4 sm:$0xff]  }
 0x529   :  { %4404 = vmatprep.subr.bf16.mxu1 %v17046_v56  ;;  %v17400_v56 = vld [vmem:[%s21325_s1 + $0x2b4] ss:$24 sps:$4 sm:$0xff]  }
 0x52b   :  { %3734 = vmatpush1.bf16.msra.mxu0 %v17366_v12 }
 0x52c   :  { %3735 = vmatprep.subr.bf16.mxu0 %v17372_v44  ;;  %4405 = vmatpush1.bf16.msra.mxu1 %v17051_v59  ;;  %v17408_v59 = vld [vmem:[%s21325_s1 + $0x2b0] ss:$24 sps:$4 sm:$0xff]  }
 0x52d   :  { %4406 = vmatprep.subr.bf16.mxu1 %v17067_v63  ;;  %v17414_v63 = vld [vmem:[%s21325_s1 + $0x2e4] ss:$24 sps:$4 sm:$0xff]  }
 0x52f   :  { %3736 = vmatpush1.bf16.msra.mxu0 %v17380_v50 }
 0x530   :  { %3737 = vmatprep.subr.bf16.mxu0 %v17386_v32  ;;  %4407 = vmatpush1.bf16.msra.mxu1 %v17074_v51  ;;  %v17422_v51 = vld [vmem:[%s21325_s1 + $0x2e0] ss:$24 sps:$4 sm:$0xff]  }
 0x531   :  { %4408 = vmatprep.subr.bf16.mxu1 %v17091_v2  ;;  %v21608_v2 = vld [vmem:[#allocation7_spill] sm:$0xff] }
 0x533   :  { %3738 = vmatpush1.bf16.msra.mxu0 %v17394_v39 }
 0x534   :  { %3739 = vmatprep.subr.bf16.mxu0 %v17400_v56  ;;  %4409 = vmatpush1.bf16.msra.mxu1 %v17103_v6  ;;  %v21618_v6 = vld [vmem:[#allocation17_spill] sm:$0xff] }
 0x535   :  { %4410 = vmatprep.subr.bf16.mxu1 %v17115_v46  ;;  %v21620_v46 = vld [vmem:[#allocation19_spill] sm:$0xff] }
 0x537   :  { %3740 = vmatpush1.bf16.msra.mxu0 %v17408_v59 }
 0x538   :  { %3741 = vmatprep.subr.bf16.mxu0 %v17414_v63  ;;  %4411 = vmatpush1.bf16.msra.mxu1 %v17127_v18  ;;  %v21621_v18 = vld [vmem:[#allocation20_spill] sm:$0xff] }
 0x539   :  { %4412 = vmatprep.subr.bf16.mxu1 %v17139_v4  ;;  %v21617_v4 = vld [vmem:[#allocation16_spill] sm:$0xff] }
 0x53b   :  { %3742 = vmatpush1.bf16.msra.mxu0 %v17422_v51 }
 0x53c   :  { %4423 = vmatprep.subr.bf16.mxu0 %v16797_v26  ;;  %4413 = vmatpush1.bf16.msra.mxu1 %v17151_v8  ;;  %v21606_v26 = vld [vmem:[#allocation5_spill] sm:$0xff]  ;;  %v21619_v8 = vld [vmem:[#allocation18_spill] sm:$0xff] }
 0x53d   :  { %4464 = vmatprep.subr.bf16.mxu1 %v17166_v1  ;;  %v21607_v1 = vld [vmem:[#allocation6_spill] sm:$0xff] }
 0x53e   :  { %3744 = vmatmul.mubr.bf16.vlgmr.msra.gmra.mrb[28].mxu0 %v17213_v31 }
 0x53f   :  { %4424 = vmatpush1.bf16.msra.mxu0 %v16792_v10  ;;  %v21609_v10 = vld [vmem:[#allocation8_spill] sm:$0xff] }
 0x540   :  { %4425 = vmatprep.subr.bf16.mxu0 %v16808_v40  ;;  %v21610_v40 = vld [vmem:[#allocation9_spill] sm:$0xff] }
 0x543   :  { %4426 = vmatpush1.bf16.msra.mxu0 %v16822_v55  ;;  %v21611_v55 = vld [vmem:[#allocation10_spill] sm:$0xff] }
 0x544   :  { %4427 = vmatprep.subr.bf16.mxu0 %v16833_v62  ;;  %v21612_v62 = vld [vmem:[#allocation11_spill] sm:$0xff] }
 0x547   :  { %4428 = vmatpush1.bf16.msra.mxu0 %v16846_v3  ;;  %v21613_v3 = vld [vmem:[#allocation12_spill] sm:$0xff] }
 0x548   :  { %4429 = vmatprep.subr.bf16.mxu0 %v16857_v7  ;;  %v21614_v7 = vld [vmem:[#allocation13_spill] sm:$0xff] }
 0x54b   :  { %4430 = vmatpush1.bf16.msra.mxu0 %v16870_v11  ;;  %v21615_v11 = vld [vmem:[#allocation14_spill] sm:$0xff] }
 0x54c   :  { %4431 = vmatprep.subr.bf16.mxu0 %v16881_v19  ;;  %v21616_v19 = vld [vmem:[#allocation15_spill] sm:$0xff] }
 0x54f   :  { %4432 = vmatpush1.bf16.msra.mxu0 %v21606_v26  ;;  %v12510_v26 = vld [vmem:[%s21326_s0 + $0xc0] sm:$0xff] }
 0x550   :  { %4433 = vmatprep.subr.bf16.mxu0 %v21607_v1  ;;  %v12511_v1 = vld [vmem:[%s21326_s0 + $0xc8] sm:$0xff] }
 0x553   :  { %4434 = vmatpush1.bf16.msra.mxu0 %v21608_v2 }
 0x554   :  { %4435 = vmatprep.subr.bf16.mxu0 %v21609_v10 }
 0x557   :  { %4436 = vmatpush1.bf16.msra.mxu0 %v21610_v40 }
 0x558   :  { %4437 = vmatprep.subr.bf16.mxu0 %v21611_v55 }
 0x55b   :  { %4438 = vmatpush1.bf16.msra.mxu0 %v21612_v62  ;;  %v12512_v62 = vld [vmem:[%s21326_s0 + $0xd0] sm:$0xff] }
 0x55c   :  { %4439 = vmatprep.subr.bf16.mxu0 %v21613_v3  ;;  %v12513_v3 = vld [vmem:[%s21326_s0 + $0xd8] sm:$0xff] }
 0x55f   :  { %4440 = vmatpush1.bf16.msra.mxu0 %v21614_v7 }
 0x560   :  { %4441 = vmatprep.subr.bf16.mxu0 %v21615_v11 }
 0x563   :  { %4442 = vmatpush1.bf16.msra.mxu0 %v21616_v19 }
 0x564   :  { %4443 = vmatprep.subr.bf16.mxu0 %v21617_v4 }
 0x567   :  { %4444 = vmatpush1.bf16.msra.mxu0 %v21618_v6 }
 0x568   :  { %4445 = vmatprep.subr.bf16.mxu0 %v21619_v8 }
 0x56b   :  { %4446 = vmatpush1.bf16.msra.mxu0 %v21620_v46 }
 0x56c   :  { %4447 = vmatprep.subr.bf16.mxu0 %v21621_v18 }
 0x56f   :  { %4448 = vmatpush1.bf16.msra.mxu0 %v21622_v37 }
 0x570   :  { %4449 = vmatprep.subr.bf16.mxu0 %v21623_v33 }
 0x573   :  { %4450 = vmatpush1.bf16.msra.mxu0 %v21624_v25 }
 0x574   :  { %4451 = vmatprep.subr.bf16.mxu0 %v21625_v28  ;;  %v21629_v28 = vld [vmem:[#allocation3_spill] sm:$0xff] }
 0x577   :  { %4452 = vmatpush1.bf16.msra.mxu0 %v21626_v58 }
 0x578   :  { %4453 = vmatprep.subr.bf16.mxu0 %v21627_v0 }
 0x57b   :  { %4454 = vmatpush1.bf16.msra.mxu0 %v21628_v47 }
 0x5d1   :  { %v3663_v35 = vpop.f32.mrb[24].mxu0  ;;  %v3704_v52 = vpop.f32.mrb[24].mxu1 }
 0x5d2   :  { %v3665_v21 = vpop.f32.mrb[25].mxu0  ;;  %v3706_v53 = vpop.f32.mrb[25].mxu1  ;;  %v3752_v2 = vadd.f32 %v12510_v26, %v3663_v35  ;;  %v3766_v7 = vadd.f32 %v12512_v62, %v3704_v52  ;;  %v12514_v35 = vld [vmem:[%s21326_s0 + $0xe0] sm:$0xff]  ;;  %v21630_v52 = vld [vmem:[#allocation4_spill] sm:$0xff] }
 0x5d3   :  { %v3667_v43 = vpop.f32.mrb[26].mxu0  ;;  %v3708_v16 = vpop.f32.mrb[26].mxu1  ;;  %v3753_v10 = vadd.f32 %v12511_v1, %v3665_v21  ;;  %v3767_v11 = vadd.f32 %v12513_v3, %v3706_v53 }
 0x5d4   :  { %v3668_v48 = vpop.f32.mrb[27].mxu0  ;;  %v3709_v31 = vpop.f32.mrb[27].mxu1  ;;  %v12612_v40 = vmul.f32 -1.442695, %v3752_v2  ;;  %v12614_v6 = vmul.f32 -1.442695, %v3766_v7 }
 0x5d5   :  { %v12613_v55 = vmul.f32 -1.442695, %v3753_v10  ;;  %v12615_v8 = vmul.f32 -1.442695, %v3767_v11  ;;  %v12515_v48 = vld [vmem:[%s21326_s0 + $0xe8] sm:$0xff] }
 0x5d6   :  { %15039 = vpow2.f32 %v12612_v40 }
 0x5d7   :  { %15041 = vpow2.f32 %v12613_v55 }
 0x5d8   :  { %15043 = vpow2.f32 %v12614_v6 }
 0x5d9   :  { %15045 = vpow2.f32 %v12615_v8 }
 0x5e0   :  { %v15040_v19 = vpop.eup %15039 }
 0x5e1   :  { %v15042_v4 = vpop.eup %15041  ;;  %v3760_v46 = vadd.f32 1.0, %v15040_v19 }
 0x5e2   :  { %v3761_v18 = vadd.f32 1.0, %v15042_v4  ;;  %v15044_v37 = vpop.eup %15043 }
 0x5e3   :  { %15047 = vrcp.f32 %v3760_v46  ;;  %v15046_v25 = vpop.eup %15045  ;;  %v3774_v1 = vadd.f32 1.0, %v15044_v37  ;;  %v17724_v37 = vld [vmem:[%s21325_s1 + $0x184] ss:$24 sps:$4 sm:$0xff]  }
 0x5e4   :  { %15049 = vrcp.f32 %v3761_v18  ;;  %v3775_v10 = vadd.f32 1.0, %v15046_v25  ;;  %v17719_v18 = vld [vmem:[%s21325_s1 + $0x158] ss:$24 sps:$4 sm:$0xff]  }
 0x5e5   :  { %21637 = vst [vmem:[#allocation11_spill] sm:$0xff] %v17719_v18  ;;  %v17736_v25 = vld [vmem:[%s21325_s1 + $0x180] ss:$24 sps:$4 sm:$0xff]  }
 0x5ed   :  { %v15048_v47 = vpop.eup %15047 }
 0x5ee   :  { %v15050_v43 = vpop.eup %15049 }
 0x611   :  { %v3745_v33 = vpop.f32.mrb[28].mxu0 }
 0x612   :  { %v3780_v58 = vadd.f32 %v3745_v33, %v21629_v28  ;;  %v3747_v0 = vpop.f32.mrb[29].mxu0  ;;  %v17730_v33 = vld [vmem:[%s21325_s1 + $0x18c] ss:$24 sps:$4 sm:$0xff]  }
 0x613   :  { %v3781_v21 = vadd.f32 %v3747_v0, %v21630_v52  ;;  %v3749_v53 = vpop.f32.mrb[30].mxu0  ;;  %21638 = vst [vmem:[#allocation12_spill] sm:$0xff] %v17730_v33  ;;  %v17748_v0 = vld [vmem:[%s21325_s1 + $0x1b4] ss:$24 sps:$4 sm:$0xff]  }
 0x614   :  { %v3782_v16 = vmul.f32 %v15048_v47, %v3780_v58  ;;  %v3750_v31 = vpop.f32.mrb[31].mxu0  ;;  %v17743_v58 = vld [vmem:[%s21325_s1 + $0x188] ss:$24 sps:$4 sm:$0xff]   ;;  %v17775_v53 = vld [vmem:[%s21325_s1 + $0x1e4] ss:$24 sps:$4 sm:$0xff]  }
 0x615   :  { %v3783_v26 = vmul.f32 %v15050_v43, %v3781_v21  ;;  %21639 = vst [vmem:[#allocation13_spill] sm:$0xff] %v17743_v58  ;;  %v17755_v47 = vld [vmem:[%s21325_s1 + $0x1b0] ss:$24 sps:$4 sm:$0xff]   ;;  %v17780_v43 = vld [vmem:[%s21325_s1 + $0x1e0] ss:$24 sps:$4 sm:$0xff]  }
 0x616   :  { %v3784_v2 = vadd.f32 %v12514_v35, %v3782_v16  ;;  %v17763_v35 = vld [vmem:[%s21325_s1 + $0x1bc] ss:$24 sps:$4 sm:$0xff]   ;;  %v17768_v21 = vld [vmem:[%s21325_s1 + $0x1b8] ss:$24 sps:$4 sm:$0xff]   ;;  %v17785_v16 = vld [vmem:[%s21325_s1 + $0x1ec] ss:$24 sps:$4 sm:$0xff]  }
 0x617   :  { %v3785_v40 = vadd.f32 %v12515_v48, %v3783_v26  ;;  %21640 = vst [vmem:[#allocation14_spill] sm:$0xff] %v17763_v35  ;;  %21641 = vst [vmem:[#allocation15_spill] sm:$0xff] %v17768_v21  ;;  %v17791_v48 = vld [vmem:[%s21325_s1 + $0x1e8] ss:$24 sps:$4 sm:$0xff]   ;;  %v17799_v31 = vld [vmem:[%s21325_s1 + $0x214] ss:$24 sps:$4 sm:$0xff]  }
 0x618   :  { %15051 = vtanh.f32 %v3784_v2  ;;  %21642 = vst [vmem:[#allocation16_spill] sm:$0xff] %v17785_v16  ;;  %21643 = vst [vmem:[#allocation17_spill] sm:$0xff] %v17791_v48  ;;  %v17804_v26 = vld [vmem:[%s21325_s1 + $0x210] ss:$24 sps:$4 sm:$0xff]  }
 0x619   :  { %15053 = vtanh.f32 %v3785_v40  ;;  %v17815_v2 = vld [vmem:[%s21325_s1 + $0x218] ss:$24 sps:$4 sm:$0xff]  }
 0x61a   :  { %15055 = vrcp.f32 %v3774_v1  ;;  %v17809_v1 = vld [vmem:[%s21325_s1 + $0x21c] ss:$24 sps:$4 sm:$0xff]   ;;  %21645 = vst [vmem:[#allocation19_spill] sm:$0xff] %v17815_v2  ;;  %v17827_v40 = vld [vmem:[%s21325_s1 + $0x240] ss:$24 sps:$4 sm:$0xff]  }
 0x61b   :  { %15057 = vrcp.f32 %v3775_v10  ;;  %21644 = vst [vmem:[#allocation18_spill] sm:$0xff] %v17809_v1  ;;  %v17820_v10 = vld [vmem:[%s21325_s1 + $0x244] ss:$24 sps:$4 sm:$0xff]  }
 0x622   :  { %v15052_v55 = vpop.eup %15051 }
 0x623   :  { %v15054_v62 = vpop.eup %15053  ;;  %v3788_v3 = vsub.f32 %v17192_v29, %v15052_v55 }
 0x624   :  { %v15056_v7 = vpop.eup %15055  ;;  %v3789_v11 = vsub.f32 %v17194_v41, %v15054_v62 }
 0x625   :  { %v15058_v19 = vpop.eup %15057  ;;  %v3790_v4 = vmul.f32 %v15056_v7, %v3788_v3  ;;  %v17844_v3 = vld [vmem:[%s21325_s1 + $0x274] ss:$24 sps:$4 sm:$0xff]  }
 0x626   :  { %v3791_v6 = vmul.f32 %v15058_v19, %v3789_v11  ;;  %v17850_v7 = vld [vmem:[%s21325_s1 + $0x27c] ss:$24 sps:$4 sm:$0xff]   ;;  %v17856_v11 = vld [vmem:[%s21325_s1 + $0x270] ss:$24 sps:$4 sm:$0xff]  }
 0x627   :  { %v17485_v8 = vadd.f32 %v15052_v55, %v3790_v4  ;;  %v17832_v55 = vld [vmem:[%s21325_s1 + $0x24c] ss:$24 sps:$4 sm:$0xff]   ;;  %21648 = vst [vmem:[#allocation22_spill] sm:$0xff] %v17850_v7  ;;  %v17863_v19 = vld [vmem:[%s21325_s1 + $0x278] ss:$24 sps:$4 sm:$0xff]  }
 0x628   :  { %v17487_v46 = vadd.f32 %v15054_v62, %v3791_v6  ;;  %21646 = vst [vmem:[#allocation20_spill] sm:$0xff] %v17832_v55  ;;  %v17839_v62 = vld [vmem:[%s21325_s1 + $0x248] ss:$24 sps:$4 sm:$0xff]   ;;  %21649 = vst [vmem:[#allocation23_spill] sm:$0xff] %v17863_v19  ;;  %v17868_v4 = vld [vmem:[%s21325_s1 + $0x2a4] ss:$24 sps:$4 sm:$0xff]  }
 0x629   :  { %12616 = vst [vmem:[%s21328_s3 + $0x40] sm:$0xff] %v17485_v8  ;;  %v3804_v41 = vpack.c.bf16 %v17485_v8, %v17485_v8  ;;  %21647 = vst [vmem:[#allocation21_spill] sm:$0xff] %v17839_v62  ;;  %v17874_v6 = vld [vmem:[%s21325_s1 + $0x2ac] ss:$24 sps:$4 sm:$0xff]  }
 0x62a   :  { %12617 = vst [vmem:[%s21328_s3 + $0x48] sm:$0xff] %v17487_v46  ;;  %v3805_v29 = vpack.c.bf16 %v17487_v46, %v17487_v46  ;;  %21650 = vst [vmem:[#allocation24_spill] sm:$0xff] %v17874_v6 }
 0x62c   :  { %4414 = vmatprep.mubr.bf16.mxu1 %v3805_v29  ;;  %4455 = vmatprep.mubr.bf16.mxu0 %v3805_v29 }
 0x62d   :  { %4415 = vmatmul.mubr.bf16.vlgmr.msra.gmra.mrb[28].mxu1 %v3804_v41  ;;  %4456 = vmatmul.mubr.bf16.vlgmr.msra.gmra.mrb[32].mxu0 %v3804_v41 }
 0x62e   :  { %4465 = vmatpush1.bf16.msra.mxu1 %v17209_v24  ;;  %4496 = vmatprep.mubr.bf16.mxu1 %v3805_v29  ;;  %v17535_v24 = vld [vmem:[%s21325_s1] ss:$24 sps:$4 sm:$0xff]  }
 0x62f   :  { %4466 = vmatprep.subr.bf16.mxu1 %v17218_v49  ;;  %v17540_v49 = vld [vmem:[%s21325_s1 + $0x4] ss:$24 sps:$4 sm:$0xff]   ;;  %v17880_v29 = vld [vmem:[%s21325_s1 + $0x2a0] ss:$24 sps:$4 sm:$0xff]  }
 0x630   :  { %5135 = vmatprep.subr.bf16.mxu0 %v17540_v49 }
 0x631   :  { %5136 = vmatpush1.bf16.msra.mxu0 %v17535_v24 }
 0x632   :  { %4467 = vmatpush1.bf16.msra.mxu1 %v17226_v20  ;;  %v17545_v20 = vld [vmem:[%s21325_s1 + $0x8] ss:$24 sps:$4 sm:$0xff]  }
 0x633   :  { %4468 = vmatprep.subr.bf16.mxu1 %v17232_v22  ;;  %v17550_v22 = vld [vmem:[%s21325_s1 + $0xc] ss:$24 sps:$4 sm:$0xff]  }
 0x636   :  { %4469 = vmatpush1.bf16.msra.mxu1 %v17240_v14  ;;  %v17555_v14 = vld [vmem:[%s21325_s1 + $0x34] ss:$24 sps:$4 sm:$0xff]  }
 0x637   :  { %4470 = vmatprep.subr.bf16.mxu1 %v17246_v45  ;;  %v17561_v45 = vld [vmem:[%s21325_s1 + $0x3c] ss:$24 sps:$4 sm:$0xff]   ;;  %5137 = vmatprep.subr.bf16.mxu0 %v17555_v14 }
 0x63a   :  { %4471 = vmatpush1.bf16.msra.mxu1 %v17254_v60  ;;  %v17568_v60 = vld [vmem:[%s21325_s1 + $0x30] ss:$24 sps:$4 sm:$0xff]  }
 0x63b   :  { %4472 = vmatprep.subr.bf16.mxu1 %v17260_v36  ;;  %v17575_v36 = vld [vmem:[%s21325_s1 + $0x38] ss:$24 sps:$4 sm:$0xff]   ;;  %5138 = vmatpush1.bf16.msra.mxu0 %v17568_v60 }
 0x63e   :  { %4473 = vmatpush1.bf16.msra.mxu1 %v17268_v54  ;;  %v17580_v54 = vld [vmem:[%s21325_s1 + $0x64] ss:$24 sps:$4 sm:$0xff]  }
 0x63f   :  { %4474 = vmatprep.subr.bf16.mxu1 %v17274_v57  ;;  %v17586_v57 = vld [vmem:[%s21325_s1 + $0x6c] ss:$24 sps:$4 sm:$0xff]   ;;  %5139 = vmatprep.subr.bf16.mxu0 %v17580_v54 }
 0x642   :  { %4475 = vmatpush1.bf16.msra.mxu1 %v17282_v61  ;;  %v17592_v61 = vld [vmem:[%s21325_s1 + $0x60] ss:$24 sps:$4 sm:$0xff]  }
 0x643   :  { %4476 = vmatprep.subr.bf16.mxu1 %v17288_v5  ;;  %v17599_v5 = vld [vmem:[%s21325_s1 + $0x68] ss:$24 sps:$4 sm:$0xff]   ;;  %5140 = vmatpush1.bf16.msra.mxu0 %v17592_v61 }
 0x646   :  { %4477 = vmatpush1.bf16.msra.mxu1 %v17296_v9  ;;  %v17604_v9 = vld [vmem:[%s21325_s1 + $0x94] ss:$24 sps:$4 sm:$0xff]  }
 0x647   :  { %4478 = vmatprep.subr.bf16.mxu1 %v17302_v15  ;;  %v17610_v15 = vld [vmem:[%s21325_s1 + $0x9c] ss:$24 sps:$4 sm:$0xff]   ;;  %5141 = vmatprep.subr.bf16.mxu0 %v17604_v9 }
 0x64a   :  { %4479 = vmatpush1.bf16.msra.mxu1 %v17310_v13  ;;  %v17616_v13 = vld [vmem:[%s21325_s1 + $0x90] ss:$24 sps:$4 sm:$0xff]  }
 0x64b   :  { %4480 = vmatprep.subr.bf16.mxu1 %v17316_v23  ;;  %v17623_v23 = vld [vmem:[%s21325_s1 + $0x98] ss:$24 sps:$4 sm:$0xff]   ;;  %5142 = vmatpush1.bf16.msra.mxu0 %v17616_v13 }
 0x64e   :  { %4481 = vmatpush1.bf16.msra.mxu1 %v17324_v27  ;;  %v17628_v27 = vld [vmem:[%s21325_s1 + $0xc4] ss:$24 sps:$4 sm:$0xff]  }
 0x64f   :  { %4482 = vmatprep.subr.bf16.mxu1 %v17330_v30  ;;  %v17634_v30 = vld [vmem:[%s21325_s1 + $0xcc] ss:$24 sps:$4 sm:$0xff]   ;;  %5143 = vmatprep.subr.bf16.mxu0 %v17628_v27 }
 0x652   :  { %4483 = vmatpush1.bf16.msra.mxu1 %v17338_v34  ;;  %v17640_v34 = vld [vmem:[%s21325_s1 + $0xc0] ss:$24 sps:$4 sm:$0xff]  }
 0x653   :  { %4484 = vmatprep.subr.bf16.mxu1 %v17344_v38  ;;  %v17647_v38 = vld [vmem:[%s21325_s1 + $0xc8] ss:$24 sps:$4 sm:$0xff]   ;;  %5144 = vmatpush1.bf16.msra.mxu0 %v17640_v34 }
 0x654   :  { %21631 = vst [vmem:[#allocation5_spill] sm:$0xff] %v17647_v38 }
 0x656   :  { %4485 = vmatpush1.bf16.msra.mxu1 %v17352_v42  ;;  %v17652_v42 = vld [vmem:[%s21325_s1 + $0xf4] ss:$24 sps:$4 sm:$0xff]  }
 0x657   :  { %4486 = vmatprep.subr.bf16.mxu1 %v17358_v17  ;;  %v17658_v17 = vld [vmem:[%s21325_s1 + $0xfc] ss:$24 sps:$4 sm:$0xff]   ;;  %5145 = vmatprep.subr.bf16.mxu0 %v17652_v42 }
 0x658   :  { %21632 = vst [vmem:[#allocation6_spill] sm:$0xff] %v17658_v17 }
 0x65a   :  { %4487 = vmatpush1.bf16.msra.mxu1 %v17366_v12  ;;  %v17664_v12 = vld [vmem:[%s21325_s1 + $0xf0] ss:$24 sps:$4 sm:$0xff]  }
 0x65b   :  { %4488 = vmatprep.subr.bf16.mxu1 %v17372_v44  ;;  %v17671_v44 = vld [vmem:[%s21325_s1 + $0xf8] ss:$24 sps:$4 sm:$0xff]   ;;  %5146 = vmatpush1.bf16.msra.mxu0 %v17664_v12 }
 0x65c   :  { %21633 = vst [vmem:[#allocation7_spill] sm:$0xff] %v17671_v44 }
 0x65e   :  { %4489 = vmatpush1.bf16.msra.mxu1 %v17380_v50  ;;  %v17676_v50 = vld [vmem:[%s21325_s1 + $0x124] ss:$24 sps:$4 sm:$0xff]  }
 0x65f   :  { %4490 = vmatprep.subr.bf16.mxu1 %v17386_v32  ;;  %v17682_v32 = vld [vmem:[%s21325_s1 + $0x12c] ss:$24 sps:$4 sm:$0xff]   ;;  %5147 = vmatprep.subr.bf16.mxu0 %v17676_v50 }
 0x660   :  { %21634 = vst [vmem:[#allocation8_spill] sm:$0xff] %v17682_v32 }
 0x662   :  { %4491 = vmatpush1.bf16.msra.mxu1 %v17394_v39  ;;  %v17688_v39 = vld [vmem:[%s21325_s1 + $0x120] ss:$24 sps:$4 sm:$0xff]  }
 0x663   :  { %4492 = vmatprep.subr.bf16.mxu1 %v17400_v56  ;;  %v17695_v56 = vld [vmem:[%s21325_s1 + $0x128] ss:$24 sps:$4 sm:$0xff]   ;;  %5148 = vmatpush1.bf16.msra.mxu0 %v17688_v39 }
 0x664   :  { %21635 = vst [vmem:[#allocation9_spill] sm:$0xff] %v17695_v56 }
 0x666   :  { %4493 = vmatpush1.bf16.msra.mxu1 %v17408_v59  ;;  %v17700_v59 = vld [vmem:[%s21325_s1 + $0x154] ss:$24 sps:$4 sm:$0xff]  }
 0x667   :  { %4494 = vmatprep.subr.bf16.mxu1 %v17414_v63  ;;  %v17706_v63 = vld [vmem:[%s21325_s1 + $0x15c] ss:$24 sps:$4 sm:$0xff]   ;;  %5149 = vmatprep.subr.bf16.mxu0 %v17700_v59 }
 0x668   :  { %21636 = vst [vmem:[#allocation10_spill] sm:$0xff] %v17706_v63 }
 0x66a   :  { %4495 = vmatpush1.bf16.msra.mxu1 %v17422_v51  ;;  %v17712_v51 = vld [vmem:[%s21325_s1 + $0x150] ss:$24 sps:$4 sm:$0xff]  }
 0x66b   :  { %5176 = vmatprep.subr.bf16.mxu1 %v17550_v22  ;;  %5150 = vmatpush1.bf16.msra.mxu0 %v17712_v51 }
 0x66c   :  { %5151 = vmatprep.subr.bf16.mxu0 %v17724_v37 }
 0x66d   :  { %4497 = vmatmul.mubr.bf16.vlgmr.msra.gmra.mrb[32].mxu1 %v3804_v41  ;;  %v17887_v41 = vld [vmem:[%s21325_s1 + $0x2a8] ss:$24 sps:$4 sm:$0xff]  }
 0x66e   :  { %5177 = vmatpush1.bf16.msra.mxu1 %v17545_v20  ;;  %21651 = vst [vmem:[#allocation25_spill] sm:$0xff] %v17887_v41 }
 0x66f   :  { %5178 = vmatprep.subr.bf16.mxu1 %v17561_v45  ;;  %5152 = vmatpush1.bf16.msra.mxu0 %v17736_v25 }
 0x670   :  { %5153 = vmatprep.subr.bf16.mxu0 %v17748_v0 }
 0x672   :  { %5179 = vmatpush1.bf16.msra.mxu1 %v17575_v36 }
 0x673   :  { %5180 = vmatprep.subr.bf16.mxu1 %v17586_v57  ;;  %5154 = vmatpush1.bf16.msra.mxu0 %v17755_v47 }
 0x674   :  { %5155 = vmatprep.subr.bf16.mxu0 %v17775_v53 }
 0x676   :  { %5181 = vmatpush1.bf16.msra.mxu1 %v17599_v5 }
 0x677   :  { %5182 = vmatprep.subr.bf16.mxu1 %v17610_v15  ;;  %5156 = vmatpush1.bf16.msra.mxu0 %v17780_v43 }
 0x678   :  { %5157 = vmatprep.subr.bf16.mxu0 %v17799_v31 }
 0x67a   :  { %5183 = vmatpush1.bf16.msra.mxu1 %v17623_v23 }
 0x67b   :  { %5184 = vmatprep.subr.bf16.mxu1 %v17634_v30  ;;  %5158 = vmatpush1.bf16.msra.mxu0 %v17804_v26 }
 0x67c   :  { %5159 = vmatprep.subr.bf16.mxu0 %v17820_v10 }
 0x67e   :  { %5185 = vmatpush1.bf16.msra.mxu1 %v17647_v38 }
 0x67f   :  { %5186 = vmatprep.subr.bf16.mxu1 %v17658_v17  ;;  %5160 = vmatpush1.bf16.msra.mxu0 %v17827_v40 }
 0x680   :  { %5161 = vmatprep.subr.bf16.mxu0 %v17844_v3 }
 0x682   :  { %5187 = vmatpush1.bf16.msra.mxu1 %v17671_v44 }
 0x683   :  { %5188 = vmatprep.subr.bf16.mxu1 %v17682_v32  ;;  %5162 = vmatpush1.bf16.msra.mxu0 %v17856_v11 }
 0x684   :  { %5163 = vmatprep.subr.bf16.mxu0 %v17868_v4 }
 0x686   :  { %5189 = vmatpush1.bf16.msra.mxu1 %v17695_v56 }
 0x687   :  { %5190 = vmatprep.subr.bf16.mxu1 %v17706_v63  ;;  %5164 = vmatpush1.bf16.msra.mxu0 %v17880_v29 }
 0x68a   :  { %5191 = vmatpush1.bf16.msra.mxu1 %v17719_v18 }
 0x68b   :  { %5192 = vmatprep.subr.bf16.mxu1 %v17730_v33 }
 0x68e   :  { %5193 = vmatpush1.bf16.msra.mxu1 %v17743_v58  ;;  %v12619_v58 = vld [vmem:[%s21326_s0 + $0xf8] sm:$0xff] }
 0x68f   :  { %5194 = vmatprep.subr.bf16.mxu1 %v17763_v35 }
 0x692   :  { %5195 = vmatpush1.bf16.msra.mxu1 %v17768_v21 }
 0x693   :  { %5196 = vmatprep.subr.bf16.mxu1 %v17785_v16 }
 0x696   :  { %5197 = vmatpush1.bf16.msra.mxu1 %v17791_v48 }
 0x697   :  { %5198 = vmatprep.subr.bf16.mxu1 %v17809_v1 }
 0x69a   :  { %5199 = vmatpush1.bf16.msra.mxu1 %v17815_v2 }
 0x69b   :  { %5200 = vmatprep.subr.bf16.mxu1 %v17832_v55  ;;  %v17919_v55 = vld [vmem:[%s21325_s1 + $0x14] ss:$24 sps:$4 sm:$0xff]  }
 0x69e   :  { %5201 = vmatpush1.bf16.msra.mxu1 %v17839_v62  ;;  %v17898_v62 = vld [vmem:[%s21325_s1 + $0x2dc] ss:$24 sps:$4 sm:$0xff]  }
 0x69f   :  { %5202 = vmatprep.subr.bf16.mxu1 %v17850_v7  ;;  %v17892_v7 = vld [vmem:[%s21325_s1 + $0x2d4] ss:$24 sps:$4 sm:$0xff]   ;;  %21652 = vst [vmem:[#allocation26_spill] sm:$0xff] %v17898_v62 }
 0x6a0   :  { %5165 = vmatprep.subr.bf16.mxu0 %v17892_v7 }
 0x6a2   :  { %5203 = vmatpush1.bf16.msra.mxu1 %v17863_v19  ;;  %v17904_v19 = vld [vmem:[%s21325_s1 + $0x2d0] ss:$24 sps:$4 sm:$0xff]  }
 0x6a3   :  { %5204 = vmatprep.subr.bf16.mxu1 %v17874_v6  ;;  %v17911_v6 = vld [vmem:[%s21325_s1 + $0x2d8] ss:$24 sps:$4 sm:$0xff]   ;;  %5166 = vmatpush1.bf16.msra.mxu0 %v17904_v19 }
 0x6a4   :  { %21653 = vst [vmem:[#allocation27_spill] sm:$0xff] %v17911_v6  ;;  %5217 = vmatprep.subr.bf16.mxu0 %v17919_v55 }
 0x6a6   :  { %5205 = vmatpush1.bf16.msra.mxu1 %v17887_v41 }
 0x6a7   :  { %5206 = vmatprep.subr.bf16.mxu1 %v17898_v62 }
 0x6aa   :  { %5207 = vmatpush1.bf16.msra.mxu1 %v17911_v6  ;;  %v12618_v6 = vld [vmem:[%s21326_s0 + $0xf0] sm:$0xff] }
 0x6ab   :  { %5888 = vmatprep.subr.bf16.mxu1 %v17540_v49 }
 0x700   :  { %v4416_v41 = vpop.f32.mrb[28].mxu1  ;;  %v4457_v2 = vpop.f32.mrb[32].mxu0 }
 0x701   :  { %v4418_v1 = vpop.f32.mrb[29].mxu1  ;;  %v4459_v48 = vpop.f32.mrb[33].mxu0  ;;  %v4505_v33 = vadd.f32 %v12618_v6, %v4416_v41 }
 0x702   :  { %v4420_v16 = vpop.f32.mrb[30].mxu1  ;;  %v4461_v21 = vpop.f32.mrb[34].mxu0  ;;  %v4506_v49 = vadd.f32 %v12619_v58, %v4418_v1 }
 0x703   :  { %v4421_v62 = vpop.f32.mrb[31].mxu1  ;;  %v4462_v35 = vpop.f32.mrb[35].mxu0  ;;  %v12720_v18 = vmul.f32 -1.442695, %v4505_v33  ;;  %v12620_v21 = vld [vmem:[%s21326_s0 + $0x100] sm:$0xff] }
 0x704   :  { %v12721_v63 = vmul.f32 -1.442695, %v4506_v49  ;;  %v12621_v35 = vld [vmem:[%s21326_s0 + $0x108] sm:$0xff]  ;;  %v4519_v16 = vadd.f32 %v12620_v21, %v4457_v2 }
 0x705   :  { %15059 = vpow2.f32 %v12720_v18  ;;  %v4520_v62 = vadd.f32 %v12621_v35, %v4459_v48  ;;  %v12622_v48 = vld [vmem:[%s21326_s0 + $0x110] sm:$0xff] }
 0x706   :  { %15061 = vpow2.f32 %v12721_v63  ;;  %v12722_v44 = vmul.f32 -1.442695, %v4519_v16 }
 0x707   :  { %v12723_v17 = vmul.f32 -1.442695, %v4520_v62 }
 0x708   :  { %15063 = vpow2.f32 %v12722_v44 }
 0x709   :  { %15065 = vpow2.f32 %v12723_v17  ;;  %v12623_v17 = vld [vmem:[%s21326_s0 + $0x118] sm:$0xff] }
 0x70f   :  { %v15060_v56 = vpop.eup %15059 }
 0x710   :  { %v15062_v32 = vpop.eup %15061  ;;  %v4513_v6 = vadd.f32 1.0, %v15060_v56 }
 0x711   :  { %v4514_v58 = vadd.f32 1.0, %v15062_v32 }
 0x712   :  { %15067 = vrcp.f32 %v4513_v6  ;;  %v15064_v63 = vpop.eup %15063 }
 0x713   :  { %15069 = vrcp.f32 %v4514_v58  ;;  %v15066_v33 = vpop.eup %15065  ;;  %v4527_v16 = vadd.f32 1.0, %v15064_v63 }
 0x714   :  { %v4528_v6 = vadd.f32 1.0, %v15066_v33  ;;  %v17985_v33 = vld [vmem:[%s21325_s1 + $0x74] ss:$24 sps:$4 sm:$0xff]  }
 0x71c   :  { %v15068_v49 = vpop.eup %15067 }
 0x71d   :  { %v15070_v56 = vpop.eup %15069 }
 0x740   :  { %v4498_v18 = vpop.f32.mrb[32].mxu1 }
 0x741   :  { %v4533_v1 = vadd.f32 %v4498_v18, %v21629_v28  ;;  %v4500_v41 = vpop.f32.mrb[33].mxu1 }
 0x742   :  { %v4534_v2 = vadd.f32 %v4500_v41, %v21630_v52  ;;  %v4502_v21 = vpop.f32.mrb[34].mxu1 }
 0x743   :  { %v4535_v32 = vmul.f32 %v15068_v49, %v4533_v1  ;;  %v4503_v44 = vpop.f32.mrb[35].mxu1 }
 0x744   :  { %v4536_v35 = vmul.f32 %v15070_v56, %v4534_v2  ;;  %v17999_v2 = vld [vmem:[%s21325_s1 + $0xa4] ss:$24 sps:$4 sm:$0xff]   ;;  %v21670_v56 = vld [vmem:[#allocation21_spill] sm:$0xff] }
 0x745   :  { %v4537_v62 = vadd.f32 %v12622_v48, %v4535_v32  ;;  %v17993_v48 = vld [vmem:[%s21325_s1 + $0x70] ss:$24 sps:$4 sm:$0xff]   ;;  %v21671_v32 = vld [vmem:[#allocation22_spill] sm:$0xff] }
 0x746   :  { %v4538_v58 = vadd.f32 %v12623_v17, %v4536_v35  ;;  %v21672_v17 = vld [vmem:[#allocation23_spill] sm:$0xff]  ;;  %v21673_v35 = vld [vmem:[#allocation24_spill] sm:$0xff] }
 0x747   :  { %15071 = vtanh.f32 %v4537_v62  ;;  %v21675_v62 = vld [vmem:[#allocation26_spill] sm:$0xff] }
 0x748   :  { %15073 = vtanh.f32 %v4538_v58 }
 0x749   :  { %15075 = vrcp.f32 %v4527_v16  ;;  %v21674_v16 = vld [vmem:[#allocation25_spill] sm:$0xff] }
 0x74a   :  { %15077 = vrcp.f32 %v4528_v6  ;;  %v21676_v6 = vld [vmem:[#allocation27_spill] sm:$0xff] }
 0x751   :  { %v15072_v18 = vpop.eup %15071 }
 0x752   :  { %v15074_v28 = vpop.eup %15073  ;;  %v4541_v41 = vsub.f32 %v17485_v8, %v15072_v18 }
 0x753   :  { %v15076_v21 = vpop.eup %15075  ;;  %v4542_v1 = vsub.f32 %v17487_v46, %v15074_v28  ;;  %v17971_v46 = vld [vmem:[%s21325_s1 + $0x44] ss:$24 sps:$4 sm:$0xff]  }
 0x754   :  { %v15078_v49 = vpop.eup %15077  ;;  %v4543_v52 = vmul.f32 %v15076_v21, %v4541_v41 }
 0x755   :  { %v4544_v38 = vmul.f32 %v15078_v49, %v4542_v1 }
 0x756   :  { %v17945_v44 = vadd.f32 %v15072_v18, %v4543_v52  ;;  %v17962_v52 = vld [vmem:[%s21325_s1 + $0x10] ss:$24 sps:$4 sm:$0xff]  }
 0x757   :  { %v17947_v63 = vadd.f32 %v15074_v28, %v4544_v38  ;;  %v17979_v38 = vld [vmem:[%s21325_s1 + $0x40] ss:$24 sps:$4 sm:$0xff]  }
 0x758   :  { %12724 = vst [vmem:[%s21328_s3 + $0x50] sm:$0xff] %v17945_v44  ;;  %v17966_v28 = vpack.c.bf16 %v17945_v44, %v17945_v44 }
 0x759   :  { %12725 = vst [vmem:[%s21328_s3 + $0x58] sm:$0xff] %v17947_v63  ;;  %v4558_v8 = vpack.c.bf16 %v17947_v63, %v17947_v63 }
 0x75b   :  { %5167 = vmatprep.mubr.bf16.mxu0 %v4558_v8  ;;  %5208 = vmatprep.mubr.bf16.mxu1 %v4558_v8 }
 0x75c   :  { %5168 = vmatmul.mubr.bf16.vlgmr.msra.gmra.mrb[36].mxu0 %v17966_v28  ;;  %5209 = vmatmul.mubr.bf16.vlgmr.msra.gmra.mrb[36].mxu1 %v17966_v28 }
 0x75d   :  { %5218 = vmatpush1.bf16.msra.mxu0 %v17962_v52  ;;  %5249 = vmatprep.mubr.bf16.mxu0 %v4558_v8 }
 0x75e   :  { %5219 = vmatprep.subr.bf16.mxu0 %v17971_v46  ;;  %5889 = vmatpush1.bf16.msra.mxu1 %v17535_v24  ;;  %v18007_v24 = vld [vmem:[%s21325_s1 + $0xa0] ss:$24 sps:$4 sm:$0xff]  }
 0x75f   :  { %5890 = vmatprep.subr.bf16.mxu1 %v17555_v14  ;;  %v18013_v14 = vld [vmem:[%s21325_s1 + $0xd4] ss:$24 sps:$4 sm:$0xff]  }
 0x761   :  { %5220 = vmatpush1.bf16.msra.mxu0 %v17979_v38 }
 0x762   :  { %5221 = vmatprep.subr.bf16.mxu0 %v17985_v33  ;;  %5891 = vmatpush1.bf16.msra.mxu1 %v17568_v60  ;;  %v18021_v60 = vld [vmem:[%s21325_s1 + $0xd0] ss:$24 sps:$4 sm:$0xff]  }
 0x763   :  { %5892 = vmatprep.subr.bf16.mxu1 %v17580_v54  ;;  %v18027_v54 = vld [vmem:[%s21325_s1 + $0x104] ss:$24 sps:$4 sm:$0xff]  }
 0x765   :  { %5222 = vmatpush1.bf16.msra.mxu0 %v17993_v48 }
 0x766   :  { %5223 = vmatprep.subr.bf16.mxu0 %v17999_v2  ;;  %5893 = vmatpush1.bf16.msra.mxu1 %v17592_v61  ;;  %v18035_v61 = vld [vmem:[%s21325_s1 + $0x100] ss:$24 sps:$4 sm:$0xff]  }
 0x767   :  { %5894 = vmatprep.subr.bf16.mxu1 %v17604_v9  ;;  %v18041_v9 = vld [vmem:[%s21325_s1 + $0x134] ss:$24 sps:$4 sm:$0xff]  }
 0x769   :  { %5224 = vmatpush1.bf16.msra.mxu0 %v18007_v24 }
 0x76a   :  { %5225 = vmatprep.subr.bf16.mxu0 %v18013_v14  ;;  %5895 = vmatpush1.bf16.msra.mxu1 %v17616_v13  ;;  %v18049_v13 = vld [vmem:[%s21325_s1 + $0x130] ss:$24 sps:$4 sm:$0xff]  }
 0x76b   :  { %5896 = vmatprep.subr.bf16.mxu1 %v17628_v27  ;;  %v18055_v27 = vld [vmem:[%s21325_s1 + $0x164] ss:$24 sps:$4 sm:$0xff]  }
 0x76d   :  { %5226 = vmatpush1.bf16.msra.mxu0 %v18021_v60 }
 0x76e   :  { %5227 = vmatprep.subr.bf16.mxu0 %v18027_v54  ;;  %5897 = vmatpush1.bf16.msra.mxu1 %v17640_v34  ;;  %v18063_v34 = vld [vmem:[%s21325_s1 + $0x160] ss:$24 sps:$4 sm:$0xff]  }
 0x76f   :  { %5898 = vmatprep.subr.bf16.mxu1 %v17652_v42  ;;  %v18069_v42 = vld [vmem:[%s21325_s1 + $0x194] ss:$24 sps:$4 sm:$0xff]  }
 0x771   :  { %5228 = vmatpush1.bf16.msra.mxu0 %v18035_v61 }
 0x772   :  { %5229 = vmatprep.subr.bf16.mxu0 %v18041_v9  ;;  %5899 = vmatpush1.bf16.msra.mxu1 %v17664_v12  ;;  %v18077_v12 = vld [vmem:[%s21325_s1 + $0x190] ss:$24 sps:$4 sm:$0xff]  }
 0x773   :  { %5900 = vmatprep.subr.bf16.mxu1 %v17676_v50  ;;  %v18083_v50 = vld [vmem:[%s21325_s1 + $0x1c4] ss:$24 sps:$4 sm:$0xff]  }
 0x775   :  { %5230 = vmatpush1.bf16.msra.mxu0 %v18049_v13 }
 0x776   :  { %5231 = vmatprep.subr.bf16.mxu0 %v18055_v27  ;;  %5901 = vmatpush1.bf16.msra.mxu1 %v17688_v39  ;;  %v18091_v39 = vld [vmem:[%s21325_s1 + $0x1c0] ss:$24 sps:$4 sm:$0xff]  }
 0x777   :  { %5902 = vmatprep.subr.bf16.mxu1 %v17700_v59  ;;  %v18097_v59 = vld [vmem:[%s21325_s1 + $0x1f4] ss:$24 sps:$4 sm:$0xff]  }
 0x779   :  { %5232 = vmatpush1.bf16.msra.mxu0 %v18063_v34 }
 0x77a   :  { %5233 = vmatprep.subr.bf16.mxu0 %v18069_v42  ;;  %5903 = vmatpush1.bf16.msra.mxu1 %v17712_v51  ;;  %v18105_v51 = vld [vmem:[%s21325_s1 + $0x1f0] ss:$24 sps:$4 sm:$0xff]  }
 0x77b   :  { %5904 = vmatprep.subr.bf16.mxu1 %v17724_v37  ;;  %v18111_v37 = vld [vmem:[%s21325_s1 + $0x224] ss:$24 sps:$4 sm:$0xff]  }
 0x77d   :  { %5234 = vmatpush1.bf16.msra.mxu0 %v18077_v12 }
 0x77e   :  { %5235 = vmatprep.subr.bf16.mxu0 %v18083_v50  ;;  %5905 = vmatpush1.bf16.msra.mxu1 %v17736_v25  ;;  %v18119_v25 = vld [vmem:[%s21325_s1 + $0x220] ss:$24 sps:$4 sm:$0xff]  }
 0x77f   :  { %5906 = vmatprep.subr.bf16.mxu1 %v17748_v0  ;;  %v18125_v0 = vld [vmem:[%s21325_s1 + $0x254] ss:$24 sps:$4 sm:$0xff]  }
 0x781   :  { %5236 = vmatpush1.bf16.msra.mxu0 %v18091_v39 }
 0x782   :  { %5237 = vmatprep.subr.bf16.mxu0 %v18097_v59  ;;  %5907 = vmatpush1.bf16.msra.mxu1 %v17755_v47  ;;  %v18133_v47 = vld [vmem:[%s21325_s1 + $0x250] ss:$24 sps:$4 sm:$0xff]  }
 0x783   :  { %5908 = vmatprep.subr.bf16.mxu1 %v17775_v53  ;;  %v18139_v53 = vld [vmem:[%s21325_s1 + $0x284] ss:$24 sps:$4 sm:$0xff]  }
 0x785   :  { %5238 = vmatpush1.bf16.msra.mxu0 %v18105_v51 }
 0x786   :  { %5239 = vmatprep.subr.bf16.mxu0 %v18111_v37  ;;  %5909 = vmatpush1.bf16.msra.mxu1 %v17780_v43  ;;  %v18147_v43 = vld [vmem:[%s21325_s1 + $0x280] ss:$24 sps:$4 sm:$0xff]  }
 0x787   :  { %5910 = vmatprep.subr.bf16.mxu1 %v17799_v31  ;;  %v18153_v31 = vld [vmem:[%s21325_s1 + $0x2b4] ss:$24 sps:$4 sm:$0xff]  }
 0x789   :  { %5240 = vmatpush1.bf16.msra.mxu0 %v18119_v25 }
 0x78a   :  { %5241 = vmatprep.subr.bf16.mxu0 %v18125_v0  ;;  %5911 = vmatpush1.bf16.msra.mxu1 %v17804_v26  ;;  %v18161_v26 = vld [vmem:[%s21325_s1 + $0x2b0] ss:$24 sps:$4 sm:$0xff]  }
 0x78b   :  { %5912 = vmatprep.subr.bf16.mxu1 %v17820_v10  ;;  %v18167_v10 = vld [vmem:[%s21325_s1 + $0x2e4] ss:$24 sps:$4 sm:$0xff]  }
 0x78d   :  { %5242 = vmatpush1.bf16.msra.mxu0 %v18133_v47 }
 0x78e   :  { %5243 = vmatprep.subr.bf16.mxu0 %v18139_v53  ;;  %5913 = vmatpush1.bf16.msra.mxu1 %v17827_v40  ;;  %v18175_v40 = vld [vmem:[%s21325_s1 + $0x2e0] ss:$24 sps:$4 sm:$0xff]  }
 0x78f   :  { %5914 = vmatprep.subr.bf16.mxu1 %v17844_v3  ;;  %v21656_v3 = vld [vmem:[#allocation7_spill] sm:$0xff] }
 0x791   :  { %5244 = vmatpush1.bf16.msra.mxu0 %v18147_v43 }
 0x792   :  { %5245 = vmatprep.subr.bf16.mxu0 %v18153_v31  ;;  %5915 = vmatpush1.bf16.msra.mxu1 %v17856_v11  ;;  %v21666_v11 = vld [vmem:[#allocation17_spill] sm:$0xff] }
 0x793   :  { %5916 = vmatprep.subr.bf16.mxu1 %v17868_v4  ;;  %v21668_v4 = vld [vmem:[#allocation19_spill] sm:$0xff] }
 0x795   :  { %5246 = vmatpush1.bf16.msra.mxu0 %v18161_v26 }
 0x796   :  { %5247 = vmatprep.subr.bf16.mxu0 %v18167_v10  ;;  %5917 = vmatpush1.bf16.msra.mxu1 %v17880_v29  ;;  %v21669_v29 = vld [vmem:[#allocation20_spill] sm:$0xff] }
 0x797   :  { %5918 = vmatprep.subr.bf16.mxu1 %v17892_v7  ;;  %v21665_v7 = vld [vmem:[#allocation16_spill] sm:$0xff] }
 0x799   :  { %5248 = vmatpush1.bf16.msra.mxu0 %v18175_v40 }
 0x79a   :  { %5929 = vmatprep.subr.bf16.mxu0 %v17550_v22  ;;  %5919 = vmatpush1.bf16.msra.mxu1 %v17904_v19  ;;  %v21654_v22 = vld [vmem:[#allocation5_spill] sm:$0xff]  ;;  %v21667_v19 = vld [vmem:[#allocation18_spill] sm:$0xff] }
 0x79b   :  { %5970 = vmatprep.subr.bf16.mxu1 %v17919_v55  ;;  %v21655_v55 = vld [vmem:[#allocation6_spill] sm:$0xff] }
 0x79c   :  { %5250 = vmatmul.mubr.bf16.vlgmr.msra.gmra.mrb[40].mxu0 %v17966_v28 }
 0x79d   :  { %5930 = vmatpush1.bf16.msra.mxu0 %v17545_v20  ;;  %v21657_v20 = vld [vmem:[#allocation8_spill] sm:$0xff] }
 0x79e   :  { %5931 = vmatprep.subr.bf16.mxu0 %v17561_v45  ;;  %v21658_v45 = vld [vmem:[#allocation9_spill] sm:$0xff] }
 0x7a1   :  { %5932 = vmatpush1.bf16.msra.mxu0 %v17575_v36  ;;  %v21659_v36 = vld [vmem:[#allocation10_spill] sm:$0xff] }
 0x7a2   :  { %5933 = vmatprep.subr.bf16.mxu0 %v17586_v57  ;;  %v21660_v57 = vld [vmem:[#allocation11_spill] sm:$0xff] }
 0x7a5   :  { %5934 = vmatpush1.bf16.msra.mxu0 %v17599_v5  ;;  %v21661_v5 = vld [vmem:[#allocation12_spill] sm:$0xff] }
 0x7a6   :  { %5935 = vmatprep.subr.bf16.mxu0 %v17610_v15  ;;  %v21662_v15 = vld [vmem:[#allocation13_spill] sm:$0xff] }
 0x7a9   :  { %5936 = vmatpush1.bf16.msra.mxu0 %v17623_v23  ;;  %v21663_v23 = vld [vmem:[#allocation14_spill] sm:$0xff] }
 0x7aa   :  { %5937 = vmatprep.subr.bf16.mxu0 %v17634_v30  ;;  %v21664_v30 = vld [vmem:[#allocation15_spill] sm:$0xff] }
 0x7ad   :  { %5938 = vmatpush1.bf16.msra.mxu0 %v21654_v22  ;;  %v12726_v22 = vld [vmem:[%s21326_s0 + $0x120] sm:$0xff] }
 0x7ae   :  { %5939 = vmatprep.subr.bf16.mxu0 %v21655_v55  ;;  %v12727_v55 = vld [vmem:[%s21326_s0 + $0x128] sm:$0xff] }
 0x7b1   :  { %5940 = vmatpush1.bf16.msra.mxu0 %v21656_v3 }
 0x7b2   :  { %5941 = vmatprep.subr.bf16.mxu0 %v21657_v20 }
 0x7b5   :  { %5942 = vmatpush1.bf16.msra.mxu0 %v21658_v45 }
 0x7b6   :  { %5943 = vmatprep.subr.bf16.mxu0 %v21659_v36 }
 0x7b9   :  { %5944 = vmatpush1.bf16.msra.mxu0 %v21660_v57  ;;  %v12728_v57 = vld [vmem:[%s21326_s0 + $0x130] sm:$0xff] }
 0x7ba   :  { %5945 = vmatprep.subr.bf16.mxu0 %v21661_v5  ;;  %v12729_v5 = vld [vmem:[%s21326_s0 + $0x138] sm:$0xff] }
 0x7bd   :  { %5946 = vmatpush1.bf16.msra.mxu0 %v21662_v15 }
 0x7be   :  { %5947 = vmatprep.subr.bf16.mxu0 %v21663_v23 }
 0x7c1   :  { %5948 = vmatpush1.bf16.msra.mxu0 %v21664_v30 }
 0x7c2   :  { %5949 = vmatprep.subr.bf16.mxu0 %v21665_v7 }
 0x7c5   :  { %5950 = vmatpush1.bf16.msra.mxu0 %v21666_v11 }
 0x7c6   :  { %5951 = vmatprep.subr.bf16.mxu0 %v21667_v19 }
 0x7c9   :  { %5952 = vmatpush1.bf16.msra.mxu0 %v21668_v4 }
 0x7ca   :  { %5953 = vmatprep.subr.bf16.mxu0 %v21669_v29 }
 0x7cd   :  { %5954 = vmatpush1.bf16.msra.mxu0 %v21670_v56 }
 0x7ce   :  { %5955 = vmatprep.subr.bf16.mxu0 %v21671_v32 }
 0x7d1   :  { %5956 = vmatpush1.bf16.msra.mxu0 %v21672_v17 }
 0x7d2   :  { %5957 = vmatprep.subr.bf16.mxu0 %v21673_v35  ;;  %v21677_v35 = vld [vmem:[#allocation3_spill] sm:$0xff] }
 0x7d5   :  { %5958 = vmatpush1.bf16.msra.mxu0 %v21674_v16 }
 0x7d6   :  { %5959 = vmatprep.subr.bf16.mxu0 %v21675_v62 }
 0x7d9   :  { %5960 = vmatpush1.bf16.msra.mxu0 %v21676_v6 }
 0x82f   :  { %v5169_v58 = vpop.f32.mrb[36].mxu0  ;;  %v5210_v18 = vpop.f32.mrb[36].mxu1 }
 0x830   :  { %v5171_v41 = vpop.f32.mrb[37].mxu0  ;;  %v5212_v21 = vpop.f32.mrb[37].mxu1  ;;  %v5258_v3 = vadd.f32 %v12726_v22, %v5169_v58  ;;  %v5272_v15 = vadd.f32 %v12728_v57, %v5210_v18  ;;  %v12730_v58 = vld [vmem:[%s21326_s0 + $0x140] sm:$0xff]  ;;  %v21678_v18 = vld [vmem:[#allocation4_spill] sm:$0xff] }
 0x831   :  { %v5173_v1 = vpop.f32.mrb[38].mxu0  ;;  %v5214_v49 = vpop.f32.mrb[38].mxu1  ;;  %v5259_v20 = vadd.f32 %v12727_v55, %v5171_v41  ;;  %v5273_v23 = vadd.f32 %v12729_v5, %v5212_v21 }
 0x832   :  { %v5174_v8 = vpop.f32.mrb[39].mxu0  ;;  %v5215_v28 = vpop.f32.mrb[39].mxu1  ;;  %v12828_v45 = vmul.f32 -1.442695, %v5258_v3  ;;  %v12830_v11 = vmul.f32 -1.442695, %v5272_v15 }
 0x833   :  { %v12829_v36 = vmul.f32 -1.442695, %v5259_v20  ;;  %v12831_v19 = vmul.f32 -1.442695, %v5273_v23  ;;  %v12731_v8 = vld [vmem:[%s21326_s0 + $0x148] sm:$0xff] }
 0x834   :  { %15079 = vpow2.f32 %v12828_v45 }
 0x835   :  { %15081 = vpow2.f32 %v12829_v36 }
 0x836   :  { %15083 = vpow2.f32 %v12830_v11 }
 0x837   :  { %15085 = vpow2.f32 %v12831_v19 }
 0x83e   :  { %v15080_v30 = vpop.eup %15079 }
 0x83f   :  { %v15082_v7 = vpop.eup %15081  ;;  %v5266_v4 = vadd.f32 1.0, %v15080_v30 }
 0x840   :  { %v5267_v29 = vadd.f32 1.0, %v15082_v7  ;;  %v15084_v56 = vpop.eup %15083 }
 0x841   :  { %15087 = vrcp.f32 %v5266_v4  ;;  %v15086_v17 = vpop.eup %15085  ;;  %v5280_v55 = vadd.f32 1.0, %v15084_v56  ;;  %v18477_v56 = vld [vmem:[%s21325_s1 + $0x184] ss:$24 sps:$4 sm:$0xff]  }
 0x842   :  { %15089 = vrcp.f32 %v5267_v29  ;;  %v5281_v20 = vadd.f32 1.0, %v15086_v17  ;;  %v18472_v29 = vld [vmem:[%s21325_s1 + $0x158] ss:$24 sps:$4 sm:$0xff]  }
 0x843   :  { %21685 = vst [vmem:[#allocation11_spill] sm:$0xff] %v18472_v29  ;;  %v18489_v17 = vld [vmem:[%s21325_s1 + $0x180] ss:$24 sps:$4 sm:$0xff]  }
 0x84b   :  { %v15088_v6 = vpop.eup %15087 }
 0x84c   :  { %v15090_v1 = vpop.eup %15089 }
 0x86f   :  { %v5251_v32 = vpop.f32.mrb[40].mxu0 }
 0x870   :  { %v5286_v16 = vadd.f32 %v5251_v32, %v21677_v35  ;;  %v5253_v62 = vpop.f32.mrb[41].mxu0  ;;  %v18483_v32 = vld [vmem:[%s21325_s1 + $0x18c] ss:$24 sps:$4 sm:$0xff]  }
 0x871   :  { %v5287_v41 = vadd.f32 %v5253_v62, %v21678_v18  ;;  %v5255_v21 = vpop.f32.mrb[42].mxu0  ;;  %21686 = vst [vmem:[#allocation12_spill] sm:$0xff] %v18483_v32  ;;  %v18501_v62 = vld [vmem:[%s21325_s1 + $0x1b4] ss:$24 sps:$4 sm:$0xff]  }
 0x872   :  { %v5288_v49 = vmul.f32 %v15088_v6, %v5286_v16  ;;  %v5256_v28 = vpop.f32.mrb[43].mxu0  ;;  %v18496_v16 = vld [vmem:[%s21325_s1 + $0x188] ss:$24 sps:$4 sm:$0xff]   ;;  %v18528_v21 = vld [vmem:[%s21325_s1 + $0x1e4] ss:$24 sps:$4 sm:$0xff]  }
 0x873   :  { %v5289_v22 = vmul.f32 %v15090_v1, %v5287_v41  ;;  %21687 = vst [vmem:[#allocation13_spill] sm:$0xff] %v18496_v16  ;;  %v18508_v6 = vld [vmem:[%s21325_s1 + $0x1b0] ss:$24 sps:$4 sm:$0xff]   ;;  %v18533_v1 = vld [vmem:[%s21325_s1 + $0x1e0] ss:$24 sps:$4 sm:$0xff]  }
 0x874   :  { %v5290_v3 = vadd.f32 %v12730_v58, %v5288_v49  ;;  %v18516_v58 = vld [vmem:[%s21325_s1 + $0x1bc] ss:$24 sps:$4 sm:$0xff]   ;;  %v18521_v41 = vld [vmem:[%s21325_s1 + $0x1b8] ss:$24 sps:$4 sm:$0xff]   ;;  %v18538_v49 = vld [vmem:[%s21325_s1 + $0x1ec] ss:$24 sps:$4 sm:$0xff]  }
 0x875   :  { %v5291_v45 = vadd.f32 %v12731_v8, %v5289_v22  ;;  %21688 = vst [vmem:[#allocation14_spill] sm:$0xff] %v18516_v58  ;;  %21689 = vst [vmem:[#allocation15_spill] sm:$0xff] %v18521_v41  ;;  %v18544_v8 = vld [vmem:[%s21325_s1 + $0x1e8] ss:$24 sps:$4 sm:$0xff]   ;;  %v18552_v28 = vld [vmem:[%s21325_s1 + $0x214] ss:$24 sps:$4 sm:$0xff]  }
 0x876   :  { %15091 = vtanh.f32 %v5290_v3  ;;  %21690 = vst [vmem:[#allocation16_spill] sm:$0xff] %v18538_v49  ;;  %21691 = vst [vmem:[#allocation17_spill] sm:$0xff] %v18544_v8  ;;  %v18557_v22 = vld [vmem:[%s21325_s1 + $0x210] ss:$24 sps:$4 sm:$0xff]  }
 0x877   :  { %15093 = vtanh.f32 %v5291_v45  ;;  %v18568_v3 = vld [vmem:[%s21325_s1 + $0x218] ss:$24 sps:$4 sm:$0xff]  }
 0x878   :  { %15095 = vrcp.f32 %v5280_v55  ;;  %v18562_v55 = vld [vmem:[%s21325_s1 + $0x21c] ss:$24 sps:$4 sm:$0xff]   ;;  %21693 = vst [vmem:[#allocation19_spill] sm:$0xff] %v18568_v3  ;;  %v18580_v45 = vld [vmem:[%s21325_s1 + $0x240] ss:$24 sps:$4 sm:$0xff]  }
 0x879   :  { %15097 = vrcp.f32 %v5281_v20  ;;  %21692 = vst [vmem:[#allocation18_spill] sm:$0xff] %v18562_v55  ;;  %v18573_v20 = vld [vmem:[%s21325_s1 + $0x244] ss:$24 sps:$4 sm:$0xff]  }
 0x880   :  { %v15092_v36 = vpop.eup %15091 }
 0x881   :  { %v15094_v57 = vpop.eup %15093  ;;  %v5294_v5 = vsub.f32 %v17945_v44, %v15092_v36 }
 0x882   :  { %v15096_v15 = vpop.eup %15095  ;;  %v5295_v23 = vsub.f32 %v17947_v63, %v15094_v57 }
 0x883   :  { %v15098_v30 = vpop.eup %15097  ;;  %v5296_v7 = vmul.f32 %v15096_v15, %v5294_v5  ;;  %v18597_v5 = vld [vmem:[%s21325_s1 + $0x274] ss:$24 sps:$4 sm:$0xff]  }
 0x884   :  { %v5297_v11 = vmul.f32 %v15098_v30, %v5295_v23  ;;  %v18603_v15 = vld [vmem:[%s21325_s1 + $0x27c] ss:$24 sps:$4 sm:$0xff]   ;;  %v18609_v23 = vld [vmem:[%s21325_s1 + $0x270] ss:$24 sps:$4 sm:$0xff]  }
 0x885   :  { %v18238_v19 = vadd.f32 %v15092_v36, %v5296_v7  ;;  %v18585_v36 = vld [vmem:[%s21325_s1 + $0x24c] ss:$24 sps:$4 sm:$0xff]   ;;  %21696 = vst [vmem:[#allocation22_spill] sm:$0xff] %v18603_v15  ;;  %v18616_v30 = vld [vmem:[%s21325_s1 + $0x278] ss:$24 sps:$4 sm:$0xff]  }
 0x886   :  { %v18240_v4 = vadd.f32 %v15094_v57, %v5297_v11  ;;  %21694 = vst [vmem:[#allocation20_spill] sm:$0xff] %v18585_v36  ;;  %v18592_v57 = vld [vmem:[%s21325_s1 + $0x248] ss:$24 sps:$4 sm:$0xff]   ;;  %21697 = vst [vmem:[#allocation23_spill] sm:$0xff] %v18616_v30  ;;  %v18621_v7 = vld [vmem:[%s21325_s1 + $0x2a4] ss:$24 sps:$4 sm:$0xff]  }
 0x887   :  { %12832 = vst [vmem:[%s21328_s3 + $0x60] sm:$0xff] %v18238_v19  ;;  %v5310_v63 = vpack.c.bf16 %v18238_v19, %v18238_v19  ;;  %21695 = vst [vmem:[#allocation21_spill] sm:$0xff] %v18592_v57  ;;  %v18627_v11 = vld [vmem:[%s21325_s1 + $0x2ac] ss:$24 sps:$4 sm:$0xff]  }
 0x888   :  { %12833 = vst [vmem:[%s21328_s3 + $0x68] sm:$0xff] %v18240_v4  ;;  %v5311_v44 = vpack.c.bf16 %v18240_v4, %v18240_v4  ;;  %21698 = vst [vmem:[#allocation24_spill] sm:$0xff] %v18627_v11 }
 0x88a   :  { %5920 = vmatprep.mubr.bf16.mxu1 %v5311_v44  ;;  %5961 = vmatprep.mubr.bf16.mxu0 %v5311_v44 }
 0x88b   :  { %5921 = vmatmul.mubr.bf16.vlgmr.msra.gmra.mrb[40].mxu1 %v5310_v63  ;;  %5962 = vmatmul.mubr.bf16.vlgmr.msra.gmra.mrb[44].mxu0 %v5310_v63 }
 0x88c   :  { %5971 = vmatpush1.bf16.msra.mxu1 %v17962_v52  ;;  %6002 = vmatprep.mubr.bf16.mxu1 %v5311_v44  ;;  %v18288_v52 = vld [vmem:[%s21325_s1] ss:$24 sps:$4 sm:$0xff]  }
 0x88d   :  { %5972 = vmatprep.subr.bf16.mxu1 %v17971_v46  ;;  %v18293_v46 = vld [vmem:[%s21325_s1 + $0x4] ss:$24 sps:$4 sm:$0xff]   ;;  %v18633_v44 = vld [vmem:[%s21325_s1 + $0x2a0] ss:$24 sps:$4 sm:$0xff]  }
 0x88e   :  { %6641 = vmatprep.subr.bf16.mxu0 %v18293_v46 }
 0x88f   :  { %6642 = vmatpush1.bf16.msra.mxu0 %v18288_v52 }
 0x890   :  { %5973 = vmatpush1.bf16.msra.mxu1 %v17979_v38  ;;  %v18298_v38 = vld [vmem:[%s21325_s1 + $0x8] ss:$24 sps:$4 sm:$0xff]  }
 0x891   :  { %5974 = vmatprep.subr.bf16.mxu1 %v17985_v33  ;;  %v18303_v33 = vld [vmem:[%s21325_s1 + $0xc] ss:$24 sps:$4 sm:$0xff]  }
 0x894   :  { %5975 = vmatpush1.bf16.msra.mxu1 %v17993_v48  ;;  %v18308_v48 = vld [vmem:[%s21325_s1 + $0x34] ss:$24 sps:$4 sm:$0xff]  }
 0x895   :  { %5976 = vmatprep.subr.bf16.mxu1 %v17999_v2  ;;  %v18314_v2 = vld [vmem:[%s21325_s1 + $0x3c] ss:$24 sps:$4 sm:$0xff]   ;;  %6643 = vmatprep.subr.bf16.mxu0 %v18308_v48 }
 0x898   :  { %5977 = vmatpush1.bf16.msra.mxu1 %v18007_v24  ;;  %v18321_v24 = vld [vmem:[%s21325_s1 + $0x30] ss:$24 sps:$4 sm:$0xff]  }
 0x899   :  { %5978 = vmatprep.subr.bf16.mxu1 %v18013_v14  ;;  %v18328_v14 = vld [vmem:[%s21325_s1 + $0x38] ss:$24 sps:$4 sm:$0xff]   ;;  %6644 = vmatpush1.bf16.msra.mxu0 %v18321_v24 }
 0x89c   :  { %5979 = vmatpush1.bf16.msra.mxu1 %v18021_v60  ;;  %v18333_v60 = vld [vmem:[%s21325_s1 + $0x64] ss:$24 sps:$4 sm:$0xff]  }
 0x89d   :  { %5980 = vmatprep.subr.bf16.mxu1 %v18027_v54  ;;  %v18339_v54 = vld [vmem:[%s21325_s1 + $0x6c] ss:$24 sps:$4 sm:$0xff]   ;;  %6645 = vmatprep.subr.bf16.mxu0 %v18333_v60 }
 0x8a0   :  { %5981 = vmatpush1.bf16.msra.mxu1 %v18035_v61  ;;  %v18345_v61 = vld [vmem:[%s21325_s1 + $0x60] ss:$24 sps:$4 sm:$0xff]  }
 0x8a1   :  { %5982 = vmatprep.subr.bf16.mxu1 %v18041_v9  ;;  %v18352_v9 = vld [vmem:[%s21325_s1 + $0x68] ss:$24 sps:$4 sm:$0xff]   ;;  %6646 = vmatpush1.bf16.msra.mxu0 %v18345_v61 }
 0x8a4   :  { %5983 = vmatpush1.bf16.msra.mxu1 %v18049_v13  ;;  %v18357_v13 = vld [vmem:[%s21325_s1 + $0x94] ss:$24 sps:$4 sm:$0xff]  }
 0x8a5   :  { %5984 = vmatprep.subr.bf16.mxu1 %v18055_v27  ;;  %v18363_v27 = vld [vmem:[%s21325_s1 + $0x9c] ss:$24 sps:$4 sm:$0xff]   ;;  %6647 = vmatprep.subr.bf16.mxu0 %v18357_v13 }
 0x8a8   :  { %5985 = vmatpush1.bf16.msra.mxu1 %v18063_v34  ;;  %v18369_v34 = vld [vmem:[%s21325_s1 + $0x90] ss:$24 sps:$4 sm:$0xff]  }
 0x8a9   :  { %5986 = vmatprep.subr.bf16.mxu1 %v18069_v42  ;;  %v18376_v42 = vld [vmem:[%s21325_s1 + $0x98] ss:$24 sps:$4 sm:$0xff]   ;;  %6648 = vmatpush1.bf16.msra.mxu0 %v18369_v34 }
 0x8ac   :  { %5987 = vmatpush1.bf16.msra.mxu1 %v18077_v12  ;;  %v18381_v12 = vld [vmem:[%s21325_s1 + $0xc4] ss:$24 sps:$4 sm:$0xff]  }
 0x8ad   :  { %5988 = vmatprep.subr.bf16.mxu1 %v18083_v50  ;;  %v18387_v50 = vld [vmem:[%s21325_s1 + $0xcc] ss:$24 sps:$4 sm:$0xff]   ;;  %6649 = vmatprep.subr.bf16.mxu0 %v18381_v12 }
 0x8b0   :  { %5989 = vmatpush1.bf16.msra.mxu1 %v18091_v39  ;;  %v18393_v39 = vld [vmem:[%s21325_s1 + $0xc0] ss:$24 sps:$4 sm:$0xff]  }
 0x8b1   :  { %5990 = vmatprep.subr.bf16.mxu1 %v18097_v59  ;;  %v18400_v59 = vld [vmem:[%s21325_s1 + $0xc8] ss:$24 sps:$4 sm:$0xff]   ;;  %6650 = vmatpush1.bf16.msra.mxu0 %v18393_v39 }
 0x8b2   :  { %21679 = vst [vmem:[#allocation5_spill] sm:$0xff] %v18400_v59 }
 0x8b4   :  { %5991 = vmatpush1.bf16.msra.mxu1 %v18105_v51  ;;  %v18405_v51 = vld [vmem:[%s21325_s1 + $0xf4] ss:$24 sps:$4 sm:$0xff]  }
 0x8b5   :  { %5992 = vmatprep.subr.bf16.mxu1 %v18111_v37  ;;  %v18411_v37 = vld [vmem:[%s21325_s1 + $0xfc] ss:$24 sps:$4 sm:$0xff]   ;;  %6651 = vmatprep.subr.bf16.mxu0 %v18405_v51 }
 0x8b6   :  { %21680 = vst [vmem:[#allocation6_spill] sm:$0xff] %v18411_v37 }
 0x8b8   :  { %5993 = vmatpush1.bf16.msra.mxu1 %v18119_v25  ;;  %v18417_v25 = vld [vmem:[%s21325_s1 + $0xf0] ss:$24 sps:$4 sm:$0xff]  }
 0x8b9   :  { %5994 = vmatprep.subr.bf16.mxu1 %v18125_v0  ;;  %v18424_v0 = vld [vmem:[%s21325_s1 + $0xf8] ss:$24 sps:$4 sm:$0xff]   ;;  %6652 = vmatpush1.bf16.msra.mxu0 %v18417_v25 }
 0x8ba   :  { %21681 = vst [vmem:[#allocation7_spill] sm:$0xff] %v18424_v0 }
 0x8bc   :  { %5995 = vmatpush1.bf16.msra.mxu1 %v18133_v47  ;;  %v18429_v47 = vld [vmem:[%s21325_s1 + $0x124] ss:$24 sps:$4 sm:$0xff]  }
 0x8bd   :  { %5996 = vmatprep.subr.bf16.mxu1 %v18139_v53  ;;  %v18435_v53 = vld [vmem:[%s21325_s1 + $0x12c] ss:$24 sps:$4 sm:$0xff]   ;;  %6653 = vmatprep.subr.bf16.mxu0 %v18429_v47 }
 0x8be   :  { %21682 = vst [vmem:[#allocation8_spill] sm:$0xff] %v18435_v53 }
 0x8c0   :  { %5997 = vmatpush1.bf16.msra.mxu1 %v18147_v43  ;;  %v18441_v43 = vld [vmem:[%s21325_s1 + $0x120] ss:$24 sps:$4 sm:$0xff]  }
 0x8c1   :  { %5998 = vmatprep.subr.bf16.mxu1 %v18153_v31  ;;  %v18448_v31 = vld [vmem:[%s21325_s1 + $0x128] ss:$24 sps:$4 sm:$0xff]   ;;  %6654 = vmatpush1.bf16.msra.mxu0 %v18441_v43 }
 0x8c2   :  { %21683 = vst [vmem:[#allocation9_spill] sm:$0xff] %v18448_v31 }
 0x8c4   :  { %5999 = vmatpush1.bf16.msra.mxu1 %v18161_v26  ;;  %v18453_v26 = vld [vmem:[%s21325_s1 + $0x154] ss:$24 sps:$4 sm:$0xff]  }
 0x8c5   :  { %6000 = vmatprep.subr.bf16.mxu1 %v18167_v10  ;;  %v18459_v10 = vld [vmem:[%s21325_s1 + $0x15c] ss:$24 sps:$4 sm:$0xff]   ;;  %6655 = vmatprep.subr.bf16.mxu0 %v18453_v26 }
 0x8c6   :  { %21684 = vst [vmem:[#allocation10_spill] sm:$0xff] %v18459_v10 }
 0x8c8   :  { %6001 = vmatpush1.bf16.msra.mxu1 %v18175_v40  ;;  %v18465_v40 = vld [vmem:[%s21325_s1 + $0x150] ss:$24 sps:$4 sm:$0xff]  }
 0x8c9   :  { %6682 = vmatprep.subr.bf16.mxu1 %v18303_v33  ;;  %6656 = vmatpush1.bf16.msra.mxu0 %v18465_v40 }
 0x8ca   :  { %6657 = vmatprep.subr.bf16.mxu0 %v18477_v56 }
 0x8cb   :  { %6003 = vmatmul.mubr.bf16.vlgmr.msra.gmra.mrb[44].mxu1 %v5310_v63  ;;  %v18640_v63 = vld [vmem:[%s21325_s1 + $0x2a8] ss:$24 sps:$4 sm:$0xff]  }
 0x8cc   :  { %6683 = vmatpush1.bf16.msra.mxu1 %v18298_v38  ;;  %21699 = vst [vmem:[#allocation25_spill] sm:$0xff] %v18640_v63 }
 0x8cd   :  { %6684 = vmatprep.subr.bf16.mxu1 %v18314_v2  ;;  %6658 = vmatpush1.bf16.msra.mxu0 %v18489_v17 }
 0x8ce   :  { %6659 = vmatprep.subr.bf16.mxu0 %v18501_v62 }
 0x8d0   :  { %6685 = vmatpush1.bf16.msra.mxu1 %v18328_v14 }
 0x8d1   :  { %6686 = vmatprep.subr.bf16.mxu1 %v18339_v54  ;;  %6660 = vmatpush1.bf16.msra.mxu0 %v18508_v6 }
 0x8d2   :  { %6661 = vmatprep.subr.bf16.mxu0 %v18528_v21 }
 0x8d4   :  { %6687 = vmatpush1.bf16.msra.mxu1 %v18352_v9 }
 0x8d5   :  { %6688 = vmatprep.subr.bf16.mxu1 %v18363_v27  ;;  %6662 = vmatpush1.bf16.msra.mxu0 %v18533_v1 }
 0x8d6   :  { %6663 = vmatprep.subr.bf16.mxu0 %v18552_v28 }
 0x8d8   :  { %6689 = vmatpush1.bf16.msra.mxu1 %v18376_v42 }
 0x8d9   :  { %6690 = vmatprep.subr.bf16.mxu1 %v18387_v50  ;;  %6664 = vmatpush1.bf16.msra.mxu0 %v18557_v22 }
 0x8da   :  { %6665 = vmatprep.subr.bf16.mxu0 %v18573_v20 }
 0x8dc   :  { %6691 = vmatpush1.bf16.msra.mxu1 %v18400_v59 }
 0x8dd   :  { %6692 = vmatprep.subr.bf16.mxu1 %v18411_v37  ;;  %6666 = vmatpush1.bf16.msra.mxu0 %v18580_v45 }
 0x8de   :  { %6667 = vmatprep.subr.bf16.mxu0 %v18597_v5 }
 0x8e0   :  { %6693 = vmatpush1.bf16.msra.mxu1 %v18424_v0 }
 0x8e1   :  { %6694 = vmatprep.subr.bf16.mxu1 %v18435_v53  ;;  %6668 = vmatpush1.bf16.msra.mxu0 %v18609_v23 }
 0x8e2   :  { %6669 = vmatprep.subr.bf16.mxu0 %v18621_v7 }
 0x8e4   :  { %6695 = vmatpush1.bf16.msra.mxu1 %v18448_v31 }
 0x8e5   :  { %6696 = vmatprep.subr.bf16.mxu1 %v18459_v10  ;;  %6670 = vmatpush1.bf16.msra.mxu0 %v18633_v44 }
 0x8e8   :  { %6697 = vmatpush1.bf16.msra.mxu1 %v18472_v29 }
 0x8e9   :  { %6698 = vmatprep.subr.bf16.mxu1 %v18483_v32 }
 0x8ec   :  { %6699 = vmatpush1.bf16.msra.mxu1 %v18496_v16  ;;  %v12835_v16 = vld [vmem:[%s21326_s0 + $0x158] sm:$0xff] }
 0x8ed   :  { %6700 = vmatprep.subr.bf16.mxu1 %v18516_v58 }
 0x8f0   :  { %6701 = vmatpush1.bf16.msra.mxu1 %v18521_v41 }
 0x8f1   :  { %6702 = vmatprep.subr.bf16.mxu1 %v18538_v49 }
 0x8f4   :  { %6703 = vmatpush1.bf16.msra.mxu1 %v18544_v8 }
 0x8f5   :  { %6704 = vmatprep.subr.bf16.mxu1 %v18562_v55 }
 0x8f8   :  { %6705 = vmatpush1.bf16.msra.mxu1 %v18568_v3 }
 0x8f9   :  { %6706 = vmatprep.subr.bf16.mxu1 %v18585_v36  ;;  %v18672_v36 = vld [vmem:[%s21325_s1 + $0x14] ss:$24 sps:$4 sm:$0xff]  }
 0x8fc   :  { %6707 = vmatpush1.bf16.msra.mxu1 %v18592_v57  ;;  %v18651_v57 = vld [vmem:[%s21325_s1 + $0x2dc] ss:$24 sps:$4 sm:$0xff]  }
 0x8fd   :  { %6708 = vmatprep.subr.bf16.mxu1 %v18603_v15  ;;  %v18645_v15 = vld [vmem:[%s21325_s1 + $0x2d4] ss:$24 sps:$4 sm:$0xff]   ;;  %21700 = vst [vmem:[#allocation26_spill] sm:$0xff] %v18651_v57 }
 0x8fe   :  { %6671 = vmatprep.subr.bf16.mxu0 %v18645_v15 }
 0x900   :  { %6709 = vmatpush1.bf16.msra.mxu1 %v18616_v30  ;;  %v18657_v30 = vld [vmem:[%s21325_s1 + $0x2d0] ss:$24 sps:$4 sm:$0xff]  }
 0x901   :  { %6710 = vmatprep.subr.bf16.mxu1 %v18627_v11  ;;  %v18664_v11 = vld [vmem:[%s21325_s1 + $0x2d8] ss:$24 sps:$4 sm:$0xff]   ;;  %6672 = vmatpush1.bf16.msra.mxu0 %v18657_v30 }
 0x902   :  { %21701 = vst [vmem:[#allocation27_spill] sm:$0xff] %v18664_v11  ;;  %6723 = vmatprep.subr.bf16.mxu0 %v18672_v36 }
 0x904   :  { %6711 = vmatpush1.bf16.msra.mxu1 %v18640_v63 }
 0x905   :  { %6712 = vmatprep.subr.bf16.mxu1 %v18651_v57 }
 0x908   :  { %6713 = vmatpush1.bf16.msra.mxu1 %v18664_v11  ;;  %v12834_v11 = vld [vmem:[%s21326_s0 + $0x150] sm:$0xff] }
 0x909   :  { %7394 = vmatprep.subr.bf16.mxu1 %v18293_v46 }
 0x95e   :  { %v5922_v63 = vpop.f32.mrb[40].mxu1  ;;  %v5963_v3 = vpop.f32.mrb[44].mxu0 }
 0x95f   :  { %v5924_v55 = vpop.f32.mrb[41].mxu1  ;;  %v5965_v8 = vpop.f32.mrb[45].mxu0  ;;  %v6011_v32 = vadd.f32 %v12834_v11, %v5922_v63 }
 0x960   :  { %v5926_v49 = vpop.f32.mrb[42].mxu1  ;;  %v5967_v41 = vpop.f32.mrb[46].mxu0  ;;  %v6012_v46 = vadd.f32 %v12835_v16, %v5924_v55 }
 0x961   :  { %v5927_v57 = vpop.f32.mrb[43].mxu1  ;;  %v5968_v58 = vpop.f32.mrb[47].mxu0  ;;  %v12936_v29 = vmul.f32 -1.442695, %v6011_v32  ;;  %v12836_v41 = vld [vmem:[%s21326_s0 + $0x160] sm:$0xff] }
 0x962   :  { %v12937_v10 = vmul.f32 -1.442695, %v6012_v46  ;;  %v12837_v58 = vld [vmem:[%s21326_s0 + $0x168] sm:$0xff]  ;;  %v6025_v49 = vadd.f32 %v12836_v41, %v5963_v3 }
 0x963   :  { %15099 = vpow2.f32 %v12936_v29  ;;  %v6026_v57 = vadd.f32 %v12837_v58, %v5965_v8  ;;  %v12838_v8 = vld [vmem:[%s21326_s0 + $0x170] sm:$0xff] }
 0x964   :  { %15101 = vpow2.f32 %v12937_v10  ;;  %v12938_v0 = vmul.f32 -1.442695, %v6025_v49 }
 0x965   :  { %v12939_v37 = vmul.f32 -1.442695, %v6026_v57 }
 0x966   :  { %15103 = vpow2.f32 %v12938_v0 }
 0x967   :  { %15105 = vpow2.f32 %v12939_v37  ;;  %v12839_v37 = vld [vmem:[%s21326_s0 + $0x178] sm:$0xff] }
 0x96d   :  { %v15100_v31 = vpop.eup %15099 }
 0x96e   :  { %v15102_v53 = vpop.eup %15101  ;;  %v6019_v11 = vadd.f32 1.0, %v15100_v31 }
 0x96f   :  { %v6020_v16 = vadd.f32 1.0, %v15102_v53 }
 0x970   :  { %15107 = vrcp.f32 %v6019_v11  ;;  %v15104_v10 = vpop.eup %15103 }
 0x971   :  { %15109 = vrcp.f32 %v6020_v16  ;;  %v15106_v32 = vpop.eup %15105  ;;  %v6033_v49 = vadd.f32 1.0, %v15104_v10 }
 0x972   :  { %v6034_v11 = vadd.f32 1.0, %v15106_v32  ;;  %v18738_v32 = vld [vmem:[%s21325_s1 + $0x74] ss:$24 sps:$4 sm:$0xff]  }
 0x97a   :  { %v15108_v46 = vpop.eup %15107 }
 0x97b   :  { %v15110_v31 = vpop.eup %15109 }
 0x99e   :  { %v6004_v29 = vpop.f32.mrb[44].mxu1 }
 0x99f   :  { %v6039_v55 = vadd.f32 %v6004_v29, %v21677_v35  ;;  %v6006_v63 = vpop.f32.mrb[45].mxu1 }
 0x9a0   :  { %v6040_v3 = vadd.f32 %v6006_v63, %v21678_v18  ;;  %v6008_v41 = vpop.f32.mrb[46].mxu1 }
 0x9a1   :  { %v6041_v53 = vmul.f32 %v15108_v46, %v6039_v55  ;;  %v6009_v0 = vpop.f32.mrb[47].mxu1 }
 0x9a2   :  { %v6042_v58 = vmul.f32 %v15110_v31, %v6040_v3  ;;  %v18752_v3 = vld [vmem:[%s21325_s1 + $0xa4] ss:$24 sps:$4 sm:$0xff]   ;;  %v21718_v31 = vld [vmem:[#allocation21_spill] sm:$0xff] }
 0x9a3   :  { %v6043_v57 = vadd.f32 %v12838_v8, %v6041_v53  ;;  %v18746_v8 = vld [vmem:[%s21325_s1 + $0x70] ss:$24 sps:$4 sm:$0xff]   ;;  %v21719_v53 = vld [vmem:[#allocation22_spill] sm:$0xff] }
 0x9a4   :  { %v6044_v16 = vadd.f32 %v12839_v37, %v6042_v58  ;;  %v21720_v37 = vld [vmem:[#allocation23_spill] sm:$0xff]  ;;  %v21721_v58 = vld [vmem:[#allocation24_spill] sm:$0xff] }
 0x9a5   :  { %15111 = vtanh.f32 %v6043_v57  ;;  %v21723_v57 = vld [vmem:[#allocation26_spill] sm:$0xff] }
 0x9a6   :  { %15113 = vtanh.f32 %v6044_v16 }
 0x9a7   :  { %15115 = vrcp.f32 %v6033_v49  ;;  %v21722_v49 = vld [vmem:[#allocation25_spill] sm:$0xff] }
 0x9a8   :  { %15117 = vrcp.f32 %v6034_v11  ;;  %v21724_v11 = vld [vmem:[#allocation27_spill] sm:$0xff] }
 0x9af   :  { %v15112_v29 = vpop.eup %15111 }
 0x9b0   :  { %v15114_v35 = vpop.eup %15113  ;;  %v6047_v63 = vsub.f32 %v18238_v19, %v15112_v29 }
 0x9b1   :  { %v15116_v41 = vpop.eup %15115  ;;  %v6048_v55 = vsub.f32 %v18240_v4, %v15114_v35  ;;  %v18724_v4 = vld [vmem:[%s21325_s1 + $0x44] ss:$24 sps:$4 sm:$0xff]  }
 0x9b2   :  { %v15118_v46 = vpop.eup %15117  ;;  %v6049_v18 = vmul.f32 %v15116_v41, %v6047_v63 }
 0x9b3   :  { %v6050_v59 = vmul.f32 %v15118_v46, %v6048_v55 }
 0x9b4   :  { %v18698_v0 = vadd.f32 %v15112_v29, %v6049_v18  ;;  %v18715_v18 = vld [vmem:[%s21325_s1 + $0x10] ss:$24 sps:$4 sm:$0xff]  }
 0x9b5   :  { %v18700_v10 = vadd.f32 %v15114_v35, %v6050_v59  ;;  %v18732_v59 = vld [vmem:[%s21325_s1 + $0x40] ss:$24 sps:$4 sm:$0xff]  }
 0x9b6   :  { %12940 = vst [vmem:[%s21328_s3 + $0x70] sm:$0xff] %v18698_v0  ;;  %v18719_v35 = vpack.c.bf16 %v18698_v0, %v18698_v0 }
 0x9b7   :  { %12941 = vst [vmem:[%s21328_s3 + $0x78] sm:$0xff] %v18700_v10  ;;  %v6064_v19 = vpack.c.bf16 %v18700_v10, %v18700_v10 }
 0x9b9   :  { %6673 = vmatprep.mubr.bf16.mxu0 %v6064_v19  ;;  %6714 = vmatprep.mubr.bf16.mxu1 %v6064_v19 }
 0x9ba   :  { %6674 = vmatmul.mubr.bf16.vlgmr.msra.gmra.mrb[48].mxu0 %v18719_v35  ;;  %6715 = vmatmul.mubr.bf16.vlgmr.msra.gmra.mrb[48].mxu1 %v18719_v35 }
 0x9bb   :  { %6724 = vmatpush1.bf16.msra.mxu0 %v18715_v18  ;;  %6755 = vmatprep.mubr.bf16.mxu0 %v6064_v19 }
 0x9bc   :  { %6725 = vmatprep.subr.bf16.mxu0 %v18724_v4  ;;  %7395 = vmatpush1.bf16.msra.mxu1 %v18288_v52  ;;  %v18760_v52 = vld [vmem:[%s21325_s1 + $0xa0] ss:$24 sps:$4 sm:$0xff]  }
 0x9bd   :  { %7396 = vmatprep.subr.bf16.mxu1 %v18308_v48  ;;  %v18766_v48 = vld [vmem:[%s21325_s1 + $0xd4] ss:$24 sps:$4 sm:$0xff]  }
 0x9bf   :  { %6726 = vmatpush1.bf16.msra.mxu0 %v18732_v59 }
 0x9c0   :  { %6727 = vmatprep.subr.bf16.mxu0 %v18738_v32  ;;  %7397 = vmatpush1.bf16.msra.mxu1 %v18321_v24  ;;  %v18774_v24 = vld [vmem:[%s21325_s1 + $0xd0] ss:$24 sps:$4 sm:$0xff]  }
 0x9c1   :  { %7398 = vmatprep.subr.bf16.mxu1 %v18333_v60  ;;  %v18780_v60 = vld [vmem:[%s21325_s1 + $0x104] ss:$24 sps:$4 sm:$0xff]  }
 0x9c3   :  { %6728 = vmatpush1.bf16.msra.mxu0 %v18746_v8 }
 0x9c4   :  { %6729 = vmatprep.subr.bf16.mxu0 %v18752_v3  ;;  %7399 = vmatpush1.bf16.msra.mxu1 %v18345_v61  ;;  %v18788_v61 = vld [vmem:[%s21325_s1 + $0x100] ss:$24 sps:$4 sm:$0xff]  }
 0x9c5   :  { %7400 = vmatprep.subr.bf16.mxu1 %v18357_v13  ;;  %v18794_v13 = vld [vmem:[%s21325_s1 + $0x134] ss:$24 sps:$4 sm:$0xff]  }
 0x9c7   :  { %6730 = vmatpush1.bf16.msra.mxu0 %v18760_v52 }
 0x9c8   :  { %6731 = vmatprep.subr.bf16.mxu0 %v18766_v48  ;;  %7401 = vmatpush1.bf16.msra.mxu1 %v18369_v34  ;;  %v18802_v34 = vld [vmem:[%s21325_s1 + $0x130] ss:$24 sps:$4 sm:$0xff]  }
 0x9c9   :  { %7402 = vmatprep.subr.bf16.mxu1 %v18381_v12  ;;  %v18808_v12 = vld [vmem:[%s21325_s1 + $0x164] ss:$24 sps:$4 sm:$0xff]  }
 0x9cb   :  { %6732 = vmatpush1.bf16.msra.mxu0 %v18774_v24 }
 0x9cc   :  { %6733 = vmatprep.subr.bf16.mxu0 %v18780_v60  ;;  %7403 = vmatpush1.bf16.msra.mxu1 %v18393_v39  ;;  %v18816_v39 = vld [vmem:[%s21325_s1 + $0x160] ss:$24 sps:$4 sm:$0xff]  }
 0x9cd   :  { %7404 = vmatprep.subr.bf16.mxu1 %v18405_v51  ;;  %v18822_v51 = vld [vmem:[%s21325_s1 + $0x194] ss:$24 sps:$4 sm:$0xff]  }
 0x9cf   :  { %6734 = vmatpush1.bf16.msra.mxu0 %v18788_v61 }
 0x9d0   :  { %6735 = vmatprep.subr.bf16.mxu0 %v18794_v13  ;;  %7405 = vmatpush1.bf16.msra.mxu1 %v18417_v25  ;;  %v18830_v25 = vld [vmem:[%s21325_s1 + $0x190] ss:$24 sps:$4 sm:$0xff]  }
 0x9d1   :  { %7406 = vmatprep.subr.bf16.mxu1 %v18429_v47  ;;  %v18836_v47 = vld [vmem:[%s21325_s1 + $0x1c4] ss:$24 sps:$4 sm:$0xff]  }
 0x9d3   :  { %6736 = vmatpush1.bf16.msra.mxu0 %v18802_v34 }
 0x9d4   :  { %6737 = vmatprep.subr.bf16.mxu0 %v18808_v12  ;;  %7407 = vmatpush1.bf16.msra.mxu1 %v18441_v43  ;;  %v18844_v43 = vld [vmem:[%s21325_s1 + $0x1c0] ss:$24 sps:$4 sm:$0xff]  }
 0x9d5   :  { %7408 = vmatprep.subr.bf16.mxu1 %v18453_v26  ;;  %v18850_v26 = vld [vmem:[%s21325_s1 + $0x1f4] ss:$24 sps:$4 sm:$0xff]  }
 0x9d7   :  { %6738 = vmatpush1.bf16.msra.mxu0 %v18816_v39 }
 0x9d8   :  { %6739 = vmatprep.subr.bf16.mxu0 %v18822_v51  ;;  %7409 = vmatpush1.bf16.msra.mxu1 %v18465_v40  ;;  %v18858_v40 = vld [vmem:[%s21325_s1 + $0x1f0] ss:$24 sps:$4 sm:$0xff]  }
 0x9d9   :  { %7410 = vmatprep.subr.bf16.mxu1 %v18477_v56  ;;  %v18864_v56 = vld [vmem:[%s21325_s1 + $0x224] ss:$24 sps:$4 sm:$0xff]  }
 0x9db   :  { %6740 = vmatpush1.bf16.msra.mxu0 %v18830_v25 }
 0x9dc   :  { %6741 = vmatprep.subr.bf16.mxu0 %v18836_v47  ;;  %7411 = vmatpush1.bf16.msra.mxu1 %v18489_v17  ;;  %v18872_v17 = vld [vmem:[%s21325_s1 + $0x220] ss:$24 sps:$4 sm:$0xff]  }
 0x9dd   :  { %7412 = vmatprep.subr.bf16.mxu1 %v18501_v62  ;;  %v18878_v62 = vld [vmem:[%s21325_s1 + $0x254] ss:$24 sps:$4 sm:$0xff]  }
 0x9df   :  { %6742 = vmatpush1.bf16.msra.mxu0 %v18844_v43 }
 0x9e0   :  { %6743 = vmatprep.subr.bf16.mxu0 %v18850_v26  ;;  %7413 = vmatpush1.bf16.msra.mxu1 %v18508_v6  ;;  %v18886_v6 = vld [vmem:[%s21325_s1 + $0x250] ss:$24 sps:$4 sm:$0xff]  }
 0x9e1   :  { %7414 = vmatprep.subr.bf16.mxu1 %v18528_v21  ;;  %v18892_v21 = vld [vmem:[%s21325_s1 + $0x284] ss:$24 sps:$4 sm:$0xff]  }
 0x9e3   :  { %6744 = vmatpush1.bf16.msra.mxu0 %v18858_v40 }
 0x9e4   :  { %6745 = vmatprep.subr.bf16.mxu0 %v18864_v56  ;;  %7415 = vmatpush1.bf16.msra.mxu1 %v18533_v1  ;;  %v18900_v1 = vld [vmem:[%s21325_s1 + $0x280] ss:$24 sps:$4 sm:$0xff]  }
 0x9e5   :  { %7416 = vmatprep.subr.bf16.mxu1 %v18552_v28  ;;  %v18906_v28 = vld [vmem:[%s21325_s1 + $0x2b4] ss:$24 sps:$4 sm:$0xff]  }
 0x9e7   :  { %6746 = vmatpush1.bf16.msra.mxu0 %v18872_v17 }
 0x9e8   :  { %6747 = vmatprep.subr.bf16.mxu0 %v18878_v62  ;;  %7417 = vmatpush1.bf16.msra.mxu1 %v18557_v22  ;;  %v18914_v22 = vld [vmem:[%s21325_s1 + $0x2b0] ss:$24 sps:$4 sm:$0xff]  }
 0x9e9   :  { %7418 = vmatprep.subr.bf16.mxu1 %v18573_v20  ;;  %v18920_v20 = vld [vmem:[%s21325_s1 + $0x2e4] ss:$24 sps:$4 sm:$0xff]  }
 0x9eb   :  { %6748 = vmatpush1.bf16.msra.mxu0 %v18886_v6 }
 0x9ec   :  { %6749 = vmatprep.subr.bf16.mxu0 %v18892_v21  ;;  %7419 = vmatpush1.bf16.msra.mxu1 %v18580_v45  ;;  %v18928_v45 = vld [vmem:[%s21325_s1 + $0x2e0] ss:$24 sps:$4 sm:$0xff]  }
 0x9ed   :  { %7420 = vmatprep.subr.bf16.mxu1 %v18597_v5  ;;  %v21704_v5 = vld [vmem:[#allocation7_spill] sm:$0xff] }
 0x9ef   :  { %6750 = vmatpush1.bf16.msra.mxu0 %v18900_v1 }
 0x9f0   :  { %6751 = vmatprep.subr.bf16.mxu0 %v18906_v28  ;;  %7421 = vmatpush1.bf16.msra.mxu1 %v18609_v23  ;;  %v21714_v23 = vld [vmem:[#allocation17_spill] sm:$0xff] }
 0x9f1   :  { %7422 = vmatprep.subr.bf16.mxu1 %v18621_v7  ;;  %v21716_v7 = vld [vmem:[#allocation19_spill] sm:$0xff] }
 0x9f3   :  { %6752 = vmatpush1.bf16.msra.mxu0 %v18914_v22 }
 0x9f4   :  { %6753 = vmatprep.subr.bf16.mxu0 %v18920_v20  ;;  %7423 = vmatpush1.bf16.msra.mxu1 %v18633_v44  ;;  %v21717_v44 = vld [vmem:[#allocation20_spill] sm:$0xff] }
 0x9f5   :  { %7424 = vmatprep.subr.bf16.mxu1 %v18645_v15  ;;  %v21713_v15 = vld [vmem:[#allocation16_spill] sm:$0xff] }
 0x9f7   :  { %6754 = vmatpush1.bf16.msra.mxu0 %v18928_v45 }
 0x9f8   :  { %7435 = vmatprep.subr.bf16.mxu0 %v18303_v33  ;;  %7425 = vmatpush1.bf16.msra.mxu1 %v18657_v30  ;;  %v21702_v33 = vld [vmem:[#allocation5_spill] sm:$0xff]  ;;  %v21715_v30 = vld [vmem:[#allocation18_spill] sm:$0xff] }
 0x9f9   :  { %7476 = vmatprep.subr.bf16.mxu1 %v18672_v36  ;;  %v21703_v36 = vld [vmem:[#allocation6_spill] sm:$0xff] }
 0x9fa   :  { %6756 = vmatmul.mubr.bf16.vlgmr.msra.gmra.mrb[52].mxu0 %v18719_v35 }
 0x9fb   :  { %7436 = vmatpush1.bf16.msra.mxu0 %v18298_v38  ;;  %v21705_v38 = vld [vmem:[#allocation8_spill] sm:$0xff] }
 0x9fc   :  { %7437 = vmatprep.subr.bf16.mxu0 %v18314_v2  ;;  %v21706_v2 = vld [vmem:[#allocation9_spill] sm:$0xff] }
 0x9ff   :  { %7438 = vmatpush1.bf16.msra.mxu0 %v18328_v14  ;;  %v21707_v14 = vld [vmem:[#allocation10_spill] sm:$0xff] }
 0xa00   :  { %7439 = vmatprep.subr.bf16.mxu0 %v18339_v54  ;;  %v21708_v54 = vld [vmem:[#allocation11_spill] sm:$0xff] }
 0xa03   :  { %7440 = vmatpush1.bf16.msra.mxu0 %v18352_v9  ;;  %v21709_v9 = vld [vmem:[#allocation12_spill] sm:$0xff] }
 0xa04   :  { %7441 = vmatprep.subr.bf16.mxu0 %v18363_v27  ;;  %v21710_v27 = vld [vmem:[#allocation13_spill] sm:$0xff] }
 0xa07   :  { %7442 = vmatpush1.bf16.msra.mxu0 %v18376_v42  ;;  %v21711_v42 = vld [vmem:[#allocation14_spill] sm:$0xff] }
 0xa08   :  { %7443 = vmatprep.subr.bf16.mxu0 %v18387_v50  ;;  %v21712_v50 = vld [vmem:[#allocation15_spill] sm:$0xff] }
 0xa0b   :  { %7444 = vmatpush1.bf16.msra.mxu0 %v21702_v33  ;;  %v12942_v33 = vld [vmem:[%s21326_s0 + $0x180] sm:$0xff] }
 0xa0c   :  { %7445 = vmatprep.subr.bf16.mxu0 %v21703_v36  ;;  %v12943_v36 = vld [vmem:[%s21326_s0 + $0x188] sm:$0xff] }
 0xa0f   :  { %7446 = vmatpush1.bf16.msra.mxu0 %v21704_v5 }
 0xa10   :  { %7447 = vmatprep.subr.bf16.mxu0 %v21705_v38 }
 0xa13   :  { %7448 = vmatpush1.bf16.msra.mxu0 %v21706_v2 }
 0xa14   :  { %7449 = vmatprep.subr.bf16.mxu0 %v21707_v14 }
 0xa17   :  { %7450 = vmatpush1.bf16.msra.mxu0 %v21708_v54  ;;  %v12944_v54 = vld [vmem:[%s21326_s0 + $0x190] sm:$0xff] }
 0xa18   :  { %7451 = vmatprep.subr.bf16.mxu0 %v21709_v9  ;;  %v12945_v9 = vld [vmem:[%s21326_s0 + $0x198] sm:$0xff] }
 0xa1b   :  { %7452 = vmatpush1.bf16.msra.mxu0 %v21710_v27 }
 0xa1c   :  { %7453 = vmatprep.subr.bf16.mxu0 %v21711_v42 }
 0xa1f   :  { %7454 = vmatpush1.bf16.msra.mxu0 %v21712_v50 }
 0xa20   :  { %7455 = vmatprep.subr.bf16.mxu0 %v21713_v15 }
 0xa23   :  { %7456 = vmatpush1.bf16.msra.mxu0 %v21714_v23 }
 0xa24   :  { %7457 = vmatprep.subr.bf16.mxu0 %v21715_v30 }
 0xa27   :  { %7458 = vmatpush1.bf16.msra.mxu0 %v21716_v7 }
 0xa28   :  { %7459 = vmatprep.subr.bf16.mxu0 %v21717_v44 }
 0xa2b   :  { %7460 = vmatpush1.bf16.msra.mxu0 %v21718_v31 }
 0xa2c   :  { %7461 = vmatprep.subr.bf16.mxu0 %v21719_v53 }
 0xa2f   :  { %7462 = vmatpush1.bf16.msra.mxu0 %v21720_v37 }
 0xa30   :  { %7463 = vmatprep.subr.bf16.mxu0 %v21721_v58  ;;  %v21725_v58 = vld [vmem:[#allocation3_spill] sm:$0xff] }
 0xa33   :  { %7464 = vmatpush1.bf16.msra.mxu0 %v21722_v49 }
 0xa34   :  { %7465 = vmatprep.subr.bf16.mxu0 %v21723_v57 }
 0xa37   :  { %7466 = vmatpush1.bf16.msra.mxu0 %v21724_v11 }
 0xa8d   :  { %v6675_v16 = vpop.f32.mrb[48].mxu0  ;;  %v6716_v29 = vpop.f32.mrb[48].mxu1 }
 0xa8e   :  { %v6677_v63 = vpop.f32.mrb[49].mxu0  ;;  %v6718_v41 = vpop.f32.mrb[49].mxu1  ;;  %v6764_v5 = vadd.f32 %v12942_v33, %v6675_v16  ;;  %v6778_v27 = vadd.f32 %v12944_v54, %v6716_v29  ;;  %v12946_v16 = vld [vmem:[%s21326_s0 + $0x1a0] sm:$0xff]  ;;  %v21726_v29 = vld [vmem:[#allocation4_spill] sm:$0xff] }
 0xa8f   :  { %v6679_v55 = vpop.f32.mrb[50].mxu0  ;;  %v6720_v46 = vpop.f32.mrb[50].mxu1  ;;  %v6765_v38 = vadd.f32 %v12943_v36, %v6677_v63  ;;  %v6779_v42 = vadd.f32 %v12945_v9, %v6718_v41 }
 0xa90   :  { %v6680_v19 = vpop.f32.mrb[51].mxu0  ;;  %v6721_v35 = vpop.f32.mrb[51].mxu1  ;;  %v13044_v2 = vmul.f32 -1.442695, %v6764_v5  ;;  %v13046_v23 = vmul.f32 -1.442695, %v6778_v27 }
 0xa91   :  { %v13045_v14 = vmul.f32 -1.442695, %v6765_v38  ;;  %v13047_v30 = vmul.f32 -1.442695, %v6779_v42  ;;  %v12947_v19 = vld [vmem:[%s21326_s0 + $0x1a8] sm:$0xff] }
 0xa92   :  { %15119 = vpow2.f32 %v13044_v2 }
 0xa93   :  { %15121 = vpow2.f32 %v13045_v14 }
 0xa94   :  { %15123 = vpow2.f32 %v13046_v23 }
 0xa95   :  { %15125 = vpow2.f32 %v13047_v30 }
 0xa9c   :  { %v15120_v50 = vpop.eup %15119 }
 0xa9d   :  { %v15122_v15 = vpop.eup %15121  ;;  %v6772_v7 = vadd.f32 1.0, %v15120_v50 }
 0xa9e   :  { %v6773_v44 = vadd.f32 1.0, %v15122_v15  ;;  %v15124_v31 = vpop.eup %15123 }
 0xa9f   :  { %15127 = vrcp.f32 %v6772_v7  ;;  %v15126_v37 = vpop.eup %15125  ;;  %v6786_v36 = vadd.f32 1.0, %v15124_v31  ;;  %v19230_v31 = vld [vmem:[%s21325_s1 + $0x184] ss:$24 sps:$4 sm:$0xff]  }
 0xaa0   :  { %15129 = vrcp.f32 %v6773_v44  ;;  %v6787_v38 = vadd.f32 1.0, %v15126_v37  ;;  %v19225_v44 = vld [vmem:[%s21325_s1 + $0x158] ss:$24 sps:$4 sm:$0xff]  }
 0xaa1   :  { %21733 = vst [vmem:[#allocation11_spill] sm:$0xff] %v19225_v44  ;;  %v19242_v37 = vld [vmem:[%s21325_s1 + $0x180] ss:$24 sps:$4 sm:$0xff]  }
 0xaa9   :  { %v15128_v11 = vpop.eup %15127 }
 0xaaa   :  { %v15130_v55 = vpop.eup %15129 }
 0xacd   :  { %v6757_v53 = vpop.f32.mrb[52].mxu0 }
 0xace   :  { %v6792_v49 = vadd.f32 %v6757_v53, %v21725_v58  ;;  %v6759_v57 = vpop.f32.mrb[53].mxu0  ;;  %v19236_v53 = vld [vmem:[%s21325_s1 + $0x18c] ss:$24 sps:$4 sm:$0xff]  }
 0xacf   :  { %v6793_v63 = vadd.f32 %v6759_v57, %v21726_v29  ;;  %v6761_v41 = vpop.f32.mrb[54].mxu0  ;;  %21734 = vst [vmem:[#allocation12_spill] sm:$0xff] %v19236_v53  ;;  %v19254_v57 = vld [vmem:[%s21325_s1 + $0x1b4] ss:$24 sps:$4 sm:$0xff]  }
 0xad0   :  { %v6794_v46 = vmul.f32 %v15128_v11, %v6792_v49  ;;  %v6762_v35 = vpop.f32.mrb[55].mxu0  ;;  %v19249_v49 = vld [vmem:[%s21325_s1 + $0x188] ss:$24 sps:$4 sm:$0xff]   ;;  %v19281_v41 = vld [vmem:[%s21325_s1 + $0x1e4] ss:$24 sps:$4 sm:$0xff]  }
 0xad1   :  { %v6795_v33 = vmul.f32 %v15130_v55, %v6793_v63  ;;  %21735 = vst [vmem:[#allocation13_spill] sm:$0xff] %v19249_v49  ;;  %v19261_v11 = vld [vmem:[%s21325_s1 + $0x1b0] ss:$24 sps:$4 sm:$0xff]   ;;  %v19286_v55 = vld [vmem:[%s21325_s1 + $0x1e0] ss:$24 sps:$4 sm:$0xff]  }
 0xad2   :  { %v6796_v5 = vadd.f32 %v12946_v16, %v6794_v46  ;;  %v19269_v16 = vld [vmem:[%s21325_s1 + $0x1bc] ss:$24 sps:$4 sm:$0xff]   ;;  %v19274_v63 = vld [vmem:[%s21325_s1 + $0x1b8] ss:$24 sps:$4 sm:$0xff]   ;;  %v19291_v46 = vld [vmem:[%s21325_s1 + $0x1ec] ss:$24 sps:$4 sm:$0xff]  }
 0xad3   :  { %v6797_v2 = vadd.f32 %v12947_v19, %v6795_v33  ;;  %21736 = vst [vmem:[#allocation14_spill] sm:$0xff] %v19269_v16  ;;  %21737 = vst [vmem:[#allocation15_spill] sm:$0xff] %v19274_v63  ;;  %v19297_v19 = vld [vmem:[%s21325_s1 + $0x1e8] ss:$24 sps:$4 sm:$0xff]   ;;  %v19305_v35 = vld [vmem:[%s21325_s1 + $0x214] ss:$24 sps:$4 sm:$0xff]  }
 0xad4   :  { %15131 = vtanh.f32 %v6796_v5  ;;  %21738 = vst [vmem:[#allocation16_spill] sm:$0xff] %v19291_v46  ;;  %21739 = vst [vmem:[#allocation17_spill] sm:$0xff] %v19297_v19  ;;  %v19310_v33 = vld [vmem:[%s21325_s1 + $0x210] ss:$24 sps:$4 sm:$0xff]  }
 0xad5   :  { %15133 = vtanh.f32 %v6797_v2  ;;  %v19321_v5 = vld [vmem:[%s21325_s1 + $0x218] ss:$24 sps:$4 sm:$0xff]  }
 0xad6   :  { %15135 = vrcp.f32 %v6786_v36  ;;  %v19315_v36 = vld [vmem:[%s21325_s1 + $0x21c] ss:$24 sps:$4 sm:$0xff]   ;;  %21741 = vst [vmem:[#allocation19_spill] sm:$0xff] %v19321_v5  ;;  %v19333_v2 = vld [vmem:[%s21325_s1 + $0x240] ss:$24 sps:$4 sm:$0xff]  }
 0xad7   :  { %15137 = vrcp.f32 %v6787_v38  ;;  %21740 = vst [vmem:[#allocation18_spill] sm:$0xff] %v19315_v36  ;;  %v19326_v38 = vld [vmem:[%s21325_s1 + $0x244] ss:$24 sps:$4 sm:$0xff]  }
 0xade   :  { %v15132_v14 = vpop.eup %15131 }
 0xadf   :  { %v15134_v54 = vpop.eup %15133  ;;  %v6800_v9 = vsub.f32 %v18698_v0, %v15132_v14 }
 0xae0   :  { %v15136_v27 = vpop.eup %15135  ;;  %v6801_v42 = vsub.f32 %v18700_v10, %v15134_v54 }
 0xae1   :  { %v15138_v50 = vpop.eup %15137  ;;  %v6802_v15 = vmul.f32 %v15136_v27, %v6800_v9  ;;  %v19350_v9 = vld [vmem:[%s21325_s1 + $0x274] ss:$24 sps:$4 sm:$0xff]  }
 0xae2   :  { %v6803_v23 = vmul.f32 %v15138_v50, %v6801_v42  ;;  %v19356_v27 = vld [vmem:[%s21325_s1 + $0x27c] ss:$24 sps:$4 sm:$0xff]   ;;  %v19362_v42 = vld [vmem:[%s21325_s1 + $0x270] ss:$24 sps:$4 sm:$0xff]  }
 0xae3   :  { %v18991_v30 = vadd.f32 %v15132_v14, %v6802_v15  ;;  %v19338_v14 = vld [vmem:[%s21325_s1 + $0x24c] ss:$24 sps:$4 sm:$0xff]   ;;  %21744 = vst [vmem:[#allocation22_spill] sm:$0xff] %v19356_v27  ;;  %v19369_v50 = vld [vmem:[%s21325_s1 + $0x278] ss:$24 sps:$4 sm:$0xff]  }
 0xae4   :  { %v18993_v7 = vadd.f32 %v15134_v54, %v6803_v23  ;;  %21742 = vst [vmem:[#allocation20_spill] sm:$0xff] %v19338_v14  ;;  %v19345_v54 = vld [vmem:[%s21325_s1 + $0x248] ss:$24 sps:$4 sm:$0xff]   ;;  %21745 = vst [vmem:[#allocation23_spill] sm:$0xff] %v19369_v50  ;;  %v19374_v15 = vld [vmem:[%s21325_s1 + $0x2a4] ss:$24 sps:$4 sm:$0xff]  }
 0xae5   :  { %13048 = vst [vmem:[%s21328_s3 + $0x80] sm:$0xff] %v18991_v30  ;;  %v6816_v10 = vpack.c.bf16 %v18991_v30, %v18991_v30  ;;  %21743 = vst [vmem:[#allocation21_spill] sm:$0xff] %v19345_v54  ;;  %v19380_v23 = vld [vmem:[%s21325_s1 + $0x2ac] ss:$24 sps:$4 sm:$0xff]  }
 0xae6   :  { %13049 = vst [vmem:[%s21328_s3 + $0x88] sm:$0xff] %v18993_v7  ;;  %v6817_v0 = vpack.c.bf16 %v18993_v7, %v18993_v7  ;;  %21746 = vst [vmem:[#allocation24_spill] sm:$0xff] %v19380_v23 }
 0xae8   :  { %7426 = vmatprep.mubr.bf16.mxu1 %v6817_v0  ;;  %7467 = vmatprep.mubr.bf16.mxu0 %v6817_v0 }
 0xae9   :  { %7427 = vmatmul.mubr.bf16.vlgmr.msra.gmra.mrb[52].mxu1 %v6816_v10  ;;  %7468 = vmatmul.mubr.bf16.vlgmr.msra.gmra.mrb[56].mxu0 %v6816_v10 }
 0xaea   :  { %7477 = vmatpush1.bf16.msra.mxu1 %v18715_v18  ;;  %7508 = vmatprep.mubr.bf16.mxu1 %v6817_v0  ;;  %v19041_v18 = vld [vmem:[%s21325_s1] ss:$24 sps:$4 sm:$0xff]  }
 0xaeb   :  { %7478 = vmatprep.subr.bf16.mxu1 %v18724_v4  ;;  %v19046_v4 = vld [vmem:[%s21325_s1 + $0x4] ss:$24 sps:$4 sm:$0xff]   ;;  %v19386_v0 = vld [vmem:[%s21325_s1 + $0x2a0] ss:$24 sps:$4 sm:$0xff]  }
 0xaec   :  { %8147 = vmatprep.subr.bf16.mxu0 %v19046_v4 }
 0xaed   :  { %8148 = vmatpush1.bf16.msra.mxu0 %v19041_v18 }
 0xaee   :  { %7479 = vmatpush1.bf16.msra.mxu1 %v18732_v59  ;;  %v19051_v59 = vld [vmem:[%s21325_s1 + $0x8] ss:$24 sps:$4 sm:$0xff]  }
 0xaef   :  { %7480 = vmatprep.subr.bf16.mxu1 %v18738_v32  ;;  %v19056_v32 = vld [vmem:[%s21325_s1 + $0xc] ss:$24 sps:$4 sm:$0xff]  }
 0xaf2   :  { %7481 = vmatpush1.bf16.msra.mxu1 %v18746_v8  ;;  %v19061_v8 = vld [vmem:[%s21325_s1 + $0x34] ss:$24 sps:$4 sm:$0xff]  }
 0xaf3   :  { %7482 = vmatprep.subr.bf16.mxu1 %v18752_v3  ;;  %v19067_v3 = vld [vmem:[%s21325_s1 + $0x3c] ss:$24 sps:$4 sm:$0xff]   ;;  %8149 = vmatprep.subr.bf16.mxu0 %v19061_v8 }
 0xaf6   :  { %7483 = vmatpush1.bf16.msra.mxu1 %v18760_v52  ;;  %v19074_v52 = vld [vmem:[%s21325_s1 + $0x30] ss:$24 sps:$4 sm:$0xff]  }
 0xaf7   :  { %7484 = vmatprep.subr.bf16.mxu1 %v18766_v48  ;;  %v19081_v48 = vld [vmem:[%s21325_s1 + $0x38] ss:$24 sps:$4 sm:$0xff]   ;;  %8150 = vmatpush1.bf16.msra.mxu0 %v19074_v52 }
 0xafa   :  { %7485 = vmatpush1.bf16.msra.mxu1 %v18774_v24  ;;  %v19086_v24 = vld [vmem:[%s21325_s1 + $0x64] ss:$24 sps:$4 sm:$0xff]  }
 0xafb   :  { %7486 = vmatprep.subr.bf16.mxu1 %v18780_v60  ;;  %v19092_v60 = vld [vmem:[%s21325_s1 + $0x6c] ss:$24 sps:$4 sm:$0xff]   ;;  %8151 = vmatprep.subr.bf16.mxu0 %v19086_v24 }
 0xafe   :  { %7487 = vmatpush1.bf16.msra.mxu1 %v18788_v61  ;;  %v19098_v61 = vld [vmem:[%s21325_s1 + $0x60] ss:$24 sps:$4 sm:$0xff]  }
 0xaff   :  { %7488 = vmatprep.subr.bf16.mxu1 %v18794_v13  ;;  %v19105_v13 = vld [vmem:[%s21325_s1 + $0x68] ss:$24 sps:$4 sm:$0xff]   ;;  %8152 = vmatpush1.bf16.msra.mxu0 %v19098_v61 }
 0xb02   :  { %7489 = vmatpush1.bf16.msra.mxu1 %v18802_v34  ;;  %v19110_v34 = vld [vmem:[%s21325_s1 + $0x94] ss:$24 sps:$4 sm:$0xff]  }
 0xb03   :  { %7490 = vmatprep.subr.bf16.mxu1 %v18808_v12  ;;  %v19116_v12 = vld [vmem:[%s21325_s1 + $0x9c] ss:$24 sps:$4 sm:$0xff]   ;;  %8153 = vmatprep.subr.bf16.mxu0 %v19110_v34 }
 0xb06   :  { %7491 = vmatpush1.bf16.msra.mxu1 %v18816_v39  ;;  %v19122_v39 = vld [vmem:[%s21325_s1 + $0x90] ss:$24 sps:$4 sm:$0xff]  }
 0xb07   :  { %7492 = vmatprep.subr.bf16.mxu1 %v18822_v51  ;;  %v19129_v51 = vld [vmem:[%s21325_s1 + $0x98] ss:$24 sps:$4 sm:$0xff]   ;;  %8154 = vmatpush1.bf16.msra.mxu0 %v19122_v39 }
 0xb0a   :  { %7493 = vmatpush1.bf16.msra.mxu1 %v18830_v25  ;;  %v19134_v25 = vld [vmem:[%s21325_s1 + $0xc4] ss:$24 sps:$4 sm:$0xff]  }
 0xb0b   :  { %7494 = vmatprep.subr.bf16.mxu1 %v18836_v47  ;;  %v19140_v47 = vld [vmem:[%s21325_s1 + $0xcc] ss:$24 sps:$4 sm:$0xff]   ;;  %8155 = vmatprep.subr.bf16.mxu0 %v19134_v25 }
 0xb0e   :  { %7495 = vmatpush1.bf16.msra.mxu1 %v18844_v43  ;;  %v19146_v43 = vld [vmem:[%s21325_s1 + $0xc0] ss:$24 sps:$4 sm:$0xff]  }
 0xb0f   :  { %7496 = vmatprep.subr.bf16.mxu1 %v18850_v26  ;;  %v19153_v26 = vld [vmem:[%s21325_s1 + $0xc8] ss:$24 sps:$4 sm:$0xff]   ;;  %8156 = vmatpush1.bf16.msra.mxu0 %v19146_v43 }
 0xb10   :  { %21727 = vst [vmem:[#allocation5_spill] sm:$0xff] %v19153_v26 }
 0xb12   :  { %7497 = vmatpush1.bf16.msra.mxu1 %v18858_v40  ;;  %v19158_v40 = vld [vmem:[%s21325_s1 + $0xf4] ss:$24 sps:$4 sm:$0xff]  }
 0xb13   :  { %7498 = vmatprep.subr.bf16.mxu1 %v18864_v56  ;;  %v19164_v56 = vld [vmem:[%s21325_s1 + $0xfc] ss:$24 sps:$4 sm:$0xff]   ;;  %8157 = vmatprep.subr.bf16.mxu0 %v19158_v40 }
 0xb14   :  { %21728 = vst [vmem:[#allocation6_spill] sm:$0xff] %v19164_v56 }
 0xb16   :  { %7499 = vmatpush1.bf16.msra.mxu1 %v18872_v17  ;;  %v19170_v17 = vld [vmem:[%s21325_s1 + $0xf0] ss:$24 sps:$4 sm:$0xff]  }
 0xb17   :  { %7500 = vmatprep.subr.bf16.mxu1 %v18878_v62  ;;  %v19177_v62 = vld [vmem:[%s21325_s1 + $0xf8] ss:$24 sps:$4 sm:$0xff]   ;;  %8158 = vmatpush1.bf16.msra.mxu0 %v19170_v17 }
 0xb18   :  { %21729 = vst [vmem:[#allocation7_spill] sm:$0xff] %v19177_v62 }
 0xb1a   :  { %7501 = vmatpush1.bf16.msra.mxu1 %v18886_v6  ;;  %v19182_v6 = vld [vmem:[%s21325_s1 + $0x124] ss:$24 sps:$4 sm:$0xff]  }
 0xb1b   :  { %7502 = vmatprep.subr.bf16.mxu1 %v18892_v21  ;;  %v19188_v21 = vld [vmem:[%s21325_s1 + $0x12c] ss:$24 sps:$4 sm:$0xff]   ;;  %8159 = vmatprep.subr.bf16.mxu0 %v19182_v6 }
 0xb1c   :  { %21730 = vst [vmem:[#allocation8_spill] sm:$0xff] %v19188_v21 }
 0xb1e   :  { %7503 = vmatpush1.bf16.msra.mxu1 %v18900_v1  ;;  %v19194_v1 = vld [vmem:[%s21325_s1 + $0x120] ss:$24 sps:$4 sm:$0xff]  }
 0xb1f   :  { %7504 = vmatprep.subr.bf16.mxu1 %v18906_v28  ;;  %v19201_v28 = vld [vmem:[%s21325_s1 + $0x128] ss:$24 sps:$4 sm:$0xff]   ;;  %8160 = vmatpush1.bf16.msra.mxu0 %v19194_v1 }
 0xb20   :  { %21731 = vst [vmem:[#allocation9_spill] sm:$0xff] %v19201_v28 }
 0xb22   :  { %7505 = vmatpush1.bf16.msra.mxu1 %v18914_v22  ;;  %v19206_v22 = vld [vmem:[%s21325_s1 + $0x154] ss:$24 sps:$4 sm:$0xff]  }
 0xb23   :  { %7506 = vmatprep.subr.bf16.mxu1 %v18920_v20  ;;  %v19212_v20 = vld [vmem:[%s21325_s1 + $0x15c] ss:$24 sps:$4 sm:$0xff]   ;;  %8161 = vmatprep.subr.bf16.mxu0 %v19206_v22 }
 0xb24   :  { %21732 = vst [vmem:[#allocation10_spill] sm:$0xff] %v19212_v20 }
 0xb26   :  { %7507 = vmatpush1.bf16.msra.mxu1 %v18928_v45  ;;  %v19218_v45 = vld [vmem:[%s21325_s1 + $0x150] ss:$24 sps:$4 sm:$0xff]  }
 0xb27   :  { %8188 = vmatprep.subr.bf16.mxu1 %v19056_v32  ;;  %8162 = vmatpush1.bf16.msra.mxu0 %v19218_v45 }
 0xb28   :  { %8163 = vmatprep.subr.bf16.mxu0 %v19230_v31 }
 0xb29   :  { %7509 = vmatmul.mubr.bf16.vlgmr.msra.gmra.mrb[56].mxu1 %v6816_v10  ;;  %v19393_v10 = vld [vmem:[%s21325_s1 + $0x2a8] ss:$24 sps:$4 sm:$0xff]  }
 0xb2a   :  { %8189 = vmatpush1.bf16.msra.mxu1 %v19051_v59  ;;  %21747 = vst [vmem:[#allocation25_spill] sm:$0xff] %v19393_v10 }
 0xb2b   :  { %8190 = vmatprep.subr.bf16.mxu1 %v19067_v3  ;;  %8164 = vmatpush1.bf16.msra.mxu0 %v19242_v37 }
 0xb2c   :  { %8165 = vmatprep.subr.bf16.mxu0 %v19254_v57 }
 0xb2e   :  { %8191 = vmatpush1.bf16.msra.mxu1 %v19081_v48 }
 0xb2f   :  { %8192 = vmatprep.subr.bf16.mxu1 %v19092_v60  ;;  %8166 = vmatpush1.bf16.msra.mxu0 %v19261_v11 }
 0xb30   :  { %8167 = vmatprep.subr.bf16.mxu0 %v19281_v41 }
 0xb32   :  { %8193 = vmatpush1.bf16.msra.mxu1 %v19105_v13 }
 0xb33   :  { %8194 = vmatprep.subr.bf16.mxu1 %v19116_v12  ;;  %8168 = vmatpush1.bf16.msra.mxu0 %v19286_v55 }
 0xb34   :  { %8169 = vmatprep.subr.bf16.mxu0 %v19305_v35 }
 0xb36   :  { %8195 = vmatpush1.bf16.msra.mxu1 %v19129_v51 }
 0xb37   :  { %8196 = vmatprep.subr.bf16.mxu1 %v19140_v47  ;;  %8170 = vmatpush1.bf16.msra.mxu0 %v19310_v33 }
 0xb38   :  { %8171 = vmatprep.subr.bf16.mxu0 %v19326_v38 }
 0xb3a   :  { %8197 = vmatpush1.bf16.msra.mxu1 %v19153_v26 }
 0xb3b   :  { %8198 = vmatprep.subr.bf16.mxu1 %v19164_v56  ;;  %8172 = vmatpush1.bf16.msra.mxu0 %v19333_v2 }
 0xb3c   :  { %8173 = vmatprep.subr.bf16.mxu0 %v19350_v9 }
 0xb3e   :  { %8199 = vmatpush1.bf16.msra.mxu1 %v19177_v62 }
 0xb3f   :  { %8200 = vmatprep.subr.bf16.mxu1 %v19188_v21  ;;  %8174 = vmatpush1.bf16.msra.mxu0 %v19362_v42 }
 0xb40   :  { %8175 = vmatprep.subr.bf16.mxu0 %v19374_v15 }
 0xb42   :  { %8201 = vmatpush1.bf16.msra.mxu1 %v19201_v28 }
 0xb43   :  { %8202 = vmatprep.subr.bf16.mxu1 %v19212_v20  ;;  %8176 = vmatpush1.bf16.msra.mxu0 %v19386_v0 }
 0xb46   :  { %8203 = vmatpush1.bf16.msra.mxu1 %v19225_v44 }
 0xb47   :  { %8204 = vmatprep.subr.bf16.mxu1 %v19236_v53 }
 0xb4a   :  { %8205 = vmatpush1.bf16.msra.mxu1 %v19249_v49  ;;  %v13051_v49 = vld [vmem:[%s21326_s0 + $0x1b8] sm:$0xff] }
 0xb4b   :  { %8206 = vmatprep.subr.bf16.mxu1 %v19269_v16 }
 0xb4e   :  { %8207 = vmatpush1.bf16.msra.mxu1 %v19274_v63 }
 0xb4f   :  { %8208 = vmatprep.subr.bf16.mxu1 %v19291_v46 }
 0xb52   :  { %8209 = vmatpush1.bf16.msra.mxu1 %v19297_v19 }
 0xb53   :  { %8210 = vmatprep.subr.bf16.mxu1 %v19315_v36 }
 0xb56   :  { %8211 = vmatpush1.bf16.msra.mxu1 %v19321_v5 }
 0xb57   :  { %8212 = vmatprep.subr.bf16.mxu1 %v19338_v14  ;;  %v19425_v14 = vld [vmem:[%s21325_s1 + $0x14] ss:$24 sps:$4 sm:$0xff]  }
 0xb5a   :  { %8213 = vmatpush1.bf16.msra.mxu1 %v19345_v54  ;;  %v19404_v54 = vld [vmem:[%s21325_s1 + $0x2dc] ss:$24 sps:$4 sm:$0xff]  }
 0xb5b   :  { %8214 = vmatprep.subr.bf16.mxu1 %v19356_v27  ;;  %v19398_v27 = vld [vmem:[%s21325_s1 + $0x2d4] ss:$24 sps:$4 sm:$0xff]   ;;  %21748 = vst [vmem:[#allocation26_spill] sm:$0xff] %v19404_v54 }
 0xb5c   :  { %8177 = vmatprep.subr.bf16.mxu0 %v19398_v27 }
 0xb5e   :  { %8215 = vmatpush1.bf16.msra.mxu1 %v19369_v50  ;;  %v19410_v50 = vld [vmem:[%s21325_s1 + $0x2d0] ss:$24 sps:$4 sm:$0xff]  }
 0xb5f   :  { %8216 = vmatprep.subr.bf16.mxu1 %v19380_v23  ;;  %v19417_v23 = vld [vmem:[%s21325_s1 + $0x2d8] ss:$24 sps:$4 sm:$0xff]   ;;  %8178 = vmatpush1.bf16.msra.mxu0 %v19410_v50 }
 0xb60   :  { %21749 = vst [vmem:[#allocation27_spill] sm:$0xff] %v19417_v23  ;;  %8229 = vmatprep.subr.bf16.mxu0 %v19425_v14 }
 0xb62   :  { %8217 = vmatpush1.bf16.msra.mxu1 %v19393_v10 }
 0xb63   :  { %8218 = vmatprep.subr.bf16.mxu1 %v19404_v54 }
 0xb66   :  { %8219 = vmatpush1.bf16.msra.mxu1 %v19417_v23  ;;  %v13050_v23 = vld [vmem:[%s21326_s0 + $0x1b0] sm:$0xff] }
 0xb67   :  { %8900 = vmatprep.subr.bf16.mxu1 %v19046_v4 }
 0xbbc   :  { %v7428_v10 = vpop.f32.mrb[52].mxu1  ;;  %v7469_v5 = vpop.f32.mrb[56].mxu0 }
 0xbbd   :  { %v7430_v36 = vpop.f32.mrb[53].mxu1  ;;  %v7471_v19 = vpop.f32.mrb[57].mxu0  ;;  %v7517_v53 = vadd.f32 %v13050_v23, %v7428_v10 }
 0xbbe   :  { %v7432_v46 = vpop.f32.mrb[54].mxu1  ;;  %v7473_v63 = vpop.f32.mrb[58].mxu0  ;;  %v7518_v4 = vadd.f32 %v13051_v49, %v7430_v36 }
 0xbbf   :  { %v7433_v54 = vpop.f32.mrb[55].mxu1  ;;  %v7474_v16 = vpop.f32.mrb[59].mxu0  ;;  %v13152_v44 = vmul.f32 -1.442695, %v7517_v53  ;;  %v13052_v63 = vld [vmem:[%s21326_s0 + $0x1c0] sm:$0xff] }
 0xbc0   :  { %v13153_v20 = vmul.f32 -1.442695, %v7518_v4  ;;  %v13053_v16 = vld [vmem:[%s21326_s0 + $0x1c8] sm:$0xff]  ;;  %v7531_v46 = vadd.f32 %v13052_v63, %v7469_v5 }
 0xbc1   :  { %15139 = vpow2.f32 %v13152_v44  ;;  %v7532_v54 = vadd.f32 %v13053_v16, %v7471_v19  ;;  %v13054_v19 = vld [vmem:[%s21326_s0 + $0x1d0] sm:$0xff] }
 0xbc2   :  { %15141 = vpow2.f32 %v13153_v20  ;;  %v13154_v62 = vmul.f32 -1.442695, %v7531_v46 }
 0xbc3   :  { %v13155_v56 = vmul.f32 -1.442695, %v7532_v54 }
 0xbc4   :  { %15143 = vpow2.f32 %v13154_v62 }
 0xbc5   :  { %15145 = vpow2.f32 %v13155_v56  ;;  %v13055_v56 = vld [vmem:[%s21326_s0 + $0x1d8] sm:$0xff] }
 0xbcb   :  { %v15140_v28 = vpop.eup %15139 }
 0xbcc   :  { %v15142_v21 = vpop.eup %15141  ;;  %v7525_v23 = vadd.f32 1.0, %v15140_v28 }
 0xbcd   :  { %v7526_v49 = vadd.f32 1.0, %v15142_v21 }
 0xbce   :  { %15147 = vrcp.f32 %v7525_v23  ;;  %v15144_v20 = vpop.eup %15143 }
 0xbcf   :  { %15149 = vrcp.f32 %v7526_v49  ;;  %v15146_v53 = vpop.eup %15145  ;;  %v7539_v46 = vadd.f32 1.0, %v15144_v20 }
 0xbd0   :  { %v7540_v23 = vadd.f32 1.0, %v15146_v53  ;;  %v19491_v53 = vld [vmem:[%s21325_s1 + $0x74] ss:$24 sps:$4 sm:$0xff]  }
 0xbd8   :  { %v15148_v4 = vpop.eup %15147 }
 0xbd9   :  { %v15150_v28 = vpop.eup %15149 }
 0xbfc   :  { %v7510_v44 = vpop.f32.mrb[56].mxu1 }
 0xbfd   :  { %v7545_v36 = vadd.f32 %v7510_v44, %v21725_v58  ;;  %v7512_v10 = vpop.f32.mrb[57].mxu1 }
 0xbfe   :  { %v7546_v5 = vadd.f32 %v7512_v10, %v21726_v29  ;;  %v7514_v63 = vpop.f32.mrb[58].mxu1 }
 0xbff   :  { %v7547_v21 = vmul.f32 %v15148_v4, %v7545_v36  ;;  %v7515_v62 = vpop.f32.mrb[59].mxu1 }
 0xc00   :  { %v7548_v16 = vmul.f32 %v15150_v28, %v7546_v5  ;;  %v19505_v5 = vld [vmem:[%s21325_s1 + $0xa4] ss:$24 sps:$4 sm:$0xff]   ;;  %v21766_v28 = vld [vmem:[#allocation21_spill] sm:$0xff] }
 0xc01   :  { %v7549_v54 = vadd.f32 %v13054_v19, %v7547_v21  ;;  %v19499_v19 = vld [vmem:[%s21325_s1 + $0x70] ss:$24 sps:$4 sm:$0xff]   ;;  %v21767_v21 = vld [vmem:[#allocation22_spill] sm:$0xff] }
 0xc02   :  { %v7550_v49 = vadd.f32 %v13055_v56, %v7548_v16  ;;  %v21768_v56 = vld [vmem:[#allocation23_spill] sm:$0xff]  ;;  %v21769_v16 = vld [vmem:[#allocation24_spill] sm:$0xff] }
 0xc03   :  { %15151 = vtanh.f32 %v7549_v54  ;;  %v21771_v54 = vld [vmem:[#allocation26_spill] sm:$0xff] }
 0xc04   :  { %15153 = vtanh.f32 %v7550_v49 }
 0xc05   :  { %15155 = vrcp.f32 %v7539_v46  ;;  %v21770_v46 = vld [vmem:[#allocation25_spill] sm:$0xff] }
 0xc06   :  { %15157 = vrcp.f32 %v7540_v23  ;;  %v21772_v23 = vld [vmem:[#allocation27_spill] sm:$0xff] }
 0xc0d   :  { %v15152_v44 = vpop.eup %15151 }
 0xc0e   :  { %v15154_v58 = vpop.eup %15153  ;;  %v7553_v10 = vsub.f32 %v18991_v30, %v15152_v44 }
 0xc0f   :  { %v15156_v63 = vpop.eup %15155  ;;  %v7554_v36 = vsub.f32 %v18993_v7, %v15154_v58  ;;  %v19477_v7 = vld [vmem:[%s21325_s1 + $0x44] ss:$24 sps:$4 sm:$0xff]  }
 0xc10   :  { %v15158_v4 = vpop.eup %15157  ;;  %v7555_v29 = vmul.f32 %v15156_v63, %v7553_v10 }
 0xc11   :  { %v7556_v26 = vmul.f32 %v15158_v4, %v7554_v36 }
 0xc12   :  { %v19451_v62 = vadd.f32 %v15152_v44, %v7555_v29  ;;  %v19468_v29 = vld [vmem:[%s21325_s1 + $0x10] ss:$24 sps:$4 sm:$0xff]  }
 0xc13   :  { %v19453_v20 = vadd.f32 %v15154_v58, %v7556_v26  ;;  %v19485_v26 = vld [vmem:[%s21325_s1 + $0x40] ss:$24 sps:$4 sm:$0xff]  }
 0xc14   :  { %13156 = vst [vmem:[%s21328_s3 + $0x90] sm:$0xff] %v19451_v62  ;;  %v19472_v58 = vpack.c.bf16 %v19451_v62, %v19451_v62 }
 0xc15   :  { %13157 = vst [vmem:[%s21328_s3 + $0x98] sm:$0xff] %v19453_v20  ;;  %v7570_v30 = vpack.c.bf16 %v19453_v20, %v19453_v20 }
 0xc17   :  { %8179 = vmatprep.mubr.bf16.mxu0 %v7570_v30  ;;  %8220 = vmatprep.mubr.bf16.mxu1 %v7570_v30 }
 0xc18   :  { %8180 = vmatmul.mubr.bf16.vlgmr.msra.gmra.mrb[60].mxu0 %v19472_v58  ;;  %8221 = vmatmul.mubr.bf16.vlgmr.msra.gmra.mrb[60].mxu1 %v19472_v58 }
 0xc19   :  { %8230 = vmatpush1.bf16.msra.mxu0 %v19468_v29  ;;  %8261 = vmatprep.mubr.bf16.mxu0 %v7570_v30 }
 0xc1a   :  { %8231 = vmatprep.subr.bf16.mxu0 %v19477_v7  ;;  %8901 = vmatpush1.bf16.msra.mxu1 %v19041_v18  ;;  %v19513_v18 = vld [vmem:[%s21325_s1 + $0xa0] ss:$24 sps:$4 sm:$0xff]  }
 0xc1b   :  { %8902 = vmatprep.subr.bf16.mxu1 %v19061_v8  ;;  %v19519_v8 = vld [vmem:[%s21325_s1 + $0xd4] ss:$24 sps:$4 sm:$0xff]  }
 0xc1d   :  { %8232 = vmatpush1.bf16.msra.mxu0 %v19485_v26 }
 0xc1e   :  { %8233 = vmatprep.subr.bf16.mxu0 %v19491_v53  ;;  %8903 = vmatpush1.bf16.msra.mxu1 %v19074_v52  ;;  %v19527_v52 = vld [vmem:[%s21325_s1 + $0xd0] ss:$24 sps:$4 sm:$0xff]  }
 0xc1f   :  { %8904 = vmatprep.subr.bf16.mxu1 %v19086_v24  ;;  %v19533_v24 = vld [vmem:[%s21325_s1 + $0x104] ss:$24 sps:$4 sm:$0xff]  }
 0xc21   :  { %8234 = vmatpush1.bf16.msra.mxu0 %v19499_v19 }
 0xc22   :  { %8235 = vmatprep.subr.bf16.mxu0 %v19505_v5  ;;  %8905 = vmatpush1.bf16.msra.mxu1 %v19098_v61  ;;  %v19541_v61 = vld [vmem:[%s21325_s1 + $0x100] ss:$24 sps:$4 sm:$0xff]  }
 0xc23   :  { %8906 = vmatprep.subr.bf16.mxu1 %v19110_v34  ;;  %v19547_v34 = vld [vmem:[%s21325_s1 + $0x134] ss:$24 sps:$4 sm:$0xff]  }
 0xc25   :  { %8236 = vmatpush1.bf16.msra.mxu0 %v19513_v18 }
 0xc26   :  { %8237 = vmatprep.subr.bf16.mxu0 %v19519_v8  ;;  %8907 = vmatpush1.bf16.msra.mxu1 %v19122_v39  ;;  %v19555_v39 = vld [vmem:[%s21325_s1 + $0x130] ss:$24 sps:$4 sm:$0xff]  }
 0xc27   :  { %8908 = vmatprep.subr.bf16.mxu1 %v19134_v25  ;;  %v19561_v25 = vld [vmem:[%s21325_s1 + $0x164] ss:$24 sps:$4 sm:$0xff]  }
 0xc29   :  { %8238 = vmatpush1.bf16.msra.mxu0 %v19527_v52 }
 0xc2a   :  { %8239 = vmatprep.subr.bf16.mxu0 %v19533_v24  ;;  %8909 = vmatpush1.bf16.msra.mxu1 %v19146_v43  ;;  %v19569_v43 = vld [vmem:[%s21325_s1 + $0x160] ss:$24 sps:$4 sm:$0xff]  }
 0xc2b   :  { %8910 = vmatprep.subr.bf16.mxu1 %v19158_v40  ;;  %v19575_v40 = vld [vmem:[%s21325_s1 + $0x194] ss:$24 sps:$4 sm:$0xff]  }
 0xc2d   :  { %8240 = vmatpush1.bf16.msra.mxu0 %v19541_v61 }
 0xc2e   :  { %8241 = vmatprep.subr.bf16.mxu0 %v19547_v34  ;;  %8911 = vmatpush1.bf16.msra.mxu1 %v19170_v17  ;;  %v19583_v17 = vld [vmem:[%s21325_s1 + $0x190] ss:$24 sps:$4 sm:$0xff]  }
 0xc2f   :  { %8912 = vmatprep.subr.bf16.mxu1 %v19182_v6  ;;  %v19589_v6 = vld [vmem:[%s21325_s1 + $0x1c4] ss:$24 sps:$4 sm:$0xff]  }
 0xc31   :  { %8242 = vmatpush1.bf16.msra.mxu0 %v19555_v39 }
 0xc32   :  { %8243 = vmatprep.subr.bf16.mxu0 %v19561_v25  ;;  %8913 = vmatpush1.bf16.msra.mxu1 %v19194_v1  ;;  %v19597_v1 = vld [vmem:[%s21325_s1 + $0x1c0] ss:$24 sps:$4 sm:$0xff]  }
 0xc33   :  { %8914 = vmatprep.subr.bf16.mxu1 %v19206_v22  ;;  %v19603_v22 = vld [vmem:[%s21325_s1 + $0x1f4] ss:$24 sps:$4 sm:$0xff]  }
 0xc35   :  { %8244 = vmatpush1.bf16.msra.mxu0 %v19569_v43 }
 0xc36   :  { %8245 = vmatprep.subr.bf16.mxu0 %v19575_v40  ;;  %8915 = vmatpush1.bf16.msra.mxu1 %v19218_v45  ;;  %v19611_v45 = vld [vmem:[%s21325_s1 + $0x1f0] ss:$24 sps:$4 sm:$0xff]  }
 0xc37   :  { %8916 = vmatprep.subr.bf16.mxu1 %v19230_v31  ;;  %v19617_v31 = vld [vmem:[%s21325_s1 + $0x224] ss:$24 sps:$4 sm:$0xff]  }
 0xc39   :  { %8246 = vmatpush1.bf16.msra.mxu0 %v19583_v17 }
 0xc3a   :  { %8247 = vmatprep.subr.bf16.mxu0 %v19589_v6  ;;  %8917 = vmatpush1.bf16.msra.mxu1 %v19242_v37  ;;  %v19625_v37 = vld [vmem:[%s21325_s1 + $0x220] ss:$24 sps:$4 sm:$0xff]  }
 0xc3b   :  { %8918 = vmatprep.subr.bf16.mxu1 %v19254_v57  ;;  %v19631_v57 = vld [vmem:[%s21325_s1 + $0x254] ss:$24 sps:$4 sm:$0xff]  }
 0xc3d   :  { %8248 = vmatpush1.bf16.msra.mxu0 %v19597_v1 }
 0xc3e   :  { %8249 = vmatprep.subr.bf16.mxu0 %v19603_v22  ;;  %8919 = vmatpush1.bf16.msra.mxu1 %v19261_v11  ;;  %v19639_v11 = vld [vmem:[%s21325_s1 + $0x250] ss:$24 sps:$4 sm:$0xff]  }
 0xc3f   :  { %8920 = vmatprep.subr.bf16.mxu1 %v19281_v41  ;;  %v19645_v41 = vld [vmem:[%s21325_s1 + $0x284] ss:$24 sps:$4 sm:$0xff]  }
 0xc41   :  { %8250 = vmatpush1.bf16.msra.mxu0 %v19611_v45 }
 0xc42   :  { %8251 = vmatprep.subr.bf16.mxu0 %v19617_v31  ;;  %8921 = vmatpush1.bf16.msra.mxu1 %v19286_v55  ;;  %v19653_v55 = vld [vmem:[%s21325_s1 + $0x280] ss:$24 sps:$4 sm:$0xff]  }
 0xc43   :  { %8922 = vmatprep.subr.bf16.mxu1 %v19305_v35  ;;  %v19659_v35 = vld [vmem:[%s21325_s1 + $0x2b4] ss:$24 sps:$4 sm:$0xff]  }
 0xc45   :  { %8252 = vmatpush1.bf16.msra.mxu0 %v19625_v37 }
 0xc46   :  { %8253 = vmatprep.subr.bf16.mxu0 %v19631_v57  ;;  %8923 = vmatpush1.bf16.msra.mxu1 %v19310_v33  ;;  %v19667_v33 = vld [vmem:[%s21325_s1 + $0x2b0] ss:$24 sps:$4 sm:$0xff]  }
 0xc47   :  { %8924 = vmatprep.subr.bf16.mxu1 %v19326_v38  ;;  %v19673_v38 = vld [vmem:[%s21325_s1 + $0x2e4] ss:$24 sps:$4 sm:$0xff]  }
 0xc49   :  { %8254 = vmatpush1.bf16.msra.mxu0 %v19639_v11 }
 0xc4a   :  { %8255 = vmatprep.subr.bf16.mxu0 %v19645_v41  ;;  %8925 = vmatpush1.bf16.msra.mxu1 %v19333_v2  ;;  %v19681_v2 = vld [vmem:[%s21325_s1 + $0x2e0] ss:$24 sps:$4 sm:$0xff]  }
 0xc4b   :  { %8926 = vmatprep.subr.bf16.mxu1 %v19350_v9  ;;  %v21752_v9 = vld [vmem:[#allocation7_spill] sm:$0xff] }
 0xc4d   :  { %8256 = vmatpush1.bf16.msra.mxu0 %v19653_v55 }
 0xc4e   :  { %8257 = vmatprep.subr.bf16.mxu0 %v19659_v35  ;;  %8927 = vmatpush1.bf16.msra.mxu1 %v19362_v42  ;;  %v21762_v42 = vld [vmem:[#allocation17_spill] sm:$0xff] }
 0xc4f   :  { %8928 = vmatprep.subr.bf16.mxu1 %v19374_v15  ;;  %v21764_v15 = vld [vmem:[#allocation19_spill] sm:$0xff] }
 0xc51   :  { %8258 = vmatpush1.bf16.msra.mxu0 %v19667_v33 }
 0xc52   :  { %8259 = vmatprep.subr.bf16.mxu0 %v19673_v38  ;;  %8929 = vmatpush1.bf16.msra.mxu1 %v19386_v0  ;;  %v21765_v0 = vld [vmem:[#allocation20_spill] sm:$0xff] }
 0xc53   :  { %8930 = vmatprep.subr.bf16.mxu1 %v19398_v27  ;;  %v21761_v27 = vld [vmem:[#allocation16_spill] sm:$0xff] }
 0xc55   :  { %8260 = vmatpush1.bf16.msra.mxu0 %v19681_v2 }
 0xc56   :  { %8941 = vmatprep.subr.bf16.mxu0 %v19056_v32  ;;  %8931 = vmatpush1.bf16.msra.mxu1 %v19410_v50  ;;  %v21750_v32 = vld [vmem:[#allocation5_spill] sm:$0xff]  ;;  %v21763_v50 = vld [vmem:[#allocation18_spill] sm:$0xff] }
 0xc57   :  { %8982 = vmatprep.subr.bf16.mxu1 %v19425_v14  ;;  %v21751_v14 = vld [vmem:[#allocation6_spill] sm:$0xff] }
 0xc58   :  { %8262 = vmatmul.mubr.bf16.vlgmr.msra.gmra.mrb[64].mxu0 %v19472_v58 }
 0xc59   :  { %8942 = vmatpush1.bf16.msra.mxu0 %v19051_v59  ;;  %v21753_v59 = vld [vmem:[#allocation8_spill] sm:$0xff] }
 0xc5a   :  { %8943 = vmatprep.subr.bf16.mxu0 %v19067_v3  ;;  %v21754_v3 = vld [vmem:[#allocation9_spill] sm:$0xff] }
 0xc5d   :  { %8944 = vmatpush1.bf16.msra.mxu0 %v19081_v48  ;;  %v21755_v48 = vld [vmem:[#allocation10_spill] sm:$0xff] }
 0xc5e   :  { %8945 = vmatprep.subr.bf16.mxu0 %v19092_v60  ;;  %v21756_v60 = vld [vmem:[#allocation11_spill] sm:$0xff] }
 0xc61   :  { %8946 = vmatpush1.bf16.msra.mxu0 %v19105_v13  ;;  %v21757_v13 = vld [vmem:[#allocation12_spill] sm:$0xff] }
 0xc62   :  { %8947 = vmatprep.subr.bf16.mxu0 %v19116_v12  ;;  %v21758_v12 = vld [vmem:[#allocation13_spill] sm:$0xff] }
 0xc65   :  { %8948 = vmatpush1.bf16.msra.mxu0 %v19129_v51  ;;  %v21759_v51 = vld [vmem:[#allocation14_spill] sm:$0xff] }
 0xc66   :  { %8949 = vmatprep.subr.bf16.mxu0 %v19140_v47  ;;  %v21760_v47 = vld [vmem:[#allocation15_spill] sm:$0xff] }
 0xc69   :  { %8950 = vmatpush1.bf16.msra.mxu0 %v21750_v32  ;;  %v13158_v32 = vld [vmem:[%s21326_s0 + $0x1e0] sm:$0xff] }
 0xc6a   :  { %8951 = vmatprep.subr.bf16.mxu0 %v21751_v14  ;;  %v13159_v14 = vld [vmem:[%s21326_s0 + $0x1e8] sm:$0xff] }
 0xc6d   :  { %8952 = vmatpush1.bf16.msra.mxu0 %v21752_v9 }
 0xc6e   :  { %8953 = vmatprep.subr.bf16.mxu0 %v21753_v59 }
 0xc71   :  { %8954 = vmatpush1.bf16.msra.mxu0 %v21754_v3 }
 0xc72   :  { %8955 = vmatprep.subr.bf16.mxu0 %v21755_v48 }
 0xc75   :  { %8956 = vmatpush1.bf16.msra.mxu0 %v21756_v60  ;;  %v13160_v60 = vld [vmem:[%s21326_s0 + $0x1f0] sm:$0xff] }
 0xc76   :  { %8957 = vmatprep.subr.bf16.mxu0 %v21757_v13  ;;  %v13161_v13 = vld [vmem:[%s21326_s0 + $0x1f8] sm:$0xff] }
 0xc79   :  { %8958 = vmatpush1.bf16.msra.mxu0 %v21758_v12 }
 0xc7a   :  { %8959 = vmatprep.subr.bf16.mxu0 %v21759_v51 }
 0xc7d   :  { %8960 = vmatpush1.bf16.msra.mxu0 %v21760_v47 }
 0xc7e   :  { %8961 = vmatprep.subr.bf16.mxu0 %v21761_v27 }
 0xc81   :  { %8962 = vmatpush1.bf16.msra.mxu0 %v21762_v42 }
 0xc82   :  { %8963 = vmatprep.subr.bf16.mxu0 %v21763_v50 }
 0xc85   :  { %8964 = vmatpush1.bf16.msra.mxu0 %v21764_v15 }
 0xc86   :  { %8965 = vmatprep.subr.bf16.mxu0 %v21765_v0 }
 0xc89   :  { %8966 = vmatpush1.bf16.msra.mxu0 %v21766_v28 }
 0xc8a   :  { %8967 = vmatprep.subr.bf16.mxu0 %v21767_v21 }
 0xc8d   :  { %8968 = vmatpush1.bf16.msra.mxu0 %v21768_v56 }
 0xc8e   :  { %8969 = vmatprep.subr.bf16.mxu0 %v21769_v16  ;;  %v21773_v16 = vld [vmem:[#allocation3_spill] sm:$0xff] }
 0xc91   :  { %8970 = vmatpush1.bf16.msra.mxu0 %v21770_v46 }
 0xc92   :  { %8971 = vmatprep.subr.bf16.mxu0 %v21771_v54 }
 0xc95   :  { %8972 = vmatpush1.bf16.msra.mxu0 %v21772_v23 }
 0xceb   :  { %v8181_v49 = vpop.f32.mrb[60].mxu0  ;;  %v8222_v44 = vpop.f32.mrb[60].mxu1 }
 0xcec   :  { %v8183_v10 = vpop.f32.mrb[61].mxu0  ;;  %v8224_v63 = vpop.f32.mrb[61].mxu1  ;;  %v8270_v9 = vadd.f32 %v13158_v32, %v8181_v49  ;;  %v8284_v12 = vadd.f32 %v13160_v60, %v8222_v44  ;;  %v13162_v49 = vld [vmem:[%s21326_s0 + $0x200] sm:$0xff]  ;;  %v21774_v44 = vld [vmem:[#allocation4_spill] sm:$0xff] }
 0xced   :  { %v8185_v36 = vpop.f32.mrb[62].mxu0  ;;  %v8226_v4 = vpop.f32.mrb[62].mxu1  ;;  %v8271_v59 = vadd.f32 %v13159_v14, %v8183_v10  ;;  %v8285_v51 = vadd.f32 %v13161_v13, %v8224_v63 }
 0xcee   :  { %v8186_v30 = vpop.f32.mrb[63].mxu0  ;;  %v8227_v58 = vpop.f32.mrb[63].mxu1  ;;  %v13260_v3 = vmul.f32 -1.442695, %v8270_v9  ;;  %v13262_v42 = vmul.f32 -1.442695, %v8284_v12 }
 0xcef   :  { %v13261_v48 = vmul.f32 -1.442695, %v8271_v59  ;;  %v13263_v50 = vmul.f32 -1.442695, %v8285_v51  ;;  %v13163_v30 = vld [vmem:[%s21326_s0 + $0x208] sm:$0xff] }
 0xcf0   :  { %15159 = vpow2.f32 %v13260_v3 }
 0xcf1   :  { %15161 = vpow2.f32 %v13261_v48 }
 0xcf2   :  { %15163 = vpow2.f32 %v13262_v42 }
 0xcf3   :  { %15165 = vpow2.f32 %v13263_v50 }
 0xcfa   :  { %v15160_v47 = vpop.eup %15159 }
 0xcfb   :  { %v15162_v27 = vpop.eup %15161  ;;  %v8278_v15 = vadd.f32 1.0, %v15160_v47 }
 0xcfc   :  { %v8279_v0 = vadd.f32 1.0, %v15162_v27  ;;  %v15164_v28 = vpop.eup %15163 }
 0xcfd   :  { %15167 = vrcp.f32 %v8278_v15  ;;  %v15166_v56 = vpop.eup %15165  ;;  %v8292_v14 = vadd.f32 1.0, %v15164_v28  ;;  %v19983_v28 = vld [vmem:[%s21325_s1 + $0x184] ss:$24 sps:$4 sm:$0xff]  }
 0xcfe   :  { %15169 = vrcp.f32 %v8279_v0  ;;  %v8293_v59 = vadd.f32 1.0, %v15166_v56  ;;  %v19978_v0 = vld [vmem:[%s21325_s1 + $0x158] ss:$24 sps:$4 sm:$0xff]  }
 0xcff   :  { %21781 = vst [vmem:[#allocation11_spill] sm:$0xff] %v19978_v0  ;;  %v19995_v56 = vld [vmem:[%s21325_s1 + $0x180] ss:$24 sps:$4 sm:$0xff]  }
 0xd07   :  { %v15168_v23 = vpop.eup %15167 }
 0xd08   :  { %v15170_v36 = vpop.eup %15169 }
 0xd2b   :  { %v8263_v21 = vpop.f32.mrb[64].mxu0 }
 0xd2c   :  { %v8298_v46 = vadd.f32 %v8263_v21, %v21773_v16  ;;  %v8265_v54 = vpop.f32.mrb[65].mxu0  ;;  %v19989_v21 = vld [vmem:[%s21325_s1 + $0x18c] ss:$24 sps:$4 sm:$0xff]  }
 0xd2d   :  { %v8299_v10 = vadd.f32 %v8265_v54, %v21774_v44  ;;  %v8267_v63 = vpop.f32.mrb[66].mxu0  ;;  %21782 = vst [vmem:[#allocation12_spill] sm:$0xff] %v19989_v21  ;;  %v20007_v54 = vld [vmem:[%s21325_s1 + $0x1b4] ss:$24 sps:$4 sm:$0xff]  }
 0xd2e   :  { %v8300_v4 = vmul.f32 %v15168_v23, %v8298_v46  ;;  %v8268_v58 = vpop.f32.mrb[67].mxu0  ;;  %v20002_v46 = vld [vmem:[%s21325_s1 + $0x188] ss:$24 sps:$4 sm:$0xff]   ;;  %v20034_v63 = vld [vmem:[%s21325_s1 + $0x1e4] ss:$24 sps:$4 sm:$0xff]  }
 0xd2f   :  { %v8301_v32 = vmul.f32 %v15170_v36, %v8299_v10  ;;  %21783 = vst [vmem:[#allocation13_spill] sm:$0xff] %v20002_v46  ;;  %v20014_v23 = vld [vmem:[%s21325_s1 + $0x1b0] ss:$24 sps:$4 sm:$0xff]   ;;  %v20039_v36 = vld [vmem:[%s21325_s1 + $0x1e0] ss:$24 sps:$4 sm:$0xff]  }
 0xd30   :  { %v8302_v9 = vadd.f32 %v13162_v49, %v8300_v4  ;;  %v20022_v49 = vld [vmem:[%s21325_s1 + $0x1bc] ss:$24 sps:$4 sm:$0xff]   ;;  %v20027_v10 = vld [vmem:[%s21325_s1 + $0x1b8] ss:$24 sps:$4 sm:$0xff]   ;;  %v20044_v4 = vld [vmem:[%s21325_s1 + $0x1ec] ss:$24 sps:$4 sm:$0xff]  }
 0xd31   :  { %v8303_v3 = vadd.f32 %v13163_v30, %v8301_v32  ;;  %21784 = vst [vmem:[#allocation14_spill] sm:$0xff] %v20022_v49  ;;  %21785 = vst [vmem:[#allocation15_spill] sm:$0xff] %v20027_v10  ;;  %v20050_v30 = vld [vmem:[%s21325_s1 + $0x1e8] ss:$24 sps:$4 sm:$0xff]   ;;  %v20058_v58 = vld [vmem:[%s21325_s1 + $0x214] ss:$24 sps:$4 sm:$0xff]  }
 0xd32   :  { %15171 = vtanh.f32 %v8302_v9  ;;  %21786 = vst [vmem:[#allocation16_spill] sm:$0xff] %v20044_v4  ;;  %21787 = vst [vmem:[#allocation17_spill] sm:$0xff] %v20050_v30  ;;  %v20063_v32 = vld [vmem:[%s21325_s1 + $0x210] ss:$24 sps:$4 sm:$0xff]  }
 0xd33   :  { %15173 = vtanh.f32 %v8303_v3  ;;  %v20074_v9 = vld [vmem:[%s21325_s1 + $0x218] ss:$24 sps:$4 sm:$0xff]  }
 0xd34   :  { %15175 = vrcp.f32 %v8292_v14  ;;  %v20068_v14 = vld [vmem:[%s21325_s1 + $0x21c] ss:$24 sps:$4 sm:$0xff]   ;;  %21789 = vst [vmem:[#allocation19_spill] sm:$0xff] %v20074_v9  ;;  %v20086_v3 = vld [vmem:[%s21325_s1 + $0x240] ss:$24 sps:$4 sm:$0xff]  }
 0xd35   :  { %15177 = vrcp.f32 %v8293_v59  ;;  %21788 = vst [vmem:[#allocation18_spill] sm:$0xff] %v20068_v14  ;;  %v20079_v59 = vld [vmem:[%s21325_s1 + $0x244] ss:$24 sps:$4 sm:$0xff]  }
 0xd3c   :  { %v15172_v48 = vpop.eup %15171 }
 0xd3d   :  { %v15174_v60 = vpop.eup %15173  ;;  %v8306_v13 = vsub.f32 %v19451_v62, %v15172_v48 }
 0xd3e   :  { %v15176_v12 = vpop.eup %15175  ;;  %v8307_v51 = vsub.f32 %v19453_v20, %v15174_v60 }
 0xd3f   :  { %v15178_v47 = vpop.eup %15177  ;;  %v8308_v27 = vmul.f32 %v15176_v12, %v8306_v13  ;;  %v20103_v13 = vld [vmem:[%s21325_s1 + $0x274] ss:$24 sps:$4 sm:$0xff]  }
 0xd40   :  { %v8309_v42 = vmul.f32 %v15178_v47, %v8307_v51  ;;  %v20109_v12 = vld [vmem:[%s21325_s1 + $0x27c] ss:$24 sps:$4 sm:$0xff]   ;;  %v20115_v51 = vld [vmem:[%s21325_s1 + $0x270] ss:$24 sps:$4 sm:$0xff]  }
 0xd41   :  { %v19744_v50 = vadd.f32 %v15172_v48, %v8308_v27  ;;  %v20091_v48 = vld [vmem:[%s21325_s1 + $0x24c] ss:$24 sps:$4 sm:$0xff]   ;;  %21792 = vst [vmem:[#allocation22_spill] sm:$0xff] %v20109_v12  ;;  %v20122_v47 = vld [vmem:[%s21325_s1 + $0x278] ss:$24 sps:$4 sm:$0xff]  }
 0xd42   :  { %v19746_v15 = vadd.f32 %v15174_v60, %v8309_v42  ;;  %21790 = vst [vmem:[#allocation20_spill] sm:$0xff] %v20091_v48  ;;  %v20098_v60 = vld [vmem:[%s21325_s1 + $0x248] ss:$24 sps:$4 sm:$0xff]   ;;  %21793 = vst [vmem:[#allocation23_spill] sm:$0xff] %v20122_v47  ;;  %v20127_v27 = vld [vmem:[%s21325_s1 + $0x2a4] ss:$24 sps:$4 sm:$0xff]  }
 0xd43   :  { %13264 = vst [vmem:[%s21328_s3 + $0xa0] sm:$0xff] %v19744_v50  ;;  %v8322_v20 = vpack.c.bf16 %v19744_v50, %v19744_v50  ;;  %21791 = vst [vmem:[#allocation21_spill] sm:$0xff] %v20098_v60  ;;  %v20133_v42 = vld [vmem:[%s21325_s1 + $0x2ac] ss:$24 sps:$4 sm:$0xff]  }
 0xd44   :  { %13265 = vst [vmem:[%s21328_s3 + $0xa8] sm:$0xff] %v19746_v15  ;;  %v8323_v62 = vpack.c.bf16 %v19746_v15, %v19746_v15  ;;  %21794 = vst [vmem:[#allocation24_spill] sm:$0xff] %v20133_v42 }
 0xd46   :  { %8932 = vmatprep.mubr.bf16.mxu1 %v8323_v62  ;;  %8973 = vmatprep.mubr.bf16.mxu0 %v8323_v62 }
 0xd47   :  { %8933 = vmatmul.mubr.bf16.vlgmr.msra.gmra.mrb[64].mxu1 %v8322_v20  ;;  %8974 = vmatmul.mubr.bf16.vlgmr.msra.gmra.mrb[68].mxu0 %v8322_v20 }
 0xd48   :  { %8983 = vmatpush1.bf16.msra.mxu1 %v19468_v29  ;;  %9014 = vmatprep.mubr.bf16.mxu1 %v8323_v62  ;;  %v19794_v29 = vld [vmem:[%s21325_s1] ss:$24 sps:$4 sm:$0xff]  }
 0xd49   :  { %8984 = vmatprep.subr.bf16.mxu1 %v19477_v7  ;;  %v19799_v7 = vld [vmem:[%s21325_s1 + $0x4] ss:$24 sps:$4 sm:$0xff]   ;;  %v20139_v62 = vld [vmem:[%s21325_s1 + $0x2a0] ss:$24 sps:$4 sm:$0xff]  }
 0xd4a   :  { %9653 = vmatprep.subr.bf16.mxu0 %v19799_v7 }
 0xd4b   :  { %9654 = vmatpush1.bf16.msra.mxu0 %v19794_v29 }
 0xd4c   :  { %8985 = vmatpush1.bf16.msra.mxu1 %v19485_v26  ;;  %v19804_v26 = vld [vmem:[%s21325_s1 + $0x8] ss:$24 sps:$4 sm:$0xff]  }
 0xd4d   :  { %8986 = vmatprep.subr.bf16.mxu1 %v19491_v53  ;;  %v19809_v53 = vld [vmem:[%s21325_s1 + $0xc] ss:$24 sps:$4 sm:$0xff]  }
 0xd50   :  { %8987 = vmatpush1.bf16.msra.mxu1 %v19499_v19  ;;  %v19814_v19 = vld [vmem:[%s21325_s1 + $0x34] ss:$24 sps:$4 sm:$0xff]  }
 0xd51   :  { %8988 = vmatprep.subr.bf16.mxu1 %v19505_v5  ;;  %v19820_v5 = vld [vmem:[%s21325_s1 + $0x3c] ss:$24 sps:$4 sm:$0xff]   ;;  %9655 = vmatprep.subr.bf16.mxu0 %v19814_v19 }
 0xd54   :  { %8989 = vmatpush1.bf16.msra.mxu1 %v19513_v18  ;;  %v19827_v18 = vld [vmem:[%s21325_s1 + $0x30] ss:$24 sps:$4 sm:$0xff]  }
 0xd55   :  { %8990 = vmatprep.subr.bf16.mxu1 %v19519_v8  ;;  %v19834_v8 = vld [vmem:[%s21325_s1 + $0x38] ss:$24 sps:$4 sm:$0xff]   ;;  %9656 = vmatpush1.bf16.msra.mxu0 %v19827_v18 }
 0xd58   :  { %8991 = vmatpush1.bf16.msra.mxu1 %v19527_v52  ;;  %v19839_v52 = vld [vmem:[%s21325_s1 + $0x64] ss:$24 sps:$4 sm:$0xff]  }
 0xd59   :  { %8992 = vmatprep.subr.bf16.mxu1 %v19533_v24  ;;  %v19845_v24 = vld [vmem:[%s21325_s1 + $0x6c] ss:$24 sps:$4 sm:$0xff]   ;;  %9657 = vmatprep.subr.bf16.mxu0 %v19839_v52 }
 0xd5c   :  { %8993 = vmatpush1.bf16.msra.mxu1 %v19541_v61  ;;  %v19851_v61 = vld [vmem:[%s21325_s1 + $0x60] ss:$24 sps:$4 sm:$0xff]  }
 0xd5d   :  { %8994 = vmatprep.subr.bf16.mxu1 %v19547_v34  ;;  %v19858_v34 = vld [vmem:[%s21325_s1 + $0x68] ss:$24 sps:$4 sm:$0xff]   ;;  %9658 = vmatpush1.bf16.msra.mxu0 %v19851_v61 }
 0xd60   :  { %8995 = vmatpush1.bf16.msra.mxu1 %v19555_v39  ;;  %v19863_v39 = vld [vmem:[%s21325_s1 + $0x94] ss:$24 sps:$4 sm:$0xff]  }
 0xd61   :  { %8996 = vmatprep.subr.bf16.mxu1 %v19561_v25  ;;  %v19869_v25 = vld [vmem:[%s21325_s1 + $0x9c] ss:$24 sps:$4 sm:$0xff]   ;;  %9659 = vmatprep.subr.bf16.mxu0 %v19863_v39 }
 0xd64   :  { %8997 = vmatpush1.bf16.msra.mxu1 %v19569_v43  ;;  %v19875_v43 = vld [vmem:[%s21325_s1 + $0x90] ss:$24 sps:$4 sm:$0xff]  }
 0xd65   :  { %8998 = vmatprep.subr.bf16.mxu1 %v19575_v40  ;;  %v19882_v40 = vld [vmem:[%s21325_s1 + $0x98] ss:$24 sps:$4 sm:$0xff]   ;;  %9660 = vmatpush1.bf16.msra.mxu0 %v19875_v43 }
 0xd68   :  { %8999 = vmatpush1.bf16.msra.mxu1 %v19583_v17  ;;  %v19887_v17 = vld [vmem:[%s21325_s1 + $0xc4] ss:$24 sps:$4 sm:$0xff]  }
 0xd69   :  { %9000 = vmatprep.subr.bf16.mxu1 %v19589_v6  ;;  %v19893_v6 = vld [vmem:[%s21325_s1 + $0xcc] ss:$24 sps:$4 sm:$0xff]   ;;  %9661 = vmatprep.subr.bf16.mxu0 %v19887_v17 }
 0xd6c   :  { %9001 = vmatpush1.bf16.msra.mxu1 %v19597_v1  ;;  %v19899_v1 = vld [vmem:[%s21325_s1 + $0xc0] ss:$24 sps:$4 sm:$0xff]  }
 0xd6d   :  { %9002 = vmatprep.subr.bf16.mxu1 %v19603_v22  ;;  %v19906_v22 = vld [vmem:[%s21325_s1 + $0xc8] ss:$24 sps:$4 sm:$0xff]   ;;  %9662 = vmatpush1.bf16.msra.mxu0 %v19899_v1 }
 0xd6e   :  { %21775 = vst [vmem:[#allocation5_spill] sm:$0xff] %v19906_v22 }
 0xd70   :  { %9003 = vmatpush1.bf16.msra.mxu1 %v19611_v45  ;;  %v19911_v45 = vld [vmem:[%s21325_s1 + $0xf4] ss:$24 sps:$4 sm:$0xff]  }
 0xd71   :  { %9004 = vmatprep.subr.bf16.mxu1 %v19617_v31  ;;  %v19917_v31 = vld [vmem:[%s21325_s1 + $0xfc] ss:$24 sps:$4 sm:$0xff]   ;;  %9663 = vmatprep.subr.bf16.mxu0 %v19911_v45 }
 0xd72   :  { %21776 = vst [vmem:[#allocation6_spill] sm:$0xff] %v19917_v31 }
 0xd74   :  { %9005 = vmatpush1.bf16.msra.mxu1 %v19625_v37  ;;  %v19923_v37 = vld [vmem:[%s21325_s1 + $0xf0] ss:$24 sps:$4 sm:$0xff]  }
 0xd75   :  { %9006 = vmatprep.subr.bf16.mxu1 %v19631_v57  ;;  %v19930_v57 = vld [vmem:[%s21325_s1 + $0xf8] ss:$24 sps:$4 sm:$0xff]   ;;  %9664 = vmatpush1.bf16.msra.mxu0 %v19923_v37 }
 0xd76   :  { %21777 = vst [vmem:[#allocation7_spill] sm:$0xff] %v19930_v57 }
 0xd78   :  { %9007 = vmatpush1.bf16.msra.mxu1 %v19639_v11  ;;  %v19935_v11 = vld [vmem:[%s21325_s1 + $0x124] ss:$24 sps:$4 sm:$0xff]  }
 0xd79   :  { %9008 = vmatprep.subr.bf16.mxu1 %v19645_v41  ;;  %v19941_v41 = vld [vmem:[%s21325_s1 + $0x12c] ss:$24 sps:$4 sm:$0xff]   ;;  %9665 = vmatprep.subr.bf16.mxu0 %v19935_v11 }
 0xd7a   :  { %21778 = vst [vmem:[#allocation8_spill] sm:$0xff] %v19941_v41 }
 0xd7c   :  { %9009 = vmatpush1.bf16.msra.mxu1 %v19653_v55  ;;  %v19947_v55 = vld [vmem:[%s21325_s1 + $0x120] ss:$24 sps:$4 sm:$0xff]  }
 0xd7d   :  { %9010 = vmatprep.subr.bf16.mxu1 %v19659_v35  ;;  %v19954_v35 = vld [vmem:[%s21325_s1 + $0x128] ss:$24 sps:$4 sm:$0xff]   ;;  %9666 = vmatpush1.bf16.msra.mxu0 %v19947_v55 }
 0xd7e   :  { %21779 = vst [vmem:[#allocation9_spill] sm:$0xff] %v19954_v35 }
 0xd80   :  { %9011 = vmatpush1.bf16.msra.mxu1 %v19667_v33  ;;  %v19959_v33 = vld [vmem:[%s21325_s1 + $0x154] ss:$24 sps:$4 sm:$0xff]  }
 0xd81   :  { %9012 = vmatprep.subr.bf16.mxu1 %v19673_v38  ;;  %v19965_v38 = vld [vmem:[%s21325_s1 + $0x15c] ss:$24 sps:$4 sm:$0xff]   ;;  %9667 = vmatprep.subr.bf16.mxu0 %v19959_v33 }
 0xd82   :  { %21780 = vst [vmem:[#allocation10_spill] sm:$0xff] %v19965_v38 }
 0xd84   :  { %9013 = vmatpush1.bf16.msra.mxu1 %v19681_v2  ;;  %v19971_v2 = vld [vmem:[%s21325_s1 + $0x150] ss:$24 sps:$4 sm:$0xff]  }
 0xd85   :  { %9694 = vmatprep.subr.bf16.mxu1 %v19809_v53  ;;  %9668 = vmatpush1.bf16.msra.mxu0 %v19971_v2 }
 0xd86   :  { %9669 = vmatprep.subr.bf16.mxu0 %v19983_v28 }
 0xd87   :  { %9015 = vmatmul.mubr.bf16.vlgmr.msra.gmra.mrb[68].mxu1 %v8322_v20  ;;  %v20146_v20 = vld [vmem:[%s21325_s1 + $0x2a8] ss:$24 sps:$4 sm:$0xff]  }
 0xd88   :  { %9695 = vmatpush1.bf16.msra.mxu1 %v19804_v26  ;;  %21795 = vst [vmem:[#allocation25_spill] sm:$0xff] %v20146_v20 }
 0xd89   :  { %9696 = vmatprep.subr.bf16.mxu1 %v19820_v5  ;;  %9670 = vmatpush1.bf16.msra.mxu0 %v19995_v56 }
 0xd8a   :  { %9671 = vmatprep.subr.bf16.mxu0 %v20007_v54 }
 0xd8c   :  { %9697 = vmatpush1.bf16.msra.mxu1 %v19834_v8 }
 0xd8d   :  { %9698 = vmatprep.subr.bf16.mxu1 %v19845_v24  ;;  %9672 = vmatpush1.bf16.msra.mxu0 %v20014_v23 }
 0xd8e   :  { %9673 = vmatprep.subr.bf16.mxu0 %v20034_v63 }
 0xd90   :  { %9699 = vmatpush1.bf16.msra.mxu1 %v19858_v34 }
 0xd91   :  { %9700 = vmatprep.subr.bf16.mxu1 %v19869_v25  ;;  %9674 = vmatpush1.bf16.msra.mxu0 %v20039_v36 }
 0xd92   :  { %9675 = vmatprep.subr.bf16.mxu0 %v20058_v58 }
 0xd94   :  { %9701 = vmatpush1.bf16.msra.mxu1 %v19882_v40 }
 0xd95   :  { %9702 = vmatprep.subr.bf16.mxu1 %v19893_v6  ;;  %9676 = vmatpush1.bf16.msra.mxu0 %v20063_v32 }
 0xd96   :  { %9677 = vmatprep.subr.bf16.mxu0 %v20079_v59 }
 0xd98   :  { %9703 = vmatpush1.bf16.msra.mxu1 %v19906_v22 }
 0xd99   :  { %9704 = vmatprep.subr.bf16.mxu1 %v19917_v31  ;;  %9678 = vmatpush1.bf16.msra.mxu0 %v20086_v3 }
 0xd9a   :  { %9679 = vmatprep.subr.bf16.mxu0 %v20103_v13 }
 0xd9c   :  { %9705 = vmatpush1.bf16.msra.mxu1 %v19930_v57 }
 0xd9d   :  { %9706 = vmatprep.subr.bf16.mxu1 %v19941_v41  ;;  %9680 = vmatpush1.bf16.msra.mxu0 %v20115_v51 }
 0xd9e   :  { %9681 = vmatprep.subr.bf16.mxu0 %v20127_v27 }
 0xda0   :  { %9707 = vmatpush1.bf16.msra.mxu1 %v19954_v35 }
 0xda1   :  { %9708 = vmatprep.subr.bf16.mxu1 %v19965_v38  ;;  %9682 = vmatpush1.bf16.msra.mxu0 %v20139_v62 }
 0xda4   :  { %9709 = vmatpush1.bf16.msra.mxu1 %v19978_v0 }
 0xda5   :  { %9710 = vmatprep.subr.bf16.mxu1 %v19989_v21 }
 0xda8   :  { %9711 = vmatpush1.bf16.msra.mxu1 %v20002_v46  ;;  %v13267_v46 = vld [vmem:[%s21326_s0 + $0x218] sm:$0xff] }
 0xda9   :  { %9712 = vmatprep.subr.bf16.mxu1 %v20022_v49 }
 0xdac   :  { %9713 = vmatpush1.bf16.msra.mxu1 %v20027_v10 }
 0xdad   :  { %9714 = vmatprep.subr.bf16.mxu1 %v20044_v4 }
 0xdb0   :  { %9715 = vmatpush1.bf16.msra.mxu1 %v20050_v30 }
 0xdb1   :  { %9716 = vmatprep.subr.bf16.mxu1 %v20068_v14 }
 0xdb4   :  { %9717 = vmatpush1.bf16.msra.mxu1 %v20074_v9 }
 0xdb5   :  { %9718 = vmatprep.subr.bf16.mxu1 %v20091_v48  ;;  %v20178_v48 = vld [vmem:[%s21325_s1 + $0x14] ss:$24 sps:$4 sm:$0xff]  }
 0xdb8   :  { %9719 = vmatpush1.bf16.msra.mxu1 %v20098_v60  ;;  %v20157_v60 = vld [vmem:[%s21325_s1 + $0x2dc] ss:$24 sps:$4 sm:$0xff]  }
 0xdb9   :  { %9720 = vmatprep.subr.bf16.mxu1 %v20109_v12  ;;  %v20151_v12 = vld [vmem:[%s21325_s1 + $0x2d4] ss:$24 sps:$4 sm:$0xff]   ;;  %21796 = vst [vmem:[#allocation26_spill] sm:$0xff] %v20157_v60 }
 0xdba   :  { %9683 = vmatprep.subr.bf16.mxu0 %v20151_v12 }
 0xdbc   :  { %9721 = vmatpush1.bf16.msra.mxu1 %v20122_v47  ;;  %v20163_v47 = vld [vmem:[%s21325_s1 + $0x2d0] ss:$24 sps:$4 sm:$0xff]  }
 0xdbd   :  { %9722 = vmatprep.subr.bf16.mxu1 %v20133_v42  ;;  %v20170_v42 = vld [vmem:[%s21325_s1 + $0x2d8] ss:$24 sps:$4 sm:$0xff]   ;;  %9684 = vmatpush1.bf16.msra.mxu0 %v20163_v47 }
 0xdbe   :  { %21797 = vst [vmem:[#allocation27_spill] sm:$0xff] %v20170_v42  ;;  %9735 = vmatprep.subr.bf16.mxu0 %v20178_v48 }
 0xdc0   :  { %9723 = vmatpush1.bf16.msra.mxu1 %v20146_v20 }
 0xdc1   :  { %9724 = vmatprep.subr.bf16.mxu1 %v20157_v60 }
 0xdc4   :  { %9725 = vmatpush1.bf16.msra.mxu1 %v20170_v42  ;;  %v13266_v42 = vld [vmem:[%s21326_s0 + $0x210] sm:$0xff] }
 0xdc5   :  { %10406 = vmatprep.subr.bf16.mxu1 %v19799_v7 }
 0xe1a   :  { %v8934_v20 = vpop.f32.mrb[64].mxu1  ;;  %v8975_v9 = vpop.f32.mrb[68].mxu0 }
 0xe1b   :  { %v8936_v14 = vpop.f32.mrb[65].mxu1  ;;  %v8977_v30 = vpop.f32.mrb[69].mxu0  ;;  %v9023_v21 = vadd.f32 %v13266_v42, %v8934_v20 }
 0xe1c   :  { %v8938_v4 = vpop.f32.mrb[66].mxu1  ;;  %v8979_v10 = vpop.f32.mrb[70].mxu0  ;;  %v9024_v7 = vadd.f32 %v13267_v46, %v8936_v14 }
 0xe1d   :  { %v8939_v60 = vpop.f32.mrb[67].mxu1  ;;  %v8980_v49 = vpop.f32.mrb[71].mxu0  ;;  %v13368_v0 = vmul.f32 -1.442695, %v9023_v21  ;;  %v13268_v10 = vld [vmem:[%s21326_s0 + $0x220] sm:$0xff] }
 0xe1e   :  { %v13369_v38 = vmul.f32 -1.442695, %v9024_v7  ;;  %v13269_v49 = vld [vmem:[%s21326_s0 + $0x228] sm:$0xff]  ;;  %v9037_v4 = vadd.f32 %v13268_v10, %v8975_v9 }
 0xe1f   :  { %15179 = vpow2.f32 %v13368_v0  ;;  %v9038_v60 = vadd.f32 %v13269_v49, %v8977_v30  ;;  %v13270_v30 = vld [vmem:[%s21326_s0 + $0x230] sm:$0xff] }
 0xe20   :  { %15181 = vpow2.f32 %v13369_v38  ;;  %v13370_v57 = vmul.f32 -1.442695, %v9037_v4 }
 0xe21   :  { %v13371_v31 = vmul.f32 -1.442695, %v9038_v60 }
 0xe22   :  { %15183 = vpow2.f32 %v13370_v57 }
 0xe23   :  { %15185 = vpow2.f32 %v13371_v31  ;;  %v13271_v31 = vld [vmem:[%s21326_s0 + $0x238] sm:$0xff] }
 0xe29   :  { %v15180_v35 = vpop.eup %15179 }
 0xe2a   :  { %v15182_v41 = vpop.eup %15181  ;;  %v9031_v42 = vadd.f32 1.0, %v15180_v35 }
 0xe2b   :  { %v9032_v46 = vadd.f32 1.0, %v15182_v41 }
 0xe2c   :  { %15187 = vrcp.f32 %v9031_v42  ;;  %v15184_v38 = vpop.eup %15183 }
 0xe2d   :  { %15189 = vrcp.f32 %v9032_v46  ;;  %v15186_v21 = vpop.eup %15185  ;;  %v9045_v4 = vadd.f32 1.0, %v15184_v38 }
 0xe2e   :  { %v9046_v42 = vadd.f32 1.0, %v15186_v21  ;;  %v20244_v21 = vld [vmem:[%s21325_s1 + $0x74] ss:$24 sps:$4 sm:$0xff]  }
 0xe36   :  { %v15188_v7 = vpop.eup %15187 }
 0xe37   :  { %v15190_v35 = vpop.eup %15189 }
 0xe5a   :  { %v9016_v0 = vpop.f32.mrb[68].mxu1 }
 0xe5b   :  { %v9051_v14 = vadd.f32 %v9016_v0, %v21773_v16  ;;  %v9018_v20 = vpop.f32.mrb[69].mxu1 }
 0xe5c   :  { %v9052_v9 = vadd.f32 %v9018_v20, %v21774_v44  ;;  %v9020_v10 = vpop.f32.mrb[70].mxu1 }
 0xe5d   :  { %v9053_v41 = vmul.f32 %v15188_v7, %v9051_v14  ;;  %v9021_v57 = vpop.f32.mrb[71].mxu1 }
 0xe5e   :  { %v9054_v49 = vmul.f32 %v15190_v35, %v9052_v9  ;;  %v20258_v9 = vld [vmem:[%s21325_s1 + $0xa4] ss:$24 sps:$4 sm:$0xff]   ;;  %v21814_v35 = vld [vmem:[#allocation21_spill] sm:$0xff] }
 0xe5f   :  { %v9055_v60 = vadd.f32 %v13270_v30, %v9053_v41  ;;  %v20252_v30 = vld [vmem:[%s21325_s1 + $0x70] ss:$24 sps:$4 sm:$0xff]   ;;  %v21815_v41 = vld [vmem:[#allocation22_spill] sm:$0xff] }
 0xe60   :  { %v9056_v46 = vadd.f32 %v13271_v31, %v9054_v49  ;;  %v21816_v31 = vld [vmem:[#allocation23_spill] sm:$0xff]  ;;  %v21817_v49 = vld [vmem:[#allocation24_spill] sm:$0xff] }
 0xe61   :  { %15191 = vtanh.f32 %v9055_v60  ;;  %v21819_v60 = vld [vmem:[#allocation26_spill] sm:$0xff] }
 0xe62   :  { %15193 = vtanh.f32 %v9056_v46 }
 0xe63   :  { %15195 = vrcp.f32 %v9045_v4  ;;  %v21818_v4 = vld [vmem:[#allocation25_spill] sm:$0xff] }
 0xe64   :  { %15197 = vrcp.f32 %v9046_v42  ;;  %v21820_v42 = vld [vmem:[#allocation27_spill] sm:$0xff] }
 0xe6b   :  { %v15192_v0 = vpop.eup %15191 }
 0xe6c   :  { %v15194_v16 = vpop.eup %15193  ;;  %v9059_v20 = vsub.f32 %v19744_v50, %v15192_v0 }
 0xe6d   :  { %v15196_v10 = vpop.eup %15195  ;;  %v9060_v14 = vsub.f32 %v19746_v15, %v15194_v16  ;;  %v20230_v15 = vld [vmem:[%s21325_s1 + $0x44] ss:$24 sps:$4 sm:$0xff]  }
 0xe6e   :  { %v15198_v7 = vpop.eup %15197  ;;  %v9061_v44 = vmul.f32 %v15196_v10, %v9059_v20 }
 0xe6f   :  { %v9062_v22 = vmul.f32 %v15198_v7, %v9060_v14 }
 0xe70   :  { %v20204_v57 = vadd.f32 %v15192_v0, %v9061_v44  ;;  %v20221_v44 = vld [vmem:[%s21325_s1 + $0x10] ss:$24 sps:$4 sm:$0xff]  }
 0xe71   :  { %v20206_v38 = vadd.f32 %v15194_v16, %v9062_v22  ;;  %v20238_v22 = vld [vmem:[%s21325_s1 + $0x40] ss:$24 sps:$4 sm:$0xff]  }
 0xe72   :  { %13372 = vst [vmem:[%s21328_s3 + $0xb0] sm:$0xff] %v20204_v57  ;;  %v20225_v16 = vpack.c.bf16 %v20204_v57, %v20204_v57 }
 0xe73   :  { %13373 = vst [vmem:[%s21328_s3 + $0xb8] sm:$0xff] %v20206_v38  ;;  %v9076_v50 = vpack.c.bf16 %v20206_v38, %v20206_v38 }
 0xe75   :  { %9685 = vmatprep.mubr.bf16.mxu0 %v9076_v50  ;;  %9726 = vmatprep.mubr.bf16.mxu1 %v9076_v50 }
 0xe76   :  { %9686 = vmatmul.mubr.bf16.vlgmr.msra.gmra.mrb[72].mxu0 %v20225_v16  ;;  %9727 = vmatmul.mubr.bf16.vlgmr.msra.gmra.mrb[72].mxu1 %v20225_v16 }
 0xe77   :  { %9736 = vmatpush1.bf16.msra.mxu0 %v20221_v44  ;;  %9767 = vmatprep.mubr.bf16.mxu0 %v9076_v50 }
 0xe78   :  { %9737 = vmatprep.subr.bf16.mxu0 %v20230_v15  ;;  %10407 = vmatpush1.bf16.msra.mxu1 %v19794_v29  ;;  %v20266_v29 = vld [vmem:[%s21325_s1 + $0xa0] ss:$24 sps:$4 sm:$0xff]  }
 0xe79   :  { %10408 = vmatprep.subr.bf16.mxu1 %v19814_v19  ;;  %v20272_v19 = vld [vmem:[%s21325_s1 + $0xd4] ss:$24 sps:$4 sm:$0xff]  }
 0xe7b   :  { %9738 = vmatpush1.bf16.msra.mxu0 %v20238_v22 }
 0xe7c   :  { %9739 = vmatprep.subr.bf16.mxu0 %v20244_v21  ;;  %10409 = vmatpush1.bf16.msra.mxu1 %v19827_v18  ;;  %v20280_v18 = vld [vmem:[%s21325_s1 + $0xd0] ss:$24 sps:$4 sm:$0xff]  }
 0xe7d   :  { %10410 = vmatprep.subr.bf16.mxu1 %v19839_v52  ;;  %v20286_v52 = vld [vmem:[%s21325_s1 + $0x104] ss:$24 sps:$4 sm:$0xff]  }
 0xe7f   :  { %9740 = vmatpush1.bf16.msra.mxu0 %v20252_v30 }
 0xe80   :  { %9741 = vmatprep.subr.bf16.mxu0 %v20258_v9  ;;  %10411 = vmatpush1.bf16.msra.mxu1 %v19851_v61  ;;  %v20294_v61 = vld [vmem:[%s21325_s1 + $0x100] ss:$24 sps:$4 sm:$0xff]  }
 0xe81   :  { %10412 = vmatprep.subr.bf16.mxu1 %v19863_v39  ;;  %v20300_v39 = vld [vmem:[%s21325_s1 + $0x134] ss:$24 sps:$4 sm:$0xff]  }
 0xe83   :  { %9742 = vmatpush1.bf16.msra.mxu0 %v20266_v29 }
 0xe84   :  { %9743 = vmatprep.subr.bf16.mxu0 %v20272_v19  ;;  %10413 = vmatpush1.bf16.msra.mxu1 %v19875_v43  ;;  %v20308_v43 = vld [vmem:[%s21325_s1 + $0x130] ss:$24 sps:$4 sm:$0xff]  }
 0xe85   :  { %10414 = vmatprep.subr.bf16.mxu1 %v19887_v17  ;;  %v20314_v17 = vld [vmem:[%s21325_s1 + $0x164] ss:$24 sps:$4 sm:$0xff]  }
 0xe87   :  { %9744 = vmatpush1.bf16.msra.mxu0 %v20280_v18 }
 0xe88   :  { %9745 = vmatprep.subr.bf16.mxu0 %v20286_v52  ;;  %10415 = vmatpush1.bf16.msra.mxu1 %v19899_v1  ;;  %v20322_v1 = vld [vmem:[%s21325_s1 + $0x160] ss:$24 sps:$4 sm:$0xff]  }
 0xe89   :  { %10416 = vmatprep.subr.bf16.mxu1 %v19911_v45  ;;  %v20328_v45 = vld [vmem:[%s21325_s1 + $0x194] ss:$24 sps:$4 sm:$0xff]  }
 0xe8b   :  { %9746 = vmatpush1.bf16.msra.mxu0 %v20294_v61 }
 0xe8c   :  { %9747 = vmatprep.subr.bf16.mxu0 %v20300_v39  ;;  %10417 = vmatpush1.bf16.msra.mxu1 %v19923_v37  ;;  %v20336_v37 = vld [vmem:[%s21325_s1 + $0x190] ss:$24 sps:$4 sm:$0xff]  }
 0xe8d   :  { %10418 = vmatprep.subr.bf16.mxu1 %v19935_v11  ;;  %v20342_v11 = vld [vmem:[%s21325_s1 + $0x1c4] ss:$24 sps:$4 sm:$0xff]  }
 0xe8f   :  { %9748 = vmatpush1.bf16.msra.mxu0 %v20308_v43 }
 0xe90   :  { %9749 = vmatprep.subr.bf16.mxu0 %v20314_v17  ;;  %10419 = vmatpush1.bf16.msra.mxu1 %v19947_v55  ;;  %v20350_v55 = vld [vmem:[%s21325_s1 + $0x1c0] ss:$24 sps:$4 sm:$0xff]  }
 0xe91   :  { %10420 = vmatprep.subr.bf16.mxu1 %v19959_v33  ;;  %v20356_v33 = vld [vmem:[%s21325_s1 + $0x1f4] ss:$24 sps:$4 sm:$0xff]  }
 0xe93   :  { %9750 = vmatpush1.bf16.msra.mxu0 %v20322_v1 }
 0xe94   :  { %9751 = vmatprep.subr.bf16.mxu0 %v20328_v45  ;;  %10421 = vmatpush1.bf16.msra.mxu1 %v19971_v2  ;;  %v20364_v2 = vld [vmem:[%s21325_s1 + $0x1f0] ss:$24 sps:$4 sm:$0xff]  }
 0xe95   :  { %10422 = vmatprep.subr.bf16.mxu1 %v19983_v28  ;;  %v20370_v28 = vld [vmem:[%s21325_s1 + $0x224] ss:$24 sps:$4 sm:$0xff]  }
 0xe97   :  { %9752 = vmatpush1.bf16.msra.mxu0 %v20336_v37 }
 0xe98   :  { %9753 = vmatprep.subr.bf16.mxu0 %v20342_v11  ;;  %10423 = vmatpush1.bf16.msra.mxu1 %v19995_v56  ;;  %v20378_v56 = vld [vmem:[%s21325_s1 + $0x220] ss:$24 sps:$4 sm:$0xff]  }
 0xe99   :  { %10424 = vmatprep.subr.bf16.mxu1 %v20007_v54  ;;  %v20384_v54 = vld [vmem:[%s21325_s1 + $0x254] ss:$24 sps:$4 sm:$0xff]  }
 0xe9b   :  { %9754 = vmatpush1.bf16.msra.mxu0 %v20350_v55 }
 0xe9c   :  { %9755 = vmatprep.subr.bf16.mxu0 %v20356_v33  ;;  %10425 = vmatpush1.bf16.msra.mxu1 %v20014_v23  ;;  %v20392_v23 = vld [vmem:[%s21325_s1 + $0x250] ss:$24 sps:$4 sm:$0xff]  }
 0xe9d   :  { %10426 = vmatprep.subr.bf16.mxu1 %v20034_v63  ;;  %v20398_v63 = vld [vmem:[%s21325_s1 + $0x284] ss:$24 sps:$4 sm:$0xff]  }
 0xe9f   :  { %9756 = vmatpush1.bf16.msra.mxu0 %v20364_v2 }
 0xea0   :  { %9757 = vmatprep.subr.bf16.mxu0 %v20370_v28  ;;  %10427 = vmatpush1.bf16.msra.mxu1 %v20039_v36  ;;  %v20406_v36 = vld [vmem:[%s21325_s1 + $0x280] ss:$24 sps:$4 sm:$0xff]  }
 0xea1   :  { %10428 = vmatprep.subr.bf16.mxu1 %v20058_v58  ;;  %v20412_v58 = vld [vmem:[%s21325_s1 + $0x2b4] ss:$24 sps:$4 sm:$0xff]  }
 0xea3   :  { %9758 = vmatpush1.bf16.msra.mxu0 %v20378_v56 }
 0xea4   :  { %9759 = vmatprep.subr.bf16.mxu0 %v20384_v54  ;;  %10429 = vmatpush1.bf16.msra.mxu1 %v20063_v32  ;;  %v20420_v32 = vld [vmem:[%s21325_s1 + $0x2b0] ss:$24 sps:$4 sm:$0xff]  }
 0xea5   :  { %10430 = vmatprep.subr.bf16.mxu1 %v20079_v59  ;;  %v20426_v59 = vld [vmem:[%s21325_s1 + $0x2e4] ss:$24 sps:$4 sm:$0xff]  }
 0xea7   :  { %9760 = vmatpush1.bf16.msra.mxu0 %v20392_v23 }
 0xea8   :  { %9761 = vmatprep.subr.bf16.mxu0 %v20398_v63  ;;  %10431 = vmatpush1.bf16.msra.mxu1 %v20086_v3  ;;  %v20434_v3 = vld [vmem:[%s21325_s1 + $0x2e0] ss:$24 sps:$4 sm:$0xff]  }
 0xea9   :  { %10432 = vmatprep.subr.bf16.mxu1 %v20103_v13  ;;  %v21800_v13 = vld [vmem:[#allocation7_spill] sm:$0xff] }
 0xeab   :  { %9762 = vmatpush1.bf16.msra.mxu0 %v20406_v36 }
 0xeac   :  { %9763 = vmatprep.subr.bf16.mxu0 %v20412_v58  ;;  %10433 = vmatpush1.bf16.msra.mxu1 %v20115_v51  ;;  %v21810_v51 = vld [vmem:[#allocation17_spill] sm:$0xff] }
 0xead   :  { %10434 = vmatprep.subr.bf16.mxu1 %v20127_v27  ;;  %v21812_v27 = vld [vmem:[#allocation19_spill] sm:$0xff] }
 0xeaf   :  { %9764 = vmatpush1.bf16.msra.mxu0 %v20420_v32 }
 0xeb0   :  { %9765 = vmatprep.subr.bf16.mxu0 %v20426_v59  ;;  %10435 = vmatpush1.bf16.msra.mxu1 %v20139_v62  ;;  %v21813_v62 = vld [vmem:[#allocation20_spill] sm:$0xff] }
 0xeb1   :  { %10436 = vmatprep.subr.bf16.mxu1 %v20151_v12  ;;  %v21809_v12 = vld [vmem:[#allocation16_spill] sm:$0xff] }
 0xeb3   :  { %9766 = vmatpush1.bf16.msra.mxu0 %v20434_v3 }
 0xeb4   :  { %10447 = vmatprep.subr.bf16.mxu0 %v19809_v53  ;;  %10437 = vmatpush1.bf16.msra.mxu1 %v20163_v47  ;;  %v21798_v53 = vld [vmem:[#allocation5_spill] sm:$0xff]  ;;  %v21811_v47 = vld [vmem:[#allocation18_spill] sm:$0xff] }
 0xeb5   :  { %10488 = vmatprep.subr.bf16.mxu1 %v20178_v48  ;;  %v21799_v48 = vld [vmem:[#allocation6_spill] sm:$0xff] }
 0xeb6   :  { %9768 = vmatmul.mubr.bf16.vlgmr.msra.gmra.mrb[76].mxu0 %v20225_v16 }
 0xeb7   :  { %10448 = vmatpush1.bf16.msra.mxu0 %v19804_v26  ;;  %v21801_v26 = vld [vmem:[#allocation8_spill] sm:$0xff] }
 0xeb8   :  { %10449 = vmatprep.subr.bf16.mxu0 %v19820_v5  ;;  %v21802_v5 = vld [vmem:[#allocation9_spill] sm:$0xff] }
 0xebb   :  { %10450 = vmatpush1.bf16.msra.mxu0 %v19834_v8  ;;  %v21803_v8 = vld [vmem:[#allocation10_spill] sm:$0xff] }
 0xebc   :  { %10451 = vmatprep.subr.bf16.mxu0 %v19845_v24  ;;  %v21804_v24 = vld [vmem:[#allocation11_spill] sm:$0xff] }
 0xebf   :  { %10452 = vmatpush1.bf16.msra.mxu0 %v19858_v34  ;;  %v21805_v34 = vld [vmem:[#allocation12_spill] sm:$0xff] }
 0xec0   :  { %10453 = vmatprep.subr.bf16.mxu0 %v19869_v25  ;;  %v21806_v25 = vld [vmem:[#allocation13_spill] sm:$0xff] }
 0xec3   :  { %10454 = vmatpush1.bf16.msra.mxu0 %v19882_v40  ;;  %v21807_v40 = vld [vmem:[#allocation14_spill] sm:$0xff] }
 0xec4   :  { %10455 = vmatprep.subr.bf16.mxu0 %v19893_v6  ;;  %v21808_v6 = vld [vmem:[#allocation15_spill] sm:$0xff] }
 0xec7   :  { %10456 = vmatpush1.bf16.msra.mxu0 %v21798_v53  ;;  %v13374_v53 = vld [vmem:[%s21326_s0 + $0x240] sm:$0xff] }
 0xec8   :  { %10457 = vmatprep.subr.bf16.mxu0 %v21799_v48  ;;  %v13375_v48 = vld [vmem:[%s21326_s0 + $0x248] sm:$0xff] }
 0xecb   :  { %10458 = vmatpush1.bf16.msra.mxu0 %v21800_v13 }
 0xecc   :  { %10459 = vmatprep.subr.bf16.mxu0 %v21801_v26 }
 0xecf   :  { %10460 = vmatpush1.bf16.msra.mxu0 %v21802_v5 }
 0xed0   :  { %10461 = vmatprep.subr.bf16.mxu0 %v21803_v8 }
 0xed3   :  { %10462 = vmatpush1.bf16.msra.mxu0 %v21804_v24  ;;  %v13376_v24 = vld [vmem:[%s21326_s0 + $0x250] sm:$0xff] }
 0xed4   :  { %10463 = vmatprep.subr.bf16.mxu0 %v21805_v34  ;;  %v13377_v34 = vld [vmem:[%s21326_s0 + $0x258] sm:$0xff] }
 0xed7   :  { %10464 = vmatpush1.bf16.msra.mxu0 %v21806_v25 }
 0xed8   :  { %10465 = vmatprep.subr.bf16.mxu0 %v21807_v40 }
 0xedb   :  { %10466 = vmatpush1.bf16.msra.mxu0 %v21808_v6 }
 0xedc   :  { %10467 = vmatprep.subr.bf16.mxu0 %v21809_v12 }
 0xedf   :  { %10468 = vmatpush1.bf16.msra.mxu0 %v21810_v51 }
 0xee0   :  { %10469 = vmatprep.subr.bf16.mxu0 %v21811_v47 }
 0xee3   :  { %10470 = vmatpush1.bf16.msra.mxu0 %v21812_v27 }
 0xee4   :  { %10471 = vmatprep.subr.bf16.mxu0 %v21813_v62 }
 0xee7   :  { %10472 = vmatpush1.bf16.msra.mxu0 %v21814_v35 }
 0xee8   :  { %10473 = vmatprep.subr.bf16.mxu0 %v21815_v41 }
 0xeeb   :  { %10474 = vmatpush1.bf16.msra.mxu0 %v21816_v31 }
 0xeec   :  { %10475 = vmatprep.subr.bf16.mxu0 %v21817_v49  ;;  %v21821_v49 = vld [vmem:[#allocation3_spill] sm:$0xff] }
 0xeef   :  { %10476 = vmatpush1.bf16.msra.mxu0 %v21818_v4 }
 0xef0   :  { %10477 = vmatprep.subr.bf16.mxu0 %v21819_v60 }
 0xef3   :  { %10478 = vmatpush1.bf16.msra.mxu0 %v21820_v42 }
 0xf49   :  { %v9687_v46 = vpop.f32.mrb[72].mxu0  ;;  %v9728_v0 = vpop.f32.mrb[72].mxu1 }
 0xf4a   :  { %v9689_v20 = vpop.f32.mrb[73].mxu0  ;;  %v9730_v10 = vpop.f32.mrb[73].mxu1  ;;  %v9776_v13 = vadd.f32 %v13374_v53, %v9687_v46  ;;  %v9790_v25 = vadd.f32 %v13376_v24, %v9728_v0  ;;  %v13378_v46 = vld [vmem:[%s21326_s0 + $0x260] sm:$0xff]  ;;  %v21822_v0 = vld [vmem:[#allocation4_spill] sm:$0xff] }
 0xf4b   :  { %v9691_v14 = vpop.f32.mrb[74].mxu0  ;;  %v9732_v7 = vpop.f32.mrb[74].mxu1  ;;  %v9777_v26 = vadd.f32 %v13375_v48, %v9689_v20  ;;  %v9791_v40 = vadd.f32 %v13377_v34, %v9730_v10 }
 0xf4c   :  { %v9692_v50 = vpop.f32.mrb[75].mxu0  ;;  %v9733_v16 = vpop.f32.mrb[75].mxu1  ;;  %v13476_v5 = vmul.f32 -1.442695, %v9776_v13  ;;  %v13478_v51 = vmul.f32 -1.442695, %v9790_v25 }
 0xf4d   :  { %v13477_v8 = vmul.f32 -1.442695, %v9777_v26  ;;  %v13479_v47 = vmul.f32 -1.442695, %v9791_v40  ;;  %v13379_v50 = vld [vmem:[%s21326_s0 + $0x268] sm:$0xff] }
 0xf4e   :  { %15199 = vpow2.f32 %v13476_v5 }
 0xf4f   :  { %15201 = vpow2.f32 %v13477_v8 }
 0xf50   :  { %15203 = vpow2.f32 %v13478_v51 }
 0xf51   :  { %15205 = vpow2.f32 %v13479_v47 }
 0xf58   :  { %v15200_v6 = vpop.eup %15199 }
 0xf59   :  { %v15202_v12 = vpop.eup %15201  ;;  %v9784_v27 = vadd.f32 1.0, %v15200_v6 }
 0xf5a   :  { %v9785_v62 = vadd.f32 1.0, %v15202_v12  ;;  %v15204_v35 = vpop.eup %15203 }
 0xf5b   :  { %15207 = vrcp.f32 %v9784_v27  ;;  %v15206_v31 = vpop.eup %15205  ;;  %v9798_v48 = vadd.f32 1.0, %v15204_v35  ;;  %v20736_v35 = vld [vmem:[%s21325_s1 + $0x184] ss:$24 sps:$4 sm:$0xff]  }
 0xf5c   :  { %15209 = vrcp.f32 %v9785_v62  ;;  %v9799_v26 = vadd.f32 1.0, %v15206_v31  ;;  %v20731_v62 = vld [vmem:[%s21325_s1 + $0x158] ss:$24 sps:$4 sm:$0xff]  }
 0xf5d   :  { %21829 = vst [vmem:[#allocation11_spill] sm:$0xff] %v20731_v62  ;;  %v20748_v31 = vld [vmem:[%s21325_s1 + $0x180] ss:$24 sps:$4 sm:$0xff]  }
 0xf65   :  { %v15208_v42 = vpop.eup %15207 }
 0xf66   :  { %v15210_v14 = vpop.eup %15209 }
 0xf89   :  { %v9769_v41 = vpop.f32.mrb[76].mxu0 }
 0xf8a   :  { %v9804_v4 = vadd.f32 %v9769_v41, %v21821_v49  ;;  %v9771_v60 = vpop.f32.mrb[77].mxu0  ;;  %v20742_v41 = vld [vmem:[%s21325_s1 + $0x18c] ss:$24 sps:$4 sm:$0xff]  }
 0xf8b   :  { %v9805_v20 = vadd.f32 %v9771_v60, %v21822_v0  ;;  %v9773_v10 = vpop.f32.mrb[78].mxu0  ;;  %21830 = vst [vmem:[#allocation12_spill] sm:$0xff] %v20742_v41  ;;  %v20760_v60 = vld [vmem:[%s21325_s1 + $0x1b4] ss:$24 sps:$4 sm:$0xff]  }
 0xf8c   :  { %v9806_v7 = vmul.f32 %v15208_v42, %v9804_v4  ;;  %v9774_v16 = vpop.f32.mrb[79].mxu0  ;;  %v20755_v4 = vld [vmem:[%s21325_s1 + $0x188] ss:$24 sps:$4 sm:$0xff]   ;;  %v20787_v10 = vld [vmem:[%s21325_s1 + $0x1e4] ss:$24 sps:$4 sm:$0xff]  }
 0xf8d   :  { %v9807_v53 = vmul.f32 %v15210_v14, %v9805_v20  ;;  %21831 = vst [vmem:[#allocation13_spill] sm:$0xff] %v20755_v4  ;;  %v20767_v42 = vld [vmem:[%s21325_s1 + $0x1b0] ss:$24 sps:$4 sm:$0xff]   ;;  %v20792_v14 = vld [vmem:[%s21325_s1 + $0x1e0] ss:$24 sps:$4 sm:$0xff]  }
 0xf8e   :  { %v9808_v13 = vadd.f32 %v13378_v46, %v9806_v7  ;;  %v20775_v46 = vld [vmem:[%s21325_s1 + $0x1bc] ss:$24 sps:$4 sm:$0xff]   ;;  %v20780_v20 = vld [vmem:[%s21325_s1 + $0x1b8] ss:$24 sps:$4 sm:$0xff]   ;;  %v20797_v7 = vld [vmem:[%s21325_s1 + $0x1ec] ss:$24 sps:$4 sm:$0xff]  }
 0xf8f   :  { %v9809_v5 = vadd.f32 %v13379_v50, %v9807_v53  ;;  %21832 = vst [vmem:[#allocation14_spill] sm:$0xff] %v20775_v46  ;;  %21833 = vst [vmem:[#allocation15_spill] sm:$0xff] %v20780_v20  ;;  %v20803_v50 = vld [vmem:[%s21325_s1 + $0x1e8] ss:$24 sps:$4 sm:$0xff]   ;;  %v20811_v16 = vld [vmem:[%s21325_s1 + $0x214] ss:$24 sps:$4 sm:$0xff]  }
 0xf90   :  { %15211 = vtanh.f32 %v9808_v13  ;;  %21834 = vst [vmem:[#allocation16_spill] sm:$0xff] %v20797_v7  ;;  %21835 = vst [vmem:[#allocation17_spill] sm:$0xff] %v20803_v50  ;;  %v20816_v53 = vld [vmem:[%s21325_s1 + $0x210] ss:$24 sps:$4 sm:$0xff]  }
 0xf91   :  { %15213 = vtanh.f32 %v9809_v5  ;;  %v20827_v13 = vld [vmem:[%s21325_s1 + $0x218] ss:$24 sps:$4 sm:$0xff]  }
 0xf92   :  { %15215 = vrcp.f32 %v9798_v48  ;;  %v20821_v48 = vld [vmem:[%s21325_s1 + $0x21c] ss:$24 sps:$4 sm:$0xff]   ;;  %21837 = vst [vmem:[#allocation19_spill] sm:$0xff] %v20827_v13  ;;  %v20839_v5 = vld [vmem:[%s21325_s1 + $0x240] ss:$24 sps:$4 sm:$0xff]  }
 0xf93   :  { %15217 = vrcp.f32 %v9799_v26  ;;  %21836 = vst [vmem:[#allocation18_spill] sm:$0xff] %v20821_v48  ;;  %v20832_v26 = vld [vmem:[%s21325_s1 + $0x244] ss:$24 sps:$4 sm:$0xff]  }
 0xf9a   :  { %v15212_v8 = vpop.eup %15211 }
 0xf9b   :  { %v15214_v24 = vpop.eup %15213  ;;  %v9812_v34 = vsub.f32 %v20204_v57, %v15212_v8 }
 0xf9c   :  { %v15216_v25 = vpop.eup %15215  ;;  %v9813_v40 = vsub.f32 %v20206_v38, %v15214_v24 }
 0xf9d   :  { %v15218_v6 = vpop.eup %15217  ;;  %v9814_v12 = vmul.f32 %v15216_v25, %v9812_v34  ;;  %v20856_v34 = vld [vmem:[%s21325_s1 + $0x274] ss:$24 sps:$4 sm:$0xff]  }
 0xf9e   :  { %v9815_v51 = vmul.f32 %v15218_v6, %v9813_v40  ;;  %v20862_v25 = vld [vmem:[%s21325_s1 + $0x27c] ss:$24 sps:$4 sm:$0xff]   ;;  %v20868_v40 = vld [vmem:[%s21325_s1 + $0x270] ss:$24 sps:$4 sm:$0xff]  }
 0xf9f   :  { %v20497_v47 = vadd.f32 %v15212_v8, %v9814_v12  ;;  %v20844_v8 = vld [vmem:[%s21325_s1 + $0x24c] ss:$24 sps:$4 sm:$0xff]   ;;  %21840 = vst [vmem:[#allocation22_spill] sm:$0xff] %v20862_v25  ;;  %v20875_v6 = vld [vmem:[%s21325_s1 + $0x278] ss:$24 sps:$4 sm:$0xff]  }
 0xfa0   :  { %v20499_v27 = vadd.f32 %v15214_v24, %v9815_v51  ;;  %21838 = vst [vmem:[#allocation20_spill] sm:$0xff] %v20844_v8  ;;  %v20851_v24 = vld [vmem:[%s21325_s1 + $0x248] ss:$24 sps:$4 sm:$0xff]   ;;  %21841 = vst [vmem:[#allocation23_spill] sm:$0xff] %v20875_v6  ;;  %v20880_v12 = vld [vmem:[%s21325_s1 + $0x2a4] ss:$24 sps:$4 sm:$0xff]  }
 0xfa1   :  { %13480 = vst [vmem:[%s21328_s3 + $0xc0] sm:$0xff] %v20497_v47  ;;  %v9828_v38 = vpack.c.bf16 %v20497_v47, %v20497_v47  ;;  %21839 = vst [vmem:[#allocation21_spill] sm:$0xff] %v20851_v24  ;;  %v20886_v51 = vld [vmem:[%s21325_s1 + $0x2ac] ss:$24 sps:$4 sm:$0xff]  }
 0xfa2   :  { %13481 = vst [vmem:[%s21328_s3 + $0xc8] sm:$0xff] %v20499_v27  ;;  %v9829_v57 = vpack.c.bf16 %v20499_v27, %v20499_v27  ;;  %21842 = vst [vmem:[#allocation24_spill] sm:$0xff] %v20886_v51 }
 0xfa4   :  { %10438 = vmatprep.mubr.bf16.mxu1 %v9829_v57  ;;  %10479 = vmatprep.mubr.bf16.mxu0 %v9829_v57 }
 0xfa5   :  { %10439 = vmatmul.mubr.bf16.vlgmr.msra.gmra.mrb[76].mxu1 %v9828_v38  ;;  %10480 = vmatmul.mubr.bf16.vlgmr.msra.gmra.mrb[80].mxu0 %v9828_v38 }
 0xfa6   :  { %10489 = vmatpush1.bf16.msra.mxu1 %v20221_v44  ;;  %10520 = vmatprep.mubr.bf16.mxu1 %v9829_v57  ;;  %v20547_v44 = vld [vmem:[%s21325_s1] ss:$24 sps:$4 sm:$0xff]  }
 0xfa7   :  { %10490 = vmatprep.subr.bf16.mxu1 %v20230_v15  ;;  %v20552_v15 = vld [vmem:[%s21325_s1 + $0x4] ss:$24 sps:$4 sm:$0xff]   ;;  %v20892_v57 = vld [vmem:[%s21325_s1 + $0x2a0] ss:$24 sps:$4 sm:$0xff]  }
 0xfa8   :  { %11159 = vmatprep.subr.bf16.mxu0 %v20552_v15 }
 0xfa9   :  { %11160 = vmatpush1.bf16.msra.mxu0 %v20547_v44 }
 0xfaa   :  { %10491 = vmatpush1.bf16.msra.mxu1 %v20238_v22  ;;  %v20557_v22 = vld [vmem:[%s21325_s1 + $0x8] ss:$24 sps:$4 sm:$0xff]  }
 0xfab   :  { %10492 = vmatprep.subr.bf16.mxu1 %v20244_v21  ;;  %v20562_v21 = vld [vmem:[%s21325_s1 + $0xc] ss:$24 sps:$4 sm:$0xff]  }
 0xfae   :  { %10493 = vmatpush1.bf16.msra.mxu1 %v20252_v30  ;;  %v20567_v30 = vld [vmem:[%s21325_s1 + $0x34] ss:$24 sps:$4 sm:$0xff]  }
 0xfaf   :  { %10494 = vmatprep.subr.bf16.mxu1 %v20258_v9  ;;  %v20573_v9 = vld [vmem:[%s21325_s1 + $0x3c] ss:$24 sps:$4 sm:$0xff]   ;;  %11161 = vmatprep.subr.bf16.mxu0 %v20567_v30 }
 0xfb2   :  { %10495 = vmatpush1.bf16.msra.mxu1 %v20266_v29  ;;  %v20580_v29 = vld [vmem:[%s21325_s1 + $0x30] ss:$24 sps:$4 sm:$0xff]  }
 0xfb3   :  { %10496 = vmatprep.subr.bf16.mxu1 %v20272_v19  ;;  %v20587_v19 = vld [vmem:[%s21325_s1 + $0x38] ss:$24 sps:$4 sm:$0xff]   ;;  %11162 = vmatpush1.bf16.msra.mxu0 %v20580_v29 }
 0xfb6   :  { %10497 = vmatpush1.bf16.msra.mxu1 %v20280_v18  ;;  %v20592_v18 = vld [vmem:[%s21325_s1 + $0x64] ss:$24 sps:$4 sm:$0xff]  }
 0xfb7   :  { %10498 = vmatprep.subr.bf16.mxu1 %v20286_v52  ;;  %v20598_v52 = vld [vmem:[%s21325_s1 + $0x6c] ss:$24 sps:$4 sm:$0xff]   ;;  %11163 = vmatprep.subr.bf16.mxu0 %v20592_v18 }
 0xfba   :  { %10499 = vmatpush1.bf16.msra.mxu1 %v20294_v61  ;;  %v20604_v61 = vld [vmem:[%s21325_s1 + $0x60] ss:$24 sps:$4 sm:$0xff]  }
 0xfbb   :  { %10500 = vmatprep.subr.bf16.mxu1 %v20300_v39  ;;  %v20611_v39 = vld [vmem:[%s21325_s1 + $0x68] ss:$24 sps:$4 sm:$0xff]   ;;  %11164 = vmatpush1.bf16.msra.mxu0 %v20604_v61 }
 0xfbe   :  { %10501 = vmatpush1.bf16.msra.mxu1 %v20308_v43  ;;  %v20616_v43 = vld [vmem:[%s21325_s1 + $0x94] ss:$24 sps:$4 sm:$0xff]  }
 0xfbf   :  { %10502 = vmatprep.subr.bf16.mxu1 %v20314_v17  ;;  %v20622_v17 = vld [vmem:[%s21325_s1 + $0x9c] ss:$24 sps:$4 sm:$0xff]   ;;  %11165 = vmatprep.subr.bf16.mxu0 %v20616_v43 }
 0xfc2   :  { %10503 = vmatpush1.bf16.msra.mxu1 %v20322_v1  ;;  %v20628_v1 = vld [vmem:[%s21325_s1 + $0x90] ss:$24 sps:$4 sm:$0xff]  }
 0xfc3   :  { %10504 = vmatprep.subr.bf16.mxu1 %v20328_v45  ;;  %v20635_v45 = vld [vmem:[%s21325_s1 + $0x98] ss:$24 sps:$4 sm:$0xff]   ;;  %11166 = vmatpush1.bf16.msra.mxu0 %v20628_v1 }
 0xfc6   :  { %10505 = vmatpush1.bf16.msra.mxu1 %v20336_v37  ;;  %v20640_v37 = vld [vmem:[%s21325_s1 + $0xc4] ss:$24 sps:$4 sm:$0xff]  }
 0xfc7   :  { %10506 = vmatprep.subr.bf16.mxu1 %v20342_v11  ;;  %v20646_v11 = vld [vmem:[%s21325_s1 + $0xcc] ss:$24 sps:$4 sm:$0xff]   ;;  %11167 = vmatprep.subr.bf16.mxu0 %v20640_v37 }
 0xfca   :  { %10507 = vmatpush1.bf16.msra.mxu1 %v20350_v55  ;;  %v20652_v55 = vld [vmem:[%s21325_s1 + $0xc0] ss:$24 sps:$4 sm:$0xff]  }
 0xfcb   :  { %10508 = vmatprep.subr.bf16.mxu1 %v20356_v33  ;;  %v20659_v33 = vld [vmem:[%s21325_s1 + $0xc8] ss:$24 sps:$4 sm:$0xff]   ;;  %11168 = vmatpush1.bf16.msra.mxu0 %v20652_v55 }
 0xfcc   :  { %21823 = vst [vmem:[#allocation5_spill] sm:$0xff] %v20659_v33 }
 0xfce   :  { %10509 = vmatpush1.bf16.msra.mxu1 %v20364_v2  ;;  %v20664_v2 = vld [vmem:[%s21325_s1 + $0xf4] ss:$24 sps:$4 sm:$0xff]  }
 0xfcf   :  { %10510 = vmatprep.subr.bf16.mxu1 %v20370_v28  ;;  %v20670_v28 = vld [vmem:[%s21325_s1 + $0xfc] ss:$24 sps:$4 sm:$0xff]   ;;  %11169 = vmatprep.subr.bf16.mxu0 %v20664_v2 }
 0xfd0   :  { %21824 = vst [vmem:[#allocation6_spill] sm:$0xff] %v20670_v28 }
 0xfd2   :  { %10511 = vmatpush1.bf16.msra.mxu1 %v20378_v56  ;;  %v20676_v56 = vld [vmem:[%s21325_s1 + $0xf0] ss:$24 sps:$4 sm:$0xff]  }
 0xfd3   :  { %10512 = vmatprep.subr.bf16.mxu1 %v20384_v54  ;;  %v20683_v54 = vld [vmem:[%s21325_s1 + $0xf8] ss:$24 sps:$4 sm:$0xff]   ;;  %11170 = vmatpush1.bf16.msra.mxu0 %v20676_v56 }
 0xfd4   :  { %21825 = vst [vmem:[#allocation7_spill] sm:$0xff] %v20683_v54 }
 0xfd6   :  { %10513 = vmatpush1.bf16.msra.mxu1 %v20392_v23  ;;  %v20688_v23 = vld [vmem:[%s21325_s1 + $0x124] ss:$24 sps:$4 sm:$0xff]  }
 0xfd7   :  { %10514 = vmatprep.subr.bf16.mxu1 %v20398_v63  ;;  %v20694_v63 = vld [vmem:[%s21325_s1 + $0x12c] ss:$24 sps:$4 sm:$0xff]   ;;  %11171 = vmatprep.subr.bf16.mxu0 %v20688_v23 }
 0xfd8   :  { %21826 = vst [vmem:[#allocation8_spill] sm:$0xff] %v20694_v63 }
 0xfda   :  { %10515 = vmatpush1.bf16.msra.mxu1 %v20406_v36  ;;  %v20700_v36 = vld [vmem:[%s21325_s1 + $0x120] ss:$24 sps:$4 sm:$0xff]  }
 0xfdb   :  { %10516 = vmatprep.subr.bf16.mxu1 %v20412_v58  ;;  %v20707_v58 = vld [vmem:[%s21325_s1 + $0x128] ss:$24 sps:$4 sm:$0xff]   ;;  %11172 = vmatpush1.bf16.msra.mxu0 %v20700_v36 }
 0xfdc   :  { %21827 = vst [vmem:[#allocation9_spill] sm:$0xff] %v20707_v58 }
 0xfde   :  { %10517 = vmatpush1.bf16.msra.mxu1 %v20420_v32  ;;  %v20712_v32 = vld [vmem:[%s21325_s1 + $0x154] ss:$24 sps:$4 sm:$0xff]  }
 0xfdf   :  { %10518 = vmatprep.subr.bf16.mxu1 %v20426_v59  ;;  %v20718_v59 = vld [vmem:[%s21325_s1 + $0x15c] ss:$24 sps:$4 sm:$0xff]   ;;  %11173 = vmatprep.subr.bf16.mxu0 %v20712_v32 }
 0xfe0   :  { %21828 = vst [vmem:[#allocation10_spill] sm:$0xff] %v20718_v59 }
 0xfe2   :  { %10519 = vmatpush1.bf16.msra.mxu1 %v20434_v3  ;;  %v20724_v3 = vld [vmem:[%s21325_s1 + $0x150] ss:$24 sps:$4 sm:$0xff]  }
 0xfe3   :  { %11200 = vmatprep.subr.bf16.mxu1 %v20562_v21  ;;  %11174 = vmatpush1.bf16.msra.mxu0 %v20724_v3 }
 0xfe4   :  { %11175 = vmatprep.subr.bf16.mxu0 %v20736_v35 }
 0xfe5   :  { %10521 = vmatmul.mubr.bf16.vlgmr.msra.gmra.mrb[80].mxu1 %v9828_v38  ;;  %v20899_v38 = vld [vmem:[%s21325_s1 + $0x2a8] ss:$24 sps:$4 sm:$0xff]  }
 0xfe6   :  { %11201 = vmatpush1.bf16.msra.mxu1 %v20557_v22  ;;  %21843 = vst [vmem:[#allocation25_spill] sm:$0xff] %v20899_v38 }
 0xfe7   :  { %11202 = vmatprep.subr.bf16.mxu1 %v20573_v9  ;;  %11176 = vmatpush1.bf16.msra.mxu0 %v20748_v31 }
 0xfe8   :  { %11177 = vmatprep.subr.bf16.mxu0 %v20760_v60 }
 0xfea   :  { %11203 = vmatpush1.bf16.msra.mxu1 %v20587_v19 }
 0xfeb   :  { %11204 = vmatprep.subr.bf16.mxu1 %v20598_v52  ;;  %11178 = vmatpush1.bf16.msra.mxu0 %v20767_v42 }
 0xfec   :  { %11179 = vmatprep.subr.bf16.mxu0 %v20787_v10 }
 0xfee   :  { %11205 = vmatpush1.bf16.msra.mxu1 %v20611_v39 }
 0xfef   :  { %11206 = vmatprep.subr.bf16.mxu1 %v20622_v17  ;;  %11180 = vmatpush1.bf16.msra.mxu0 %v20792_v14 }
 0xff0   :  { %11181 = vmatprep.subr.bf16.mxu0 %v20811_v16 }
 0xff2   :  { %11207 = vmatpush1.bf16.msra.mxu1 %v20635_v45 }
 0xff3   :  { %11208 = vmatprep.subr.bf16.mxu1 %v20646_v11  ;;  %11182 = vmatpush1.bf16.msra.mxu0 %v20816_v53 }
 0xff4   :  { %11183 = vmatprep.subr.bf16.mxu0 %v20832_v26 }
 0xff6   :  { %11209 = vmatpush1.bf16.msra.mxu1 %v20659_v33 }
 0xff7   :  { %11210 = vmatprep.subr.bf16.mxu1 %v20670_v28  ;;  %11184 = vmatpush1.bf16.msra.mxu0 %v20839_v5 }
 0xff8   :  { %11185 = vmatprep.subr.bf16.mxu0 %v20856_v34 }
 0xffa   :  { %11211 = vmatpush1.bf16.msra.mxu1 %v20683_v54 }
 0xffb   :  { %11212 = vmatprep.subr.bf16.mxu1 %v20694_v63  ;;  %11186 = vmatpush1.bf16.msra.mxu0 %v20868_v40 }
 0xffc   :  { %11187 = vmatprep.subr.bf16.mxu0 %v20880_v12 }
 0xffe   :  { %11213 = vmatpush1.bf16.msra.mxu1 %v20707_v58 }
 0xfff   :  { %11214 = vmatprep.subr.bf16.mxu1 %v20718_v59  ;;  %11188 = vmatpush1.bf16.msra.mxu0 %v20892_v57 }
0x1002   :  { %11215 = vmatpush1.bf16.msra.mxu1 %v20731_v62 }
0x1003   :  { %11216 = vmatprep.subr.bf16.mxu1 %v20742_v41 }
0x1006   :  { %11217 = vmatpush1.bf16.msra.mxu1 %v20755_v4  ;;  %v13483_v4 = vld [vmem:[%s21326_s0 + $0x278] sm:$0xff] }
0x1007   :  { %11218 = vmatprep.subr.bf16.mxu1 %v20775_v46 }
0x100a   :  { %11219 = vmatpush1.bf16.msra.mxu1 %v20780_v20 }
0x100b   :  { %11220 = vmatprep.subr.bf16.mxu1 %v20797_v7 }
0x100e   :  { %11221 = vmatpush1.bf16.msra.mxu1 %v20803_v50 }
0x100f   :  { %11222 = vmatprep.subr.bf16.mxu1 %v20821_v48 }
0x1012   :  { %11223 = vmatpush1.bf16.msra.mxu1 %v20827_v13 }
0x1013   :  { %11224 = vmatprep.subr.bf16.mxu1 %v20844_v8  ;;  %v20931_v8 = vld [vmem:[%s21325_s1 + $0x14] ss:$24 sps:$4 sm:$0xff]  }
0x1016   :  { %11225 = vmatpush1.bf16.msra.mxu1 %v20851_v24  ;;  %v20910_v24 = vld [vmem:[%s21325_s1 + $0x2dc] ss:$24 sps:$4 sm:$0xff]  }
0x1017   :  { %11226 = vmatprep.subr.bf16.mxu1 %v20862_v25  ;;  %v20904_v25 = vld [vmem:[%s21325_s1 + $0x2d4] ss:$24 sps:$4 sm:$0xff]   ;;  %21844 = vst [vmem:[#allocation26_spill] sm:$0xff] %v20910_v24 }
0x1018   :  { %11189 = vmatprep.subr.bf16.mxu0 %v20904_v25 }
0x101a   :  { %11227 = vmatpush1.bf16.msra.mxu1 %v20875_v6  ;;  %v20916_v6 = vld [vmem:[%s21325_s1 + $0x2d0] ss:$24 sps:$4 sm:$0xff]  }
0x101b   :  { %11228 = vmatprep.subr.bf16.mxu1 %v20886_v51  ;;  %v20923_v51 = vld [vmem:[%s21325_s1 + $0x2d8] ss:$24 sps:$4 sm:$0xff]   ;;  %11190 = vmatpush1.bf16.msra.mxu0 %v20916_v6 }
0x101c   :  { %21845 = vst [vmem:[#allocation27_spill] sm:$0xff] %v20923_v51  ;;  %11241 = vmatprep.subr.bf16.mxu0 %v20931_v8 }
0x101e   :  { %11229 = vmatpush1.bf16.msra.mxu1 %v20899_v38 }
0x101f   :  { %11230 = vmatprep.subr.bf16.mxu1 %v20910_v24 }
0x1022   :  { %11231 = vmatpush1.bf16.msra.mxu1 %v20923_v51  ;;  %v13482_v51 = vld [vmem:[%s21326_s0 + $0x270] sm:$0xff] }
0x1023   :  { %11912 = vmatprep.subr.bf16.mxu1 %v20552_v15 }
0x1078   :  { %v10440_v38 = vpop.f32.mrb[76].mxu1  ;;  %v10481_v13 = vpop.f32.mrb[80].mxu0 }
0x1079   :  { %v10442_v48 = vpop.f32.mrb[77].mxu1  ;;  %v10483_v50 = vpop.f32.mrb[81].mxu0  ;;  %v10529_v41 = vadd.f32 %v13482_v51, %v10440_v38 }
0x107a   :  { %v10444_v7 = vpop.f32.mrb[78].mxu1  ;;  %v10485_v20 = vpop.f32.mrb[82].mxu0  ;;  %v10530_v15 = vadd.f32 %v13483_v4, %v10442_v48 }
0x107b   :  { %v10445_v24 = vpop.f32.mrb[79].mxu1  ;;  %v10486_v46 = vpop.f32.mrb[83].mxu0  ;;  %v13584_v62 = vmul.f32 -1.442695, %v10529_v41  ;;  %v13484_v20 = vld [vmem:[%s21326_s0 + $0x280] sm:$0xff] }
0x107c   :  { %v13585_v59 = vmul.f32 -1.442695, %v10530_v15  ;;  %v13485_v46 = vld [vmem:[%s21326_s0 + $0x288] sm:$0xff]  ;;  %v10543_v7 = vadd.f32 %v13484_v20, %v10481_v13 }
0x107d   :  { %15219 = vpow2.f32 %v13584_v62  ;;  %v10544_v24 = vadd.f32 %v13485_v46, %v10483_v50  ;;  %v13486_v50 = vld [vmem:[%s21326_s0 + $0x290] sm:$0xff] }
0x107e   :  { %15221 = vpow2.f32 %v13585_v59  ;;  %v13586_v54 = vmul.f32 -1.442695, %v10543_v7 }
0x107f   :  { %v13587_v28 = vmul.f32 -1.442695, %v10544_v24 }
0x1080   :  { %15223 = vpow2.f32 %v13586_v54 }
0x1081   :  { %15225 = vpow2.f32 %v13587_v28  ;;  %v13487_v28 = vld [vmem:[%s21326_s0 + $0x298] sm:$0xff] }
0x1087   :  { %v15220_v58 = vpop.eup %15219 }
0x1088   :  { %v15222_v63 = vpop.eup %15221  ;;  %v10537_v51 = vadd.f32 1.0, %v15220_v58 }
0x1089   :  { %v10538_v4 = vadd.f32 1.0, %v15222_v63 }
0x108a   :  { %15227 = vrcp.f32 %v10537_v51  ;;  %v15224_v59 = vpop.eup %15223 }
0x108b   :  { %15229 = vrcp.f32 %v10538_v4  ;;  %v15226_v41 = vpop.eup %15225  ;;  %v10551_v7 = vadd.f32 1.0, %v15224_v59 }
0x108c   :  { %v10552_v51 = vadd.f32 1.0, %v15226_v41  ;;  %v20997_v41 = vld [vmem:[%s21325_s1 + $0x74] ss:$24 sps:$4 sm:$0xff]  }
0x1094   :  { %v15228_v15 = vpop.eup %15227 }
0x1095   :  { %v15230_v58 = vpop.eup %15229 }
0x10b8   :  { %v10522_v62 = vpop.f32.mrb[80].mxu1 }
0x10b9   :  { %v10557_v48 = vadd.f32 %v10522_v62, %v21821_v49  ;;  %v10524_v38 = vpop.f32.mrb[81].mxu1 }
0x10ba   :  { %v10558_v13 = vadd.f32 %v10524_v38, %v21822_v0  ;;  %v10526_v20 = vpop.f32.mrb[82].mxu1 }
0x10bb   :  { %v10559_v63 = vmul.f32 %v15228_v15, %v10557_v48  ;;  %v10527_v54 = vpop.f32.mrb[83].mxu1 }
0x10bc   :  { %v10560_v46 = vmul.f32 %v15230_v58, %v10558_v13  ;;  %v21011_v13 = vld [vmem:[%s21325_s1 + $0xa4] ss:$24 sps:$4 sm:$0xff]   ;;  %v21862_v58 = vld [vmem:[#allocation21_spill] sm:$0xff] }
0x10bd   :  { %v10561_v24 = vadd.f32 %v13486_v50, %v10559_v63  ;;  %v21005_v50 = vld [vmem:[%s21325_s1 + $0x70] ss:$24 sps:$4 sm:$0xff]   ;;  %v21863_v63 = vld [vmem:[#allocation22_spill] sm:$0xff] }
0x10be   :  { %v10562_v4 = vadd.f32 %v13487_v28, %v10560_v46  ;;  %v21864_v28 = vld [vmem:[#allocation23_spill] sm:$0xff]  ;;  %v21865_v46 = vld [vmem:[#allocation24_spill] sm:$0xff] }
0x10bf   :  { %15231 = vtanh.f32 %v10561_v24  ;;  %v21867_v24 = vld [vmem:[#allocation26_spill] sm:$0xff] }
0x10c0   :  { %15233 = vtanh.f32 %v10562_v4 }
0x10c1   :  { %15235 = vrcp.f32 %v10551_v7  ;;  %v21866_v7 = vld [vmem:[#allocation25_spill] sm:$0xff] }
0x10c2   :  { %15237 = vrcp.f32 %v10552_v51  ;;  %v21868_v51 = vld [vmem:[#allocation27_spill] sm:$0xff] }
0x10c9   :  { %v15232_v62 = vpop.eup %15231 }
0x10ca   :  { %v15234_v49 = vpop.eup %15233  ;;  %v10565_v38 = vsub.f32 %v20497_v47, %v15232_v62 }
0x10cb   :  { %v15236_v20 = vpop.eup %15235  ;;  %v10566_v48 = vsub.f32 %v20499_v27, %v15234_v49  ;;  %v20983_v27 = vld [vmem:[%s21325_s1 + $0x44] ss:$24 sps:$4 sm:$0xff]  }
0x10cc   :  { %v15238_v15 = vpop.eup %15237  ;;  %v10567_v0 = vmul.f32 %v15236_v20, %v10565_v38 }
0x10cd   :  { %v10568_v33 = vmul.f32 %v15238_v15, %v10566_v48 }
0x10ce   :  { %v20957_v54 = vadd.f32 %v15232_v62, %v10567_v0  ;;  %v20974_v0 = vld [vmem:[%s21325_s1 + $0x10] ss:$24 sps:$4 sm:$0xff]  }
0x10cf   :  { %v20959_v59 = vadd.f32 %v15234_v49, %v10568_v33  ;;  %v20991_v33 = vld [vmem:[%s21325_s1 + $0x40] ss:$24 sps:$4 sm:$0xff]  }
0x10d0   :  { %13588 = vst [vmem:[%s21328_s3 + $0xd0] sm:$0xff] %v20957_v54  ;;  %v20978_v49 = vpack.c.bf16 %v20957_v54, %v20957_v54 }
0x10d1   :  { %13589 = vst [vmem:[%s21328_s3 + $0xd8] sm:$0xff] %v20959_v59  ;;  %v10582_v47 = vpack.c.bf16 %v20959_v59, %v20959_v59 }
0x10d3   :  { %11191 = vmatprep.mubr.bf16.mxu0 %v10582_v47  ;;  %11232 = vmatprep.mubr.bf16.mxu1 %v10582_v47 }
0x10d4   :  { %11192 = vmatmul.mubr.bf16.vlgmr.msra.gmra.mrb[84].mxu0 %v20978_v49  ;;  %11233 = vmatmul.mubr.bf16.vlgmr.msra.gmra.mrb[84].mxu1 %v20978_v49 }
0x10d5   :  { %11242 = vmatpush1.bf16.msra.mxu0 %v20974_v0  ;;  %11273 = vmatprep.mubr.bf16.mxu0 %v10582_v47 }
0x10d6   :  { %11243 = vmatprep.subr.bf16.mxu0 %v20983_v27  ;;  %11913 = vmatpush1.bf16.msra.mxu1 %v20547_v44  ;;  %v21019_v44 = vld [vmem:[%s21325_s1 + $0xa0] ss:$24 sps:$4 sm:$0xff]  }
0x10d7   :  { %11914 = vmatprep.subr.bf16.mxu1 %v20567_v30  ;;  %v21025_v30 = vld [vmem:[%s21325_s1 + $0xd4] ss:$24 sps:$4 sm:$0xff]  }
0x10d9   :  { %11244 = vmatpush1.bf16.msra.mxu0 %v20991_v33 }
0x10da   :  { %11245 = vmatprep.subr.bf16.mxu0 %v20997_v41  ;;  %11915 = vmatpush1.bf16.msra.mxu1 %v20580_v29  ;;  %v21033_v29 = vld [vmem:[%s21325_s1 + $0xd0] ss:$24 sps:$4 sm:$0xff]  }
0x10db   :  { %11916 = vmatprep.subr.bf16.mxu1 %v20592_v18  ;;  %v21039_v18 = vld [vmem:[%s21325_s1 + $0x104] ss:$24 sps:$4 sm:$0xff]  }
0x10dd   :  { %11246 = vmatpush1.bf16.msra.mxu0 %v21005_v50 }
0x10de   :  { %11247 = vmatprep.subr.bf16.mxu0 %v21011_v13  ;;  %11917 = vmatpush1.bf16.msra.mxu1 %v20604_v61  ;;  %v21047_v61 = vld [vmem:[%s21325_s1 + $0x100] ss:$24 sps:$4 sm:$0xff]  }
0x10df   :  { %11918 = vmatprep.subr.bf16.mxu1 %v20616_v43  ;;  %v21053_v43 = vld [vmem:[%s21325_s1 + $0x134] ss:$24 sps:$4 sm:$0xff]  }
0x10e1   :  { %11248 = vmatpush1.bf16.msra.mxu0 %v21019_v44 }
0x10e2   :  { %11249 = vmatprep.subr.bf16.mxu0 %v21025_v30  ;;  %11919 = vmatpush1.bf16.msra.mxu1 %v20628_v1  ;;  %v21061_v1 = vld [vmem:[%s21325_s1 + $0x130] ss:$24 sps:$4 sm:$0xff]  }
0x10e3   :  { %11920 = vmatprep.subr.bf16.mxu1 %v20640_v37  ;;  %v21067_v37 = vld [vmem:[%s21325_s1 + $0x164] ss:$24 sps:$4 sm:$0xff]  }
0x10e5   :  { %11250 = vmatpush1.bf16.msra.mxu0 %v21033_v29 }
0x10e6   :  { %11251 = vmatprep.subr.bf16.mxu0 %v21039_v18  ;;  %11921 = vmatpush1.bf16.msra.mxu1 %v20652_v55  ;;  %v21075_v55 = vld [vmem:[%s21325_s1 + $0x160] ss:$24 sps:$4 sm:$0xff]  }
0x10e7   :  { %11922 = vmatprep.subr.bf16.mxu1 %v20664_v2  ;;  %v21081_v2 = vld [vmem:[%s21325_s1 + $0x194] ss:$24 sps:$4 sm:$0xff]  }
0x10e9   :  { %11252 = vmatpush1.bf16.msra.mxu0 %v21047_v61 }
0x10ea   :  { %11253 = vmatprep.subr.bf16.mxu0 %v21053_v43  ;;  %11923 = vmatpush1.bf16.msra.mxu1 %v20676_v56  ;;  %v21089_v56 = vld [vmem:[%s21325_s1 + $0x190] ss:$24 sps:$4 sm:$0xff]  }
0x10eb   :  { %11924 = vmatprep.subr.bf16.mxu1 %v20688_v23  ;;  %v21095_v23 = vld [vmem:[%s21325_s1 + $0x1c4] ss:$24 sps:$4 sm:$0xff]  }
0x10ed   :  { %11254 = vmatpush1.bf16.msra.mxu0 %v21061_v1 }
0x10ee   :  { %11255 = vmatprep.subr.bf16.mxu0 %v21067_v37  ;;  %11925 = vmatpush1.bf16.msra.mxu1 %v20700_v36  ;;  %v21103_v36 = vld [vmem:[%s21325_s1 + $0x1c0] ss:$24 sps:$4 sm:$0xff]  }
0x10ef   :  { %11926 = vmatprep.subr.bf16.mxu1 %v20712_v32  ;;  %v21109_v32 = vld [vmem:[%s21325_s1 + $0x1f4] ss:$24 sps:$4 sm:$0xff]  }
0x10f1   :  { %11256 = vmatpush1.bf16.msra.mxu0 %v21075_v55 }
0x10f2   :  { %11257 = vmatprep.subr.bf16.mxu0 %v21081_v2  ;;  %11927 = vmatpush1.bf16.msra.mxu1 %v20724_v3  ;;  %v21117_v3 = vld [vmem:[%s21325_s1 + $0x1f0] ss:$24 sps:$4 sm:$0xff]  }
0x10f3   :  { %11928 = vmatprep.subr.bf16.mxu1 %v20736_v35  ;;  %v21123_v35 = vld [vmem:[%s21325_s1 + $0x224] ss:$24 sps:$4 sm:$0xff]  }
0x10f5   :  { %11258 = vmatpush1.bf16.msra.mxu0 %v21089_v56 }
0x10f6   :  { %11259 = vmatprep.subr.bf16.mxu0 %v21095_v23  ;;  %11929 = vmatpush1.bf16.msra.mxu1 %v20748_v31  ;;  %v21131_v31 = vld [vmem:[%s21325_s1 + $0x220] ss:$24 sps:$4 sm:$0xff]  }
0x10f7   :  { %11930 = vmatprep.subr.bf16.mxu1 %v20760_v60  ;;  %v21137_v60 = vld [vmem:[%s21325_s1 + $0x254] ss:$24 sps:$4 sm:$0xff]  }
0x10f9   :  { %11260 = vmatpush1.bf16.msra.mxu0 %v21103_v36 }
0x10fa   :  { %11261 = vmatprep.subr.bf16.mxu0 %v21109_v32  ;;  %11931 = vmatpush1.bf16.msra.mxu1 %v20767_v42  ;;  %v21145_v42 = vld [vmem:[%s21325_s1 + $0x250] ss:$24 sps:$4 sm:$0xff]  }
0x10fb   :  { %11932 = vmatprep.subr.bf16.mxu1 %v20787_v10  ;;  %v21151_v10 = vld [vmem:[%s21325_s1 + $0x284] ss:$24 sps:$4 sm:$0xff]  }
0x10fd   :  { %11262 = vmatpush1.bf16.msra.mxu0 %v21117_v3 }
0x10fe   :  { %11263 = vmatprep.subr.bf16.mxu0 %v21123_v35  ;;  %11933 = vmatpush1.bf16.msra.mxu1 %v20792_v14  ;;  %v21159_v14 = vld [vmem:[%s21325_s1 + $0x280] ss:$24 sps:$4 sm:$0xff]  }
0x10ff   :  { %11934 = vmatprep.subr.bf16.mxu1 %v20811_v16  ;;  %v21165_v16 = vld [vmem:[%s21325_s1 + $0x2b4] ss:$24 sps:$4 sm:$0xff]  }
0x1101   :  { %11264 = vmatpush1.bf16.msra.mxu0 %v21131_v31 }
0x1102   :  { %11265 = vmatprep.subr.bf16.mxu0 %v21137_v60  ;;  %11935 = vmatpush1.bf16.msra.mxu1 %v20816_v53  ;;  %v21173_v53 = vld [vmem:[%s21325_s1 + $0x2b0] ss:$24 sps:$4 sm:$0xff]  }
0x1103   :  { %11936 = vmatprep.subr.bf16.mxu1 %v20832_v26  ;;  %v21179_v26 = vld [vmem:[%s21325_s1 + $0x2e4] ss:$24 sps:$4 sm:$0xff]  }
0x1105   :  { %11266 = vmatpush1.bf16.msra.mxu0 %v21145_v42 }
0x1106   :  { %11267 = vmatprep.subr.bf16.mxu0 %v21151_v10  ;;  %11937 = vmatpush1.bf16.msra.mxu1 %v20839_v5  ;;  %v21187_v5 = vld [vmem:[%s21325_s1 + $0x2e0] ss:$24 sps:$4 sm:$0xff]  }
0x1107   :  { %11938 = vmatprep.subr.bf16.mxu1 %v20856_v34  ;;  %v21848_v34 = vld [vmem:[#allocation7_spill] sm:$0xff] }
0x1109   :  { %11268 = vmatpush1.bf16.msra.mxu0 %v21159_v14 }
0x110a   :  { %11269 = vmatprep.subr.bf16.mxu0 %v21165_v16  ;;  %11939 = vmatpush1.bf16.msra.mxu1 %v20868_v40  ;;  %v21858_v40 = vld [vmem:[#allocation17_spill] sm:$0xff] }
0x110b   :  { %11940 = vmatprep.subr.bf16.mxu1 %v20880_v12  ;;  %v21860_v12 = vld [vmem:[#allocation19_spill] sm:$0xff] }
0x110d   :  { %11270 = vmatpush1.bf16.msra.mxu0 %v21173_v53 }
0x110e   :  { %11271 = vmatprep.subr.bf16.mxu0 %v21179_v26  ;;  %11941 = vmatpush1.bf16.msra.mxu1 %v20892_v57  ;;  %v21861_v57 = vld [vmem:[#allocation20_spill] sm:$0xff] }
0x110f   :  { %11942 = vmatprep.subr.bf16.mxu1 %v20904_v25  ;;  %v21857_v25 = vld [vmem:[#allocation16_spill] sm:$0xff] }
0x1111   :  { %11272 = vmatpush1.bf16.msra.mxu0 %v21187_v5 }
0x1112   :  { %11953 = vmatprep.subr.bf16.mxu0 %v20562_v21  ;;  %11943 = vmatpush1.bf16.msra.mxu1 %v20916_v6  ;;  %v21846_v21 = vld [vmem:[#allocation5_spill] sm:$0xff]  ;;  %v21859_v6 = vld [vmem:[#allocation18_spill] sm:$0xff] }
0x1113   :  { %11994 = vmatprep.subr.bf16.mxu1 %v20931_v8  ;;  %v21847_v8 = vld [vmem:[#allocation6_spill] sm:$0xff] }
0x1114   :  { %11274 = vmatmul.mubr.bf16.vlgmr.msra.gmra.mrb[88].mxu0 %v20978_v49 }
0x1115   :  { %11954 = vmatpush1.bf16.msra.mxu0 %v20557_v22  ;;  %v21849_v22 = vld [vmem:[#allocation8_spill] sm:$0xff] }
0x1116   :  { %11955 = vmatprep.subr.bf16.mxu0 %v20573_v9  ;;  %v21850_v9 = vld [vmem:[#allocation9_spill] sm:$0xff] }
0x1119   :  { %11956 = vmatpush1.bf16.msra.mxu0 %v20587_v19  ;;  %v21851_v19 = vld [vmem:[#allocation10_spill] sm:$0xff] }
0x111a   :  { %11957 = vmatprep.subr.bf16.mxu0 %v20598_v52  ;;  %v21852_v52 = vld [vmem:[#allocation11_spill] sm:$0xff] }
0x111d   :  { %11958 = vmatpush1.bf16.msra.mxu0 %v20611_v39  ;;  %v21853_v39 = vld [vmem:[#allocation12_spill] sm:$0xff] }
0x111e   :  { %11959 = vmatprep.subr.bf16.mxu0 %v20622_v17  ;;  %v21854_v17 = vld [vmem:[#allocation13_spill] sm:$0xff] }
0x1121   :  { %11960 = vmatpush1.bf16.msra.mxu0 %v20635_v45  ;;  %v21855_v45 = vld [vmem:[#allocation14_spill] sm:$0xff] }
0x1122   :  { %11961 = vmatprep.subr.bf16.mxu0 %v20646_v11  ;;  %v21856_v11 = vld [vmem:[#allocation15_spill] sm:$0xff] }
0x1125   :  { %11962 = vmatpush1.bf16.msra.mxu0 %v21846_v21  ;;  %v13590_v21 = vld [vmem:[%s21326_s0 + $0x2a0] sm:$0xff] }
0x1126   :  { %11963 = vmatprep.subr.bf16.mxu0 %v21847_v8  ;;  %v13591_v8 = vld [vmem:[%s21326_s0 + $0x2a8] sm:$0xff] }
0x1129   :  { %11964 = vmatpush1.bf16.msra.mxu0 %v21848_v34 }
0x112a   :  { %11965 = vmatprep.subr.bf16.mxu0 %v21849_v22 }
0x112d   :  { %11966 = vmatpush1.bf16.msra.mxu0 %v21850_v9 }
0x112e   :  { %11967 = vmatprep.subr.bf16.mxu0 %v21851_v19 }
0x1131   :  { %11968 = vmatpush1.bf16.msra.mxu0 %v21852_v52  ;;  %v13592_v52 = vld [vmem:[%s21326_s0 + $0x2b0] sm:$0xff] }
0x1132   :  { %11969 = vmatprep.subr.bf16.mxu0 %v21853_v39  ;;  %v13593_v39 = vld [vmem:[%s21326_s0 + $0x2b8] sm:$0xff] }
0x1135   :  { %11970 = vmatpush1.bf16.msra.mxu0 %v21854_v17 }
0x1136   :  { %11971 = vmatprep.subr.bf16.mxu0 %v21855_v45 }
0x1139   :  { %11972 = vmatpush1.bf16.msra.mxu0 %v21856_v11 }
0x113a   :  { %11973 = vmatprep.subr.bf16.mxu0 %v21857_v25 }
0x113d   :  { %11974 = vmatpush1.bf16.msra.mxu0 %v21858_v40 }
0x113e   :  { %11975 = vmatprep.subr.bf16.mxu0 %v21859_v6 }
0x1141   :  { %11976 = vmatpush1.bf16.msra.mxu0 %v21860_v12 }
0x1142   :  { %11977 = vmatprep.subr.bf16.mxu0 %v21861_v57 }
0x1145   :  { %11978 = vmatpush1.bf16.msra.mxu0 %v21862_v58 }
0x1146   :  { %11979 = vmatprep.subr.bf16.mxu0 %v21863_v63 }
0x1149   :  { %11980 = vmatpush1.bf16.msra.mxu0 %v21864_v28 }
0x114a   :  { %11981 = vmatprep.subr.bf16.mxu0 %v21865_v46  ;;  %v21869_v46 = vld [vmem:[#allocation3_spill] sm:$0xff] }
0x114d   :  { %11982 = vmatpush1.bf16.msra.mxu0 %v21866_v7 }
0x114e   :  { %11983 = vmatprep.subr.bf16.mxu0 %v21867_v24 }
0x1151   :  { %11984 = vmatpush1.bf16.msra.mxu0 %v21868_v51 }
0x11a7   :  { %v11193_v4 = vpop.f32.mrb[84].mxu0  ;;  %v11234_v62 = vpop.f32.mrb[84].mxu1 }
0x11a8   :  { %v11195_v38 = vpop.f32.mrb[85].mxu0  ;;  %v11236_v20 = vpop.f32.mrb[85].mxu1  ;;  %v11282_v34 = vadd.f32 %v13590_v21, %v11193_v4  ;;  %v11296_v17 = vadd.f32 %v13592_v52, %v11234_v62  ;;  %v13594_v4 = vld [vmem:[%s21326_s0 + $0x2c0] sm:$0xff]  ;;  %v21870_v62 = vld [vmem:[#allocation4_spill] sm:$0xff] }
0x11a9   :  { %v11197_v48 = vpop.f32.mrb[86].mxu0  ;;  %v11238_v15 = vpop.f32.mrb[86].mxu1  ;;  %v11283_v22 = vadd.f32 %v13591_v8, %v11195_v38  ;;  %v11297_v45 = vadd.f32 %v13593_v39, %v11236_v20 }
0x11aa   :  { %v11198_v47 = vpop.f32.mrb[87].mxu0  ;;  %v11239_v49 = vpop.f32.mrb[87].mxu1  ;;  %v13692_v9 = vmul.f32 -1.442695, %v11282_v34  ;;  %v13694_v40 = vmul.f32 -1.442695, %v11296_v17 }
0x11ab   :  { %v13693_v19 = vmul.f32 -1.442695, %v11283_v22  ;;  %v13695_v6 = vmul.f32 -1.442695, %v11297_v45  ;;  %v13595_v47 = vld [vmem:[%s21326_s0 + $0x2c8] sm:$0xff] }
0x11ac   :  { %15239 = vpow2.f32 %v13692_v9 }
0x11ad   :  { %15241 = vpow2.f32 %v13693_v19 }
0x11ae   :  { %15243 = vpow2.f32 %v13694_v40 }
0x11af   :  { %15245 = vpow2.f32 %v13695_v6 }
0x11b6   :  { %v15240_v11 = vpop.eup %15239 }
0x11b7   :  { %v15242_v25 = vpop.eup %15241  ;;  %v11290_v12 = vadd.f32 1.0, %v15240_v11 }
0x11b8   :  { %v11291_v57 = vadd.f32 1.0, %v15242_v25  ;;  %v15244_v58 = vpop.eup %15243 }
0x11b9   :  { %15247 = vrcp.f32 %v11290_v12  ;;  %v15246_v28 = vpop.eup %15245  ;;  %v11304_v8 = vadd.f32 1.0, %v15244_v58 }
0x11ba   :  { %15249 = vrcp.f32 %v11291_v57  ;;  %v11305_v22 = vadd.f32 1.0, %v15246_v28 }
0x11c3   :  { %v15248_v51 = vpop.eup %15247 }
0x11c4   :  { %v15250_v48 = vpop.eup %15249 }
0x11e7   :  { %v11275_v63 = vpop.f32.mrb[88].mxu0 }
0x11e8   :  { %v11310_v7 = vadd.f32 %v11275_v63, %v21869_v46  ;;  %v11277_v24 = vpop.f32.mrb[89].mxu0 }
0x11e9   :  { %v11311_v38 = vadd.f32 %v11277_v24, %v21870_v62  ;;  %v11279_v20 = vpop.f32.mrb[90].mxu0 }
0x11ea   :  { %v11312_v15 = vmul.f32 %v15248_v51, %v11310_v7  ;;  %v11280_v49 = vpop.f32.mrb[91].mxu0  ;;  %v13703_v7 = vld [vmem:[%s21326_s0 + $0x2f8] sm:$0xff] }
0x11eb   :  { %v11313_v21 = vmul.f32 %v15250_v48, %v11311_v38 }
0x11ec   :  { %v11314_v34 = vadd.f32 %v13594_v4, %v11312_v15 }
0x11ed   :  { %v11315_v9 = vadd.f32 %v13595_v47, %v11313_v21 }
0x11ee   :  { %15251 = vtanh.f32 %v11314_v34 }
0x11ef   :  { %15253 = vtanh.f32 %v11315_v9 }
0x11f0   :  { %15255 = vrcp.f32 %v11304_v8 }
0x11f1   :  { %15257 = vrcp.f32 %v11305_v22 }
0x11f8   :  { %v15252_v19 = vpop.eup %15251 }
0x11f9   :  { %v15254_v52 = vpop.eup %15253  ;;  %v11318_v39 = vsub.f32 %v20957_v54, %v15252_v19 }
0x11fa   :  { %v15256_v17 = vpop.eup %15255  ;;  %v11319_v45 = vsub.f32 %v20959_v59, %v15254_v52 }
0x11fb   :  { %v15258_v11 = vpop.eup %15257  ;;  %v11320_v25 = vmul.f32 %v15256_v17, %v11318_v39 }
0x11fc   :  { %v11321_v40 = vmul.f32 %v15258_v11, %v11319_v45 }
0x11fd   :  { %v21250_v6 = vadd.f32 %v15252_v19, %v11320_v25 }
0x11fe   :  { %v21252_v12 = vadd.f32 %v15254_v52, %v11321_v40 }
0x11ff   :  { %13696 = vst [vmem:[%s21328_s3 + $0xe0] sm:$0xff] %v21250_v6  ;;  %v11334_v59 = vpack.c.bf16 %v21250_v6, %v21250_v6 }
0x1200   :  { %13697 = vst [vmem:[%s21328_s3 + $0xe8] sm:$0xff] %v21252_v12  ;;  %v11335_v54 = vpack.c.bf16 %v21252_v12, %v21252_v12 }
0x1202   :  { %11944 = vmatprep.mubr.bf16.mxu1 %v11335_v54  ;;  %11985 = vmatprep.mubr.bf16.mxu0 %v11335_v54 }
0x1203   :  { %11945 = vmatmul.mubr.bf16.vlgmr.msra.gmra.mrb[88].mxu1 %v11334_v59  ;;  %11986 = vmatmul.mubr.bf16.vlgmr.msra.gmra.mrb[92].mxu0 %v11334_v59 }
0x1204   :  { %11995 = vmatpush1.bf16.msra.mxu1 %v20974_v0  ;;  %12026 = vmatprep.mubr.bf16.mxu1 %v11335_v54 }
0x1205   :  { %11996 = vmatprep.subr.bf16.mxu1 %v20983_v27 }
0x1208   :  { %11997 = vmatpush1.bf16.msra.mxu1 %v20991_v33 }
0x1209   :  { %11998 = vmatprep.subr.bf16.mxu1 %v20997_v41 }
0x120c   :  { %11999 = vmatpush1.bf16.msra.mxu1 %v21005_v50 }
0x120d   :  { %12000 = vmatprep.subr.bf16.mxu1 %v21011_v13 }
0x1210   :  { %12001 = vmatpush1.bf16.msra.mxu1 %v21019_v44 }
0x1211   :  { %12002 = vmatprep.subr.bf16.mxu1 %v21025_v30 }
0x1214   :  { %12003 = vmatpush1.bf16.msra.mxu1 %v21033_v29  ;;  %v13698_v29 = vld [vmem:[%s21326_s0 + $0x2d0] sm:$0xff] }
0x1215   :  { %12004 = vmatprep.subr.bf16.mxu1 %v21039_v18  ;;  %v13699_v18 = vld [vmem:[%s21326_s0 + $0x2d8] sm:$0xff] }
0x1218   :  { %12005 = vmatpush1.bf16.msra.mxu1 %v21047_v61 }
0x1219   :  { %12006 = vmatprep.subr.bf16.mxu1 %v21053_v43 }
0x121c   :  { %12007 = vmatpush1.bf16.msra.mxu1 %v21061_v1 }
0x121d   :  { %12008 = vmatprep.subr.bf16.mxu1 %v21067_v37 }
0x1220   :  { %12009 = vmatpush1.bf16.msra.mxu1 %v21075_v55  ;;  %v13700_v55 = vld [vmem:[%s21326_s0 + $0x2e0] sm:$0xff] }
0x1221   :  { %12010 = vmatprep.subr.bf16.mxu1 %v21081_v2  ;;  %v13701_v2 = vld [vmem:[%s21326_s0 + $0x2e8] sm:$0xff] }
0x1224   :  { %12011 = vmatpush1.bf16.msra.mxu1 %v21089_v56 }
0x1225   :  { %12012 = vmatprep.subr.bf16.mxu1 %v21095_v23 }
0x1228   :  { %12013 = vmatpush1.bf16.msra.mxu1 %v21103_v36 }
0x1229   :  { %12014 = vmatprep.subr.bf16.mxu1 %v21109_v32 }
0x122c   :  { %12015 = vmatpush1.bf16.msra.mxu1 %v21117_v3 }
0x122d   :  { %12016 = vmatprep.subr.bf16.mxu1 %v21123_v35 }
0x1230   :  { %12017 = vmatpush1.bf16.msra.mxu1 %v21131_v31 }
0x1231   :  { %12018 = vmatprep.subr.bf16.mxu1 %v21137_v60 }
0x1234   :  { %12019 = vmatpush1.bf16.msra.mxu1 %v21145_v42 }
0x1235   :  { %12020 = vmatprep.subr.bf16.mxu1 %v21151_v10 }
0x1238   :  { %12021 = vmatpush1.bf16.msra.mxu1 %v21159_v14 }
0x1239   :  { %12022 = vmatprep.subr.bf16.mxu1 %v21165_v16 }
0x123c   :  { %12023 = vmatpush1.bf16.msra.mxu1 %v21173_v53 }
0x123d   :  { %12024 = vmatprep.subr.bf16.mxu1 %v21179_v26 }
0x1240   :  { %12025 = vmatpush1.bf16.msra.mxu1 %v21187_v5  ;;  %v13702_v5 = vld [vmem:[%s21326_s0 + $0x2f0] sm:$0xff] }
0x1243   :  { %12027 = vmatmul.mubr.bf16.vlgmr.msra.gmra.mrb[92].mxu1 %v11334_v59 }
0x12d6   :  { %v11946_v0 = vpop.f32.mrb[88].mxu1  ;;  %v11987_v27 = vpop.f32.mrb[92].mxu0 }
0x12d7   :  { %v11948_v33 = vpop.f32.mrb[89].mxu1  ;;  %v11989_v41 = vpop.f32.mrb[93].mxu0  ;;  %v12035_v61 = vadd.f32 %v13698_v29, %v11946_v0  ;;  %v12049_v56 = vadd.f32 %v13700_v55, %v11987_v27 }
0x12d8   :  { %v11950_v50 = vpop.f32.mrb[90].mxu1  ;;  %v11991_v13 = vpop.f32.mrb[94].mxu0  ;;  %v12036_v43 = vadd.f32 %v13699_v18, %v11948_v33  ;;  %v12050_v23 = vadd.f32 %v13701_v2, %v11989_v41 }
0x12d9   :  { %v11951_v44 = vpop.f32.mrb[91].mxu1  ;;  %v11992_v30 = vpop.f32.mrb[95].mxu0  ;;  %v13800_v1 = vmul.f32 -1.442695, %v12035_v61  ;;  %v13802_v3 = vmul.f32 -1.442695, %v12049_v56 }
0x12da   :  { %v13801_v37 = vmul.f32 -1.442695, %v12036_v43  ;;  %v13803_v35 = vmul.f32 -1.442695, %v12050_v23 }
0x12db   :  { %15259 = vpow2.f32 %v13800_v1 }
0x12dc   :  { %15261 = vpow2.f32 %v13801_v37 }
0x12dd   :  { %15263 = vpow2.f32 %v13802_v3 }
0x12de   :  { %15265 = vpow2.f32 %v13803_v35 }
0x12e5   :  { %v15260_v36 = vpop.eup %15259 }
0x12e6   :  { %v15262_v32 = vpop.eup %15261  ;;  %v12043_v31 = vadd.f32 1.0, %v15260_v36 }
0x12e7   :  { %v12044_v60 = vadd.f32 1.0, %v15262_v32  ;;  %v15264_v42 = vpop.eup %15263 }
0x12e8   :  { %15267 = vrcp.f32 %v12043_v31  ;;  %v15266_v14 = vpop.eup %15265  ;;  %v12057_v4 = vadd.f32 1.0, %v15264_v42 }
0x12e9   :  { %15269 = vrcp.f32 %v12044_v60 }
0x12f2   :  { %v15268_v26 = vpop.eup %15267 }
0x12f3   :  { %v15270_v63 = vpop.eup %15269 }
0x1316   :  { %v12028_v10 = vpop.f32.mrb[92].mxu1 }
0x1317   :  { %v12063_v16 = vadd.f32 %v12028_v10, %v21869_v46  ;;  %v12030_v53 = vpop.f32.mrb[93].mxu1  ;;  %v12058_v46 = vadd.f32 1.0, %v15266_v14 }
0x1318   :  { %v12064_v57 = vadd.f32 %v12030_v53, %v21870_v62  ;;  %v12032_v58 = vpop.f32.mrb[94].mxu1 }
0x1319   :  { %v12065_v28 = vmul.f32 %v15268_v26, %v12063_v16  ;;  %v12033_v24 = vpop.f32.mrb[95].mxu1 }
0x131a   :  { %v12066_v51 = vmul.f32 %v15270_v63, %v12064_v57 }
0x131b   :  { %v12067_v38 = vadd.f32 %v13702_v5, %v12065_v28 }
0x131c   :  { %v12068_v20 = vadd.f32 %v13703_v7, %v12066_v51 }
0x131d   :  { %15271 = vtanh.f32 %v12067_v38 }
0x131e   :  { %15273 = vtanh.f32 %v12068_v20 }
0x131f   :  { %15275 = vrcp.f32 %v12057_v4 }
0x1320   :  { %15277 = vrcp.f32 %v12058_v46 }
0x1327   :  { %v15272_v48 = vpop.eup %15271 }
0x1328   :  { %v15274_v15 = vpop.eup %15273  ;;  %v12071_v62 = vsub.f32 %v21250_v6, %v15272_v48 }
0x1329   :  { %v15276_v47 = vpop.eup %15275  ;;  %v12072_v49 = vsub.f32 %v21252_v12, %v15274_v15 }
0x132a   :  { %v15278_v21 = vpop.eup %15277  ;;  %v12073_v8 = vmul.f32 %v15276_v47, %v12071_v62 }
0x132b   :  { %v12074_v34 = vmul.f32 %v15278_v21, %v12072_v49 }
0x132c   :  { %v12075_v22 = vadd.f32 %v15272_v48, %v12073_v8 }
0x132d   :  { %v12076_v9 = vadd.f32 %v15274_v15, %v12074_v34 }
0x132e   :  { %13804 = vst [vmem:[%s21328_s3 + $0xf0] sm:$0xff] %v12075_v22 }
0x132f   :  { %13805 = vst [vmem:[%s21328_s3 + $0xf8] sm:$0xff] %v12076_v9 }

</bundles_post_ra>
